<compile_context>
chip_gen: v7x
topology: tpu7x:2x2x1
jax: 0.10.0
libtpu: 0.0.40
codegen_flags: <defaults>
</compile_context>

<pallas_src>
import jax
import jax.numpy as jnp
from jax.experimental import pallas as pl
from jax.experimental.pallas import tpu as pltpu

NUM_CLASS = 150
H1 = 1024
H2 = 2048

NC_PAD = 256          # class dim padded to a lane multiple for the fc3 output / logits
NEG_MASK = -1e30      # finite "minus infinity" folded into padded b3 columns


def _round_up(n, m):
    return ((n + m - 1) // m) * m


def _mlp_logsoftmax_kernel(x_ref, w1_ref, b1_ref, w2_ref, b2_ref,
                           w3_ref, b3_ref, o_ref):
    # fc1: in-kernel f32->bf16 cast (cheap VPU op hidden under MXU), f32 accumulate.
    x = x_ref[...].astype(jnp.bfloat16)
    h1 = jnp.dot(x, w1_ref[...], preferred_element_type=jnp.float32)
    h1 = jnp.maximum(h1 + b1_ref[...], 0.0)

    # F.dropout(x, training=self.training): identity at inference time.

    # fc2 + relu
    h2 = jnp.dot(h1.astype(jnp.bfloat16), w2_ref[...],
                 preferred_element_type=jnp.float32)
    h2 = jnp.maximum(h2 + b2_ref[...], 0.0)

    # fc3; b3 carries NEG_MASK in the padded class columns, so the bias add also
    # masks them (exp underflows to 0 -> softmax over the true 150 classes only).
    logits = jnp.dot(h2.astype(jnp.bfloat16), w3_ref[...],
                     preferred_element_type=jnp.float32)
    logits = logits + b3_ref[...]

    # numerically-stable log_softmax along dim=1 (f32; class axis stays the lane axis
    # so the max/sum reductions land on the XLU and exp/log on the EUP).
    m = jnp.max(logits, axis=1, keepdims=True)
    lse = jnp.log(jnp.sum(jnp.exp(logits - m), axis=1, keepdims=True)) + m
    o_ref[...] = logits - lse


def prepare_params(params):
    """One-time bf16 cast + class-dim padding of weights (outside the hot path)."""
    w1, b1, w2, b2, w3, b3 = params
    w1_p = w1.astype(jnp.bfloat16)                       # (150, 1024) — K unpadded
    w2_p = w2.astype(jnp.bfloat16)                       # (1024, 2048)
    w3_p = jnp.zeros((H2, NC_PAD), jnp.bfloat16).at[:, :NUM_CLASS].set(
        w3.astype(jnp.bfloat16))                         # (2048, 256)
    b1_p = b1.reshape(1, H1).astype(jnp.float32)
    b2_p = b2.reshape(1, H2).astype(jnp.float32)
    # padded class columns get NEG_MASK so the bias add doubles as the class mask
    b3_p = jnp.full((1, NC_PAD), NEG_MASK, jnp.float32).at[0, :NUM_CLASS].set(
        b3.astype(jnp.float32))
    return (w1_p, b1_p, w2_p, b2_p, w3_p, b3_p)


@jax.jit
def net_forward(x, prepared_params):
    """x: [B, NUM_CLASS] float32 -> log_softmax logits [B, NUM_CLASS] float32."""
    w1_p, b1_p, w2_p, b2_p, w3_p, b3_p = prepared_params
    B = x.shape[0]

    # Batch tiling: TM is a multiple of 8, capped at 512.  For B >= 16 the grid has
    # at least 2 steps so the "parallel" axis can be sharded across v7x's 2 TCs.
    b8 = _round_up(B, 8)
    if b8 <= 8:
        TM = b8
    elif b8 <= 1024:
        TM = _round_up(pl.cdiv(b8, 2), 8)   # 2 grid steps, <= 512
    else:
        TM = 512
    b_pad = _round_up(B, TM)
    grid = (b_pad // TM,)

    # Only a (usually tiny) batch-dim pad; no lane padding, no wrapper-side cast.
    if b_pad != B:
        x = jnp.pad(x, ((0, b_pad - B), (0, 0)))

    weight_bytes = (NUM_CLASS * H1 + H1 * H2 + H2 * NC_PAD) * 2 \
        + (H1 + H2 + NC_PAD) * 4
    act_bytes = b_pad * (NUM_CLASS * 4 + NC_PAD * 4)
    cost = pl.CostEstimate(
        flops=2 * b_pad * (NUM_CLASS * H1 + H1 * H2 + H2 * NC_PAD),
        transcendentals=b_pad * (NC_PAD + 1),
        bytes_accessed=weight_bytes + act_bytes,
    )

    out = pl.pallas_call(
        _mlp_logsoftmax_kernel,
        out_shape=jax.ShapeDtypeStruct((b_pad, NC_PAD), jnp.float32),
        grid=grid,
        in_specs=[
            pl.BlockSpec((TM, NUM_CLASS), lambda i: (i, 0)),   # x tile (f32, unpadded K)
            pl.BlockSpec((NUM_CLASS, H1), lambda i: (0, 0)),   # w1 (resident)
            pl.BlockSpec((1, H1),         lambda i: (0, 0)),   # b1
            pl.BlockSpec((H1, H2),        lambda i: (0, 0)),   # w2 (resident)
            pl.BlockSpec((1, H2),         lambda i: (0, 0)),   # b2
            pl.BlockSpec((H2, NC_PAD),    lambda i: (0, 0)),   # w3 (resident)
            pl.BlockSpec((1, NC_PAD),     lambda i: (0, 0)),   # b3 (+ class mask)
        ],
        out_specs=pl.BlockSpec((TM, NC_PAD), lambda i: (i, 0)),
        compiler_params=pltpu.CompilerParams(
            dimension_semantics=("parallel",),
            vmem_limit_bytes=48 << 20,   # safe on v7x's 64 MiB; ample for ~19 MiB used
        ),
        cost_estimate=cost,
    )(x, w1_p, b1_p, w2_p, b2_p, w3_p, b3_p)

    return out[:B, :NUM_CLASS]


def init_params(key):
    """Deterministic parameter init mimicking nn.Linear shapes.

    Stored as (in_features, out_features) so the kernel does x @ W + b,
    which equals PyTorch's x @ weight.T + bias."""
    k1, k2, k3, k4, k5, k6 = jax.random.split(key, 6)

    def linear(kw, kb, fan_in, fan_out):
        bound = 1.0 / jnp.sqrt(fan_in)
        w = jax.random.uniform(kw, (fan_in, fan_out), jnp.float32, -bound, bound)
        b = jax.random.uniform(kb, (fan_out,), jnp.float32, -bound, bound)
        return w, b

    w1, b1 = linear(k1, k2, NUM_CLASS, H1)
    w2, b2 = linear(k3, k4, H1, H2)
    w3, b3 = linear(k5, k6, H2, NUM_CLASS)
    return (w1, b1, w2, b2, w3, b3)


def reference_forward(x, params):
    """Pure-JAX f32 reference (eval-mode forward of the PyTorch module)."""
    w1, b1, w2, b2, w3, b3 = params
    h1 = jnp.maximum(x @ w1 + b1, 0.0)
    h2 = jnp.maximum(h1 @ w2 + b2, 0.0)
    logits = h2 @ w3 + b3
    return jax.nn.log_softmax(logits, axis=1)


if __name__ == "__main__":
    key = jax.random.PRNGKey(0)
    kp, kx = jax.random.split(key)
    params = init_params(kp)
    prepared = prepare_params(params)   # one-time pad + bf16 cast (outside hot path)

    batch = 4
    x = jax.random.normal(kx, (batch, NUM_CLASS), jnp.float32)

    out = net_forward(x, prepared)
    out = jax.block_until_ready(out)

    ref = reference_forward(x, params)
    assert out.shape == (batch, NUM_CLASS)
    # bf16 matmul operands vs f32 reference -> loosened tolerance
    assert jnp.max(jnp.abs(out - ref)) < 5e-2, "mismatch vs pure-JAX reference"
    assert jnp.all(jnp.isfinite(out)), "non-finite values in output"

    print("KERNEL_OK")
</pallas_src>

<mosaic_0001>
module attributes {stable_mosaic.version = 11 : i64} {
  func.func @_mlp_logsoftmax_kernel(%arg0: i32, %arg1: memref<8x150xf32, #tpu.memory_space<vmem>>, %arg2: memref<150x1024xbf16, #tpu.memory_space<vmem>>, %arg3: memref<1x1024xf32, #tpu.memory_space<vmem>>, %arg4: memref<1024x2048xbf16, #tpu.memory_space<vmem>>, %arg5: memref<1x2048xf32, #tpu.memory_space<vmem>>, %arg6: memref<2048x256xbf16, #tpu.memory_space<vmem>>, %arg7: memref<1x256xf32, #tpu.memory_space<vmem>>, %arg8: memref<8x256xf32, #tpu.memory_space<vmem>>) attributes {dimension_semantics = [#tpu.dimension_semantics<parallel>], iteration_bounds = array<i64: 1>, scalar_prefetch = 0 : i64, scratch_operands = 0 : i64, tpu.core_type = #tpu.core_type<tc>, window_params = [{transform_indices = @transform_0, window_bounds = array<i64: 8, 150>}, {pipeline_mode = #tpu.pipeline_mode<synchronous>, transform_indices = @transform_1, window_bounds = array<i64: 150, 1024>}, {pipeline_mode = #tpu.pipeline_mode<synchronous>, transform_indices = @transform_2, window_bounds = array<i64: 1, 1024>}, {pipeline_mode = #tpu.pipeline_mode<synchronous>, transform_indices = @transform_3, window_bounds = array<i64: 1024, 2048>}, {pipeline_mode = #tpu.pipeline_mode<synchronous>, transform_indices = @transform_4, window_bounds = array<i64: 1, 2048>}, {pipeline_mode = #tpu.pipeline_mode<synchronous>, transform_indices = @transform_5, window_bounds = array<i64: 2048, 256>}, {pipeline_mode = #tpu.pipeline_mode<synchronous>, transform_indices = @transform_6, window_bounds = array<i64: 1, 256>}, {transform_indices = @transform_7, window_bounds = array<i64: 8, 256>}]} {
    %c0 = arith.constant 0 : index
    %c0_0 = arith.constant 0 : index
    %0 = vector.load %arg1[%c0, %c0_0] : memref<8x150xf32, #tpu.memory_space<vmem>>, vector<8x150xf32>
    %1 = arith.truncf %0 : vector<8x150xf32> to vector<8x150xbf16>
    %c0_1 = arith.constant 0 : index
    %c0_2 = arith.constant 0 : index
    %2 = vector.load %arg2[%c0_1, %c0_2] : memref<150x1024xbf16, #tpu.memory_space<vmem>>, vector<150x1024xbf16>
    %cst = arith.constant dense<0.000000e+00> : vector<8x1024xf32>
    %3 = tpu.matmul %1, %2, %cst {dimension_numbers = #tpu.dot_dimension_numbers<[1], [0], [0], [1], [0, 0, 1, 1], [], []>} : vector<8x150xbf16>, vector<150x1024xbf16>, vector<8x1024xf32> -> vector<8x1024xf32>
    %c0_3 = arith.constant 0 : index
    %c0_4 = arith.constant 0 : index
    %4 = vector.load %arg3[%c0_3, %c0_4] : memref<1x1024xf32, #tpu.memory_space<vmem>>, vector<1x1024xf32>
    %5 = vector.broadcast %4 : vector<1x1024xf32> to vector<8x1024xf32>
    %6 = arith.addf %3, %5 : vector<8x1024xf32>
    %cst_5 = arith.constant 0.000000e+00 : f32
    %7 = vector.broadcast %cst_5 : f32 to vector<8x1024xf32>
    %8 = arith.maximumf %6, %7 : vector<8x1024xf32>
    %9 = arith.truncf %8 : vector<8x1024xf32> to vector<8x1024xbf16>
    %c0_6 = arith.constant 0 : index
    %c0_7 = arith.constant 0 : index
    %10 = vector.load %arg4[%c0_6, %c0_7] : memref<1024x2048xbf16, #tpu.memory_space<vmem>>, vector<1024x2048xbf16>
    %cst_8 = arith.constant dense<0.000000e+00> : vector<8x2048xf32>
    %11 = tpu.matmul %9, %10, %cst_8 {dimension_numbers = #tpu.dot_dimension_numbers<[1], [0], [0], [1], [0, 0, 1, 1], [], []>} : vector<8x1024xbf16>, vector<1024x2048xbf16>, vector<8x2048xf32> -> vector<8x2048xf32>
    %c0_9 = arith.constant 0 : index
    %c0_10 = arith.constant 0 : index
    %12 = vector.load %arg5[%c0_9, %c0_10] : memref<1x2048xf32, #tpu.memory_space<vmem>>, vector<1x2048xf32>
    %13 = vector.broadcast %12 : vector<1x2048xf32> to vector<8x2048xf32>
    %14 = arith.addf %11, %13 : vector<8x2048xf32>
    %cst_11 = arith.constant 0.000000e+00 : f32
    %15 = vector.broadcast %cst_11 : f32 to vector<8x2048xf32>
    %16 = arith.maximumf %14, %15 : vector<8x2048xf32>
    %17 = arith.truncf %16 : vector<8x2048xf32> to vector<8x2048xbf16>
    %c0_12 = arith.constant 0 : index
    %c0_13 = arith.constant 0 : index
    %18 = vector.load %arg6[%c0_12, %c0_13] : memref<2048x256xbf16, #tpu.memory_space<vmem>>, vector<2048x256xbf16>
    %cst_14 = arith.constant dense<0.000000e+00> : vector<8x256xf32>
    %19 = tpu.matmul %17, %18, %cst_14 {dimension_numbers = #tpu.dot_dimension_numbers<[1], [0], [0], [1], [0, 0, 1, 1], [], []>} : vector<8x2048xbf16>, vector<2048x256xbf16>, vector<8x256xf32> -> vector<8x256xf32>
    %c0_15 = arith.constant 0 : index
    %c0_16 = arith.constant 0 : index
    %20 = vector.load %arg7[%c0_15, %c0_16] : memref<1x256xf32, #tpu.memory_space<vmem>>, vector<1x256xf32>
    %21 = vector.broadcast %20 : vector<1x256xf32> to vector<8x256xf32>
    %22 = arith.addf %19, %21 : vector<8x256xf32>
    %cst_17 = arith.constant dense<0xFF800000> : vector<8xf32>
    %23 = vector.multi_reduction <maximumf>, %22, %cst_17 [1] : vector<8x256xf32> to vector<8xf32>
    %24 = vector.shape_cast %23 : vector<8xf32> to vector<8x1xf32>
    %25 = vector.broadcast %24 : vector<8x1xf32> to vector<8x256xf32>
    %26 = arith.subf %22, %25 : vector<8x256xf32>
    %27 = math.exp %26 : vector<8x256xf32>
    %cst_18 = arith.constant dense<0.000000e+00> : vector<8xf32>
    %28 = vector.multi_reduction <add>, %27, %cst_18 [1] : vector<8x256xf32> to vector<8xf32>
    %29 = vector.shape_cast %28 : vector<8xf32> to vector<8x1xf32>
    %30 = math.log %29 : vector<8x1xf32>
    %31 = arith.addf %30, %24 : vector<8x1xf32>
    %32 = vector.broadcast %31 : vector<8x1xf32> to vector<8x256xf32>
    %33 = arith.subf %22, %32 : vector<8x256xf32>
    %c0_19 = arith.constant 0 : index
    %c0_20 = arith.constant 0 : index
    %34 = vector.load %arg8[%c0_19, %c0_20] : memref<8x256xf32, #tpu.memory_space<vmem>>, vector<8x256xf32>
    tpu.vector_store %arg8[%c0_19, %c0_20], %33 {strides = array<i32>} : memref<8x256xf32, #tpu.memory_space<vmem>>, vector<8x256xf32>,
    return
  }
  func.func @transform_0(%arg0: i32) -> (i32, i32) {
    %c0_i32 = arith.constant 0 : i32
    %c0_i32_0 = arith.constant 0 : i32
    return %arg0, %c0_i32 : i32, i32
  }
  func.func @transform_1(%arg0: i32) -> (i32, i32) {
    %c0_i32 = arith.constant 0 : i32
    %c0_i32_0 = arith.constant 0 : i32
    %c0_i32_1 = arith.constant 0 : i32
    return %c0_i32, %c0_i32_0 : i32, i32
  }
  func.func @transform_2(%arg0: i32) -> (i32, i32) {
    %c0_i32 = arith.constant 0 : i32
    %c0_i32_0 = arith.constant 0 : i32
    %c0_i32_1 = arith.constant 0 : i32
    return %c0_i32, %c0_i32_0 : i32, i32
  }
  func.func @transform_3(%arg0: i32) -> (i32, i32) {
    %c0_i32 = arith.constant 0 : i32
    %c0_i32_0 = arith.constant 0 : i32
    %c0_i32_1 = arith.constant 0 : i32
    return %c0_i32, %c0_i32_0 : i32, i32
  }
  func.func @transform_4(%arg0: i32) -> (i32, i32) {
    %c0_i32 = arith.constant 0 : i32
    %c0_i32_0 = arith.constant 0 : i32
    %c0_i32_1 = arith.constant 0 : i32
    return %c0_i32, %c0_i32_0 : i32, i32
  }
  func.func @transform_5(%arg0: i32) -> (i32, i32) {
    %c0_i32 = arith.constant 0 : i32
    %c0_i32_0 = arith.constant 0 : i32
    %c0_i32_1 = arith.constant 0 : i32
    return %c0_i32, %c0_i32_0 : i32, i32
  }
  func.func @transform_6(%arg0: i32) -> (i32, i32) {
    %c0_i32 = arith.constant 0 : i32
    %c0_i32_0 = arith.constant 0 : i32
    %c0_i32_1 = arith.constant 0 : i32
    return %c0_i32, %c0_i32_0 : i32, i32
  }
  func.func @transform_7(%arg0: i32) -> (i32, i32) {
    %c0_i32 = arith.constant 0 : i32
    %c0_i32_0 = arith.constant 0 : i32
    return %arg0, %c0_i32 : i32, i32
  }
}

</mosaic_0001>

<bundles_post_ra>
// kernel: net_forward.1
= control target key start
LH: loop header
LB: loop body
LE: loop exit
PB: predicated region body
PF: predicated region fallthrough
CT: control target
= control target key end

     0   :  { %12 = vsyncpa [#allocation3], 0  ;;  %s12747_s0 = inlined_call_operand.vmem [shape: f32[8,150], index: 0, kind: input, shape index: {}]   ;;  %s12748_s1 = inlined_call_operand.hbm [shape: bf16[150,1024], index: 1, kind: input, shape index: {}]   ;;  %s12749_s2 = inlined_call_operand.hbm [shape: f32[1,1024], index: 2, kind: input, shape index: {}]   ;;  %s12750_s3 = inlined_call_operand.hbm [shape: bf16[1024,2048], index: 3, kind: input, shape index: {}]   ;;  %s12751_s4 = inlined_call_operand.hbm [shape: f32[1,2048], index: 4, kind: input, shape index: {}]   ;;  %s12752_s5 = inlined_call_operand.hbm [shape: bf16[2048,256], index: 5, kind: input, shape index: {}]   ;;  %s12753_s6 = inlined_call_operand.hbm [shape: f32[1,256], index: 6, kind: input, shape index: {}]   ;;  %s12754_s7 = inlined_call_operand.vmem [shape: f32[8,256], index: 7, kind: output, shape index: {}]  }
   0x1   :  { %13 = vsyncpa [#allocation5], 0 }
   0x2   :  { %14 = vsyncpa [#allocation8], 0 }
   0x3   :  { %15 = vsyncpa [#allocation11], 0  ;;  %s12352_s24 = smov [#allocation4]   ;;  %s12353_s26 = smov [#allocation7]  }
   0x4   :  { %s36_s25 = sshll.u32 %s12352_s24, 4  ;;  %s58_s27 = sshll.u32 %s12353_s26, 4  ;;  %s37_s25 = int_to_ptr.vmem [resolvable:$true] %s36_s25  ;;  %s59_s27 = int_to_ptr.vmem [resolvable:$true] %s58_s27 }
   0x5   :  { %s12212_s30 = scalar_lea.hbm %s12749_s2, 128 }
   0x6   :  { %p12213_p0 = scmp.ne.s32.totalorder %s12749_s2, %s12212_s30  ;;  %p12216_p1 = scmp.lt.u32.totalorder %s12212_s30, %s12749_s2 }
   0x8   :  { %p12218_p2 = pnand %p12216_p1, %p12213_p0 }
   0xa   :  { %12221 = shalt.err (!%p12218_p2)
}
   0xb   :  { %s12222_s12 = scalar_lea.vmem %s37_s25, 128  ;;  %p12227_p4 = scmp.lt.s32.totalorder %s37_s25, %s37_s25 }
   0xc   :  { %p12223_p3 = scmp.ne.s32.totalorder %s37_s25, %s12222_s12  ;;  %p12228_p5 = scmp.lt.s32.totalorder %s12222_s12, %s12222_s12 }
   0xe   :  { %p12229_p6 = por %p12228_p5, %p12227_p4 }
  0x10   :  { %p12230_p7 = pnand %p12229_p6, %p12223_p3 }
  0x12   :  { %12233 = shalt.err (!%p12230_p7)
}
  0x13   :  { %39 = dma.hbm_to_vmem [thread:$0]  %s12749_s2, 128, %s37_s25, [#allocation5]  }
  0x14   :  { %s12234_s17 = scalar_lea.hbm %s12751_s4, 256 }
  0x15   :  { %p12235_p8 = scmp.ne.s32.totalorder %s12751_s4, %s12234_s17  ;;  %p12238_p9 = scmp.lt.u32.totalorder %s12234_s17, %s12751_s4 }
  0x17   :  { %p12240_p10 = pnand %p12238_p9, %p12235_p8 }
  0x19   :  { %12243 = shalt.err (!%p12240_p10)
}
  0x1a   :  { %s12244_s22 = scalar_lea.vmem %s59_s27, 256  ;;  %p12249_p12 = scmp.lt.s32.totalorder %s59_s27, %s59_s27 }
  0x1b   :  { %p12245_p11 = scmp.ne.s32.totalorder %s59_s27, %s12244_s22  ;;  %p12250_p13 = scmp.lt.s32.totalorder %s12244_s22, %s12244_s22 }
  0x1d   :  { %p12251_p0 = por %p12250_p13, %p12249_p12 }
  0x1f   :  { %p12252_p1 = pnand %p12251_p0, %p12245_p11 }
  0x21   :  { %12255 = shalt.err (!%p12252_p1)
}
  0x22   :  { %61 = dma.hbm_to_vmem [thread:$0]  %s12751_s4, 256, %s59_s27, [#allocation8]  }
  0x23   :  { %s12354_s24 = smov [#allocation2]   ;;  %s12256_s29 = scalar_lea.hbm %s12748_s1, 9728 }
  0x24   :  { %s23_s25 = sshll.u32 %s12354_s24, 4  ;;  %p12257_p2 = scmp.ne.s32.totalorder %s12748_s1, %s12256_s29  ;;  %s24_s25 = int_to_ptr.vmem [resolvable:$true] %s23_s25 }
  0x25   :  { %p12260_p3 = scmp.lt.u32.totalorder %s12256_s29, %s12748_s1 }
  0x27   :  { %p12262_p4 = pnand %p12260_p3, %p12257_p2 }
  0x29   :  { %12265 = shalt.err (!%p12262_p4)
}
  0x2a   :  { %s12266_s11 = scalar_lea.vmem %s24_s25, 9728  ;;  %p12271_p6 = scmp.lt.s32.totalorder %s24_s25, %s24_s25 }
  0x2b   :  { %p12267_p5 = scmp.ne.s32.totalorder %s24_s25, %s12266_s11  ;;  %p12272_p7 = scmp.lt.s32.totalorder %s12266_s11, %s12266_s11 }
  0x2d   :  { %p12273_p8 = por %p12272_p7, %p12271_p6 }
  0x2f   :  { %p12274_p9 = pnand %p12273_p8, %p12267_p5 }
  0x31   :  { %12277 = shalt.err (!%p12274_p9)
}
  0x32   :  { %s12355_s4 = smov 512   ;;  %s12356_s27 = smov 32  }
  0x33   :  { %29 = dma.hbm_to_vmem [thread:$0]  %s12748_s1, 9728, %s24_s25, [#allocation3], %s12355_s4, %s12355_s4, %s12356_s27  }
  0x34   :  { %s12357_s14 = smov [#allocation6]   ;;  %s12278_s18 = scalar_lea.hbm %s12750_s3, 131072 }
  0x35   :  { %s45_s15 = sshll.u32 %s12357_s14, 4  ;;  %p12279_p10 = scmp.ne.s32.totalorder %s12750_s3, %s12278_s18  ;;  %s46_s15 = int_to_ptr.vmem [resolvable:$true] %s45_s15 }
  0x36   :  { %p12282_p11 = scmp.lt.u32.totalorder %s12278_s18, %s12750_s3 }
  0x38   :  { %p12284_p12 = pnand %p12282_p11, %p12279_p10 }
  0x3a   :  { %12287 = shalt.err (!%p12284_p12)
}
  0x3b   :  { %s12288_s2 = scalar_lea.vmem %s46_s15, 131072  ;;  %p12293_p0 = scmp.lt.s32.totalorder %s46_s15, %s46_s15 }
  0x3c   :  { %p12289_p13 = scmp.ne.s32.totalorder %s46_s15, %s12288_s2  ;;  %p12294_p1 = scmp.lt.s32.totalorder %s12288_s2, %s12288_s2 }
  0x3e   :  { %p12295_p2 = por %p12294_p1, %p12293_p0 }
  0x40   :  { %p12296_p3 = pnand %p12295_p2, %p12289_p13 }
  0x42   :  { %12299 = shalt.err (!%p12296_p3)
}
  0x43   :  { %s12358_s1 = smov 1024   ;;  %s12359_s23 = smov 64  }
  0x44   :  { %51 = dma.hbm_to_vmem [thread:$0]  %s12750_s3, 131072, %s46_s15, [#allocation5], %s12358_s1, %s12358_s1, %s12359_s23  }
  0x45   :  { %s12360_s26 = smov [#allocation9]   ;;  %s12300_s8 = scalar_lea.hbm %s12752_s5, 32768 }
  0x46   :  { %s67_s28 = sshll.u32 %s12360_s26, 4  ;;  %p12301_p4 = scmp.ne.s32.totalorder %s12752_s5, %s12300_s8  ;;  %s68_s28 = int_to_ptr.vmem [resolvable:$true] %s67_s28 }
  0x47   :  { %p12304_p5 = scmp.lt.u32.totalorder %s12300_s8, %s12752_s5 }
  0x49   :  { %p12306_p6 = pnand %p12304_p5, %p12301_p4 }
  0x4b   :  { %12309 = shalt.err (!%p12306_p6)
}
  0x4c   :  { %s12310_s27 = scalar_lea.vmem %s68_s28, 32768  ;;  %p12315_p8 = scmp.lt.s32.totalorder %s68_s28, %s68_s28 }
  0x4d   :  { %p12311_p7 = scmp.ne.s32.totalorder %s68_s28, %s12310_s27  ;;  %p12316_p9 = scmp.lt.s32.totalorder %s12310_s27, %s12310_s27 }
  0x4f   :  { %p12317_p10 = por %p12316_p9, %p12315_p8 }
  0x51   :  { %p12318_p11 = pnand %p12317_p10, %p12311_p7 }
  0x53   :  { %12321 = shalt.err (!%p12318_p11)
}
  0x54   :  { %s12361_s3 = smov 128   ;;  %s12362_s12 = smov 8  }
  0x55   :  { %73 = dma.hbm_to_vmem [thread:$0]  %s12752_s5, 32768, %s68_s28, [#allocation8], %s12361_s3, %s12361_s3, %s12362_s12  }
  0x56   :  { %s12363_s15 = smov [#allocation10]   ;;  %s12322_s19 = scalar_lea.hbm %s12753_s6, 32 }
  0x57   :  { %s80_s16 = sshll.u32 %s12363_s15, 4  ;;  %p12323_p12 = scmp.ne.s32.totalorder %s12753_s6, %s12322_s19  ;;  %s81_s16 = int_to_ptr.vmem [resolvable:$true] %s80_s16 }
  0x58   :  { %p12326_p13 = scmp.lt.u32.totalorder %s12322_s19, %s12753_s6 }
  0x5a   :  { %p12328_p0 = pnand %p12326_p13, %p12323_p12 }
  0x5c   :  { %12331 = shalt.err (!%p12328_p0)
}
  0x5d   :  { %s12332_s1 = scalar_lea.vmem %s81_s16, 32  ;;  %p12337_p2 = scmp.lt.s32.totalorder %s81_s16, %s81_s16 }
  0x5e   :  { %p12333_p1 = scmp.ne.s32.totalorder %s81_s16, %s12332_s1  ;;  %p12338_p3 = scmp.lt.s32.totalorder %s12332_s1, %s12332_s1 }
  0x60   :  { %p12339_p4 = por %p12338_p3, %p12337_p2 }
  0x62   :  { %p12340_p5 = pnand %p12339_p4, %p12333_p1 }
  0x64   :  { %12343 = shalt.err (!%p12340_p5)
}
  0x65   :  { %83 = dma.hbm_to_vmem [thread:$0]  %s12753_s6, 32, %s81_s16, [#allocation11]  }
  0x66   :  { %12344 = dma.done.wait [#allocation3], 9728  }
  0x67   :  { %12345 = vsyncadd [#allocation3], 4294957568 }
  0x68   :  { %12346 = dma.done.wait [#allocation5], 131200  }
  0x69   :  { %12347 = vsyncadd [#allocation5], 4294836096 }
  0x6a   :  { %12348 = dma.done.wait [#allocation8], 33024  }
  0x6b   :  { %12349 = vsyncadd [#allocation8], 4294934272 }
  0x6c   :  { %12350 = dma.done.wait [#allocation11], 32  }
  0x6d   :  { %12351 = vsyncadd [#allocation11], 4294967264  ;;  %v107_v0 = vld [vmem:[#allocation2] sm:$0xff]  ;;  %v104_v13 = vld [vmem:[%s12747_s0 + $0x8] sm:$0xff]  ;;  %vm605_vm0 = vcmask 179200   ;;  %vm609_vm1 = vcmask 1042432  }
  0x6e   :  { %v111_v1 = vld [vmem:[#allocation2 + $0x20] sm:$0xff]  ;;  %v12479_v14 = vpack.c.bf16 %v104_v13, %v104_v13  ;;  %v108_v15 = vld [vmem:[#allocation2 + $0x8] sm:$0xff] }
  0x6f   :  { %v115_v2 = vld [vmem:[#allocation2 + $0x40] sm:$0xff]  ;;  %v10290_v3 = vcombine.high %v107_v0, %v111_v1  ;;  %v10289_v4 = vcombine.low %v107_v0, %v111_v1  ;;  %v112_v16 = vld [vmem:[#allocation2 + $0x28] sm:$0xff] }
  0x70   :  { %v119_v5 = vld [vmem:[#allocation2 + $0x60] sm:$0xff]  ;;  %v116_v17 = vld [vmem:[#allocation2 + $0x48] sm:$0xff]  ;;  %v10292_v19 = vcombine.high %v108_v15, %v112_v16  ;;  %v10291_v20 = vcombine.low %v108_v15, %v112_v16  ;;  %10370 = vmatprep.mubr.msk.bf16.mxu0 %vm605_vm0, %v12479_v14  ;;  %10372 = vmatprep.mubr.msk.bf16.mxu1 %vm605_vm0, %v12479_v14 }
  0x71   :  { %v10298_v6 = vcombine.high %v115_v2, %v119_v5  ;;  %v123_v7 = vld [vmem:[#allocation2 + $0x80] sm:$0xff]  ;;  %634 = vmatprep.subr.bf16.mxu0 %v10290_v3  ;;  %v10297_v9 = vcombine.low %v115_v2, %v119_v5  ;;  %v120_v21 = vld [vmem:[#allocation2 + $0x68] sm:$0xff] }
  0x72   :  { %v127_v8 = vld [vmem:[#allocation2 + $0xa0] sm:$0xff]  ;;  %635 = vmatpush1.bf16.msra.mxu0 %v10289_v4  ;;  %v10300_v23 = vcombine.high %v116_v17, %v120_v21  ;;  %v124_v24 = vld [vmem:[#allocation2 + $0x88] sm:$0xff]  ;;  %675 = vmatprep.subr.bf16.mxu1 %v10292_v19  ;;  %v10299_v28 = vcombine.low %v116_v17, %v120_v21  ;;  %v117_v19 = vld [vmem:[#allocation2 + $0x50] sm:$0xff] }
  0x73   :  { %636 = vmatprep.subr.bf16.mxu0 %v10298_v6  ;;  %v10306_v10 = vcombine.high %v123_v7, %v127_v8  ;;  %v131_v11 = vld [vmem:[#allocation2 + $0xc0] sm:$0xff]  ;;  %v10305_v18 = vcombine.low %v123_v7, %v127_v8  ;;  %v128_v25 = vld [vmem:[#allocation2 + $0xa8] sm:$0xff]  ;;  %676 = vmatpush1.bf16.msra.mxu1 %v10291_v20  ;;  %v121_v20 = vld [vmem:[#allocation2 + $0x70] sm:$0xff] }
  0x74   :  { %v135_v12 = vld [vmem:[#allocation2 + $0xe0] sm:$0xff]  ;;  %677 = vmatprep.subr.bf16.mxu1 %v10300_v23  ;;  %v10308_v30 = vcombine.high %v124_v24, %v128_v25  ;;  %v132_v32 = vld [vmem:[#allocation2 + $0xc8] sm:$0xff]  ;;  %v10307_v36 = vcombine.low %v124_v24, %v128_v25 }
  0x75   :  { %v10314_v22 = vcombine.high %v131_v11, %v135_v12  ;;  %v139_v26 = vld [vmem:[#allocation2 + $0x100] sm:$0xff]  ;;  %v10313_v29 = vcombine.low %v131_v11, %v135_v12  ;;  %v136_v33 = vld [vmem:[#allocation2 + $0xe8] sm:$0xff]  ;;  %v113_v11 = vld [vmem:[#allocation2 + $0x30] sm:$0xff] }
  0x76   :  { %637 = vmatpush1.bf16.msra.mxu0 %v10297_v9  ;;  %v143_v27 = vld [vmem:[#allocation2 + $0x120] sm:$0xff]  ;;  %v10316_v38 = vcombine.high %v132_v32, %v136_v33  ;;  %v140_v40 = vld [vmem:[#allocation2 + $0x108] sm:$0xff]  ;;  %v10315_v44 = vcombine.low %v132_v32, %v136_v33  ;;  %v10301_v32 = vcombine.low %v117_v19, %v121_v20  ;;  %v133_v33 = vld [vmem:[#allocation2 + $0xd0] sm:$0xff] }
  0x77   :  { %638 = vmatprep.subr.bf16.mxu0 %v10306_v10  ;;  %v10322_v31 = vcombine.high %v139_v26, %v143_v27  ;;  %v147_v34 = vld [vmem:[#allocation2 + $0x140] sm:$0xff]  ;;  %678 = vmatpush1.bf16.msra.mxu1 %v10299_v28  ;;  %v10321_v37 = vcombine.low %v139_v26, %v143_v27  ;;  %v144_v41 = vld [vmem:[#allocation2 + $0x128] sm:$0xff]  ;;  %v109_v10 = vld [vmem:[#allocation2 + $0x10] sm:$0xff]  ;;  %v10302_v26 = vcombine.high %v117_v19, %v121_v20 }
  0x78   :  { %v151_v35 = vld [vmem:[#allocation2 + $0x160] sm:$0xff]  ;;  %679 = vmatprep.subr.bf16.mxu1 %v10308_v30  ;;  %v10324_v46 = vcombine.high %v140_v40, %v144_v41  ;;  %v148_v48 = vld [vmem:[#allocation2 + $0x148] sm:$0xff]  ;;  %v10323_v52 = vcombine.low %v140_v40, %v144_v41  ;;  %v10293_v25 = vcombine.low %v109_v10, %v113_v11  ;;  %v110_v27 = vld [vmem:[#allocation2 + $0x18] sm:$0xff] }
  0x79   :  { %v10330_v39 = vcombine.high %v147_v34, %v151_v35  ;;  %v155_v42 = vld [vmem:[#allocation2 + $0x180] sm:$0xff]  ;;  %v10329_v45 = vcombine.low %v147_v34, %v151_v35  ;;  %v152_v49 = vld [vmem:[#allocation2 + $0x168] sm:$0xff]  ;;  %v114_v28 = vld [vmem:[#allocation2 + $0x38] sm:$0xff] }
  0x7a   :  { %639 = vmatpush1.bf16.msra.mxu0 %v10305_v18  ;;  %v159_v43 = vld [vmem:[#allocation2 + $0x1a0] sm:$0xff]  ;;  %v10332_v54 = vcombine.high %v148_v48, %v152_v49  ;;  %v156_v56 = vld [vmem:[#allocation2 + $0x188] sm:$0xff]  ;;  %v10331_v60 = vcombine.low %v148_v48, %v152_v49  ;;  %v10294_v18 = vcombine.high %v109_v10, %v113_v11  ;;  %v129_v30 = vld [vmem:[#allocation2 + $0xb0] sm:$0xff]  ;;  %v10296_v35 = vcombine.high %v110_v27, %v114_v28 }
  0x7b   :  { %640 = vmatprep.subr.bf16.mxu0 %v10314_v22  ;;  %680 = vmatpush1.bf16.msra.mxu1 %v10307_v36  ;;  %v10338_v47 = vcombine.high %v155_v42, %v159_v43  ;;  %v163_v50 = vld [vmem:[#allocation2 + $0x1c0] sm:$0xff]  ;;  %v10337_v53 = vcombine.low %v155_v42, %v159_v43  ;;  %v160_v57 = vld [vmem:[#allocation2 + $0x1a8] sm:$0xff]  ;;  %v137_v34 = vld [vmem:[#allocation2 + $0xf0] sm:$0xff] }
  0x7c   :  { %681 = vmatprep.subr.bf16.mxu1 %v10316_v38  ;;  %v167_v51 = vld [vmem:[#allocation2 + $0x1e0] sm:$0xff]  ;;  %v10340_v62 = vcombine.high %v156_v56, %v160_v57  ;;  %v164_v0 = vld [vmem:[#allocation2 + $0x1c8] sm:$0xff]  ;;  %v10339_v3 = vcombine.low %v156_v56, %v160_v57  ;;  %v118_v36 = vld [vmem:[#allocation2 + $0x58] sm:$0xff] }
  0x7d   :  { %v10346_v55 = vcombine.high %v163_v50, %v167_v51  ;;  %v171_v58 = vld [vmem:[#allocation2 + $0x200] sm:$0xff]  ;;  %v10345_v61 = vcombine.low %v163_v50, %v167_v51  ;;  %v168_v1 = vld [vmem:[#allocation2 + $0x1e8] sm:$0xff]  ;;  %v126_v40 = vld [vmem:[#allocation2 + $0x98] sm:$0xff]  ;;  %v10317_v50 = vcombine.low %v133_v33, %v137_v34 }
  0x7e   :  { %641 = vmatpush1.bf16.msra.mxu0 %v10313_v29  ;;  %v175_v59 = vld [vmem:[#allocation2 + $0x220] sm:$0xff]  ;;  %v10348_v5 = vcombine.high %v164_v0, %v168_v1  ;;  %v172_v8 = vld [vmem:[#allocation2 + $0x208] sm:$0xff]  ;;  %v10347_v12 = vcombine.low %v164_v0, %v168_v1  ;;  %v125_v29 = vld [vmem:[#allocation2 + $0x90] sm:$0xff] }
  0x7f   :  { %642 = vmatprep.subr.bf16.mxu0 %v10322_v31  ;;  %682 = vmatpush1.bf16.msra.mxu1 %v10315_v44  ;;  %v10354_v63 = vcombine.high %v171_v58, %v175_v59  ;;  %v179_v2 = vld [vmem:[#allocation2 + $0x240] sm:$0x77]  ;;  %v10353_v4 = vcombine.low %v171_v58, %v175_v59  ;;  %v176_v9 = vld [vmem:[#allocation2 + $0x228] sm:$0xff]  ;;  %v10310_v38 = vcombine.high %v125_v29, %v129_v30  ;;  %v130_v41 = vld [vmem:[#allocation2 + $0xb8] sm:$0xff] }
  0x80   :  { %683 = vmatprep.subr.bf16.mxu1 %v10324_v46  ;;  %v10362_v6 = vcombine.high %v179_v2, %v179_v2  ;;  %v10361_v7 = vcombine.low %v179_v2, %v179_v2  ;;  %v103_v13 = vld [vmem:[%s12747_s0] sm:$0xff]  ;;  %v10356_v15 = vcombine.high %v172_v8, %v176_v9  ;;  %v180_v17 = vld [vmem:[#allocation2 + $0x248] sm:$0x77]  ;;  %v10355_v22 = vcombine.low %v172_v8, %v176_v9  ;;  %v141_v43 = vld [vmem:[#allocation2 + $0x110] sm:$0xff] }
  0x81   :  { %v12490_v21 = vpack.c.bf16 %v103_v13, %v103_v13  ;;  %v10364_v23 = vcombine.high %v180_v17, %v180_v17  ;;  %v10363_v24 = vcombine.low %v180_v17, %v180_v17  ;;  %v10309_v42 = vcombine.low %v125_v29, %v129_v30  ;;  %v145_v44 = vld [vmem:[#allocation2 + $0x130] sm:$0xff]  ;;  %v134_v48 = vld [vmem:[#allocation2 + $0xd8] sm:$0xff] }
  0x82   :  { %643 = vmatpush1.bf16.msra.mxu0 %v10321_v37  ;;  %v611_v16 = vsel %vm609_vm1, %v10361_v7, 0  ;;  %v122_v37 = vld [vmem:[#allocation2 + $0x78] sm:$0xff]  ;;  %v10318_v46 = vcombine.high %v133_v33, %v137_v34  ;;  %v149_v51 = vld [vmem:[#allocation2 + $0x150] sm:$0xff]  ;;  %v10325_v58 = vcombine.low %v141_v43, %v145_v44 }
  0x83   :  { %644 = vmatprep.subr.bf16.mxu0 %v10330_v39  ;;  %684 = vmatpush1.bf16.msra.mxu1 %v10323_v52  ;;  %v617_v31 = vsel %vm609_vm1, %v10363_v24, 0  ;;  %v10295_v39 = vcombine.low %v110_v27, %v114_v28  ;;  %v138_v49 = vld [vmem:[#allocation2 + $0xf8] sm:$0xff]  ;;  %v153_v52 = vld [vmem:[#allocation2 + $0x170] sm:$0xff] }
  0x84   :  { %685 = vmatprep.subr.bf16.mxu1 %v10332_v54  ;;  %v10326_v54 = vcombine.high %v141_v43, %v145_v44  ;;  %v142_v56 = vld [vmem:[#allocation2 + $0x118] sm:$0xff]  ;;  %v157_v59 = vld [vmem:[#allocation2 + $0x190] sm:$0xff]  ;;  %v10333_v1 = vcombine.low %v149_v51, %v153_v52 }
  0x85   :  { %v146_v57 = vld [vmem:[#allocation2 + $0x138] sm:$0xff]  ;;  %v165_v2 = vld [vmem:[#allocation2 + $0x1d0] sm:$0xff] }
  0x86   :  { %645 = vmatpush1.bf16.msra.mxu0 %v10329_v45  ;;  %v10304_v45 = vcombine.high %v118_v36, %v122_v37  ;;  %v154_v0 = vld [vmem:[#allocation2 + $0x178] sm:$0xff]  ;;  %v173_v10 = vld [vmem:[#allocation2 + $0x210] sm:$0xff] }
  0x87   :  { %646 = vmatprep.subr.bf16.mxu0 %v10338_v47  ;;  %686 = vmatpush1.bf16.msra.mxu1 %v10331_v60  ;;  %v10303_v47 = vcombine.low %v118_v36, %v122_v37  ;;  %v161_v60 = vld [vmem:[#allocation2 + $0x1b0] sm:$0xff]  ;;  %v158_v7 = vld [vmem:[#allocation2 + $0x198] sm:$0xff] }
  0x88   :  { %687 = vmatprep.subr.bf16.mxu1 %v10340_v62  ;;  %v10319_v62 = vcombine.low %v134_v48, %v138_v49  ;;  %v162_v8 = vld [vmem:[#allocation2 + $0x1b8] sm:$0xff]  ;;  %v10341_v9 = vcombine.low %v157_v59, %v161_v60  ;;  %v177_v11 = vld [vmem:[#allocation2 + $0x230] sm:$0xff] }
  0x89   :  { %v170_v17 = vld [vmem:[#allocation2 + $0x1f8] sm:$0xff]  ;;  %v181_v19 = vld [vmem:[#allocation2 + $0x250] sm:$0x77]  ;;  %v10344_v20 = vcombine.high %v158_v7, %v162_v8 }
  0x8a   :  { %647 = vmatpush1.bf16.msra.mxu0 %v10337_v53  ;;  %v10312_v53 = vcombine.high %v126_v40, %v130_v41  ;;  %v174_v24 = vld [vmem:[#allocation2 + $0x218] sm:$0xff]  ;;  %v10366_v30 = vcombine.high %v181_v19, %v181_v19 }
  0x8b   :  { %648 = vmatprep.subr.bf16.mxu0 %v10346_v55  ;;  %688 = vmatpush1.bf16.msra.mxu1 %v10339_v3  ;;  %v10311_v55 = vcombine.low %v126_v40, %v130_v41  ;;  %v169_v3 = vld [vmem:[#allocation2 + $0x1f0] sm:$0xff]  ;;  %v816_v28 = vld [vmem:[#allocation6 + $0x10] sm:$0xff]  ;;  %v814_v40 = vld [vmem:[#allocation6] sm:$0xff] }
  0x8c   :  { %689 = vmatprep.subr.bf16.mxu1 %v10348_v5  ;;  %v10342_v5 = vcombine.high %v157_v59, %v161_v60  ;;  %v10350_v13 = vcombine.high %v165_v2, %v169_v3  ;;  %v824_v29 = vld [vmem:[#allocation6 + $0x50] sm:$0xff]  ;;  %v822_v41 = vld [vmem:[#allocation6 + $0x40] sm:$0xff] }
  0x8d   :  { %v182_v33 = vld [vmem:[#allocation2 + $0x258] sm:$0x77]  ;;  %v10381_v44 = vcombine.low %v816_v28, %v824_v29 }
  0x8e   :  { %649 = vmatpush1.bf16.msra.mxu0 %v10345_v61  ;;  %v10320_v61 = vcombine.high %v134_v48, %v138_v49  ;;  %v840_v36 = vld [vmem:[#allocation6 + $0xd0] sm:$0xff]  ;;  %v10367_v43 = vcombine.low %v182_v33, %v182_v33  ;;  %v830_v48 = vld [vmem:[#allocation6 + $0x80] sm:$0xff] }
  0x8f   :  { %650 = vmatprep.subr.bf16.mxu0 %v10354_v63  ;;  %690 = vmatpush1.bf16.msra.mxu1 %v10347_v12  ;;  %v150_v63 = vld [vmem:[#allocation2 + $0x158] sm:$0xff]  ;;  %v838_v49 = vld [vmem:[#allocation6 + $0xc0] sm:$0xff] }
  0x90   :  { %691 = vmatprep.subr.bf16.mxu1 %v10356_v15  ;;  %v10336_v12 = vcombine.high %v150_v63, %v154_v0  ;;  %v10335_v15 = vcombine.low %v150_v63, %v154_v0  ;;  %v10394_v59 = vcombine.high %v830_v48, %v838_v49  ;;  %v10393_v63 = vcombine.low %v830_v48, %v838_v49  ;;  %v862_v0 = vld [vmem:[#allocation6 + $0x180] sm:$0xff] }
  0x91   :  { %v958_v49 = vld [vmem:[#allocation6 + $0x480] sm:$0xff] }
  0x92   :  { %651 = vmatpush1.bf16.msra.mxu0 %v10353_v4  ;;  %v10328_v4 = vcombine.high %v142_v56, %v146_v57 }
  0x93   :  { %10369 = vmatprep.subr.msk.bf16.mxu0 %vm609_vm1, %v10362_v6  ;;  %692 = vmatpush1.bf16.msra.mxu1 %v10355_v22  ;;  %v10327_v6 = vcombine.low %v142_v56, %v146_v57  ;;  %v10358_v22 = vcombine.high %v173_v10, %v177_v11  ;;  %v10377_v56 = vcombine.low %v814_v40, %v822_v41  ;;  %v846_v57 = vld [vmem:[#allocation6 + $0x100] sm:$0xff] }
  0x94   :  { %10371 = vmatprep.subr.msk.bf16.mxu1 %vm609_vm1, %v10364_v23  ;;  %v10343_v23 = vcombine.low %v158_v7, %v162_v8  ;;  %v878_v8 = vld [vmem:[#allocation6 + $0x200] sm:$0xff] }
  0x96   :  { %653 = vmatpush1.bf16.msra.mxu0 %v611_v16  ;;  %v166_v16 = vld [vmem:[#allocation2 + $0x1d8] sm:$0xff] }
  0x97   :  { %716 = vmatprep.subr.bf16.mxu0 %v10294_v18  ;;  %694 = vmatpush1.bf16.msra.mxu1 %v617_v31  ;;  %v10349_v18 = vcombine.low %v165_v2, %v169_v3  ;;  %v10352_v27 = vcombine.high %v166_v16, %v170_v17  ;;  %v10365_v31 = vcombine.low %v181_v19, %v181_v19 }
  0x98   :  { %757 = vmatprep.subr.bf16.mxu1 %v10296_v35  ;;  %v832_v35 = vld [vmem:[#allocation6 + $0x90] sm:$0xff] }
  0x99   :  { %667 = vmatmul.mubr.bf16.vlgmr.msra.gmra.mrb[0].mxu0 %v12490_v21  ;;  %v623_v37 = vsel %vm609_vm1, %v10365_v31, 0 }
  0x9a   :  { %717 = vmatpush1.bf16.msra.mxu0 %v10293_v25  ;;  %10374 = vmatprep.mubr.msk.bf16.mxu0 %vm605_vm0, %v12479_v14  ;;  %v178_v25 = vld [vmem:[#allocation2 + $0x238] sm:$0xff] }
  0x9b   :  { %718 = vmatprep.subr.bf16.mxu0 %v10302_v26  ;;  %708 = vmatmul.mubr.bf16.vlgmr.msra.gmra.mrb[0].mxu1 %v12490_v21  ;;  %v10357_v26 = vcombine.low %v173_v10, %v177_v11  ;;  %v10360_v34 = vcombine.high %v174_v24, %v178_v25  ;;  %v912_v11 = vld [vmem:[#allocation6 + $0x310] sm:$0xff] }
  0x9c   :  { %758 = vmatpush1.bf16.msra.mxu1 %v10295_v39  ;;  %10376 = vmatprep.mubr.msk.bf16.mxu1 %vm605_vm0, %v12479_v14  ;;  %v10334_v14 = vcombine.high %v149_v51, %v153_v52  ;;  %v10359_v39 = vcombine.low %v174_v24, %v178_v25  ;;  %v10378_v51 = vcombine.high %v814_v40, %v822_v41  ;;  %v910_v25 = vld [vmem:[#allocation6 + $0x300] sm:$0xff] }
  0x9d   :  { %759 = vmatprep.subr.bf16.mxu1 %v10304_v45  ;;  %v848_v45 = vld [vmem:[#allocation6 + $0x110] sm:$0xff]  ;;  %v10397_v52 = vcombine.low %v832_v35, %v840_v36  ;;  %v942_v41 = vld [vmem:[#allocation6 + $0x400] sm:$0xff] }
  0x9e   :  { %719 = vmatpush1.bf16.msra.mxu0 %v10301_v32  ;;  %v10351_v32 = vcombine.low %v166_v16, %v170_v17  ;;  %v894_v16 = vld [vmem:[#allocation6 + $0x280] sm:$0xff] }
  0x9f   :  { %720 = vmatprep.subr.bf16.mxu0 %v10310_v38  ;;  %v10382_v38 = vcombine.high %v816_v28, %v824_v29  ;;  %v902_v17 = vld [vmem:[#allocation6 + $0x2c0] sm:$0xff]  ;;  %v944_v29 = vld [vmem:[#allocation6 + $0x410] sm:$0xff] }
  0xa0   :  { %760 = vmatpush1.bf16.msra.mxu1 %v10303_v47  ;;  %v10398_v47 = vcombine.high %v832_v35, %v840_v36 }
  0xa1   :  { %761 = vmatprep.subr.bf16.mxu1 %v10312_v53  ;;  %v864_v53 = vld [vmem:[#allocation6 + $0x190] sm:$0xff] }
  0xa2   :  { %721 = vmatpush1.bf16.msra.mxu0 %v10309_v42  ;;  %v10368_v42 = vcombine.high %v182_v33, %v182_v33  ;;  %v926_v33 = vld [vmem:[#allocation6 + $0x380] sm:$0xff] }
  0xa3   :  { %722 = vmatprep.subr.bf16.mxu0 %v10318_v46  ;;  %v856_v46 = vld [vmem:[#allocation6 + $0x150] sm:$0xff] }
  0xa4   :  { %762 = vmatpush1.bf16.msra.mxu1 %v10311_v55  ;;  %v10414_v55 = vcombine.high %v848_v45, %v856_v46  ;;  %v10413_v60 = vcombine.low %v848_v45, %v856_v46  ;;  %v976_v45 = vld [vmem:[#allocation6 + $0x510] sm:$0xff] }
  0xa5   :  { %763 = vmatprep.subr.bf16.mxu1 %v10320_v61  ;;  %v880_v61 = vld [vmem:[#allocation6 + $0x210] sm:$0xff] }
  0xa6   :  { %723 = vmatpush1.bf16.msra.mxu0 %v10317_v50  ;;  %v629_v50 = vsel %vm609_vm1, %v10367_v43, 0  ;;  %v984_v46 = vld [vmem:[#allocation6 + $0x550] sm:$0xff] }
  0xa7   :  { %724 = vmatprep.subr.bf16.mxu0 %v10326_v54  ;;  %v872_v54 = vld [vmem:[#allocation6 + $0x1d0] sm:$0xff] }
  0xa8   :  { %764 = vmatpush1.bf16.msra.mxu1 %v10319_v62  ;;  %v10430_v62 = vcombine.high %v864_v53, %v872_v54  ;;  %v10429_v3 = vcombine.low %v864_v53, %v872_v54  ;;  %v992_v53 = vld [vmem:[#allocation6 + $0x590] sm:$0xff] }
  0xa9   :  { %765 = vmatprep.subr.bf16.mxu1 %v10328_v4  ;;  %v896_v4 = vld [vmem:[#allocation6 + $0x290] sm:$0xff] }
  0xaa   :  { %725 = vmatpush1.bf16.msra.mxu0 %v10325_v58  ;;  %v854_v58 = vld [vmem:[#allocation6 + $0x140] sm:$0xff]  ;;  %v1000_v54 = vld [vmem:[#allocation6 + $0x5d0] sm:$0xff] }
  0xab   :  { %726 = vmatprep.subr.bf16.mxu0 %v10334_v14  ;;  %v888_v14 = vld [vmem:[#allocation6 + $0x250] sm:$0xff]  ;;  %v10410_v2 = vcombine.high %v846_v57, %v854_v58  ;;  %v10409_v7 = vcombine.low %v846_v57, %v854_v58  ;;  %v974_v57 = vld [vmem:[#allocation6 + $0x500] sm:$0xff] }
  0xac   :  { %766 = vmatpush1.bf16.msra.mxu1 %v10327_v6  ;;  %v10446_v6 = vcombine.high %v880_v61, %v888_v14  ;;  %v982_v58 = vld [vmem:[#allocation6 + $0x540] sm:$0xff] }
  0xad   :  { %767 = vmatprep.subr.bf16.mxu1 %v10336_v12  ;;  %v920_v12 = vld [vmem:[#allocation6 + $0x350] sm:$0xff] }
  0xae   :  { %727 = vmatpush1.bf16.msra.mxu0 %v10333_v1  ;;  %v870_v1 = vld [vmem:[#allocation6 + $0x1c0] sm:$0xff]  ;;  %v10477_v28 = vcombine.low %v912_v11, %v920_v12 }
  0xaf   :  { %728 = vmatprep.subr.bf16.mxu0 %v10342_v5  ;;  %v904_v5 = vld [vmem:[#allocation6 + $0x2d0] sm:$0xff]  ;;  %v10426_v10 = vcombine.high %v862_v0, %v870_v1 }
  0xb0   :  { %768 = vmatpush1.bf16.msra.mxu1 %v10335_v15  ;;  %v10425_v15 = vcombine.low %v862_v0, %v870_v1  ;;  %v10461_v19 = vcombine.low %v896_v4, %v904_v5  ;;  %v990_v0 = vld [vmem:[#allocation6 + $0x580] sm:$0xff] }
  0xb1   :  { %769 = vmatprep.subr.bf16.mxu1 %v10344_v20  ;;  %v928_v20 = vld [vmem:[#allocation6 + $0x390] sm:$0xff]  ;;  %v998_v1 = vld [vmem:[#allocation6 + $0x5c0] sm:$0xff] }
  0xb2   :  { %729 = vmatpush1.bf16.msra.mxu0 %v10341_v9  ;;  %v886_v9 = vld [vmem:[#allocation6 + $0x240] sm:$0xff] }
  0xb3   :  { %730 = vmatprep.subr.bf16.mxu0 %v10350_v13  ;;  %v10462_v13 = vcombine.high %v896_v4, %v904_v5  ;;  %v10441_v24 = vcombine.low %v878_v8, %v886_v9  ;;  %v1024_v4 = vld [vmem:[#allocation6 + $0x690] sm:$0xff] }
  0xb4   :  { %770 = vmatpush1.bf16.msra.mxu1 %v10343_v23  ;;  %v10478_v23 = vcombine.high %v912_v11, %v920_v12  ;;  %v1032_v5 = vld [vmem:[#allocation6 + $0x6d0] sm:$0xff] }
  0xb5   :  { %771 = vmatprep.subr.bf16.mxu1 %v10352_v27  ;;  %v10458_v27 = vcombine.high %v894_v16, %v902_v17  ;;  %v1040_v11 = vld [vmem:[#allocation6 + $0x710] sm:$0xff] }
  0xb6   :  { %731 = vmatpush1.bf16.msra.mxu0 %v10349_v18  ;;  %v10442_v18 = vcombine.high %v878_v8, %v886_v9  ;;  %v1006_v8 = vld [vmem:[#allocation6 + $0x600] sm:$0xff]  ;;  %v1048_v12 = vld [vmem:[#allocation6 + $0x750] sm:$0xff] }
  0xb7   :  { %732 = vmatprep.subr.bf16.mxu0 %v10358_v22  ;;  %v936_v22 = vld [vmem:[#allocation6 + $0x3d0] sm:$0xff]  ;;  %v1014_v9 = vld [vmem:[#allocation6 + $0x640] sm:$0xff] }
  0xb8   :  { %772 = vmatpush1.bf16.msra.mxu1 %v10351_v32  ;;  %v10494_v31 = vcombine.high %v928_v20, %v936_v22  ;;  %v10457_v32 = vcombine.low %v894_v16, %v902_v17  ;;  %v10493_v36 = vcombine.low %v928_v20, %v936_v22  ;;  %v1022_v16 = vld [vmem:[#allocation6 + $0x680] sm:$0xff]  ;;  %v12510_v20 = vld [vmem:[#allocation6 + $0x810] sm:$0xff]  ;;  %v10570_v22 = vcombine.high %v1006_v8, %v1014_v9 }
  0xb9   :  { %773 = vmatprep.subr.bf16.mxu1 %v10360_v34  ;;  %v934_v34 = vld [vmem:[#allocation6 + $0x3c0] sm:$0xff] }
  0xba   :  { %733 = vmatpush1.bf16.msra.mxu0 %v10357_v26  ;;  %v918_v26 = vld [vmem:[#allocation6 + $0x340] sm:$0xff]  ;;  %v10490_v43 = vcombine.high %v926_v33, %v934_v34  ;;  %v10489_v48 = vcombine.low %v926_v33, %v934_v34 }
  0xbb   :  { %10373 = vmatprep.subr.msk.bf16.mxu0 %vm609_vm1, %v10366_v30  ;;  %v952_v30 = vld [vmem:[#allocation6 + $0x450] sm:$0xff]  ;;  %v10474_v35 = vcombine.high %v910_v25, %v918_v26  ;;  %v10473_v40 = vcombine.low %v910_v25, %v918_v26  ;;  %v1030_v17 = vld [vmem:[#allocation6 + $0x6c0] sm:$0xff]  ;;  %v10606_v25 = vcombine.high %v1040_v11, %v1048_v12 }
  0xbc   :  { %774 = vmatpush1.bf16.msra.mxu1 %v10359_v39  ;;  %v10510_v39 = vcombine.high %v944_v29, %v952_v30  ;;  %v1038_v33 = vld [vmem:[#allocation6 + $0x700] sm:$0xff] }
  0xbd   :  { %10375 = vmatprep.subr.msk.bf16.mxu1 %vm609_vm1, %v10368_v42  ;;  %v950_v42 = vld [vmem:[#allocation6 + $0x440] sm:$0xff] }
  0xbe   :  { %735 = vmatpush1.bf16.msra.mxu0 %v623_v37  ;;  %v960_v37 = vld [vmem:[#allocation6 + $0x490] sm:$0xff]  ;;  %v1046_v34 = vld [vmem:[#allocation6 + $0x740] sm:$0xff] }
  0xbf   :  { %7370 = vmatprep.subr.bf16.mxu0 %v10382_v38  ;;  %v968_v38 = vld [vmem:[#allocation6 + $0x4d0] sm:$0xff] }
  0xc0   :  { %776 = vmatpush1.bf16.msra.mxu1 %v629_v50  ;;  %v966_v50 = vld [vmem:[#allocation6 + $0x4c0] sm:$0xff] }
  0xc1   :  { %749 = vmatmul.mubr.bf16.vlgmr.msra.gmra.mrb[4].mxu0 %v12490_v21  ;;  %7042 = vmatprep.subr.bf16.mxu1 %v10378_v51  ;;  %v10506_v51 = vcombine.high %v942_v41, %v950_v42 }
  0xc2   :  { %7371 = vmatpush1.bf16.msra.mxu0 %v10381_v44  ;;  %v10509_v44 = vcombine.low %v944_v29, %v952_v30  ;;  %v1064_v29 = vld [vmem:[#allocation6 + $0x7d0] sm:$0xff]  ;;  %v10569_v30 = vcombine.low %v1006_v8, %v1014_v9  ;;  %v1110_v8 = vld [vmem:[#allocation6 + $0x940] sm:$0xff] }
  0xc3   :  { %7372 = vmatprep.subr.bf16.mxu0 %v10398_v47  ;;  %790 = vmatmul.mubr.bf16.vlgmr.msra.gmra.mrb[4].mxu1 %v12490_v21  ;;  %v10445_v21 = vcombine.low %v880_v61, %v888_v14  ;;  %v10526_v47 = vcombine.high %v960_v37, %v968_v38  ;;  %v1008_v61 = vld [vmem:[#allocation6 + $0x610] sm:$0xff] }
  0xc4   :  { %7043 = vmatpush1.bf16.msra.mxu1 %v10377_v56  ;;  %v10505_v56 = vcombine.low %v942_v41, %v950_v42  ;;  %v1016_v14 = vld [vmem:[#allocation6 + $0x650] sm:$0xff]  ;;  %v10601_v42 = vcombine.low %v1038_v33, %v1046_v34 }
  0xc5   :  { %7044 = vmatprep.subr.bf16.mxu1 %v10394_v59  ;;  %v10522_v59 = vcombine.high %v958_v49, %v966_v50  ;;  %v1104_v9 = vld [vmem:[#allocation6 + $0x910] sm:$0xff] }
  0xc6   :  { %7373 = vmatpush1.bf16.msra.mxu0 %v10397_v52  ;;  %v10525_v52 = vcombine.low %v960_v37, %v968_v38  ;;  %v10602_v37 = vcombine.high %v1038_v33, %v1046_v34  ;;  %v1144_v33 = vld [vmem:[#allocation6 + $0xa50] sm:$0xff] }
  0xc7   :  { %7374 = vmatprep.subr.bf16.mxu0 %v10414_v55  ;;  %v10542_v55 = vcombine.high %v976_v45, %v984_v46 }
  0xc8   :  { %7045 = vmatpush1.bf16.msra.mxu1 %v10393_v63  ;;  %v10521_v63 = vcombine.low %v958_v49, %v966_v50  ;;  %v12527_v49 = vld [vmem:[#allocation4] sm:$0xff] }
  0xc9   :  { %7046 = vmatprep.subr.bf16.mxu1 %v10410_v2  ;;  %v10538_v2 = vcombine.high %v974_v57, %v982_v58 }
  0xca   :  { %7375 = vmatpush1.bf16.msra.mxu0 %v10413_v60  ;;  %v10541_v60 = vcombine.low %v976_v45, %v984_v46  ;;  %v185_v46 = vlaneseq }
  0xcb   :  { %7376 = vmatprep.subr.bf16.mxu0 %v10430_v62  ;;  %v10558_v62 = vcombine.high %v992_v53, %v1000_v54 }
  0xcc   :  { %7047 = vmatpush1.bf16.msra.mxu1 %v10409_v7  ;;  %v10537_v7 = vcombine.low %v974_v57, %v982_v58 }
  0xcd   :  { %7048 = vmatprep.subr.bf16.mxu1 %v10426_v10  ;;  %v10554_v10 = vcombine.high %v990_v0, %v998_v1 }
  0xce   :  { %7377 = vmatpush1.bf16.msra.mxu0 %v10429_v3  ;;  %v10557_v3 = vcombine.low %v992_v53, %v1000_v54 }
  0xcf   :  { %7378 = vmatprep.subr.bf16.mxu0 %v10446_v6  ;;  %v10574_v6 = vcombine.high %v1008_v61, %v1016_v14 }
  0xd0   :  { %7049 = vmatpush1.bf16.msra.mxu1 %v10425_v15  ;;  %v10553_v15 = vcombine.low %v990_v0, %v998_v1  ;;  %v1096_v0 = vld [vmem:[#allocation6 + $0x8d0] sm:$0xff] }
  0xd1   :  { %7050 = vmatprep.subr.bf16.mxu1 %v10442_v18  ;;  %v12506_v18 = vld [vmem:[#allocation6 + $0x800] sm:$0xff] }
  0xd2   :  { %7379 = vmatpush1.bf16.msra.mxu0 %v10445_v21  ;;  %v10573_v21 = vcombine.low %v1008_v61, %v1016_v14  ;;  %v1086_v61 = vld [vmem:[#allocation6 + $0x880] sm:$0xff] }
  0xd3   :  { %7380 = vmatprep.subr.bf16.mxu0 %v10462_v13  ;;  %v10590_v13 = vcombine.high %v1024_v4, %v1032_v5 }
  0xd4   :  { %7051 = vmatpush1.bf16.msra.mxu1 %v10441_v24  ;;  %v12512_v24 = vld [vmem:[#allocation6 + $0x850] sm:$0xff] }
  0xd5   :  { %7052 = vmatprep.subr.bf16.mxu1 %v10458_v27  ;;  %v10637_v27 = vcombine.low %v12510_v20, %v12512_v24  ;;  %v10638_v41 = vcombine.high %v12510_v20, %v12512_v24 }
  0xd6   :  { %7381 = vmatpush1.bf16.msra.mxu0 %v10461_v19  ;;  %v12508_v19 = vld [vmem:[#allocation6 + $0x840] sm:$0xff] }
  0xd7   :  { %7382 = vmatprep.subr.bf16.mxu0 %v10478_v23  ;;  %v10589_v23 = vcombine.low %v1024_v4, %v1032_v5  ;;  %v10633_v26 = vcombine.low %v12506_v18, %v12508_v19  ;;  %v10634_v45 = vcombine.high %v12506_v18, %v12508_v19 }
  0xd8   :  { %7053 = vmatpush1.bf16.msra.mxu1 %v10457_v32  ;;  %v10605_v32 = vcombine.low %v1040_v11, %v1048_v12 }
  0xd9   :  { %7054 = vmatprep.subr.bf16.mxu1 %v10474_v35 }
  0xda   :  { %7383 = vmatpush1.bf16.msra.mxu0 %v10477_v28  ;;  %v1056_v28 = vld [vmem:[#allocation6 + $0x790] sm:$0xff] }
  0xdb   :  { %7384 = vmatprep.subr.bf16.mxu0 %v10494_v31  ;;  %v10586_v31 = vcombine.high %v1022_v16, %v1030_v17  ;;  %v10622_v35 = vcombine.high %v1056_v28, %v1064_v29  ;;  %v10621_v38 = vcombine.low %v1056_v28, %v1064_v29  ;;  %v1126_v28 = vld [vmem:[#allocation6 + $0x9c0] sm:$0xff]  ;;  %v1120_v29 = vld [vmem:[#allocation6 + $0x990] sm:$0xff] }
  0xdc   :  { %7055 = vmatpush1.bf16.msra.mxu1 %v10473_v40  ;;  %v1062_v40 = vld [vmem:[#allocation6 + $0x7c0] sm:$0xff] }
  0xdd   :  { %7056 = vmatprep.subr.bf16.mxu1 %v10490_v43 }
  0xde   :  { %7385 = vmatpush1.bf16.msra.mxu0 %v10493_v36  ;;  %v10585_v36 = vcombine.low %v1022_v16, %v1030_v17 }
  0xdf   :  { %7386 = vmatprep.subr.bf16.mxu0 %v10510_v39  ;;  %v1054_v39 = vld [vmem:[#allocation6 + $0x780] sm:$0xff] }
  0xe0   :  { %7057 = vmatpush1.bf16.msra.mxu1 %v10489_v48  ;;  %v10618_v43 = vcombine.high %v1054_v39, %v1062_v40 }
  0xe1   :  { %7058 = vmatprep.subr.bf16.mxu1 %v10506_v51 }
  0xe2   :  { %7387 = vmatpush1.bf16.msra.mxu0 %v10509_v44  ;;  %v10617_v44 = vcombine.low %v1054_v39, %v1062_v40  ;;  %v1158_v39 = vld [vmem:[#allocation6 + $0xac0] sm:$0xff]  ;;  %v1152_v40 = vld [vmem:[#allocation6 + $0xa90] sm:$0xff] }
  0xe3   :  { %7388 = vmatprep.subr.bf16.mxu0 %v10526_v47  ;;  %v12522_v47 = vshrl.u32 %v185_v46, 7  ;;  %v1166_v46 = vld [vmem:[#allocation6 + $0xb00] sm:$0xff] }
  0xe4   :  { %7059 = vmatpush1.bf16.msra.mxu1 %v10505_v56 }
  0xe5   :  { %7060 = vmatprep.subr.bf16.mxu1 %v10522_v59  ;;  %v12525_v48 = vsub.s32 0, %v12522_v47  ;;  %v12530_v50 = vsub.s32 1, %v12522_v47  ;;  %v12537_v56 = vsub.s32 3, %v12522_v47 }
  0xe6   :  { %7389 = vmatpush1.bf16.msra.mxu0 %v10525_v52 }
  0xe7   :  { %7390 = vmatprep.subr.bf16.mxu0 %v10542_v55  ;;  %v188_v51 = vrot.slane %v12527_v49, %v12525_v48  ;;  %v192_v52 = vrot.slane %v12527_v49, %v12530_v50  ;;  %v200_v1 = vrot.slane %v12527_v49, %v12537_v56 }
  0xe8   :  { %7061 = vmatpush1.bf16.msra.mxu1 %v10521_v63  ;;  %v1088_v63 = vld [vmem:[#allocation6 + $0x890] sm:$0xff] }
  0xe9   :  { %7062 = vmatprep.subr.bf16.mxu1 %v10538_v2  ;;  %v10654_v5 = vcombine.high %v1088_v63, %v1096_v0 }
  0xea   :  { %7391 = vmatpush1.bf16.msra.mxu0 %v10541_v60 }
  0xeb   :  { %7392 = vmatprep.subr.bf16.mxu0 %v10558_v62  ;;  %v1094_v62 = vld [vmem:[#allocation6 + $0x8c0] sm:$0xff] }
  0xec   :  { %7063 = vmatpush1.bf16.msra.mxu1 %v10537_v7  ;;  %v10650_v4 = vcombine.high %v1086_v61, %v1094_v62 }
  0xed   :  { %7064 = vmatprep.subr.bf16.mxu1 %v10554_v10  ;;  %v1112_v10 = vld [vmem:[#allocation6 + $0x950] sm:$0xff] }
  0xee   :  { %7393 = vmatpush1.bf16.msra.mxu0 %v10557_v3  ;;  %v10669_v19 = vcombine.low %v1104_v9, %v1112_v10 }
  0xef   :  { %7394 = vmatprep.subr.bf16.mxu0 %v10574_v6  ;;  %v1102_v6 = vld [vmem:[#allocation6 + $0x900] sm:$0xff] }
  0xf0   :  { %7065 = vmatpush1.bf16.msra.mxu1 %v10553_v15  ;;  %v10653_v15 = vcombine.low %v1088_v63, %v1096_v0  ;;  %v10666_v17 = vcombine.high %v1102_v6, %v1110_v8  ;;  %v10665_v18 = vcombine.low %v1102_v6, %v1110_v8  ;;  %v1200_v6 = vld [vmem:[#allocation6 + $0xc10] sm:$0xff] }
  0xf1   :  { %7066 = vmatprep.subr.bf16.mxu1 %v10570_v22  ;;  %v10670_v22 = vcombine.high %v1104_v9, %v1112_v10  ;;  %v1208_v8 = vld [vmem:[#allocation6 + $0xc50] sm:$0xff] }
  0xf2   :  { %7395 = vmatpush1.bf16.msra.mxu0 %v10573_v21 }
  0xf3   :  { %7396 = vmatprep.subr.bf16.mxu0 %v10590_v13  ;;  %v10649_v13 = vcombine.low %v1086_v61, %v1094_v62  ;;  %v1184_v61 = vld [vmem:[#allocation6 + $0xb90] sm:$0xff] }
  0xf4   :  { %7067 = vmatpush1.bf16.msra.mxu1 %v10569_v30  ;;  %v1128_v30 = vld [vmem:[#allocation6 + $0x9d0] sm:$0xff] }
  0xf5   :  { %7068 = vmatprep.subr.bf16.mxu1 %v10586_v31  ;;  %v10686_v24 = vcombine.high %v1120_v29, %v1128_v30 }
  0xf6   :  { %7397 = vmatpush1.bf16.msra.mxu0 %v10589_v23  ;;  %v1118_v23 = vld [vmem:[#allocation6 + $0x980] sm:$0xff] }
  0xf7   :  { %7398 = vmatprep.subr.bf16.mxu0 %v10606_v25  ;;  %v10682_v20 = vcombine.high %v1118_v23, %v1126_v28  ;;  %v10681_v34 = vcombine.low %v1118_v23, %v1126_v28  ;;  %v1230_v28 = vld [vmem:[#allocation6 + $0xd00] sm:$0xff] }
  0xf8   :  { %7069 = vmatpush1.bf16.msra.mxu1 %v10585_v36 }
  0xf9   :  { %7070 = vmatprep.subr.bf16.mxu1 %v10602_v37 }
  0xfa   :  { %7399 = vmatpush1.bf16.msra.mxu0 %v10605_v32  ;;  %v1136_v32 = vld [vmem:[#allocation6 + $0xa10] sm:$0xff] }
  0xfb   :  { %7400 = vmatprep.subr.bf16.mxu0 %v10622_v35  ;;  %v10685_v35 = vcombine.low %v1120_v29, %v1128_v30  ;;  %v10702_v37 = vcombine.high %v1136_v32, %v1144_v33  ;;  %v1238_v29 = vld [vmem:[#allocation6 + $0xd40] sm:$0xff]  ;;  %v1232_v30 = vld [vmem:[#allocation6 + $0xd10] sm:$0xff] }
  0xfc   :  { %7071 = vmatpush1.bf16.msra.mxu1 %v10601_v42 }
  0xfd   :  { %7072 = vmatprep.subr.bf16.mxu1 %v10618_v43  ;;  %v10701_v43 = vcombine.low %v1136_v32, %v1144_v33  ;;  %v10794_v32 = vcombine.high %v1230_v28, %v1238_v29 }
  0xfe   :  { %7401 = vmatpush1.bf16.msra.mxu0 %v10621_v38  ;;  %v1150_v38 = vld [vmem:[#allocation6 + $0xa80] sm:$0xff] }
  0xff   :  { %7411 = vmatprep.subr.bf16.mxu0 %v10638_v41  ;;  %v1160_v41 = vld [vmem:[#allocation6 + $0xad0] sm:$0xff] }
 0x100   :  { %7073 = vmatpush1.bf16.msra.mxu1 %v10617_v44  ;;  %v10714_v44 = vcombine.high %v1150_v38, %v1158_v39 }
 0x101   :  { %7083 = vmatprep.subr.bf16.mxu1 %v10634_v45  ;;  %v10718_v45 = vcombine.high %v1152_v40, %v1160_v41 }
 0x16c   :  { %v668_v53 = vpop.f32.mrb[0].mxu0 }
 0x16d   :  { %v669_v54 = vadd.f32 %v668_v53, %v188_v51  ;;  %v670_v55 = vpop.f32.mrb[1].mxu0  ;;  %v1174_v51 = vld [vmem:[#allocation6 + $0xb40] sm:$0xff]  ;;  %v1176_v53 = vld [vmem:[#allocation6 + $0xb50] sm:$0xff] }
 0x16e   :  { %v671_v57 = vadd.f32 %v670_v55, %v192_v52  ;;  %v672_v58 = vpop.f32.mrb[2].mxu0  ;;  %v12545_v7 = vpop.f32.mrb[0].mxu1  ;;  %v1168_v52 = vld [vmem:[#allocation6 + $0xb10] sm:$0xff]  ;;  %v10717_v55 = vcombine.low %v1152_v40, %v1160_v41  ;;  %v10729_v62 = vcombine.low %v1166_v46, %v1174_v51 }
 0x16f   :  { %v798_v59 = vmax.f32 %v669_v54, 0.0  ;;  %v673_v60 = vpop.f32.mrb[3].mxu0  ;;  %v711_v21 = vpop.f32.mrb[1].mxu1  ;;  %v10713_v54 = vcombine.low %v1150_v38, %v1158_v39  ;;  %v10734_v58 = vcombine.high %v1168_v52, %v1176_v53  ;;  %v10733_v63 = vcombine.low %v1168_v52, %v1176_v53  ;;  %v1256_v38 = vld [vmem:[#allocation6 + $0xdd0] sm:$0xff] }
 0x170   :  { %v799_v14 = vmax.f32 %v671_v57, 0.0  ;;  %v712_v11 = vadd.f32 %v711_v21, %v200_v1  ;;  %v713_v12 = vpop.f32.mrb[2].mxu1  ;;  %v10730_v57 = vcombine.high %v1166_v46, %v1174_v51  ;;  %v1190_v60 = vld [vmem:[#allocation6 + $0xbc0] sm:$0xff]  ;;  %v10793_v39 = vcombine.low %v1230_v28, %v1238_v29  ;;  %v1264_v46 = vld [vmem:[#allocation6 + $0xe10] sm:$0xff] }
 0x171   :  { %v12543_v3 = vpack.c.bf16 %v798_v59, %v798_v59  ;;  %v714_v16 = vpop.f32.mrb[3].mxu1  ;;  %v1182_v59 = vld [vmem:[#allocation6 + $0xb80] sm:$0xff]  ;;  %v1272_v51 = vld [vmem:[#allocation6 + $0xe50] sm:$0xff] }
 0x172   :  { %v12541_v2 = vpack.c.bf16 %v799_v14, %v799_v14  ;;  %v801_v25 = vmax.f32 %v712_v11, 0.0  ;;  %v1192_v14 = vld [vmem:[#allocation6 + $0xbd0] sm:$0xff]  ;;  %v10746_v0 = vcombine.high %v1182_v59, %v1190_v60  ;;  %v10745_v9 = vcombine.low %v1182_v59, %v1190_v60  ;;  %v1214_v12 = vld [vmem:[#allocation6 + $0xc80] sm:$0xff] }
 0x173   :  { %v10750_v1 = vcombine.high %v1184_v61, %v1192_v14  ;;  %v10749_v10 = vcombine.low %v1184_v61, %v1192_v14  ;;  %v10766_v11 = vcombine.high %v1200_v6, %v1208_v8  ;;  %v1224_v16 = vld [vmem:[#allocation6 + $0xcd0] sm:$0xff]  ;;  %v10830_v59 = vcombine.high %v1264_v46, %v1272_v51  ;;  %v1278_v60 = vld [vmem:[#allocation6 + $0xe80] sm:$0xff] }
 0x174   :  { %7074 = vmatprep.mubr.bf16.mxu1 %v12541_v2  ;;  %7402 = vmatprep.mubr.bf16.mxu0 %v12541_v2  ;;  %v12557_v31 = vpack.c.bf16 %v801_v25, %v801_v25  ;;  %v1286_v61 = vld [vmem:[#allocation6 + $0xec0] sm:$0xff]  ;;  %v1280_v14 = vld [vmem:[#allocation6 + $0xe90] sm:$0xff] }
 0x175   :  { %7075 = vmatmul.mubr.bf16.vlgmr.msra.gmra.mrb[8].mxu1 %v12543_v3  ;;  %7403 = vmatmul.mubr.bf16.vlgmr.msra.gmra.mrb[8].mxu0 %v12543_v3 }
 0x176   :  { %7084 = vmatpush1.bf16.msra.mxu1 %v10633_v26  ;;  %7412 = vmatpush1.bf16.msra.mxu0 %v10637_v27  ;;  %v1134_v26 = vld [vmem:[#allocation6 + $0xa00] sm:$0xff] }
 0x177   :  { %7085 = vmatprep.subr.bf16.mxu1 %v10650_v4  ;;  %7413 = vmatprep.subr.bf16.mxu0 %v10654_v5  ;;  %v1142_v27 = vld [vmem:[#allocation6 + $0xa40] sm:$0xff] }
 0x178   :  { %7115 = vmatprep.mubr.bf16.mxu1 %v12557_v31  ;;  %7443 = vmatprep.mubr.bf16.mxu0 %v12557_v31  ;;  %v10698_v36 = vcombine.high %v1134_v26, %v1142_v27  ;;  %v10697_v42 = vcombine.low %v1134_v26, %v1142_v27  ;;  %v1198_v4 = vld [vmem:[#allocation6 + $0xc00] sm:$0xff] }
 0x179   :  { %v1206_v5 = vld [vmem:[#allocation6 + $0xc40] sm:$0xff] }
 0x17a   :  { %7086 = vmatpush1.bf16.msra.mxu1 %v10649_v13  ;;  %7414 = vmatpush1.bf16.msra.mxu0 %v10653_v15  ;;  %v10762_v21 = vcombine.high %v1198_v4, %v1206_v5  ;;  %v1222_v13 = vld [vmem:[#allocation6 + $0xcc0] sm:$0xff]  ;;  %v1216_v15 = vld [vmem:[#allocation6 + $0xc90] sm:$0xff] }
 0x17b   :  { %7087 = vmatprep.subr.bf16.mxu1 %v10666_v17  ;;  %7415 = vmatprep.subr.bf16.mxu0 %v10670_v22  ;;  %v10761_v17 = vcombine.low %v1198_v4, %v1206_v5  ;;  %v10765_v22 = vcombine.low %v1200_v6, %v1208_v8  ;;  %v10778_v23 = vcombine.high %v1214_v12, %v1222_v13  ;;  %v1294_v6 = vld [vmem:[#allocation6 + $0xf00] sm:$0xff] }
 0x17c   :  { %v10782_v25 = vcombine.high %v1216_v15, %v1224_v16  ;;  %v10781_v26 = vcombine.low %v1216_v15, %v1224_v16  ;;  %v10842_v4 = vcombine.high %v1278_v60, %v1286_v61  ;;  %v1302_v8 = vld [vmem:[#allocation6 + $0xf40] sm:$0xff] }
 0x17d   :  { %v10858_v15 = vcombine.high %v1294_v6, %v1302_v8 }
 0x17e   :  { %7088 = vmatpush1.bf16.msra.mxu1 %v10665_v18  ;;  %7416 = vmatpush1.bf16.msra.mxu0 %v10669_v19  ;;  %v1240_v18 = vld [vmem:[#allocation6 + $0xd50] sm:$0xff] }
 0x17f   :  { %7089 = vmatprep.subr.bf16.mxu1 %v10682_v20  ;;  %7417 = vmatprep.subr.bf16.mxu0 %v10686_v24  ;;  %v10777_v24 = vcombine.low %v1214_v12, %v1222_v13  ;;  %v10798_v33 = vcombine.high %v1232_v30, %v1240_v18  ;;  %v10797_v40 = vcombine.low %v1232_v30, %v1240_v18 }
 0x180   :  { %v10841_v12 = vcombine.low %v1278_v60, %v1286_v61  ;;  %v10857_v30 = vcombine.low %v1294_v6, %v1302_v8  ;;  %v1384_v6 = vld [vmem:[#allocation6 + $0x11d0] sm:$0xff] }
 0x182   :  { %7090 = vmatpush1.bf16.msra.mxu1 %v10681_v34  ;;  %7418 = vmatpush1.bf16.msra.mxu0 %v10685_v35  ;;  %v1246_v34 = vld [vmem:[#allocation6 + $0xd80] sm:$0xff] }
 0x183   :  { %7091 = vmatprep.subr.bf16.mxu1 %v10698_v36  ;;  %7419 = vmatprep.subr.bf16.mxu0 %v10702_v37  ;;  %v1254_v36 = vld [vmem:[#allocation6 + $0xdc0] sm:$0xff]  ;;  %v1248_v37 = vld [vmem:[#allocation6 + $0xd90] sm:$0xff] }
 0x184   :  { %v10810_v41 = vcombine.high %v1246_v34, %v1254_v36 }
 0x186   :  { %7092 = vmatpush1.bf16.msra.mxu1 %v10697_v42  ;;  %7420 = vmatpush1.bf16.msra.mxu0 %v10701_v43  ;;  %v10814_v42 = vcombine.high %v1248_v37, %v1256_v38  ;;  %v1262_v43 = vld [vmem:[#allocation6 + $0xe00] sm:$0xff] }
 0x187   :  { %7093 = vmatprep.subr.bf16.mxu1 %v10714_v44  ;;  %7421 = vmatprep.subr.bf16.mxu0 %v10718_v45  ;;  %v1270_v45 = vld [vmem:[#allocation6 + $0xe40] sm:$0xff] }
 0x18a   :  { %7094 = vmatpush1.bf16.msra.mxu1 %v10713_v54  ;;  %7422 = vmatpush1.bf16.msra.mxu0 %v10717_v55  ;;  %v10809_v54 = vcombine.low %v1246_v34, %v1254_v36  ;;  %v10813_v55 = vcombine.low %v1248_v37, %v1256_v38  ;;  %v1336_v34 = vld [vmem:[#allocation6 + $0x1050] sm:$0xff] }
 0x18b   :  { %7095 = vmatprep.subr.bf16.mxu1 %v10730_v57  ;;  %7423 = vmatprep.subr.bf16.mxu0 %v10734_v58  ;;  %v10826_v58 = vcombine.high %v1262_v43, %v1270_v45 }
 0x18e   :  { %7096 = vmatpush1.bf16.msra.mxu1 %v10729_v62  ;;  %7424 = vmatpush1.bf16.msra.mxu0 %v10733_v63  ;;  %v1288_v62 = vld [vmem:[#allocation6 + $0xed0] sm:$0xff]  ;;  %v12570_v63 = vsub.s32 2, %v12522_v47 }
 0x18f   :  { %7097 = vmatprep.subr.bf16.mxu1 %v10746_v0  ;;  %7425 = vmatprep.subr.bf16.mxu0 %v10750_v1  ;;  %v10825_v0 = vcombine.low %v1262_v43, %v1270_v45  ;;  %v10829_v1 = vcombine.low %v1264_v46, %v1272_v51  ;;  %v10846_v5 = vcombine.high %v1280_v14, %v1288_v62  ;;  %v1352_v43 = vld [vmem:[#allocation6 + $0x10d0] sm:$0xff] }
 0x190   :  { %v10845_v13 = vcombine.low %v1280_v14, %v1288_v62 }
 0x192   :  { %7098 = vmatpush1.bf16.msra.mxu1 %v10745_v9  ;;  %7426 = vmatpush1.bf16.msra.mxu0 %v10749_v10  ;;  %v1296_v9 = vld [vmem:[#allocation6 + $0xf10] sm:$0xff] }
 0x193   :  { %7099 = vmatprep.subr.bf16.mxu1 %v10762_v21  ;;  %7427 = vmatprep.subr.bf16.mxu0 %v10766_v11  ;;  %v1304_v10 = vld [vmem:[#allocation6 + $0xf50] sm:$0xff]  ;;  %v12573_v21 = vsub.s32 5, %v12522_v47  ;;  %v196_v11 = vrot.slane %v12527_v49, %v12570_v63 }
 0x194   :  { %v12561_v19 = vpop.f32.mrb[4].mxu0  ;;  %v10862_v16 = vcombine.high %v1296_v9, %v1304_v10  ;;  %v10861_v18 = vcombine.low %v1296_v9, %v1304_v10 }
 0x195   :  { %v12563_v20 = vpop.f32.mrb[5].mxu0  ;;  %v208_v28 = vrot.slane %v12527_v49, %v12573_v21  ;;  %v710_v29 = vadd.f32 %v12545_v7, %v196_v11 }
 0x196   :  { %7100 = vmatpush1.bf16.msra.mxu1 %v10761_v17  ;;  %7428 = vmatpush1.bf16.msra.mxu0 %v10765_v22  ;;  %v754_v27 = vpop.f32.mrb[6].mxu0  ;;  %v12565_v44 = vpop.f32.mrb[4].mxu1  ;;  %v1310_v17 = vld [vmem:[#allocation6 + $0xf80] sm:$0xff] }
 0x197   :  { %7101 = vmatprep.subr.bf16.mxu1 %v10778_v23  ;;  %7429 = vmatprep.subr.bf16.mxu0 %v10782_v25  ;;  %v755_v35 = vpop.f32.mrb[7].mxu0  ;;  %v12567_v52 = vpop.f32.mrb[5].mxu1  ;;  %v1318_v22 = vld [vmem:[#allocation6 + $0xfc0] sm:$0xff]  ;;  %v1312_v23 = vld [vmem:[#allocation6 + $0xf90] sm:$0xff]  ;;  %v800_v36 = vmax.f32 %v710_v29, 0.0 }
 0x198   :  { %v795_v53 = vpop.f32.mrb[6].mxu1  ;;  %v1320_v25 = vld [vmem:[#allocation6 + $0xfd0] sm:$0xff]  ;;  %v1326_v27 = vld [vmem:[#allocation6 + $0x1000] sm:$0xff]  ;;  %v753_v35 = vadd.f32 %v12563_v20, %v208_v28  ;;  %v10873_v37 = vcombine.low %v1310_v17, %v1318_v22 }
 0x199   :  { %v796_v57 = vpop.f32.mrb[7].mxu1  ;;  %v10877_v38 = vcombine.low %v1312_v23, %v1320_v25  ;;  %v12581_v46 = vpack.c.bf16 %v800_v36, %v800_v36  ;;  %v1406_v28 = vld [vmem:[#allocation6 + $0x1280] sm:$0xff]  ;;  %v1432_v36 = vld [vmem:[#allocation6 + $0x1350] sm:$0xff] }
 0x19a   :  { %7102 = vmatpush1.bf16.msra.mxu1 %v10777_v24  ;;  %7430 = vmatpush1.bf16.msra.mxu0 %v10781_v26  ;;  %v10874_v24 = vcombine.high %v1310_v17, %v1318_v22  ;;  %v10878_v26 = vcombine.high %v1312_v23, %v1320_v25  ;;  %v803_v45 = vmax.f32 %v753_v35, 0.0  ;;  %v1366_v57 = vld [vmem:[#allocation6 + $0x1140] sm:$0xff]  ;;  %v1424_v35 = vld [vmem:[#allocation6 + $0x1310] sm:$0xff] }
 0x19b   :  { %7103 = vmatprep.subr.bf16.mxu1 %v10794_v32  ;;  %7431 = vmatprep.subr.bf16.mxu0 %v10798_v33  ;;  %v1334_v32 = vld [vmem:[#allocation6 + $0x1040] sm:$0xff]  ;;  %v1328_v33 = vld [vmem:[#allocation6 + $0x1010] sm:$0xff] }
 0x19c   :  { %v10890_v7 = vcombine.high %v1326_v27, %v1334_v32  ;;  %v10889_v51 = vcombine.low %v1326_v27, %v1334_v32  ;;  %v10893_v20 = vcombine.low %v1328_v33, %v1336_v34  ;;  %v12583_v60 = vpack.c.bf16 %v803_v45, %v803_v45  ;;  %v1414_v29 = vld [vmem:[#allocation6 + $0x12c0] sm:$0xff] }
 0x19d   :  { %v10970_v27 = vcombine.high %v1406_v28, %v1414_v29 }
 0x19e   :  { %7104 = vmatpush1.bf16.msra.mxu1 %v10793_v39  ;;  %7432 = vmatpush1.bf16.msra.mxu0 %v10797_v40  ;;  %v10894_v39 = vcombine.high %v1328_v33, %v1336_v34  ;;  %v1342_v40 = vld [vmem:[#allocation6 + $0x1080] sm:$0xff] }
 0x19f   :  { %7105 = vmatprep.subr.bf16.mxu1 %v10810_v41  ;;  %7433 = vmatprep.subr.bf16.mxu0 %v10814_v42  ;;  %v1350_v41 = vld [vmem:[#allocation6 + $0x10c0] sm:$0xff]  ;;  %v1344_v42 = vld [vmem:[#allocation6 + $0x1090] sm:$0xff] }
 0x1a0   :  { %v10906_v53 = vcombine.high %v1342_v40, %v1350_v41  ;;  %v10905_v61 = vcombine.low %v1342_v40, %v1350_v41  ;;  %v10909_v14 = vcombine.low %v1344_v42, %v1352_v43  ;;  %v1422_v33 = vld [vmem:[#allocation6 + $0x1300] sm:$0xff] }
 0x1a1   :  { %v1430_v34 = vld [vmem:[#allocation6 + $0x1340] sm:$0xff] }
 0x1a2   :  { %7106 = vmatpush1.bf16.msra.mxu1 %v10809_v54  ;;  %7434 = vmatpush1.bf16.msra.mxu0 %v10813_v55  ;;  %v10910_v54 = vcombine.high %v1344_v42, %v1352_v43  ;;  %v1358_v55 = vld [vmem:[#allocation6 + $0x1100] sm:$0xff]  ;;  %v1440_v42 = vld [vmem:[#allocation6 + $0x1390] sm:$0xff]  ;;  %v10985_v45 = vcombine.low %v1422_v33, %v1430_v34 }
 0x1a3   :  { %7107 = vmatprep.subr.bf16.mxu1 %v10826_v58  ;;  %7435 = vmatprep.subr.bf16.mxu0 %v10830_v59  ;;  %v1360_v58 = vld [vmem:[#allocation6 + $0x1110] sm:$0xff]  ;;  %v10922_v62 = vcombine.high %v1358_v55, %v1366_v57  ;;  %v10921_v8 = vcombine.low %v1358_v55, %v1366_v57  ;;  %v1438_v40 = vld [vmem:[#allocation6 + $0x1380] sm:$0xff] }
 0x1a4   :  { %v1368_v59 = vld [vmem:[#allocation6 + $0x1150] sm:$0xff]  ;;  %v1446_v41 = vld [vmem:[#allocation6 + $0x13c0] sm:$0xff] }
 0x1a5   :  { %v10925_v9 = vcombine.low %v1360_v58, %v1368_v59  ;;  %v1448_v43 = vld [vmem:[#allocation6 + $0x13d0] sm:$0xff]  ;;  %v1462_v55 = vld [vmem:[#allocation6 + $0x1440] sm:$0xff] }
 0x1a6   :  { %7108 = vmatpush1.bf16.msra.mxu1 %v10825_v0  ;;  %7436 = vmatpush1.bf16.msra.mxu0 %v10829_v1  ;;  %v10926_v0 = vcombine.high %v1360_v58, %v1368_v59  ;;  %v1374_v1 = vld [vmem:[#allocation6 + $0x1180] sm:$0xff]  ;;  %v1456_v57 = vld [vmem:[#allocation6 + $0x1410] sm:$0xff]  ;;  %v11001_v59 = vcombine.low %v1438_v40, %v1446_v41 }
 0x1a7   :  { %7109 = vmatprep.subr.bf16.mxu1 %v10842_v4  ;;  %7437 = vmatprep.subr.bf16.mxu0 %v10846_v5  ;;  %v1382_v4 = vld [vmem:[#allocation6 + $0x11c0] sm:$0xff]  ;;  %v1376_v5 = vld [vmem:[#allocation6 + $0x1190] sm:$0xff] }
 0x1a8   :  { %v10938_v10 = vcombine.high %v1374_v1, %v1382_v4  ;;  %v10942_v11 = vcombine.high %v1376_v5, %v1384_v6  ;;  %v10937_v17 = vcombine.low %v1374_v1, %v1382_v4  ;;  %v10941_v22 = vcombine.low %v1376_v5, %v1384_v6  ;;  %v1464_v58 = vld [vmem:[#allocation6 + $0x1450] sm:$0xff]  ;;  %v1478_v1 = vld [vmem:[#allocation6 + $0x14c0] sm:$0xff] }
 0x1a9   :  { %v1472_v4 = vld [vmem:[#allocation6 + $0x1490] sm:$0xff] }
 0x1aa   :  { %7110 = vmatpush1.bf16.msra.mxu1 %v10841_v12  ;;  %7438 = vmatpush1.bf16.msra.mxu0 %v10845_v13  ;;  %v1390_v12 = vld [vmem:[#allocation6 + $0x1200] sm:$0xff]  ;;  %v1480_v5 = vld [vmem:[#allocation6 + $0x14d0] sm:$0xff] }
 0x1ab   :  { %7111 = vmatprep.subr.bf16.mxu1 %v10858_v15  ;;  %7439 = vmatprep.subr.bf16.mxu0 %v10862_v16  ;;  %v1398_v13 = vld [vmem:[#allocation6 + $0x1240] sm:$0xff]  ;;  %v1392_v15 = vld [vmem:[#allocation6 + $0x1210] sm:$0xff] }
 0x1ac   :  { %v1400_v16 = vld [vmem:[#allocation6 + $0x1250] sm:$0xff]  ;;  %v10954_v23 = vcombine.high %v1390_v12, %v1398_v13 }
 0x1ad   :  { %v10958_v25 = vcombine.high %v1392_v15, %v1400_v16 }
 0x1ae   :  { %7112 = vmatpush1.bf16.msra.mxu1 %v10857_v30  ;;  %7440 = vmatpush1.bf16.msra.mxu0 %v10861_v18  ;;  %v1408_v30 = vld [vmem:[#allocation6 + $0x1290] sm:$0xff] }
 0x1af   :  { %7113 = vmatprep.subr.bf16.mxu1 %v10874_v24  ;;  %7441 = vmatprep.subr.bf16.mxu0 %v10878_v26  ;;  %v1416_v18 = vld [vmem:[#allocation6 + $0x12d0] sm:$0xff]  ;;  %v10953_v24 = vcombine.low %v1390_v12, %v1398_v13  ;;  %v10957_v26 = vcombine.low %v1392_v15, %v1400_v16  ;;  %v1494_v12 = vld [vmem:[#allocation6 + $0x1540] sm:$0xff] }
 0x1b0   :  { %v10974_v32 = vcombine.high %v1408_v30, %v1416_v18  ;;  %v1488_v13 = vld [vmem:[#allocation6 + $0x1510] sm:$0xff] }
 0x1b1   :  { %v1496_v15 = vld [vmem:[#allocation6 + $0x1550] sm:$0xff] }
 0x1b2   :  { %7114 = vmatpush1.bf16.msra.mxu1 %v10873_v37  ;;  %7442 = vmatpush1.bf16.msra.mxu0 %v10877_v38  ;;  %v10969_v37 = vcombine.low %v1406_v28, %v1414_v29  ;;  %v10973_v38 = vcombine.low %v1408_v30, %v1416_v18  ;;  %v1510_v28 = vld [vmem:[#allocation6 + $0x15c0] sm:$0xff]  ;;  %v1504_v29 = vld [vmem:[#allocation6 + $0x1590] sm:$0xff] }
 0x1b3   :  { %7124 = vmatprep.subr.bf16.mxu1 %v10890_v7  ;;  %7452 = vmatprep.subr.bf16.mxu0 %v10894_v39  ;;  %v10986_v7 = vcombine.high %v1422_v33, %v1430_v34  ;;  %v10990_v39 = vcombine.high %v1424_v35, %v1432_v36  ;;  %v1512_v30 = vld [vmem:[#allocation6 + $0x15d0] sm:$0xff]  ;;  %v1526_v33 = vld [vmem:[#allocation6 + $0x1640] sm:$0xff] }
 0x1b4   :  { %v1520_v34 = vld [vmem:[#allocation6 + $0x1610] sm:$0xff] }
 0x1b5   :  { %7116 = vmatmul.mubr.bf16.vlgmr.msra.gmra.mrb[8].mxu1 %v12581_v46  ;;  %7444 = vmatmul.mubr.bf16.vlgmr.msra.gmra.mrb[8].mxu0 %v12581_v46 }
 0x1b6   :  { %7125 = vmatpush1.bf16.msra.mxu1 %v10889_v51  ;;  %7453 = vmatpush1.bf16.msra.mxu0 %v10893_v20  ;;  %v10989_v51 = vcombine.low %v1424_v35, %v1432_v36  ;;  %v11002_v20 = vcombine.high %v1438_v40, %v1446_v41  ;;  %v1528_v35 = vld [vmem:[#allocation6 + $0x1650] sm:$0xff]  ;;  %v1542_v40 = vld [vmem:[#allocation6 + $0x16c0] sm:$0xff] }
 0x1b7   :  { %7126 = vmatprep.subr.bf16.mxu1 %v10906_v53  ;;  %7454 = vmatprep.subr.bf16.mxu0 %v10910_v54  ;;  %v11006_v53 = vcombine.high %v1440_v42, %v1448_v43  ;;  %v1454_v54 = vld [vmem:[#allocation6 + $0x1400] sm:$0xff]  ;;  %v1536_v41 = vld [vmem:[#allocation6 + $0x1690] sm:$0xff] }
 0x1b8   :  { %7156 = vmatprep.mubr.bf16.mxu1 %v12583_v60  ;;  %7484 = vmatprep.mubr.bf16.mxu0 %v12583_v60  ;;  %v11017_v6 = vcombine.low %v1454_v54, %v1462_v55 }
 0x1ba   :  { %7127 = vmatpush1.bf16.msra.mxu1 %v10905_v61  ;;  %7455 = vmatpush1.bf16.msra.mxu0 %v10909_v14  ;;  %v11005_v61 = vcombine.low %v1440_v42, %v1448_v43  ;;  %v11018_v14 = vcombine.high %v1454_v54, %v1462_v55  ;;  %v1544_v42 = vld [vmem:[#allocation6 + $0x16d0] sm:$0xff]  ;;  %v12590_v43 = vsub.s32 4, %v12522_v47  ;;  %v1550_v54 = vld [vmem:[#allocation6 + $0x1700] sm:$0xff] }
 0x1bb   :  { %7128 = vmatprep.subr.bf16.mxu1 %v10922_v62  ;;  %7456 = vmatprep.subr.bf16.mxu0 %v10926_v0  ;;  %v11022_v62 = vcombine.high %v1456_v57, %v1464_v58  ;;  %v1470_v0 = vld [vmem:[#allocation6 + $0x1480] sm:$0xff] }
 0x1bc   :  { %v11033_v16 = vcombine.low %v1470_v0, %v1478_v1  ;;  %v1558_v55 = vld [vmem:[#allocation6 + $0x1740] sm:$0xff] }
 0x1be   :  { %7129 = vmatpush1.bf16.msra.mxu1 %v10921_v8  ;;  %7457 = vmatpush1.bf16.msra.mxu0 %v10925_v9  ;;  %v11021_v8 = vcombine.low %v1456_v57, %v1464_v58  ;;  %v11034_v9 = vcombine.high %v1470_v0, %v1478_v1  ;;  %v1552_v57 = vld [vmem:[#allocation6 + $0x1710] sm:$0xff]  ;;  %v11114_v0 = vcombine.high %v1550_v54, %v1558_v55 }
 0x1bf   :  { %7130 = vmatprep.subr.bf16.mxu1 %v10938_v10  ;;  %7458 = vmatprep.subr.bf16.mxu0 %v10942_v11  ;;  %v11038_v10 = vcombine.high %v1472_v4, %v1480_v5  ;;  %v1486_v11 = vld [vmem:[#allocation6 + $0x1500] sm:$0xff]  ;;  %v1560_v58 = vld [vmem:[#allocation6 + $0x1750] sm:$0xff] }
 0x1c0   :  { %v11049_v18 = vcombine.low %v1486_v11, %v1494_v12  ;;  %v11118_v1 = vcombine.high %v1552_v57, %v1560_v58 }
 0x1c2   :  { %7131 = vmatpush1.bf16.msra.mxu1 %v10937_v17  ;;  %7459 = vmatpush1.bf16.msra.mxu0 %v10941_v22  ;;  %v11037_v17 = vcombine.low %v1472_v4, %v1480_v5  ;;  %v11050_v22 = vcombine.high %v1486_v11, %v1494_v12  ;;  %v1566_v4 = vld [vmem:[#allocation6 + $0x1780] sm:$0xff]  ;;  %v11113_v11 = vcombine.low %v1550_v54, %v1558_v55  ;;  %v1632_v54 = vld [vmem:[#allocation6 + $0x1990] sm:$0xff] }
 0x1c3   :  { %7132 = vmatprep.subr.bf16.mxu1 %v10954_v23  ;;  %7460 = vmatprep.subr.bf16.mxu0 %v10958_v25  ;;  %v11054_v23 = vcombine.high %v1488_v13, %v1496_v15  ;;  %v1502_v25 = vld [vmem:[#allocation6 + $0x1580] sm:$0xff]  ;;  %v11117_v12 = vcombine.low %v1552_v57, %v1560_v58  ;;  %v1640_v55 = vld [vmem:[#allocation6 + $0x19d0] sm:$0xff] }
 0x1c4   :  { %v11065_v36 = vcombine.low %v1502_v25, %v1510_v28  ;;  %v1574_v5 = vld [vmem:[#allocation6 + $0x17c0] sm:$0xff] }
 0x1c6   :  { %7133 = vmatpush1.bf16.msra.mxu1 %v10953_v24  ;;  %7461 = vmatpush1.bf16.msra.mxu0 %v10957_v26  ;;  %v11053_v24 = vcombine.low %v1488_v13, %v1496_v15  ;;  %v11066_v26 = vcombine.high %v1502_v25, %v1510_v28  ;;  %v11130_v13 = vcombine.high %v1566_v4, %v1574_v5 }
 0x1c7   :  { %7134 = vmatprep.subr.bf16.mxu1 %v10970_v27  ;;  %7462 = vmatprep.subr.bf16.mxu0 %v10974_v32  ;;  %v11070_v27 = vcombine.high %v1504_v29, %v1512_v30  ;;  %v1518_v32 = vld [vmem:[#allocation6 + $0x1600] sm:$0xff] }
 0x1ca   :  { %7135 = vmatpush1.bf16.msra.mxu1 %v10969_v37  ;;  %7463 = vmatpush1.bf16.msra.mxu0 %v10973_v38  ;;  %v11069_v37 = vcombine.low %v1504_v29, %v1512_v30  ;;  %v11082_v38 = vcombine.high %v1518_v32, %v1526_v33 }
 0x1cb   :  { %7136 = vmatprep.subr.bf16.mxu1 %v10986_v7  ;;  %7464 = vmatprep.subr.bf16.mxu0 %v10990_v39  ;;  %v11086_v7 = vcombine.high %v1520_v34, %v1528_v35  ;;  %v1534_v39 = vld [vmem:[#allocation6 + $0x1680] sm:$0xff] }
 0x1ce   :  { %7137 = vmatpush1.bf16.msra.mxu1 %v10985_v45  ;;  %7465 = vmatpush1.bf16.msra.mxu0 %v10989_v51  ;;  %v11081_v45 = vcombine.low %v1518_v32, %v1526_v33  ;;  %v11085_v51 = vcombine.low %v1520_v34, %v1528_v35 }
 0x1cf   :  { %7138 = vmatprep.subr.bf16.mxu1 %v11002_v20  ;;  %7466 = vmatprep.subr.bf16.mxu0 %v11006_v53  ;;  %v11098_v20 = vcombine.high %v1534_v39, %v1542_v40  ;;  %v11102_v53 = vcombine.high %v1536_v41, %v1544_v42 }
 0x1d2   :  { %7139 = vmatpush1.bf16.msra.mxu1 %v11001_v59  ;;  %7467 = vmatpush1.bf16.msra.mxu0 %v11005_v61  ;;  %v12593_v59 = vsub.s32 7, %v12522_v47  ;;  %v204_v61 = vrot.slane %v12527_v49, %v12590_v43 }
 0x1d3   :  { %7140 = vmatprep.subr.bf16.mxu1 %v11018_v14  ;;  %7468 = vmatprep.subr.bf16.mxu0 %v11022_v62  ;;  %v11097_v14 = vcombine.low %v1534_v39, %v1542_v40  ;;  %v11101_v62 = vcombine.low %v1536_v41, %v1544_v42  ;;  %v1624_v39 = vld [vmem:[#allocation6 + $0x1950] sm:$0xff] }
 0x1d6   :  { %7141 = vmatpush1.bf16.msra.mxu1 %v11017_v6  ;;  %7469 = vmatpush1.bf16.msra.mxu0 %v11021_v8  ;;  %v1568_v6 = vld [vmem:[#allocation6 + $0x1790] sm:$0xff] }
 0x1d7   :  { %7142 = vmatprep.subr.bf16.mxu1 %v11034_v9  ;;  %7470 = vmatprep.subr.bf16.mxu0 %v11038_v10  ;;  %v1576_v8 = vld [vmem:[#allocation6 + $0x17d0] sm:$0xff]  ;;  %v216_v9 = vrot.slane %v12527_v49, %v12593_v59  ;;  %v751_v10 = vadd.f32 %v12561_v19, %v204_v61  ;;  %v11129_v49 = vcombine.low %v1566_v4, %v1574_v5 }
 0x1d8   :  { %v11134_v15 = vcombine.high %v1568_v6, %v1576_v8  ;;  %v11133_v29 = vcombine.low %v1568_v6, %v1576_v8  ;;  %v1656_v4 = vld [vmem:[#allocation6 + $0x1a50] sm:$0xff]  ;;  %v11197_v6 = vcombine.low %v1632_v54, %v1640_v55 }
 0x1d9   :  { %v794_v25 = vadd.f32 %v12567_v52, %v216_v9  ;;  %v802_v28 = vmax.f32 %v751_v10, 0.0  ;;  %v1662_v10 = vld [vmem:[#allocation6 + $0x1a80] sm:$0xff] }
 0x1da   :  { %7143 = vmatpush1.bf16.msra.mxu1 %v11033_v16  ;;  %7471 = vmatpush1.bf16.msra.mxu0 %v11037_v17  ;;  %v1582_v16 = vld [vmem:[#allocation6 + $0x1800] sm:$0xff] }
 0x1db   :  { %7144 = vmatprep.subr.bf16.mxu1 %v11050_v22  ;;  %7472 = vmatprep.subr.bf16.mxu0 %v11054_v23  ;;  %v1590_v17 = vld [vmem:[#allocation6 + $0x1840] sm:$0xff]  ;;  %v1584_v22 = vld [vmem:[#allocation6 + $0x1810] sm:$0xff]  ;;  %v805_v32 = vmax.f32 %v794_v25, 0.0  ;;  %v12601_v33 = vpack.c.bf16 %v802_v28, %v802_v28 }
 0x1dc   :  { %v1592_v23 = vld [vmem:[#allocation6 + $0x1850] sm:$0xff]  ;;  %v11146_v19 = vcombine.high %v1582_v16, %v1590_v17  ;;  %v11145_v34 = vcombine.low %v1582_v16, %v1590_v17  ;;  %v1686_v25 = vld [vmem:[#allocation6 + $0x1b40] sm:$0xff] }
 0x1dd   :  { %v11150_v30 = vcombine.high %v1584_v22, %v1592_v23  ;;  %v11149_v52 = vcombine.low %v1584_v22, %v1592_v23  ;;  %v12603_v40 = vpack.c.bf16 %v805_v32, %v805_v32  ;;  %v1678_v23 = vld [vmem:[#allocation6 + $0x1b00] sm:$0xff]  ;;  %v1680_v28 = vld [vmem:[#allocation6 + $0x1b10] sm:$0xff] }
 0x1de   :  { %7145 = vmatpush1.bf16.msra.mxu1 %v11049_v18  ;;  %7473 = vmatpush1.bf16.msra.mxu0 %v11053_v24  ;;  %v1598_v18 = vld [vmem:[#allocation6 + $0x1880] sm:$0xff]  ;;  %v1704_v32 = vld [vmem:[#allocation6 + $0x1bd0] sm:$0xff] }
 0x1df   :  { %7146 = vmatprep.subr.bf16.mxu1 %v11066_v26  ;;  %7474 = vmatprep.subr.bf16.mxu0 %v11070_v27  ;;  %v1606_v24 = vld [vmem:[#allocation6 + $0x18c0] sm:$0xff]  ;;  %v1600_v26 = vld [vmem:[#allocation6 + $0x1890] sm:$0xff] }
 0x1e0   :  { %v1608_v27 = vld [vmem:[#allocation6 + $0x18d0] sm:$0xff]  ;;  %v11162_v35 = vcombine.high %v1598_v18, %v1606_v24  ;;  %v11161_v41 = vcombine.low %v1598_v18, %v1606_v24  ;;  %v1694_v24 = vld [vmem:[#allocation6 + $0x1b80] sm:$0xff] }
 0x1e1   :  { %v11165_v42 = vcombine.low %v1600_v26, %v1608_v27 }
 0x1e2   :  { %7147 = vmatpush1.bf16.msra.mxu1 %v11065_v36  ;;  %7475 = vmatpush1.bf16.msra.mxu0 %v11069_v37  ;;  %v11166_v36 = vcombine.high %v1600_v26, %v1608_v27  ;;  %v1614_v37 = vld [vmem:[#allocation6 + $0x1900] sm:$0xff]  ;;  %v1696_v27 = vld [vmem:[#allocation6 + $0x1b90] sm:$0xff] }
 0x1e3   :  { %7148 = vmatprep.subr.bf16.mxu1 %v11082_v38  ;;  %7476 = vmatprep.subr.bf16.mxu0 %v11086_v7  ;;  %v1622_v38 = vld [vmem:[#allocation6 + $0x1940] sm:$0xff]  ;;  %v1616_v7 = vld [vmem:[#allocation6 + $0x1910] sm:$0xff] }
 0x1e4   :  { %v11177_v57 = vcombine.low %v1614_v37, %v1622_v38  ;;  %v11181_v58 = vcombine.low %v1616_v7, %v1624_v39  ;;  %v1702_v26 = vld [vmem:[#allocation6 + $0x1bc0] sm:$0xff] }
 0x1e6   :  { %7149 = vmatpush1.bf16.msra.mxu1 %v11081_v45  ;;  %7477 = vmatpush1.bf16.msra.mxu0 %v11085_v51  ;;  %v11178_v45 = vcombine.high %v1614_v37, %v1622_v38  ;;  %v11182_v51 = vcombine.high %v1616_v7, %v1624_v39  ;;  %v1710_v37 = vld [vmem:[#allocation6 + $0x1c00] sm:$0xff]  ;;  %v1712_v7 = vld [vmem:[#allocation6 + $0x1c10] sm:$0xff] }
 0x1e7   :  { %7150 = vmatprep.subr.bf16.mxu1 %v11098_v20  ;;  %7478 = vmatprep.subr.bf16.mxu0 %v11102_v53  ;;  %v1630_v20 = vld [vmem:[#allocation6 + $0x1980] sm:$0xff]  ;;  %v1720_v39 = vld [vmem:[#allocation6 + $0x1c50] sm:$0xff] }
 0x1e8   :  { %v1638_v53 = vld [vmem:[#allocation6 + $0x19c0] sm:$0xff] }
 0x1e9   :  { %v11194_v61 = vcombine.high %v1630_v20, %v1638_v53  ;;  %v11193_v5 = vcombine.low %v1630_v20, %v1638_v53  ;;  %v1718_v38 = vld [vmem:[#allocation6 + $0x1c40] sm:$0xff] }
 0x1ea   :  { %7151 = vmatpush1.bf16.msra.mxu1 %v11097_v14  ;;  %7479 = vmatpush1.bf16.msra.mxu0 %v11101_v62  ;;  %v11198_v14 = vcombine.high %v1632_v54, %v1640_v55  ;;  %v1646_v62 = vld [vmem:[#allocation6 + $0x1a00] sm:$0xff]  ;;  %v1728_v54 = vld [vmem:[#allocation6 + $0x1c90] sm:$0xff] }
 0x1eb   :  { %7152 = vmatprep.subr.bf16.mxu1 %v11114_v0  ;;  %7480 = vmatprep.subr.bf16.mxu0 %v11118_v1  ;;  %v1654_v0 = vld [vmem:[#allocation6 + $0x1a40] sm:$0xff]  ;;  %v1648_v1 = vld [vmem:[#allocation6 + $0x1a10] sm:$0xff] }
 0x1ec   :  { %v11210_v8 = vcombine.high %v1646_v62, %v1654_v0  ;;  %v11214_v9 = vcombine.high %v1648_v1, %v1656_v4  ;;  %v11213_v16 = vcombine.low %v1648_v1, %v1656_v4  ;;  %v1726_v20 = vld [vmem:[#allocation6 + $0x1c80] sm:$0xff]  ;;  %v1736_v55 = vld [vmem:[#allocation6 + $0x1cd0] sm:$0xff] }
 0x1ed   :  { %v1734_v53 = vld [vmem:[#allocation6 + $0x1cc0] sm:$0xff]  ;;  %v1744_v1 = vld [vmem:[#allocation6 + $0x1d10] sm:$0xff] }
 0x1ee   :  { %7153 = vmatpush1.bf16.msra.mxu1 %v11113_v11  ;;  %7481 = vmatpush1.bf16.msra.mxu0 %v11117_v12  ;;  %v1670_v11 = vld [vmem:[#allocation6 + $0x1ac0] sm:$0xff]  ;;  %v1664_v12 = vld [vmem:[#allocation6 + $0x1a90] sm:$0xff] }
 0x1ef   :  { %7154 = vmatprep.subr.bf16.mxu1 %v11130_v13  ;;  %7482 = vmatprep.subr.bf16.mxu0 %v11134_v15  ;;  %v1672_v13 = vld [vmem:[#allocation6 + $0x1ad0] sm:$0xff]  ;;  %v11209_v15 = vcombine.low %v1646_v62, %v1654_v0  ;;  %v11226_v17 = vcombine.high %v1662_v10, %v1670_v11  ;;  %v1742_v62 = vld [vmem:[#allocation6 + $0x1d00] sm:$0xff] }
 0x1f0   :  { %v11230_v22 = vcombine.high %v1664_v12, %v1672_v13  ;;  %v1750_v0 = vld [vmem:[#allocation6 + $0x1d40] sm:$0xff]  ;;  %v1752_v4 = vld [vmem:[#allocation6 + $0x1d50] sm:$0xff] }
 0x1f2   :  { %7155 = vmatpush1.bf16.msra.mxu1 %v11129_v49  ;;  %7483 = vmatpush1.bf16.msra.mxu0 %v11133_v29  ;;  %v1688_v49 = vld [vmem:[#allocation6 + $0x1b50] sm:$0xff]  ;;  %v11225_v29 = vcombine.low %v1662_v10, %v1670_v11  ;;  %v1758_v10 = vld [vmem:[#allocation6 + $0x1d80] sm:$0xff] }
 0x1f3   :  { %7165 = vmatprep.subr.bf16.mxu1 %v11146_v19  ;;  %7493 = vmatprep.subr.bf16.mxu0 %v11150_v30  ;;  %v11229_v19 = vcombine.low %v1664_v12, %v1672_v13  ;;  %v11242_v30 = vcombine.high %v1678_v23, %v1686_v25  ;;  %v11246_v18 = vcombine.high %v1680_v28, %v1688_v49  ;;  %v1766_v11 = vld [vmem:[#allocation6 + $0x1dc0] sm:$0xff]  ;;  %v1760_v12 = vld [vmem:[#allocation6 + $0x1d90] sm:$0xff] }
 0x1f4   :  { %v1768_v13 = vld [vmem:[#allocation6 + $0x1dd0] sm:$0xff] }
 0x1f5   :  { %7157 = vmatmul.mubr.bf16.vlgmr.msra.gmra.mrb[8].mxu1 %v12601_v33  ;;  %7485 = vmatmul.mubr.bf16.vlgmr.msra.gmra.mrb[8].mxu0 %v12601_v33 }
 0x1f6   :  { %7166 = vmatpush1.bf16.msra.mxu1 %v11145_v34  ;;  %7494 = vmatpush1.bf16.msra.mxu0 %v11149_v52  ;;  %v11241_v34 = vcombine.low %v1678_v23, %v1686_v25  ;;  %v11245_v52 = vcombine.low %v1680_v28, %v1688_v49  ;;  %v1774_v23 = vld [vmem:[#allocation6 + $0x1e00] sm:$0xff]  ;;  %v1776_v28 = vld [vmem:[#allocation6 + $0x1e10] sm:$0xff] }
 0x1f7   :  { %7167 = vmatprep.subr.bf16.mxu1 %v11162_v35  ;;  %7495 = vmatprep.subr.bf16.mxu0 %v11166_v36  ;;  %v11258_v35 = vcombine.high %v1694_v24, %v1702_v26  ;;  %v11262_v36 = vcombine.high %v1696_v27, %v1704_v32  ;;  %v1782_v25 = vld [vmem:[#allocation6 + $0x1e40] sm:$0xff]  ;;  %v1784_v49 = vld [vmem:[#allocation6 + $0x1e50] sm:$0xff] }
 0x1f8   :  { %7197 = vmatprep.mubr.bf16.mxu1 %v12603_v40  ;;  %7525 = vmatprep.mubr.bf16.mxu0 %v12603_v40 }
 0x1fa   :  { %7168 = vmatpush1.bf16.msra.mxu1 %v11161_v41  ;;  %7496 = vmatpush1.bf16.msra.mxu0 %v11165_v42  ;;  %v11257_v41 = vcombine.low %v1694_v24, %v1702_v26  ;;  %v11261_v42 = vcombine.low %v1696_v27, %v1704_v32  ;;  %v1790_v24 = vld [vmem:[#allocation6 + $0x1e80] sm:$0xff]  ;;  %v1792_v27 = vld [vmem:[#allocation6 + $0x1e90] sm:$0xff] }
 0x1fb   :  { %7169 = vmatprep.subr.bf16.mxu1 %v11178_v45  ;;  %7497 = vmatprep.subr.bf16.mxu0 %v11182_v51  ;;  %v11274_v45 = vcombine.high %v1710_v37, %v1718_v38  ;;  %v11278_v51 = vcombine.high %v1712_v7, %v1720_v39  ;;  %v1798_v26 = vld [vmem:[#allocation6 + $0x1ec0] sm:$0xff]  ;;  %v1800_v32 = vld [vmem:[#allocation6 + $0x1ed0] sm:$0xff] }
 0x1fe   :  { %7170 = vmatpush1.bf16.msra.mxu1 %v11177_v57  ;;  %7498 = vmatpush1.bf16.msra.mxu0 %v11181_v58  ;;  %v11273_v57 = vcombine.low %v1710_v37, %v1718_v38  ;;  %v11277_v58 = vcombine.low %v1712_v7, %v1720_v39  ;;  %v11358_v37 = vcombine.high %v1792_v27, %v1800_v32  ;;  %v1806_v38 = vld [vmem:[#allocation6 + $0x1f00] sm:$0xff]  ;;  %v1808_v39 = vld [vmem:[#allocation6 + $0x1f10] sm:$0xff] }
 0x1ff   :  { %7171 = vmatprep.subr.bf16.mxu1 %v11194_v61  ;;  %7499 = vmatprep.subr.bf16.mxu0 %v11198_v14  ;;  %v11290_v61 = vcombine.high %v1726_v20, %v1734_v53  ;;  %v11294_v14 = vcombine.high %v1728_v54, %v1736_v55  ;;  %v1814_v7 = vld [vmem:[#allocation6 + $0x1f40] sm:$0xff] }
 0x202   :  { %7172 = vmatpush1.bf16.msra.mxu1 %v11193_v5  ;;  %7500 = vmatpush1.bf16.msra.mxu0 %v11197_v6  ;;  %v11289_v5 = vcombine.low %v1726_v20, %v1734_v53  ;;  %v11293_v6 = vcombine.low %v1728_v54, %v1736_v55  ;;  %v11370_v53 = vcombine.high %v1806_v38, %v1814_v7  ;;  %v1822_v54 = vld [vmem:[#allocation6 + $0x1f80] sm:$0xff] }
 0x203   :  { %7173 = vmatprep.subr.bf16.mxu1 %v11210_v8  ;;  %7501 = vmatprep.subr.bf16.mxu0 %v11214_v9  ;;  %v11306_v8 = vcombine.high %v1742_v62, %v1750_v0  ;;  %v11310_v9 = vcombine.high %v1744_v1, %v1752_v4  ;;  %v1830_v55 = vld [vmem:[#allocation6 + $0x1fc0] sm:$0xff] }
 0x206   :  { %7174 = vmatpush1.bf16.msra.mxu1 %v11209_v15  ;;  %7502 = vmatpush1.bf16.msra.mxu0 %v11213_v16  ;;  %v11305_v15 = vcombine.low %v1742_v62, %v1750_v0  ;;  %v11309_v16 = vcombine.low %v1744_v1, %v1752_v4  ;;  %v11386_v0 = vcombine.high %v1822_v54, %v1830_v55  ;;  %v815_v4 = vld [vmem:[#allocation6 + $0x8] sm:$0xff] }
 0x207   :  { %7175 = vmatprep.subr.bf16.mxu1 %v11226_v17  ;;  %7503 = vmatprep.subr.bf16.mxu0 %v11230_v22  ;;  %v11322_v17 = vcombine.high %v1758_v10, %v1766_v11  ;;  %v11326_v22 = vcombine.high %v1760_v12, %v1768_v13 }
 0x20a   :  { %7176 = vmatpush1.bf16.msra.mxu1 %v11225_v29  ;;  %7504 = vmatpush1.bf16.msra.mxu0 %v11229_v19  ;;  %v11321_v29 = vcombine.low %v1758_v10, %v1766_v11  ;;  %v11325_v19 = vcombine.low %v1760_v12, %v1768_v13 }
 0x20b   :  { %7177 = vmatprep.subr.bf16.mxu1 %v11242_v30  ;;  %7505 = vmatprep.subr.bf16.mxu0 %v11246_v18  ;;  %v11338_v30 = vcombine.high %v1774_v23, %v1782_v25  ;;  %v11342_v18 = vcombine.high %v1776_v28, %v1784_v49 }
 0x20e   :  { %7178 = vmatpush1.bf16.msra.mxu1 %v11241_v34  ;;  %7506 = vmatpush1.bf16.msra.mxu0 %v11245_v52  ;;  %v11337_v34 = vcombine.low %v1774_v23, %v1782_v25  ;;  %v11341_v52 = vcombine.low %v1776_v28, %v1784_v49 }
 0x20f   :  { %7179 = vmatprep.subr.bf16.mxu1 %v11258_v35  ;;  %7507 = vmatprep.subr.bf16.mxu0 %v11262_v36  ;;  %v12610_v35 = vsub.s32 6, %v12522_v47  ;;  %v11354_v36 = vcombine.high %v1790_v24, %v1798_v26 }
 0x212   :  { %7180 = vmatpush1.bf16.msra.mxu1 %v11257_v41  ;;  %7508 = vmatpush1.bf16.msra.mxu0 %v11261_v42  ;;  %v1816_v41 = vld [vmem:[#allocation6 + $0x1f50] sm:$0xff]  ;;  %v11353_v42 = vcombine.low %v1790_v24, %v1798_v26 }
 0x213   :  { %7181 = vmatprep.subr.bf16.mxu1 %v11274_v45  ;;  %7509 = vmatprep.subr.bf16.mxu0 %v11278_v51  ;;  %v11357_v45 = vcombine.low %v1792_v27, %v1800_v32  ;;  %v12209_v51 = vld [vmem:[#allocation4] sm:$0xff]  ;;  %v11374_v47 = vcombine.high %v1808_v39, %v1816_v41 }
 0x214   :  { %v212_v20 = vrot.slane %v12209_v51, %v12610_v35  ;;  %v882_v51 = vld [vmem:[#allocation6 + $0x220] sm:$0xff] }
 0x216   :  { %7182 = vmatpush1.bf16.msra.mxu1 %v11273_v57  ;;  %7510 = vmatpush1.bf16.msra.mxu0 %v11277_v58  ;;  %v1824_v57 = vld [vmem:[#allocation6 + $0x1f90] sm:$0xff]  ;;  %v792_v62 = vadd.f32 %v12565_v44, %v212_v20  ;;  %v834_v44 = vld [vmem:[#allocation6 + $0xa0] sm:$0xff] }
 0x217   :  { %7183 = vmatprep.subr.bf16.mxu1 %v11290_v61  ;;  %7511 = vmatprep.subr.bf16.mxu0 %v11294_v14  ;;  %v1832_v58 = vld [vmem:[#allocation6 + $0x1fd0] sm:$0xff]  ;;  %v11369_v61 = vcombine.low %v1806_v38, %v1814_v7  ;;  %v11373_v14 = vcombine.low %v1808_v39, %v1816_v41  ;;  %v890_v20 = vld [vmem:[#allocation6 + $0x260] sm:$0xff] }
 0x218   :  { %v11390_v1 = vcombine.high %v1824_v57, %v1832_v58  ;;  %v11389_v10 = vcombine.low %v1824_v57, %v1832_v58  ;;  %v804_v11 = vmax.f32 %v792_v62, 0.0  ;;  %v895_v57 = vld [vmem:[#allocation6 + $0x288] sm:$0xff] }
 0x219   :  { %v903_v58 = vld [vmem:[#allocation6 + $0x2c8] sm:$0xff] }
 0x21a   :  { %7184 = vmatpush1.bf16.msra.mxu1 %v11289_v5  ;;  %7512 = vmatpush1.bf16.msra.mxu0 %v11293_v6  ;;  %v823_v5 = vld [vmem:[#allocation6 + $0x48] sm:$0xff]  ;;  %v818_v6 = vld [vmem:[#allocation6 + $0x20] sm:$0xff]  ;;  %v12614_v23 = vpack.c.bf16 %v804_v11, %v804_v11 }
 0x21b   :  { %7185 = vmatprep.subr.bf16.mxu1 %v11306_v8  ;;  %7513 = vmatprep.subr.bf16.mxu0 %v11310_v9  ;;  %v826_v8 = vld [vmem:[#allocation6 + $0x60] sm:$0xff]  ;;  %v11385_v9 = vcombine.low %v1822_v54, %v1830_v55  ;;  %v10380_v12 = vcombine.high %v815_v4, %v823_v5  ;;  %v10450_v55 = vcombine.high %v882_v51, %v890_v20 }
 0x21c   :  { %v10386_v13 = vcombine.high %v818_v6, %v826_v8  ;;  %v10385_v25 = vcombine.low %v818_v6, %v826_v8  ;;  %v919_v6 = vld [vmem:[#allocation6 + $0x348] sm:$0xff]  ;;  %v914_v8 = vld [vmem:[#allocation6 + $0x320] sm:$0xff] }
 0x21e   :  { %7186 = vmatpush1.bf16.msra.mxu1 %v11305_v15  ;;  %7514 = vmatpush1.bf16.msra.mxu0 %v11309_v16  ;;  %v831_v15 = vld [vmem:[#allocation6 + $0x88] sm:$0xff] }
 0x21f   :  { %7187 = vmatprep.subr.bf16.mxu1 %v11322_v17  ;;  %7515 = vmatprep.subr.bf16.mxu0 %v11326_v22  ;;  %v839_v16 = vld [vmem:[#allocation6 + $0xc8] sm:$0xff]  ;;  %v842_v17 = vld [vmem:[#allocation6 + $0xe0] sm:$0xff]  ;;  %v10379_v22 = vcombine.low %v815_v4, %v823_v5 }
 0x220   :  { %v10396_v28 = vcombine.high %v831_v15, %v839_v16  ;;  %v10402_v49 = vcombine.high %v834_v44, %v842_v17  ;;  %v10395_v24 = vcombine.low %v831_v15, %v839_v16  ;;  %v10401_v26 = vcombine.low %v834_v44, %v842_v17  ;;  %v911_v5 = vld [vmem:[#allocation6 + $0x308] sm:$0xff]  ;;  %v930_v44 = vld [vmem:[#allocation6 + $0x3a0] sm:$0xff] }
 0x221   :  { %v927_v15 = vld [vmem:[#allocation6 + $0x388] sm:$0xff]  ;;  %v938_v17 = vld [vmem:[#allocation6 + $0x3e0] sm:$0xff] }
 0x222   :  { %7188 = vmatpush1.bf16.msra.mxu1 %v11321_v29  ;;  %7516 = vmatpush1.bf16.msra.mxu0 %v11325_v19  ;;  %v847_v29 = vld [vmem:[#allocation6 + $0x108] sm:$0xff] }
 0x223   :  { %7189 = vmatprep.subr.bf16.mxu1 %v11338_v30  ;;  %7517 = vmatprep.subr.bf16.mxu0 %v11342_v18  ;;  %v855_v19 = vld [vmem:[#allocation6 + $0x148] sm:$0xff]  ;;  %v850_v30 = vld [vmem:[#allocation6 + $0x120] sm:$0xff] }
 0x224   :  { %v858_v18 = vld [vmem:[#allocation6 + $0x160] sm:$0xff]  ;;  %v10412_v27 = vcombine.high %v847_v29, %v855_v19  ;;  %v10411_v38 = vcombine.low %v847_v29, %v855_v19  ;;  %v935_v16 = vld [vmem:[#allocation6 + $0x3c8] sm:$0xff] }
 0x225   :  { %v10418_v32 = vcombine.high %v850_v30, %v858_v18  ;;  %v10417_v7 = vcombine.low %v850_v30, %v858_v18  ;;  %v943_v29 = vld [vmem:[#allocation6 + $0x408] sm:$0xff]  ;;  %v946_v30 = vld [vmem:[#allocation6 + $0x420] sm:$0xff] }
 0x226   :  { %7190 = vmatpush1.bf16.msra.mxu1 %v11337_v34  ;;  %7518 = vmatpush1.bf16.msra.mxu0 %v11341_v52  ;;  %v863_v34 = vld [vmem:[#allocation6 + $0x188] sm:$0xff]  ;;  %v954_v18 = vld [vmem:[#allocation6 + $0x460] sm:$0xff] }
 0x227   :  { %7191 = vmatprep.subr.bf16.mxu1 %v11354_v36  ;;  %7519 = vmatprep.subr.bf16.mxu0 %v11358_v37  ;;  %v871_v52 = vld [vmem:[#allocation6 + $0x1c8] sm:$0xff]  ;;  %v866_v36 = vld [vmem:[#allocation6 + $0x1a0] sm:$0xff] }
 0x228   :  { %v874_v37 = vld [vmem:[#allocation6 + $0x1e0] sm:$0xff]  ;;  %v10428_v39 = vcombine.high %v863_v34, %v871_v52  ;;  %v951_v19 = vld [vmem:[#allocation6 + $0x448] sm:$0xff] }
 0x229   :  { %v10434_v41 = vcombine.high %v866_v36, %v874_v37 }
 0x22a   :  { %7192 = vmatpush1.bf16.msra.mxu1 %v11353_v42  ;;  %7520 = vmatpush1.bf16.msra.mxu0 %v11357_v45  ;;  %v879_v42 = vld [vmem:[#allocation6 + $0x208] sm:$0xff] }
 0x22b   :  { %7193 = vmatprep.subr.bf16.mxu1 %v11370_v53  ;;  %7521 = vmatprep.subr.bf16.mxu0 %v11374_v47  ;;  %v887_v45 = vld [vmem:[#allocation6 + $0x248] sm:$0xff]  ;;  %v10427_v53 = vcombine.low %v863_v34, %v871_v52  ;;  %v10433_v47 = vcombine.low %v866_v36, %v874_v37  ;;  %v962_v36 = vld [vmem:[#allocation6 + $0x4a0] sm:$0xff] }
 0x22c   :  { %v10444_v54 = vcombine.high %v879_v42, %v887_v45  ;;  %v10443_v62 = vcombine.low %v879_v42, %v887_v45  ;;  %v959_v34 = vld [vmem:[#allocation6 + $0x488] sm:$0xff]  ;;  %v970_v37 = vld [vmem:[#allocation6 + $0x4e0] sm:$0xff] }
 0x22d   :  { %v967_v52 = vld [vmem:[#allocation6 + $0x4c8] sm:$0xff] }
 0x22e   :  { %7194 = vmatpush1.bf16.msra.mxu1 %v11369_v61  ;;  %7522 = vmatpush1.bf16.msra.mxu0 %v11373_v14  ;;  %v898_v61 = vld [vmem:[#allocation6 + $0x2a0] sm:$0xff]  ;;  %v975_v42 = vld [vmem:[#allocation6 + $0x508] sm:$0xff] }
 0x22f   :  { %7195 = vmatprep.subr.bf16.mxu1 %v11386_v0  ;;  %7523 = vmatprep.subr.bf16.mxu0 %v11390_v1  ;;  %v906_v14 = vld [vmem:[#allocation6 + $0x2e0] sm:$0xff]  ;;  %v10449_v0 = vcombine.low %v882_v51, %v890_v20  ;;  %v10460_v1 = vcombine.high %v895_v57, %v903_v58  ;;  %v983_v45 = vld [vmem:[#allocation6 + $0x548] sm:$0xff] }
 0x230   :  { %v10466_v4 = vcombine.high %v898_v61, %v906_v14  ;;  %v10465_v11 = vcombine.low %v898_v61, %v906_v14  ;;  %v978_v51 = vld [vmem:[#allocation6 + $0x520] sm:$0xff] }
 0x231   :  { %v986_v20 = vld [vmem:[#allocation6 + $0x560] sm:$0xff] }
 0x232   :  { %7196 = vmatpush1.bf16.msra.mxu1 %v11385_v9  ;;  %7524 = vmatpush1.bf16.msra.mxu0 %v11389_v10  ;;  %v922_v9 = vld [vmem:[#allocation6 + $0x360] sm:$0xff]  ;;  %v10459_v10 = vcombine.low %v895_v57, %v903_v58  ;;  %v991_v57 = vld [vmem:[#allocation6 + $0x588] sm:$0xff] }
 0x233   :  { %7206 = vmatprep.subr.bf16.mxu1 %v10380_v12  ;;  %7698 = vmatprep.subr.bf16.mxu0 %v10386_v13  ;;  %v10476_v12 = vcombine.high %v911_v5, %v919_v6  ;;  %v10482_v13 = vcombine.high %v914_v8, %v922_v9  ;;  %v999_v58 = vld [vmem:[#allocation6 + $0x5c8] sm:$0xff]  ;;  %v994_v61 = vld [vmem:[#allocation6 + $0x5a0] sm:$0xff] }
 0x234   :  { %v1002_v14 = vld [vmem:[#allocation6 + $0x5e0] sm:$0xff] }
 0x235   :  { %7198 = vmatmul.mubr.bf16.vlgmr.msra.gmra.mrb[8].mxu1 %v12614_v23  ;;  %7526 = vmatmul.mubr.bf16.vlgmr.msra.gmra.mrb[8].mxu0 %v12614_v23 }
 0x236   :  { %7207 = vmatpush1.bf16.msra.mxu1 %v10379_v22  ;;  %7238 = vmatprep.mubr.bf16.mxu1 %v12541_v2  ;;  %v10475_v22 = vcombine.low %v911_v5, %v919_v6  ;;  %v1007_v5 = vld [vmem:[#allocation6 + $0x608] sm:$0xff] }
 0x237   :  { %7699 = vmatpush1.bf16.msra.mxu0 %v10385_v25  ;;  %7730 = vmatprep.mubr.bf16.mxu0 %v12541_v2  ;;  %v10481_v25 = vcombine.low %v914_v8, %v922_v9  ;;  %v1015_v6 = vld [vmem:[#allocation6 + $0x648] sm:$0xff]  ;;  %v1010_v8 = vld [vmem:[#allocation6 + $0x620] sm:$0xff] }
 0x238   :  { %7208 = vmatprep.subr.bf16.mxu1 %v10396_v28  ;;  %7700 = vmatprep.subr.bf16.mxu0 %v10402_v49  ;;  %v10492_v28 = vcombine.high %v927_v15, %v935_v16  ;;  %v10498_v49 = vcombine.high %v930_v44, %v938_v17  ;;  %v1018_v9 = vld [vmem:[#allocation6 + $0x660] sm:$0xff] }
 0x23a   :  { %7209 = vmatpush1.bf16.msra.mxu1 %v10395_v24  ;;  %v10491_v24 = vcombine.low %v927_v15, %v935_v16  ;;  %v1023_v15 = vld [vmem:[#allocation6 + $0x688] sm:$0xff] }
 0x23b   :  { %7701 = vmatpush1.bf16.msra.mxu0 %v10401_v26  ;;  %7210 = vmatprep.subr.bf16.mxu1 %v10412_v27  ;;  %v10497_v26 = vcombine.low %v930_v44, %v938_v17  ;;  %v10508_v27 = vcombine.high %v943_v29, %v951_v19  ;;  %v1031_v16 = vld [vmem:[#allocation6 + $0x6c8] sm:$0xff]  ;;  %v1026_v44 = vld [vmem:[#allocation6 + $0x6a0] sm:$0xff] }
 0x23c   :  { %7702 = vmatprep.subr.bf16.mxu0 %v10418_v32  ;;  %v10514_v32 = vcombine.high %v946_v30, %v954_v18  ;;  %v1034_v17 = vld [vmem:[#allocation6 + $0x6e0] sm:$0xff] }
 0x23e   :  { %7211 = vmatpush1.bf16.msra.mxu1 %v10411_v38  ;;  %v10507_v38 = vcombine.low %v943_v29, %v951_v19  ;;  %v1039_v29 = vld [vmem:[#allocation6 + $0x708] sm:$0xff] }
 0x23f   :  { %7703 = vmatpush1.bf16.msra.mxu0 %v10417_v7  ;;  %7212 = vmatprep.subr.bf16.mxu1 %v10428_v39  ;;  %v10513_v7 = vcombine.low %v946_v30, %v954_v18  ;;  %v10524_v39 = vcombine.high %v959_v34, %v967_v52  ;;  %v1047_v19 = vld [vmem:[#allocation6 + $0x748] sm:$0xff]  ;;  %v1042_v30 = vld [vmem:[#allocation6 + $0x720] sm:$0xff] }
 0x240   :  { %7704 = vmatprep.subr.bf16.mxu0 %v10434_v41  ;;  %v10530_v41 = vcombine.high %v962_v36, %v970_v37  ;;  %v1050_v18 = vld [vmem:[#allocation6 + $0x760] sm:$0xff] }
 0x242   :  { %7213 = vmatpush1.bf16.msra.mxu1 %v10427_v53  ;;  %v10523_v53 = vcombine.low %v959_v34, %v967_v52  ;;  %v1055_v34 = vld [vmem:[#allocation6 + $0x788] sm:$0xff] }
 0x243   :  { %7705 = vmatpush1.bf16.msra.mxu0 %v10433_v47  ;;  %7214 = vmatprep.subr.bf16.mxu1 %v10444_v54  ;;  %v10529_v47 = vcombine.low %v962_v36, %v970_v37  ;;  %v10540_v54 = vcombine.high %v975_v42, %v983_v45  ;;  %v1063_v52 = vld [vmem:[#allocation6 + $0x7c8] sm:$0xff]  ;;  %v1058_v36 = vld [vmem:[#allocation6 + $0x7a0] sm:$0xff] }
 0x244   :  { %7706 = vmatprep.subr.bf16.mxu0 %v10450_v55  ;;  %v10546_v55 = vcombine.high %v978_v51, %v986_v20  ;;  %v1066_v37 = vld [vmem:[#allocation6 + $0x7e0] sm:$0xff] }
 0x246   :  { %7215 = vmatpush1.bf16.msra.mxu1 %v10443_v62  ;;  %v10539_v62 = vcombine.low %v975_v42, %v983_v45  ;;  %v1071_v42 = vld [vmem:[#allocation6 + $0x808] sm:$0xff] }
 0x247   :  { %7707 = vmatpush1.bf16.msra.mxu0 %v10449_v0  ;;  %7216 = vmatprep.subr.bf16.mxu1 %v10460_v1  ;;  %v10545_v0 = vcombine.low %v978_v51, %v986_v20  ;;  %v10556_v1 = vcombine.high %v991_v57, %v999_v58  ;;  %v1079_v45 = vld [vmem:[#allocation6 + $0x848] sm:$0xff]  ;;  %v1074_v51 = vld [vmem:[#allocation6 + $0x820] sm:$0xff] }
 0x248   :  { %7708 = vmatprep.subr.bf16.mxu0 %v10466_v4  ;;  %v10562_v4 = vcombine.high %v994_v61, %v1002_v14  ;;  %v1082_v20 = vld [vmem:[#allocation6 + $0x860] sm:$0xff] }
 0x24a   :  { %7217 = vmatpush1.bf16.msra.mxu1 %v10459_v10  ;;  %v10555_v10 = vcombine.low %v991_v57, %v999_v58  ;;  %v1087_v57 = vld [vmem:[#allocation6 + $0x888] sm:$0xff] }
 0x24b   :  { %7709 = vmatpush1.bf16.msra.mxu0 %v10465_v11  ;;  %7218 = vmatprep.subr.bf16.mxu1 %v10476_v12  ;;  %v10561_v11 = vcombine.low %v994_v61, %v1002_v14  ;;  %v10572_v12 = vcombine.high %v1007_v5, %v1015_v6  ;;  %v1095_v58 = vld [vmem:[#allocation6 + $0x8c8] sm:$0xff]  ;;  %v10635_v61 = vcombine.low %v1071_v42, %v1079_v45  ;;  %v1090_v14 = vld [vmem:[#allocation6 + $0x8a0] sm:$0xff] }
 0x24c   :  { %7710 = vmatprep.subr.bf16.mxu0 %v10482_v13  ;;  %v10578_v13 = vcombine.high %v1010_v8, %v1018_v9 }
 0x24e   :  { %7219 = vmatpush1.bf16.msra.mxu1 %v10475_v22  ;;  %v10571_v22 = vcombine.low %v1007_v5, %v1015_v6  ;;  %v1111_v5 = vld [vmem:[#allocation6 + $0x948] sm:$0xff] }
 0x24f   :  { %7711 = vmatpush1.bf16.msra.mxu0 %v10481_v25  ;;  %7220 = vmatprep.subr.bf16.mxu1 %v10492_v28  ;;  %v10577_v25 = vcombine.low %v1010_v8, %v1018_v9  ;;  %v10588_v28 = vcombine.high %v1023_v15, %v1031_v16  ;;  %v1106_v8 = vld [vmem:[#allocation6 + $0x920] sm:$0xff] }
 0x250   :  { %7712 = vmatprep.subr.bf16.mxu0 %v10498_v49  ;;  %v10594_v49 = vcombine.high %v1026_v44, %v1034_v17  ;;  %v1114_v9 = vld [vmem:[#allocation6 + $0x960] sm:$0xff] }
 0x252   :  { %7221 = vmatpush1.bf16.msra.mxu1 %v10491_v24  ;;  %v10587_v24 = vcombine.low %v1023_v15, %v1031_v16  ;;  %v1119_v15 = vld [vmem:[#allocation6 + $0x988] sm:$0xff] }
 0x253   :  { %7713 = vmatpush1.bf16.msra.mxu0 %v10497_v26  ;;  %7222 = vmatprep.subr.bf16.mxu1 %v10508_v27  ;;  %v10593_v26 = vcombine.low %v1026_v44, %v1034_v17  ;;  %v10604_v27 = vcombine.high %v1039_v29, %v1047_v19  ;;  %v1127_v16 = vld [vmem:[#allocation6 + $0x9c8] sm:$0xff]  ;;  %v1122_v44 = vld [vmem:[#allocation6 + $0x9a0] sm:$0xff] }
 0x254   :  { %7714 = vmatprep.subr.bf16.mxu0 %v10514_v32  ;;  %v10610_v32 = vcombine.high %v1042_v30, %v1050_v18  ;;  %v1130_v17 = vld [vmem:[#allocation6 + $0x9e0] sm:$0xff] }
 0x256   :  { %7223 = vmatpush1.bf16.msra.mxu1 %v10507_v38  ;;  %v10603_v38 = vcombine.low %v1039_v29, %v1047_v19  ;;  %v1135_v29 = vld [vmem:[#allocation6 + $0xa08] sm:$0xff] }
 0x257   :  { %7715 = vmatpush1.bf16.msra.mxu0 %v10513_v7  ;;  %7224 = vmatprep.subr.bf16.mxu1 %v10524_v39  ;;  %v10609_v7 = vcombine.low %v1042_v30, %v1050_v18  ;;  %v10620_v39 = vcombine.high %v1055_v34, %v1063_v52  ;;  %v1143_v19 = vld [vmem:[#allocation6 + $0xa48] sm:$0xff]  ;;  %v1138_v30 = vld [vmem:[#allocation6 + $0xa20] sm:$0xff] }
 0x258   :  { %7716 = vmatprep.subr.bf16.mxu0 %v10530_v41  ;;  %v10626_v41 = vcombine.high %v1058_v36, %v1066_v37  ;;  %v1146_v18 = vld [vmem:[#allocation6 + $0xa60] sm:$0xff] }
 0x25a   :  { %7225 = vmatpush1.bf16.msra.mxu1 %v10523_v53  ;;  %v10619_v53 = vcombine.low %v1055_v34, %v1063_v52  ;;  %v1151_v34 = vld [vmem:[#allocation6 + $0xa88] sm:$0xff] }
 0x25b   :  { %7717 = vmatpush1.bf16.msra.mxu0 %v10529_v47  ;;  %7226 = vmatprep.subr.bf16.mxu1 %v10540_v54  ;;  %v10625_v47 = vcombine.low %v1058_v36, %v1066_v37  ;;  %v10636_v54 = vcombine.high %v1071_v42, %v1079_v45  ;;  %v1159_v52 = vld [vmem:[#allocation6 + $0xac8] sm:$0xff]  ;;  %v1154_v36 = vld [vmem:[#allocation6 + $0xaa0] sm:$0xff] }
 0x25c   :  { %7718 = vmatprep.subr.bf16.mxu0 %v10546_v55  ;;  %v10642_v55 = vcombine.high %v1074_v51, %v1082_v20  ;;  %v1162_v37 = vld [vmem:[#allocation6 + $0xae0] sm:$0xff]  ;;  %v1167_v42 = vld [vmem:[#allocation6 + $0xb08] sm:$0xff] }
 0x25d   :  { %v1175_v45 = vld [vmem:[#allocation6 + $0xb48] sm:$0xff] }
 0x25e   :  { %7227 = vmatpush1.bf16.msra.mxu1 %v10539_v62  ;;  %v1098_v62 = vld [vmem:[#allocation6 + $0x8e0] sm:$0xff] }
 0x25f   :  { %7719 = vmatpush1.bf16.msra.mxu0 %v10545_v0  ;;  %7228 = vmatprep.subr.bf16.mxu1 %v10556_v1  ;;  %v10641_v0 = vcombine.low %v1074_v51, %v1082_v20  ;;  %v10652_v1 = vcombine.high %v1087_v57, %v1095_v58  ;;  %v10658_v6 = vcombine.high %v1090_v14, %v1098_v62  ;;  %v1170_v51 = vld [vmem:[#allocation6 + $0xb20] sm:$0xff] }
 0x260   :  { %7720 = vmatprep.subr.bf16.mxu0 %v10562_v4  ;;  %v1103_v4 = vld [vmem:[#allocation6 + $0x908] sm:$0xff]  ;;  %v1178_v20 = vld [vmem:[#allocation6 + $0xb60] sm:$0xff] }
 0x262   :  { %7229 = vmatpush1.bf16.msra.mxu1 %v10555_v10  ;;  %v10651_v10 = vcombine.low %v1087_v57, %v1095_v58  ;;  %v1183_v57 = vld [vmem:[#allocation6 + $0xb88] sm:$0xff] }
 0x263   :  { %7721 = vmatpush1.bf16.msra.mxu0 %v10561_v11  ;;  %7230 = vmatprep.subr.bf16.mxu1 %v10572_v12  ;;  %v10657_v11 = vcombine.low %v1090_v14, %v1098_v62  ;;  %v10668_v12 = vcombine.high %v1103_v4, %v1111_v5  ;;  %v1191_v58 = vld [vmem:[#allocation6 + $0xbc8] sm:$0xff]  ;;  %v1194_v14 = vld [vmem:[#allocation6 + $0xbe0] sm:$0xff]  ;;  %v10731_v62 = vcombine.low %v1167_v42, %v1175_v45 }
 0x264   :  { %7722 = vmatprep.subr.bf16.mxu0 %v10578_v13  ;;  %v10674_v13 = vcombine.high %v1106_v8, %v1114_v9 }
 0x266   :  { %7231 = vmatpush1.bf16.msra.mxu1 %v10571_v22  ;;  %v10667_v22 = vcombine.low %v1103_v4, %v1111_v5  ;;  %v1199_v5 = vld [vmem:[#allocation6 + $0xc08] sm:$0xff] }
 0x267   :  { %7723 = vmatpush1.bf16.msra.mxu0 %v10577_v25  ;;  %7232 = vmatprep.subr.bf16.mxu1 %v10588_v28  ;;  %v10673_v25 = vcombine.low %v1106_v8, %v1114_v9  ;;  %v10684_v28 = vcombine.high %v1119_v15, %v1127_v16  ;;  %v1202_v8 = vld [vmem:[#allocation6 + $0xc20] sm:$0xff] }
 0x268   :  { %7724 = vmatprep.subr.bf16.mxu0 %v10594_v49  ;;  %v10690_v49 = vcombine.high %v1122_v44, %v1130_v17  ;;  %v1210_v9 = vld [vmem:[#allocation6 + $0xc60] sm:$0xff] }
 0x26a   :  { %7233 = vmatpush1.bf16.msra.mxu1 %v10587_v24  ;;  %v10683_v24 = vcombine.low %v1119_v15, %v1127_v16  ;;  %v1215_v15 = vld [vmem:[#allocation6 + $0xc88] sm:$0xff] }
 0x26b   :  { %7725 = vmatpush1.bf16.msra.mxu0 %v10593_v26  ;;  %7234 = vmatprep.subr.bf16.mxu1 %v10604_v27  ;;  %v10689_v26 = vcombine.low %v1122_v44, %v1130_v17  ;;  %v10700_v27 = vcombine.high %v1135_v29, %v1143_v19  ;;  %v1223_v16 = vld [vmem:[#allocation6 + $0xcc8] sm:$0xff]  ;;  %v1218_v44 = vld [vmem:[#allocation6 + $0xca0] sm:$0xff] }
 0x26c   :  { %7726 = vmatprep.subr.bf16.mxu0 %v10610_v32  ;;  %v10706_v32 = vcombine.high %v1138_v30, %v1146_v18  ;;  %v1226_v17 = vld [vmem:[#allocation6 + $0xce0] sm:$0xff] }
 0x26e   :  { %7235 = vmatpush1.bf16.msra.mxu1 %v10603_v38  ;;  %v10699_v38 = vcombine.low %v1135_v29, %v1143_v19  ;;  %v1231_v29 = vld [vmem:[#allocation6 + $0xd08] sm:$0xff] }
 0x26f   :  { %7727 = vmatpush1.bf16.msra.mxu0 %v10609_v7  ;;  %7236 = vmatprep.subr.bf16.mxu1 %v10620_v39  ;;  %v10705_v7 = vcombine.low %v1138_v30, %v1146_v18  ;;  %v10716_v39 = vcombine.high %v1151_v34, %v1159_v52  ;;  %v1239_v19 = vld [vmem:[#allocation6 + $0xd48] sm:$0xff]  ;;  %v1234_v30 = vld [vmem:[#allocation6 + $0xd20] sm:$0xff] }
 0x270   :  { %7728 = vmatprep.subr.bf16.mxu0 %v10626_v41  ;;  %v10722_v41 = vcombine.high %v1154_v36, %v1162_v37  ;;  %v1242_v18 = vld [vmem:[#allocation6 + $0xd60] sm:$0xff] }
 0x272   :  { %7237 = vmatpush1.bf16.msra.mxu1 %v10619_v53  ;;  %v10715_v53 = vcombine.low %v1151_v34, %v1159_v52  ;;  %v1247_v34 = vld [vmem:[#allocation6 + $0xd88] sm:$0xff] }
 0x273   :  { %7729 = vmatpush1.bf16.msra.mxu0 %v10625_v47  ;;  %7247 = vmatprep.subr.bf16.mxu1 %v10636_v54  ;;  %v10721_v47 = vcombine.low %v1154_v36, %v1162_v37  ;;  %v10732_v54 = vcombine.high %v1167_v42, %v1175_v45  ;;  %v1255_v52 = vld [vmem:[#allocation6 + $0xdc8] sm:$0xff]  ;;  %v1250_v36 = vld [vmem:[#allocation6 + $0xda0] sm:$0xff] }
 0x274   :  { %7739 = vmatprep.subr.bf16.mxu0 %v10642_v55  ;;  %v10738_v55 = vcombine.high %v1170_v51, %v1178_v20  ;;  %v1258_v37 = vld [vmem:[#allocation6 + $0xde0] sm:$0xff]  ;;  %v1263_v42 = vld [vmem:[#allocation6 + $0xe08] sm:$0xff] }
 0x275   :  { %7239 = vmatmul.mubr.bf16.vlgmr.msra.gmra.mrb[12].mxu1 %v12543_v3  ;;  %v1271_v45 = vld [vmem:[#allocation6 + $0xe48] sm:$0xff] }
 0x276   :  { %7731 = vmatmul.mubr.bf16.vlgmr.msra.gmra.mrb[12].mxu0 %v12543_v3  ;;  %7248 = vmatpush1.bf16.msra.mxu1 %v10635_v61  ;;  %v1186_v61 = vld [vmem:[#allocation6 + $0xba0] sm:$0xff] }
 0x277   :  { %7279 = vmatprep.mubr.bf16.mxu1 %v12557_v31  ;;  %7740 = vmatpush1.bf16.msra.mxu0 %v10641_v0  ;;  %v10737_v0 = vcombine.low %v1170_v51, %v1178_v20  ;;  %v10754_v4 = vcombine.high %v1186_v61, %v1194_v14  ;;  %v1266_v51 = vld [vmem:[#allocation6 + $0xe20] sm:$0xff] }
 0x278   :  { %7771 = vmatprep.mubr.bf16.mxu0 %v12557_v31  ;;  %7249 = vmatprep.subr.bf16.mxu1 %v10652_v1  ;;  %v10748_v1 = vcombine.high %v1183_v57, %v1191_v58  ;;  %v1274_v20 = vld [vmem:[#allocation6 + $0xe60] sm:$0xff] }
 0x279   :  { %7741 = vmatprep.subr.bf16.mxu0 %v10658_v6  ;;  %v1207_v6 = vld [vmem:[#allocation6 + $0xc48] sm:$0xff] }
 0x27a   :  { %7250 = vmatpush1.bf16.msra.mxu1 %v10651_v10  ;;  %v10747_v10 = vcombine.low %v1183_v57, %v1191_v58  ;;  %v1279_v57 = vld [vmem:[#allocation6 + $0xe88] sm:$0xff] }
 0x27b   :  { %7742 = vmatpush1.bf16.msra.mxu0 %v10657_v11  ;;  %7251 = vmatprep.subr.bf16.mxu1 %v10668_v12  ;;  %v10753_v11 = vcombine.low %v1186_v61, %v1194_v14  ;;  %v10764_v12 = vcombine.high %v1199_v5, %v1207_v6  ;;  %v1287_v58 = vld [vmem:[#allocation6 + $0xec8] sm:$0xff]  ;;  %v1282_v61 = vld [vmem:[#allocation6 + $0xea0] sm:$0xff] }
 0x27c   :  { %7743 = vmatprep.subr.bf16.mxu0 %v10674_v13  ;;  %v10770_v13 = vcombine.high %v1202_v8, %v1210_v9  ;;  %v1290_v14 = vld [vmem:[#allocation6 + $0xee0] sm:$0xff] }
 0x27e   :  { %7252 = vmatpush1.bf16.msra.mxu1 %v10667_v22  ;;  %v10763_v22 = vcombine.low %v1199_v5, %v1207_v6  ;;  %v1295_v5 = vld [vmem:[#allocation6 + $0xf08] sm:$0xff] }
 0x27f   :  { %7744 = vmatpush1.bf16.msra.mxu0 %v10673_v25  ;;  %7253 = vmatprep.subr.bf16.mxu1 %v10684_v28  ;;  %v10769_v25 = vcombine.low %v1202_v8, %v1210_v9  ;;  %v10780_v28 = vcombine.high %v1215_v15, %v1223_v16  ;;  %v1303_v6 = vld [vmem:[#allocation6 + $0xf48] sm:$0xff]  ;;  %v1298_v8 = vld [vmem:[#allocation6 + $0xf20] sm:$0xff] }
 0x280   :  { %7745 = vmatprep.subr.bf16.mxu0 %v10690_v49  ;;  %v10786_v49 = vcombine.high %v1218_v44, %v1226_v17  ;;  %v1306_v9 = vld [vmem:[#allocation6 + $0xf60] sm:$0xff] }
 0x282   :  { %7254 = vmatpush1.bf16.msra.mxu1 %v10683_v24  ;;  %v10779_v24 = vcombine.low %v1215_v15, %v1223_v16  ;;  %v1311_v15 = vld [vmem:[#allocation6 + $0xf88] sm:$0xff] }
 0x283   :  { %7746 = vmatpush1.bf16.msra.mxu0 %v10689_v26  ;;  %7255 = vmatprep.subr.bf16.mxu1 %v10700_v27  ;;  %v10785_v26 = vcombine.low %v1218_v44, %v1226_v17  ;;  %v10796_v27 = vcombine.high %v1231_v29, %v1239_v19  ;;  %v1319_v16 = vld [vmem:[#allocation6 + $0xfc8] sm:$0xff]  ;;  %v1314_v44 = vld [vmem:[#allocation6 + $0xfa0] sm:$0xff] }
 0x284   :  { %7747 = vmatprep.subr.bf16.mxu0 %v10706_v32  ;;  %v10802_v32 = vcombine.high %v1234_v30, %v1242_v18  ;;  %v1322_v17 = vld [vmem:[#allocation6 + $0xfe0] sm:$0xff] }
 0x286   :  { %7256 = vmatpush1.bf16.msra.mxu1 %v10699_v38  ;;  %v10795_v38 = vcombine.low %v1231_v29, %v1239_v19  ;;  %v1327_v29 = vld [vmem:[#allocation6 + $0x1008] sm:$0xff] }
 0x287   :  { %7748 = vmatpush1.bf16.msra.mxu0 %v10705_v7  ;;  %7257 = vmatprep.subr.bf16.mxu1 %v10716_v39  ;;  %v10801_v7 = vcombine.low %v1234_v30, %v1242_v18  ;;  %v10812_v39 = vcombine.high %v1247_v34, %v1255_v52  ;;  %v1335_v19 = vld [vmem:[#allocation6 + $0x1048] sm:$0xff]  ;;  %v1330_v30 = vld [vmem:[#allocation6 + $0x1020] sm:$0xff] }
 0x288   :  { %7749 = vmatprep.subr.bf16.mxu0 %v10722_v41  ;;  %v10818_v41 = vcombine.high %v1250_v36, %v1258_v37  ;;  %v1338_v18 = vld [vmem:[#allocation6 + $0x1060] sm:$0xff] }
 0x28a   :  { %7258 = vmatpush1.bf16.msra.mxu1 %v10715_v53  ;;  %v10811_v53 = vcombine.low %v1247_v34, %v1255_v52  ;;  %v1343_v34 = vld [vmem:[#allocation6 + $0x1088] sm:$0xff] }
 0x28b   :  { %7750 = vmatpush1.bf16.msra.mxu0 %v10721_v47  ;;  %7259 = vmatprep.subr.bf16.mxu1 %v10732_v54  ;;  %v10817_v47 = vcombine.low %v1250_v36, %v1258_v37  ;;  %v10828_v54 = vcombine.high %v1263_v42, %v1271_v45  ;;  %v1351_v52 = vld [vmem:[#allocation6 + $0x10c8] sm:$0xff]  ;;  %v10891_v36 = vcombine.low %v1327_v29, %v1335_v19  ;;  %v1346_v37 = vld [vmem:[#allocation6 + $0x10a0] sm:$0xff] }
 0x28c   :  { %7751 = vmatprep.subr.bf16.mxu0 %v10738_v55  ;;  %v10834_v55 = vcombine.high %v1266_v51, %v1274_v20 }
 0x28e   :  { %7260 = vmatpush1.bf16.msra.mxu1 %v10731_v62  ;;  %v10827_v62 = vcombine.low %v1263_v42, %v1271_v45  ;;  %v1367_v42 = vld [vmem:[#allocation6 + $0x1148] sm:$0xff] }
 0x28f   :  { %7752 = vmatpush1.bf16.msra.mxu0 %v10737_v0  ;;  %7261 = vmatprep.subr.bf16.mxu1 %v10748_v1  ;;  %v10833_v0 = vcombine.low %v1266_v51, %v1274_v20  ;;  %v10844_v1 = vcombine.high %v1279_v57, %v1287_v58  ;;  %v1362_v51 = vld [vmem:[#allocation6 + $0x1120] sm:$0xff] }
 0x290   :  { %7753 = vmatprep.subr.bf16.mxu0 %v10754_v4  ;;  %v10850_v4 = vcombine.high %v1282_v61, %v1290_v14  ;;  %v1370_v20 = vld [vmem:[#allocation6 + $0x1160] sm:$0xff] }
 0x292   :  { %7262 = vmatpush1.bf16.msra.mxu1 %v10747_v10  ;;  %v10843_v10 = vcombine.low %v1279_v57, %v1287_v58  ;;  %v1375_v57 = vld [vmem:[#allocation6 + $0x1188] sm:$0xff] }
 0x293   :  { %7754 = vmatpush1.bf16.msra.mxu0 %v10753_v11  ;;  %7263 = vmatprep.subr.bf16.mxu1 %v10764_v12  ;;  %v10849_v11 = vcombine.low %v1282_v61, %v1290_v14  ;;  %v10860_v12 = vcombine.high %v1295_v5, %v1303_v6  ;;  %v1383_v58 = vld [vmem:[#allocation6 + $0x11c8] sm:$0xff]  ;;  %v1378_v61 = vld [vmem:[#allocation6 + $0x11a0] sm:$0xff] }
 0x294   :  { %7755 = vmatprep.subr.bf16.mxu0 %v10770_v13  ;;  %v10866_v13 = vcombine.high %v1298_v8, %v1306_v9  ;;  %v1386_v14 = vld [vmem:[#allocation6 + $0x11e0] sm:$0xff] }
 0x296   :  { %7264 = vmatpush1.bf16.msra.mxu1 %v10763_v22  ;;  %v10859_v22 = vcombine.low %v1295_v5, %v1303_v6  ;;  %v1391_v5 = vld [vmem:[#allocation6 + $0x1208] sm:$0xff] }
 0x297   :  { %7756 = vmatpush1.bf16.msra.mxu0 %v10769_v25  ;;  %7265 = vmatprep.subr.bf16.mxu1 %v10780_v28  ;;  %v10865_v25 = vcombine.low %v1298_v8, %v1306_v9  ;;  %v10876_v28 = vcombine.high %v1311_v15, %v1319_v16  ;;  %v1399_v6 = vld [vmem:[#allocation6 + $0x1248] sm:$0xff]  ;;  %v1394_v8 = vld [vmem:[#allocation6 + $0x1220] sm:$0xff] }
 0x298   :  { %7757 = vmatprep.subr.bf16.mxu0 %v10786_v49  ;;  %v10882_v49 = vcombine.high %v1314_v44, %v1322_v17  ;;  %v1402_v9 = vld [vmem:[#allocation6 + $0x1260] sm:$0xff] }
 0x29a   :  { %7266 = vmatpush1.bf16.msra.mxu1 %v10779_v24  ;;  %v10875_v24 = vcombine.low %v1311_v15, %v1319_v16  ;;  %v1407_v15 = vld [vmem:[#allocation6 + $0x1288] sm:$0xff] }
 0x29b   :  { %7758 = vmatpush1.bf16.msra.mxu0 %v10785_v26  ;;  %7267 = vmatprep.subr.bf16.mxu1 %v10796_v27  ;;  %v10881_v26 = vcombine.low %v1314_v44, %v1322_v17  ;;  %v10892_v27 = vcombine.high %v1327_v29, %v1335_v19  ;;  %v1415_v16 = vld [vmem:[#allocation6 + $0x12c8] sm:$0xff]  ;;  %v1410_v44 = vld [vmem:[#allocation6 + $0x12a0] sm:$0xff] }
 0x29c   :  { %7759 = vmatprep.subr.bf16.mxu0 %v10802_v32  ;;  %v10898_v32 = vcombine.high %v1330_v30, %v1338_v18  ;;  %v1418_v17 = vld [vmem:[#allocation6 + $0x12e0] sm:$0xff]  ;;  %v1423_v29 = vld [vmem:[#allocation6 + $0x1308] sm:$0xff] }
 0x29d   :  { %v1431_v19 = vld [vmem:[#allocation6 + $0x1348] sm:$0xff] }
 0x29e   :  { %7268 = vmatpush1.bf16.msra.mxu1 %v10795_v38  ;;  %v1354_v38 = vld [vmem:[#allocation6 + $0x10e0] sm:$0xff] }
 0x29f   :  { %7760 = vmatpush1.bf16.msra.mxu0 %v10801_v7  ;;  %7269 = vmatprep.subr.bf16.mxu1 %v10812_v39  ;;  %v10897_v7 = vcombine.low %v1330_v30, %v1338_v18  ;;  %v10908_v39 = vcombine.high %v1343_v34, %v1351_v52  ;;  %v10914_v45 = vcombine.high %v1346_v37, %v1354_v38  ;;  %v1426_v30 = vld [vmem:[#allocation6 + $0x1320] sm:$0xff] }
 0x2a0   :  { %7761 = vmatprep.subr.bf16.mxu0 %v10818_v41  ;;  %v1359_v41 = vld [vmem:[#allocation6 + $0x1108] sm:$0xff]  ;;  %v1434_v18 = vld [vmem:[#allocation6 + $0x1360] sm:$0xff] }
 0x2a2   :  { %7270 = vmatpush1.bf16.msra.mxu1 %v10811_v53  ;;  %v10907_v53 = vcombine.low %v1343_v34, %v1351_v52  ;;  %v1439_v34 = vld [vmem:[#allocation6 + $0x1388] sm:$0xff] }
 0x2a3   :  { %7762 = vmatpush1.bf16.msra.mxu0 %v10817_v47  ;;  %7271 = vmatprep.subr.bf16.mxu1 %v10828_v54  ;;  %v10913_v47 = vcombine.low %v1346_v37, %v1354_v38  ;;  %v10924_v54 = vcombine.high %v1359_v41, %v1367_v42  ;;  %v1447_v52 = vld [vmem:[#allocation6 + $0x13c8] sm:$0xff]  ;;  %v1450_v37 = vld [vmem:[#allocation6 + $0x13e0] sm:$0xff]  ;;  %v10987_v38 = vcombine.low %v1423_v29, %v1431_v19 }
 0x2a4   :  { %7763 = vmatprep.subr.bf16.mxu0 %v10834_v55  ;;  %v10930_v55 = vcombine.high %v1362_v51, %v1370_v20 }
 0x2a6   :  { %7272 = vmatpush1.bf16.msra.mxu1 %v10827_v62  ;;  %v10923_v62 = vcombine.low %v1359_v41, %v1367_v42  ;;  %v1455_v42 = vld [vmem:[#allocation6 + $0x1408] sm:$0xff] }
 0x2a7   :  { %7764 = vmatpush1.bf16.msra.mxu0 %v10833_v0  ;;  %7273 = vmatprep.subr.bf16.mxu1 %v10844_v1  ;;  %v10929_v0 = vcombine.low %v1362_v51, %v1370_v20  ;;  %v10940_v1 = vcombine.high %v1375_v57, %v1383_v58  ;;  %v1458_v51 = vld [vmem:[#allocation6 + $0x1420] sm:$0xff] }
 0x2a8   :  { %7765 = vmatprep.subr.bf16.mxu0 %v10850_v4  ;;  %v10946_v4 = vcombine.high %v1378_v61, %v1386_v14  ;;  %v1466_v20 = vld [vmem:[#allocation6 + $0x1460] sm:$0xff] }
 0x2aa   :  { %7274 = vmatpush1.bf16.msra.mxu1 %v10843_v10  ;;  %v10939_v10 = vcombine.low %v1375_v57, %v1383_v58  ;;  %v1471_v57 = vld [vmem:[#allocation6 + $0x1488] sm:$0xff] }
 0x2ab   :  { %7766 = vmatpush1.bf16.msra.mxu0 %v10849_v11  ;;  %7275 = vmatprep.subr.bf16.mxu1 %v10860_v12  ;;  %v10945_v11 = vcombine.low %v1378_v61, %v1386_v14  ;;  %v10956_v12 = vcombine.high %v1391_v5, %v1399_v6  ;;  %v1479_v58 = vld [vmem:[#allocation6 + $0x14c8] sm:$0xff]  ;;  %v1474_v61 = vld [vmem:[#allocation6 + $0x14a0] sm:$0xff] }
 0x2ac   :  { %7767 = vmatprep.subr.bf16.mxu0 %v10866_v13  ;;  %v10962_v13 = vcombine.high %v1394_v8, %v1402_v9  ;;  %v1482_v14 = vld [vmem:[#allocation6 + $0x14e0] sm:$0xff] }
 0x2ae   :  { %7276 = vmatpush1.bf16.msra.mxu1 %v10859_v22  ;;  %v10955_v22 = vcombine.low %v1391_v5, %v1399_v6  ;;  %v1487_v5 = vld [vmem:[#allocation6 + $0x1508] sm:$0xff] }
 0x2af   :  { %7768 = vmatpush1.bf16.msra.mxu0 %v10865_v25  ;;  %7277 = vmatprep.subr.bf16.mxu1 %v10876_v28  ;;  %v10961_v25 = vcombine.low %v1394_v8, %v1402_v9  ;;  %v10972_v28 = vcombine.high %v1407_v15, %v1415_v16  ;;  %v1495_v6 = vld [vmem:[#allocation6 + $0x1548] sm:$0xff]  ;;  %v1490_v8 = vld [vmem:[#allocation6 + $0x1520] sm:$0xff] }
 0x2b0   :  { %7769 = vmatprep.subr.bf16.mxu0 %v10882_v49  ;;  %v10978_v49 = vcombine.high %v1410_v44, %v1418_v17  ;;  %v1498_v9 = vld [vmem:[#allocation6 + $0x1560] sm:$0xff] }
 0x2b2   :  { %7278 = vmatpush1.bf16.msra.mxu1 %v10875_v24  ;;  %v10971_v24 = vcombine.low %v1407_v15, %v1415_v16  ;;  %v1503_v15 = vld [vmem:[#allocation6 + $0x1588] sm:$0xff] }
 0x2b3   :  { %7770 = vmatpush1.bf16.msra.mxu0 %v10881_v26  ;;  %7288 = vmatprep.subr.bf16.mxu1 %v10892_v27  ;;  %v10977_v26 = vcombine.low %v1410_v44, %v1418_v17  ;;  %v10988_v27 = vcombine.high %v1423_v29, %v1431_v19  ;;  %v1511_v16 = vld [vmem:[#allocation6 + $0x15c8] sm:$0xff]  ;;  %v1506_v44 = vld [vmem:[#allocation6 + $0x15a0] sm:$0xff] }
 0x2b4   :  { %7780 = vmatprep.subr.bf16.mxu0 %v10898_v32  ;;  %v10994_v32 = vcombine.high %v1426_v30, %v1434_v18  ;;  %v1514_v17 = vld [vmem:[#allocation6 + $0x15e0] sm:$0xff]  ;;  %v1519_v29 = vld [vmem:[#allocation6 + $0x1608] sm:$0xff] }
 0x2b5   :  { %7280 = vmatmul.mubr.bf16.vlgmr.msra.gmra.mrb[12].mxu1 %v12581_v46  ;;  %v1527_v19 = vld [vmem:[#allocation6 + $0x1648] sm:$0xff] }
 0x2b6   :  { %7772 = vmatmul.mubr.bf16.vlgmr.msra.gmra.mrb[12].mxu0 %v12581_v46  ;;  %7289 = vmatpush1.bf16.msra.mxu1 %v10891_v36  ;;  %v1442_v36 = vld [vmem:[#allocation6 + $0x13a0] sm:$0xff] }
 0x2b7   :  { %7320 = vmatprep.mubr.bf16.mxu1 %v12583_v60  ;;  %7781 = vmatpush1.bf16.msra.mxu0 %v10897_v7  ;;  %v10993_v7 = vcombine.low %v1426_v30, %v1434_v18  ;;  %v11010_v41 = vcombine.high %v1442_v36, %v1450_v37  ;;  %v1522_v30 = vld [vmem:[#allocation6 + $0x1620] sm:$0xff] }
 0x2b8   :  { %7812 = vmatprep.mubr.bf16.mxu0 %v12583_v60  ;;  %7290 = vmatprep.subr.bf16.mxu1 %v10908_v39  ;;  %v11004_v39 = vcombine.high %v1439_v34, %v1447_v52  ;;  %v1530_v18 = vld [vmem:[#allocation6 + $0x1660] sm:$0xff] }
 0x2b9   :  { %7782 = vmatprep.subr.bf16.mxu0 %v10914_v45  ;;  %v1463_v45 = vld [vmem:[#allocation6 + $0x1448] sm:$0xff] }
 0x2ba   :  { %7291 = vmatpush1.bf16.msra.mxu1 %v10907_v53  ;;  %v11003_v53 = vcombine.low %v1439_v34, %v1447_v52  ;;  %v1535_v34 = vld [vmem:[#allocation6 + $0x1688] sm:$0xff] }
 0x2bb   :  { %7783 = vmatpush1.bf16.msra.mxu0 %v10913_v47  ;;  %7292 = vmatprep.subr.bf16.mxu1 %v10924_v54  ;;  %v11009_v47 = vcombine.low %v1442_v36, %v1450_v37  ;;  %v11020_v54 = vcombine.high %v1455_v42, %v1463_v45  ;;  %v1543_v52 = vld [vmem:[#allocation6 + $0x16c8] sm:$0xff]  ;;  %v1538_v36 = vld [vmem:[#allocation6 + $0x16a0] sm:$0xff] }
 0x2bc   :  { %7784 = vmatprep.subr.bf16.mxu0 %v10930_v55  ;;  %v11026_v55 = vcombine.high %v1458_v51, %v1466_v20  ;;  %v1546_v37 = vld [vmem:[#allocation6 + $0x16e0] sm:$0xff] }
 0x2be   :  { %7293 = vmatpush1.bf16.msra.mxu1 %v10923_v62  ;;  %v11019_v62 = vcombine.low %v1455_v42, %v1463_v45  ;;  %v1551_v42 = vld [vmem:[#allocation6 + $0x1708] sm:$0xff] }
 0x2bf   :  { %7785 = vmatpush1.bf16.msra.mxu0 %v10929_v0  ;;  %7294 = vmatprep.subr.bf16.mxu1 %v10940_v1  ;;  %v11025_v0 = vcombine.low %v1458_v51, %v1466_v20  ;;  %v11036_v1 = vcombine.high %v1471_v57, %v1479_v58  ;;  %v1559_v45 = vld [vmem:[#allocation6 + $0x1748] sm:$0xff]  ;;  %v1554_v51 = vld [vmem:[#allocation6 + $0x1720] sm:$0xff] }
 0x2c0   :  { %7786 = vmatprep.subr.bf16.mxu0 %v10946_v4  ;;  %v11042_v4 = vcombine.high %v1474_v61, %v1482_v14  ;;  %v1562_v20 = vld [vmem:[#allocation6 + $0x1760] sm:$0xff] }
 0x2c2   :  { %7295 = vmatpush1.bf16.msra.mxu1 %v10939_v10  ;;  %v11035_v10 = vcombine.low %v1471_v57, %v1479_v58  ;;  %v1567_v57 = vld [vmem:[#allocation6 + $0x1788] sm:$0xff] }
 0x2c3   :  { %7787 = vmatpush1.bf16.msra.mxu0 %v10945_v11  ;;  %7296 = vmatprep.subr.bf16.mxu1 %v10956_v12  ;;  %v11041_v11 = vcombine.low %v1474_v61, %v1482_v14  ;;  %v11052_v12 = vcombine.high %v1487_v5, %v1495_v6  ;;  %v1575_v58 = vld [vmem:[#allocation6 + $0x17c8] sm:$0xff]  ;;  %v1570_v61 = vld [vmem:[#allocation6 + $0x17a0] sm:$0xff] }
 0x2c4   :  { %7788 = vmatprep.subr.bf16.mxu0 %v10962_v13  ;;  %v11058_v13 = vcombine.high %v1490_v8, %v1498_v9  ;;  %v1578_v14 = vld [vmem:[#allocation6 + $0x17e0] sm:$0xff] }
 0x2c6   :  { %7297 = vmatpush1.bf16.msra.mxu1 %v10955_v22  ;;  %v11051_v22 = vcombine.low %v1487_v5, %v1495_v6  ;;  %v1583_v5 = vld [vmem:[#allocation6 + $0x1808] sm:$0xff] }
 0x2c7   :  { %7789 = vmatpush1.bf16.msra.mxu0 %v10961_v25  ;;  %7298 = vmatprep.subr.bf16.mxu1 %v10972_v28  ;;  %v11057_v25 = vcombine.low %v1490_v8, %v1498_v9  ;;  %v11068_v28 = vcombine.high %v1503_v15, %v1511_v16  ;;  %v1591_v6 = vld [vmem:[#allocation6 + $0x1848] sm:$0xff]  ;;  %v1586_v8 = vld [vmem:[#allocation6 + $0x1820] sm:$0xff] }
 0x2c8   :  { %7790 = vmatprep.subr.bf16.mxu0 %v10978_v49  ;;  %v11074_v49 = vcombine.high %v1506_v44, %v1514_v17  ;;  %v1594_v9 = vld [vmem:[#allocation6 + $0x1860] sm:$0xff] }
 0x2ca   :  { %7299 = vmatpush1.bf16.msra.mxu1 %v10971_v24  ;;  %v11067_v24 = vcombine.low %v1503_v15, %v1511_v16  ;;  %v1599_v15 = vld [vmem:[#allocation6 + $0x1888] sm:$0xff] }
 0x2cb   :  { %7791 = vmatpush1.bf16.msra.mxu0 %v10977_v26  ;;  %7300 = vmatprep.subr.bf16.mxu1 %v10988_v27  ;;  %v11073_v26 = vcombine.low %v1506_v44, %v1514_v17  ;;  %v11084_v27 = vcombine.high %v1519_v29, %v1527_v19  ;;  %v1607_v16 = vld [vmem:[#allocation6 + $0x18c8] sm:$0xff]  ;;  %v11147_v44 = vcombine.low %v1583_v5, %v1591_v6  ;;  %v1602_v17 = vld [vmem:[#allocation6 + $0x18a0] sm:$0xff] }
 0x2cc   :  { %7792 = vmatprep.subr.bf16.mxu0 %v10994_v32  ;;  %v11090_v32 = vcombine.high %v1522_v30, %v1530_v18 }
 0x2ce   :  { %7301 = vmatpush1.bf16.msra.mxu1 %v10987_v38  ;;  %v11083_v38 = vcombine.low %v1519_v29, %v1527_v19  ;;  %v1623_v29 = vld [vmem:[#allocation6 + $0x1948] sm:$0xff] }
 0x2cf   :  { %7793 = vmatpush1.bf16.msra.mxu0 %v10993_v7  ;;  %7302 = vmatprep.subr.bf16.mxu1 %v11004_v39  ;;  %v11089_v7 = vcombine.low %v1522_v30, %v1530_v18  ;;  %v11100_v39 = vcombine.high %v1535_v34, %v1543_v52  ;;  %v1618_v30 = vld [vmem:[#allocation6 + $0x1920] sm:$0xff] }
 0x2d0   :  { %7794 = vmatprep.subr.bf16.mxu0 %v11010_v41  ;;  %v11106_v41 = vcombine.high %v1538_v36, %v1546_v37  ;;  %v1626_v18 = vld [vmem:[#allocation6 + $0x1960] sm:$0xff] }
 0x2d2   :  { %7303 = vmatpush1.bf16.msra.mxu1 %v11003_v53  ;;  %v11099_v53 = vcombine.low %v1535_v34, %v1543_v52  ;;  %v1631_v34 = vld [vmem:[#allocation6 + $0x1988] sm:$0xff] }
 0x2d3   :  { %7795 = vmatpush1.bf16.msra.mxu0 %v11009_v47  ;;  %7304 = vmatprep.subr.bf16.mxu1 %v11020_v54  ;;  %v11105_v47 = vcombine.low %v1538_v36, %v1546_v37  ;;  %v11116_v54 = vcombine.high %v1551_v42, %v1559_v45  ;;  %v1639_v52 = vld [vmem:[#allocation6 + $0x19c8] sm:$0xff]  ;;  %v1634_v36 = vld [vmem:[#allocation6 + $0x19a0] sm:$0xff] }
 0x2d4   :  { %7796 = vmatprep.subr.bf16.mxu0 %v11026_v55  ;;  %v11122_v55 = vcombine.high %v1554_v51, %v1562_v20  ;;  %v1642_v37 = vld [vmem:[#allocation6 + $0x19e0] sm:$0xff] }
 0x2d6   :  { %7305 = vmatpush1.bf16.msra.mxu1 %v11019_v62  ;;  %v11115_v62 = vcombine.low %v1551_v42, %v1559_v45  ;;  %v1647_v42 = vld [vmem:[#allocation6 + $0x1a08] sm:$0xff] }
 0x2d7   :  { %7797 = vmatpush1.bf16.msra.mxu0 %v11025_v0  ;;  %7306 = vmatprep.subr.bf16.mxu1 %v11036_v1  ;;  %v11121_v0 = vcombine.low %v1554_v51, %v1562_v20  ;;  %v11132_v1 = vcombine.high %v1567_v57, %v1575_v58  ;;  %v1655_v45 = vld [vmem:[#allocation6 + $0x1a48] sm:$0xff]  ;;  %v1650_v51 = vld [vmem:[#allocation6 + $0x1a20] sm:$0xff] }
 0x2d8   :  { %7798 = vmatprep.subr.bf16.mxu0 %v11042_v4  ;;  %v11138_v4 = vcombine.high %v1570_v61, %v1578_v14  ;;  %v1658_v20 = vld [vmem:[#allocation6 + $0x1a60] sm:$0xff] }
 0x2da   :  { %7307 = vmatpush1.bf16.msra.mxu1 %v11035_v10  ;;  %v11131_v10 = vcombine.low %v1567_v57, %v1575_v58  ;;  %v1663_v57 = vld [vmem:[#allocation6 + $0x1a88] sm:$0xff] }
 0x2db   :  { %7799 = vmatpush1.bf16.msra.mxu0 %v11041_v11  ;;  %7308 = vmatprep.subr.bf16.mxu1 %v11052_v12  ;;  %v11137_v11 = vcombine.low %v1570_v61, %v1578_v14  ;;  %v11148_v12 = vcombine.high %v1583_v5, %v1591_v6  ;;  %v1671_v58 = vld [vmem:[#allocation6 + $0x1ac8] sm:$0xff]  ;;  %v1666_v61 = vld [vmem:[#allocation6 + $0x1aa0] sm:$0xff] }
 0x2dc   :  { %7800 = vmatprep.subr.bf16.mxu0 %v11058_v13  ;;  %v11154_v13 = vcombine.high %v1586_v8, %v1594_v9  ;;  %v1674_v14 = vld [vmem:[#allocation6 + $0x1ae0] sm:$0xff]  ;;  %v1679_v5 = vld [vmem:[#allocation6 + $0x1b08] sm:$0xff] }
 0x2dd   :  { %v1687_v6 = vld [vmem:[#allocation6 + $0x1b48] sm:$0xff] }
 0x2de   :  { %7309 = vmatpush1.bf16.msra.mxu1 %v11051_v22  ;;  %v1610_v22 = vld [vmem:[#allocation6 + $0x18e0] sm:$0xff] }
 0x2df   :  { %7801 = vmatpush1.bf16.msra.mxu0 %v11057_v25  ;;  %7310 = vmatprep.subr.bf16.mxu1 %v11068_v28  ;;  %v11153_v25 = vcombine.low %v1586_v8, %v1594_v9  ;;  %v11164_v28 = vcombine.high %v1599_v15, %v1607_v16  ;;  %v11170_v19 = vcombine.high %v1602_v17, %v1610_v22  ;;  %v1682_v8 = vld [vmem:[#allocation6 + $0x1b20] sm:$0xff] }
 0x2e0   :  { %7802 = vmatprep.subr.bf16.mxu0 %v11074_v49  ;;  %v1615_v49 = vld [vmem:[#allocation6 + $0x1908] sm:$0xff]  ;;  %v1690_v9 = vld [vmem:[#allocation6 + $0x1b60] sm:$0xff] }
 0x2e2   :  { %7311 = vmatpush1.bf16.msra.mxu1 %v11067_v24  ;;  %v11163_v24 = vcombine.low %v1599_v15, %v1607_v16  ;;  %v11250_v16 = vcombine.high %v1682_v8, %v1690_v9 }
 0x2e3   :  { %7803 = vmatpush1.bf16.msra.mxu0 %v11073_v26  ;;  %7312 = vmatprep.subr.bf16.mxu1 %v11084_v27  ;;  %v11169_v26 = vcombine.low %v1602_v17, %v1610_v22  ;;  %v11180_v27 = vcombine.high %v1615_v49, %v1623_v29  ;;  %v1703_v17 = vld [vmem:[#allocation6 + $0x1bc8] sm:$0xff] }
 0x2e4   :  { %7804 = vmatprep.subr.bf16.mxu0 %v11090_v32  ;;  %v11186_v32 = vcombine.high %v1618_v30, %v1626_v18 }
 0x2e6   :  { %7313 = vmatpush1.bf16.msra.mxu1 %v11083_v38  ;;  %v11179_v38 = vcombine.low %v1615_v49, %v1623_v29  ;;  %v1706_v49 = vld [vmem:[#allocation6 + $0x1be0] sm:$0xff] }
 0x2e7   :  { %7805 = vmatpush1.bf16.msra.mxu0 %v11089_v7  ;;  %7314 = vmatprep.subr.bf16.mxu1 %v11100_v39  ;;  %v11185_v7 = vcombine.low %v1618_v30, %v1626_v18  ;;  %v11196_v39 = vcombine.high %v1631_v34, %v1639_v52  ;;  %v11243_v30 = vcombine.low %v1679_v5, %v1687_v6 }
 0x2e8   :  { %7806 = vmatprep.subr.bf16.mxu0 %v11106_v41  ;;  %v11202_v41 = vcombine.high %v1634_v36, %v1642_v37 }
 0x2ea   :  { %7315 = vmatpush1.bf16.msra.mxu1 %v11099_v53  ;;  %v11195_v53 = vcombine.low %v1631_v34, %v1639_v52  ;;  %v1711_v34 = vld [vmem:[#allocation6 + $0x1c08] sm:$0xff] }
 0x2eb   :  { %7807 = vmatpush1.bf16.msra.mxu0 %v11105_v47  ;;  %7316 = vmatprep.subr.bf16.mxu1 %v11116_v54  ;;  %v11201_v47 = vcombine.low %v1634_v36, %v1642_v37  ;;  %v11212_v54 = vcombine.high %v1647_v42, %v1655_v45  ;;  %v1719_v52 = vld [vmem:[#allocation6 + $0x1c48] sm:$0xff]  ;;  %v1714_v36 = vld [vmem:[#allocation6 + $0x1c20] sm:$0xff] }
 0x2ec   :  { %7808 = vmatprep.subr.bf16.mxu0 %v11122_v55  ;;  %v11218_v55 = vcombine.high %v1650_v51, %v1658_v20  ;;  %v1722_v37 = vld [vmem:[#allocation6 + $0x1c60] sm:$0xff] }
 0x2ee   :  { %7317 = vmatpush1.bf16.msra.mxu1 %v11115_v62  ;;  %v11211_v62 = vcombine.low %v1647_v42, %v1655_v45  ;;  %v1727_v42 = vld [vmem:[#allocation6 + $0x1c88] sm:$0xff] }
 0x2ef   :  { %7809 = vmatpush1.bf16.msra.mxu0 %v11121_v0  ;;  %7318 = vmatprep.subr.bf16.mxu1 %v11132_v1  ;;  %v11217_v0 = vcombine.low %v1650_v51, %v1658_v20  ;;  %v11228_v1 = vcombine.high %v1663_v57, %v1671_v58  ;;  %v1735_v45 = vld [vmem:[#allocation6 + $0x1cc8] sm:$0xff]  ;;  %v1730_v51 = vld [vmem:[#allocation6 + $0x1ca0] sm:$0xff] }
 0x2f0   :  { %7810 = vmatprep.subr.bf16.mxu0 %v11138_v4  ;;  %v11234_v4 = vcombine.high %v1666_v61, %v1674_v14  ;;  %v1738_v20 = vld [vmem:[#allocation6 + $0x1ce0] sm:$0xff] }
 0x2f2   :  { %7319 = vmatpush1.bf16.msra.mxu1 %v11131_v10  ;;  %v11227_v10 = vcombine.low %v1663_v57, %v1671_v58  ;;  %v1743_v57 = vld [vmem:[#allocation6 + $0x1d08] sm:$0xff] }
 0x2f3   :  { %7811 = vmatpush1.bf16.msra.mxu0 %v11137_v11  ;;  %7329 = vmatprep.subr.bf16.mxu1 %v11148_v12  ;;  %v11233_v11 = vcombine.low %v1666_v61, %v1674_v14  ;;  %v11244_v12 = vcombine.high %v1679_v5, %v1687_v6  ;;  %v1751_v58 = vld [vmem:[#allocation6 + $0x1d48] sm:$0xff]  ;;  %v1746_v61 = vld [vmem:[#allocation6 + $0x1d20] sm:$0xff] }
 0x2f4   :  { %7821 = vmatprep.subr.bf16.mxu0 %v11154_v13  ;;  %v1754_v14 = vld [vmem:[#allocation6 + $0x1d60] sm:$0xff]  ;;  %v1759_v5 = vld [vmem:[#allocation6 + $0x1d88] sm:$0xff] }
 0x2f5   :  { %7321 = vmatmul.mubr.bf16.vlgmr.msra.gmra.mrb[12].mxu1 %v12601_v33  ;;  %v1767_v6 = vld [vmem:[#allocation6 + $0x1dc8] sm:$0xff] }
 0x2f6   :  { %7813 = vmatmul.mubr.bf16.vlgmr.msra.gmra.mrb[12].mxu0 %v12601_v33  ;;  %7330 = vmatpush1.bf16.msra.mxu1 %v11147_v44  ;;  %v1695_v44 = vld [vmem:[#allocation6 + $0x1b88] sm:$0xff] }
 0x2f7   :  { %7361 = vmatprep.mubr.bf16.mxu1 %v12603_v40  ;;  %7822 = vmatpush1.bf16.msra.mxu0 %v11153_v25 }
 0x2f8   :  { %7853 = vmatprep.mubr.bf16.mxu0 %v12603_v40  ;;  %7331 = vmatprep.subr.bf16.mxu1 %v11164_v28  ;;  %v1698_v28 = vld [vmem:[#allocation6 + $0x1ba0] sm:$0xff] }
 0x2f9   :  { %7823 = vmatprep.subr.bf16.mxu0 %v11170_v19 }
 0x2fa   :  { %7332 = vmatpush1.bf16.msra.mxu1 %v11163_v24 }
 0x2fb   :  { %7824 = vmatpush1.bf16.msra.mxu0 %v11169_v26  ;;  %7333 = vmatprep.subr.bf16.mxu1 %v11180_v27  ;;  %v11249_v26 = vcombine.low %v1682_v8, %v1690_v9  ;;  %v11260_v27 = vcombine.high %v1695_v44, %v1703_v17  ;;  %v1762_v8 = vld [vmem:[#allocation6 + $0x1da0] sm:$0xff] }
 0x2fc   :  { %7825 = vmatprep.subr.bf16.mxu0 %v11186_v32  ;;  %v11266_v32 = vcombine.high %v1698_v28, %v1706_v49  ;;  %v1770_v9 = vld [vmem:[#allocation6 + $0x1de0] sm:$0xff] }
 0x2fe   :  { %7334 = vmatpush1.bf16.msra.mxu1 %v11179_v38  ;;  %v11259_v38 = vcombine.low %v1695_v44, %v1703_v17  ;;  %v1775_v44 = vld [vmem:[#allocation6 + $0x1e08] sm:$0xff] }
 0x2ff   :  { %7826 = vmatpush1.bf16.msra.mxu0 %v11185_v7  ;;  %7335 = vmatprep.subr.bf16.mxu1 %v11196_v39  ;;  %v11265_v7 = vcombine.low %v1698_v28, %v1706_v49  ;;  %v11276_v39 = vcombine.high %v1711_v34, %v1719_v52  ;;  %v1783_v17 = vld [vmem:[#allocation6 + $0x1e48] sm:$0xff]  ;;  %v1778_v28 = vld [vmem:[#allocation6 + $0x1e20] sm:$0xff] }
 0x300   :  { %7827 = vmatprep.subr.bf16.mxu0 %v11202_v41  ;;  %v11282_v41 = vcombine.high %v1714_v36, %v1722_v37  ;;  %v1786_v49 = vld [vmem:[#allocation6 + $0x1e60] sm:$0xff] }
 0x302   :  { %7336 = vmatpush1.bf16.msra.mxu1 %v11195_v53  ;;  %v11275_v53 = vcombine.low %v1711_v34, %v1719_v52  ;;  %v11339_v34 = vcombine.low %v1775_v44, %v1783_v17  ;;  %v11345_v52 = vcombine.low %v1778_v28, %v1786_v49 }
 0x303   :  { %7828 = vmatpush1.bf16.msra.mxu0 %v11201_v47  ;;  %7337 = vmatprep.subr.bf16.mxu1 %v11212_v54  ;;  %v11281_v47 = vcombine.low %v1714_v36, %v1722_v37  ;;  %v11292_v54 = vcombine.high %v1727_v42, %v1735_v45 }
 0x304   :  { %7829 = vmatprep.subr.bf16.mxu0 %v11218_v55  ;;  %v11298_v55 = vcombine.high %v1730_v51, %v1738_v20 }
 0x306   :  { %7338 = vmatpush1.bf16.msra.mxu1 %v11211_v62  ;;  %v11291_v62 = vcombine.low %v1727_v42, %v1735_v45 }
 0x307   :  { %7830 = vmatpush1.bf16.msra.mxu0 %v11217_v0  ;;  %7339 = vmatprep.subr.bf16.mxu1 %v11228_v1  ;;  %v11297_v0 = vcombine.low %v1730_v51, %v1738_v20  ;;  %v11308_v1 = vcombine.high %v1743_v57, %v1751_v58 }
 0x308   :  { %v12632_v13 = vpop.f32.mrb[8].mxu1  ;;  %v12634_v15 = vpop.f32.mrb[8].mxu0  ;;  %7831 = vmatprep.subr.bf16.mxu0 %v11234_v4  ;;  %v11314_v4 = vcombine.high %v1746_v61, %v1754_v14 }
 0x309   :  { %v12636_v22 = vpop.f32.mrb[9].mxu1  ;;  %v12638_v25 = vpop.f32.mrb[9].mxu0 }
 0x30a   :  { %v7203_v29 = vpop.f32.mrb[10].mxu1  ;;  %7340 = vmatpush1.bf16.msra.mxu1 %v11227_v10  ;;  %v7531_v19 = vpop.f32.mrb[10].mxu0  ;;  %v11307_v10 = vcombine.low %v1743_v57, %v1751_v58 }
 0x30b   :  { %7832 = vmatpush1.bf16.msra.mxu0 %v11233_v11  ;;  %v7204_v18 = vpop.f32.mrb[11].mxu1  ;;  %v7532_v24 = vpop.f32.mrb[11].mxu0  ;;  %7341 = vmatprep.subr.bf16.mxu1 %v11244_v12  ;;  %v11313_v11 = vcombine.low %v1746_v61, %v1754_v14  ;;  %v11324_v12 = vcombine.high %v1759_v5, %v1767_v6  ;;  %v11323_v29 = vcombine.low %v1759_v5, %v1767_v6 }
 0x30c   :  { %7833 = vmatprep.subr.bf16.mxu0 %v11250_v16  ;;  %v11330_v16 = vcombine.high %v1762_v8, %v1770_v9  ;;  %v11329_v19 = vcombine.low %v1762_v8, %v1770_v9  ;;  %v11346_v18 = vcombine.high %v1778_v28, %v1786_v49  ;;  %v1791_v24 = vld [vmem:[#allocation6 + $0x1e88] sm:$0xff]  ;;  %v849_v49 = vld [vmem:[#allocation6 + $0x118] sm:$0xff] }
 0x30e   :  { %7342 = vmatpush1.bf16.msra.mxu1 %v11243_v30  ;;  %v11340_v30 = vcombine.high %v1775_v44, %v1783_v17  ;;  %v844_v44 = vld [vmem:[#allocation6 + $0xf0] sm:$0xff] }
 0x30f   :  { %7834 = vmatpush1.bf16.msra.mxu0 %v11249_v26  ;;  %7343 = vmatprep.subr.bf16.mxu1 %v11260_v27  ;;  %v1799_v26 = vld [vmem:[#allocation6 + $0x1ec8] sm:$0xff]  ;;  %v1794_v27 = vld [vmem:[#allocation6 + $0x1ea0] sm:$0xff] }
 0x310   :  { %7835 = vmatprep.subr.bf16.mxu0 %v11266_v32  ;;  %v1802_v32 = vld [vmem:[#allocation6 + $0x1ee0] sm:$0xff]  ;;  %v11356_v36 = vcombine.high %v1791_v24, %v1799_v26  ;;  %v11355_v42 = vcombine.low %v1791_v24, %v1799_v26 }
 0x311   :  { %v11362_v37 = vcombine.high %v1794_v27, %v1802_v32  ;;  %v11361_v45 = vcombine.low %v1794_v27, %v1802_v32 }
 0x312   :  { %7344 = vmatpush1.bf16.msra.mxu1 %v11259_v38  ;;  %v1807_v38 = vld [vmem:[#allocation6 + $0x1f08] sm:$0xff] }
 0x313   :  { %7836 = vmatpush1.bf16.msra.mxu0 %v11265_v7  ;;  %7345 = vmatprep.subr.bf16.mxu1 %v11276_v39  ;;  %v1815_v7 = vld [vmem:[#allocation6 + $0x1f48] sm:$0xff]  ;;  %v1810_v39 = vld [vmem:[#allocation6 + $0x1f20] sm:$0xff] }
 0x314   :  { %7837 = vmatprep.subr.bf16.mxu0 %v11282_v41  ;;  %v1818_v41 = vld [vmem:[#allocation6 + $0x1f60] sm:$0xff]  ;;  %v11372_v51 = vcombine.high %v1807_v38, %v1815_v7  ;;  %v11371_v57 = vcombine.low %v1807_v38, %v1815_v7 }
 0x315   :  { %v11378_v20 = vcombine.high %v1810_v39, %v1818_v41  ;;  %v11377_v58 = vcombine.low %v1810_v39, %v1818_v41 }
 0x316   :  { %7346 = vmatpush1.bf16.msra.mxu1 %v11275_v53  ;;  %v1823_v53 = vld [vmem:[#allocation6 + $0x1f88] sm:$0xff] }
 0x317   :  { %7838 = vmatpush1.bf16.msra.mxu0 %v11281_v47  ;;  %7347 = vmatprep.subr.bf16.mxu1 %v11292_v54  ;;  %v1831_v47 = vld [vmem:[#allocation6 + $0x1fc8] sm:$0xff]  ;;  %v1826_v54 = vld [vmem:[#allocation6 + $0x1fa0] sm:$0xff] }
 0x318   :  { %7839 = vmatprep.subr.bf16.mxu0 %v11298_v55  ;;  %v1834_v55 = vld [vmem:[#allocation6 + $0x1fe0] sm:$0xff]  ;;  %v11388_v61 = vcombine.high %v1823_v53, %v1831_v47  ;;  %v11387_v5 = vcombine.low %v1823_v53, %v1831_v47 }
 0x319   :  { %v11394_v14 = vcombine.high %v1826_v54, %v1834_v55  ;;  %v11393_v6 = vcombine.low %v1826_v54, %v1834_v55 }
 0x31a   :  { %7348 = vmatpush1.bf16.msra.mxu1 %v11291_v62  ;;  %v817_v62 = vld [vmem:[#allocation6 + $0x18] sm:$0xff] }
 0x31b   :  { %7840 = vmatpush1.bf16.msra.mxu0 %v11297_v0  ;;  %7349 = vmatprep.subr.bf16.mxu1 %v11308_v1  ;;  %v825_v0 = vld [vmem:[#allocation6 + $0x58] sm:$0xff]  ;;  %v820_v1 = vld [vmem:[#allocation6 + $0x30] sm:$0xff] }
 0x31c   :  { %7841 = vmatprep.subr.bf16.mxu0 %v11314_v4  ;;  %v828_v4 = vld [vmem:[#allocation6 + $0x70] sm:$0xff]  ;;  %v10384_v8 = vcombine.high %v817_v62, %v825_v0 }
 0x31d   :  { %v10390_v9 = vcombine.high %v820_v1, %v828_v4  ;;  %v10389_v17 = vcombine.low %v820_v1, %v828_v4 }
 0x31e   :  { %7350 = vmatpush1.bf16.msra.mxu1 %v11307_v10  ;;  %v833_v10 = vld [vmem:[#allocation6 + $0x98] sm:$0xff] }
 0x31f   :  { %7842 = vmatpush1.bf16.msra.mxu0 %v11313_v11  ;;  %7351 = vmatprep.subr.bf16.mxu1 %v11324_v12  ;;  %v841_v11 = vld [vmem:[#allocation6 + $0xd8] sm:$0xff]  ;;  %v10383_v12 = vcombine.low %v817_v62, %v825_v0 }
 0x320   :  { %7843 = vmatprep.subr.bf16.mxu0 %v11330_v16  ;;  %v836_v16 = vld [vmem:[#allocation6 + $0xb0] sm:$0xff]  ;;  %v10400_v28 = vcombine.high %v833_v10, %v841_v11  ;;  %v10399_v24 = vcombine.low %v833_v10, %v841_v11 }
 0x321   :  { %v10405_v26 = vcombine.low %v836_v16, %v844_v44 }
 0x322   :  { %7352 = vmatpush1.bf16.msra.mxu1 %v11323_v29  ;;  %v857_v29 = vld [vmem:[#allocation6 + $0x158] sm:$0xff] }
 0x323   :  { %7844 = vmatpush1.bf16.msra.mxu0 %v11329_v19  ;;  %7353 = vmatprep.subr.bf16.mxu1 %v11340_v30  ;;  %v10406_v19 = vcombine.high %v836_v16, %v844_v44  ;;  %v852_v30 = vld [vmem:[#allocation6 + $0x130] sm:$0xff]  ;;  %v10416_v27 = vcombine.high %v849_v49, %v857_v29  ;;  %v10415_v38 = vcombine.low %v849_v49, %v857_v29  ;;  %v929_v44 = vld [vmem:[#allocation6 + $0x398] sm:$0xff] }
 0x324   :  { %7845 = vmatprep.subr.bf16.mxu0 %v11346_v18  ;;  %v860_v18 = vld [vmem:[#allocation6 + $0x170] sm:$0xff] }
 0x325   :  { %v10422_v32 = vcombine.high %v852_v30, %v860_v18  ;;  %v10421_v7 = vcombine.low %v852_v30, %v860_v18  ;;  %v940_v49 = vld [vmem:[#allocation6 + $0x3f0] sm:$0xff] }
 0x326   :  { %7354 = vmatpush1.bf16.msra.mxu1 %v11339_v34  ;;  %v865_v34 = vld [vmem:[#allocation6 + $0x198] sm:$0xff] }
 0x327   :  { %7846 = vmatpush1.bf16.msra.mxu0 %v11345_v52  ;;  %7355 = vmatprep.subr.bf16.mxu1 %v11356_v36  ;;  %v873_v52 = vld [vmem:[#allocation6 + $0x1d8] sm:$0xff]  ;;  %v868_v36 = vld [vmem:[#allocation6 + $0x1b0] sm:$0xff] }
 0x328   :  { %7847 = vmatprep.subr.bf16.mxu0 %v11362_v37  ;;  %v876_v37 = vld [vmem:[#allocation6 + $0x1f0] sm:$0xff]  ;;  %v10432_v39 = vcombine.high %v865_v34, %v873_v52  ;;  %v10431_v53 = vcombine.low %v865_v34, %v873_v52 }
 0x329   :  { %v10438_v41 = vcombine.high %v868_v36, %v876_v37  ;;  %v10437_v47 = vcombine.low %v868_v36, %v876_v37 }
 0x32a   :  { %7356 = vmatpush1.bf16.msra.mxu1 %v11355_v42  ;;  %v881_v42 = vld [vmem:[#allocation6 + $0x218] sm:$0xff] }
 0x32b   :  { %7848 = vmatpush1.bf16.msra.mxu0 %v11361_v45  ;;  %7357 = vmatprep.subr.bf16.mxu1 %v11372_v51  ;;  %v889_v45 = vld [vmem:[#allocation6 + $0x258] sm:$0xff]  ;;  %v884_v51 = vld [vmem:[#allocation6 + $0x230] sm:$0xff] }
 0x32c   :  { %7849 = vmatprep.subr.bf16.mxu0 %v11378_v20  ;;  %v892_v20 = vld [vmem:[#allocation6 + $0x270] sm:$0xff]  ;;  %v10448_v54 = vcombine.high %v881_v42, %v889_v45  ;;  %v10447_v62 = vcombine.low %v881_v42, %v889_v45 }
 0x32d   :  { %v10454_v55 = vcombine.high %v884_v51, %v892_v20  ;;  %v10453_v0 = vcombine.low %v884_v51, %v892_v20 }
 0x32e   :  { %7358 = vmatpush1.bf16.msra.mxu1 %v11371_v57  ;;  %v897_v57 = vld [vmem:[#allocation6 + $0x298] sm:$0xff] }
 0x32f   :  { %7850 = vmatpush1.bf16.msra.mxu0 %v11377_v58  ;;  %7359 = vmatprep.subr.bf16.mxu1 %v11388_v61  ;;  %v905_v58 = vld [vmem:[#allocation6 + $0x2d8] sm:$0xff]  ;;  %v900_v61 = vld [vmem:[#allocation6 + $0x2b0] sm:$0xff] }
 0x330   :  { %7851 = vmatprep.subr.bf16.mxu0 %v11394_v14  ;;  %v908_v14 = vld [vmem:[#allocation6 + $0x2f0] sm:$0xff]  ;;  %v10464_v1 = vcombine.high %v897_v57, %v905_v58  ;;  %v10463_v10 = vcombine.low %v897_v57, %v905_v58 }
 0x331   :  { %v10470_v4 = vcombine.high %v900_v61, %v908_v14  ;;  %v10469_v11 = vcombine.low %v900_v61, %v908_v14 }
 0x332   :  { %7360 = vmatpush1.bf16.msra.mxu1 %v11387_v5  ;;  %v913_v5 = vld [vmem:[#allocation6 + $0x318] sm:$0xff] }
 0x333   :  { %7852 = vmatpush1.bf16.msra.mxu0 %v11393_v6  ;;  %7534 = vmatprep.subr.bf16.mxu1 %v10384_v8  ;;  %v921_v6 = vld [vmem:[#allocation6 + $0x358] sm:$0xff]  ;;  %v916_v8 = vld [vmem:[#allocation6 + $0x330] sm:$0xff] }
 0x334   :  { %8026 = vmatprep.subr.bf16.mxu0 %v10390_v9  ;;  %v924_v9 = vld [vmem:[#allocation6 + $0x370] sm:$0xff]  ;;  %v10479_v29 = vcombine.low %v913_v5, %v921_v6 }
 0x335   :  { %7362 = vmatmul.mubr.bf16.vlgmr.msra.gmra.mrb[12].mxu1 %v12614_v23  ;;  %v10486_v16 = vcombine.high %v916_v8, %v924_v9 }
 0x336   :  { %7854 = vmatmul.mubr.bf16.vlgmr.msra.gmra.mrb[12].mxu0 %v12614_v23  ;;  %7535 = vmatpush1.bf16.msra.mxu1 %v10383_v12  ;;  %v10480_v12 = vcombine.high %v913_v5, %v921_v6 }
 0x337   :  { %7566 = vmatprep.mubr.bf16.mxu1 %v12541_v2  ;;  %8027 = vmatpush1.bf16.msra.mxu0 %v10389_v17  ;;  %v937_v17 = vld [vmem:[#allocation6 + $0x3d8] sm:$0xff] }
 0x338   :  { %8058 = vmatprep.mubr.bf16.mxu0 %v12541_v2  ;;  %7536 = vmatprep.subr.bf16.mxu1 %v10400_v28  ;;  %v932_v28 = vld [vmem:[#allocation6 + $0x3b0] sm:$0xff]  ;;  %v10496_v30 = vcombine.high %v929_v44, %v937_v17  ;;  %v10495_v34 = vcombine.low %v929_v44, %v937_v17 }
 0x339   :  { %8028 = vmatprep.subr.bf16.mxu0 %v10406_v19  ;;  %v10485_v19 = vcombine.low %v916_v8, %v924_v9  ;;  %v10502_v18 = vcombine.high %v932_v28, %v940_v49  ;;  %v10501_v52 = vcombine.low %v932_v28, %v940_v49 }
 0x33a   :  { %7537 = vmatpush1.bf16.msra.mxu1 %v10399_v24  ;;  %v945_v24 = vld [vmem:[#allocation6 + $0x418] sm:$0xff] }
 0x33b   :  { %8029 = vmatpush1.bf16.msra.mxu0 %v10405_v26  ;;  %7538 = vmatprep.subr.bf16.mxu1 %v10416_v27  ;;  %v953_v26 = vld [vmem:[#allocation6 + $0x458] sm:$0xff]  ;;  %v948_v27 = vld [vmem:[#allocation6 + $0x430] sm:$0xff] }
 0x33c   :  { %8030 = vmatprep.subr.bf16.mxu0 %v10422_v32  ;;  %v956_v32 = vld [vmem:[#allocation6 + $0x470] sm:$0xff]  ;;  %v10512_v36 = vcombine.high %v945_v24, %v953_v26  ;;  %v10511_v42 = vcombine.low %v945_v24, %v953_v26 }
 0x33d   :  { %v10518_v37 = vcombine.high %v948_v27, %v956_v32  ;;  %v10517_v45 = vcombine.low %v948_v27, %v956_v32 }
 0x33e   :  { %7539 = vmatpush1.bf16.msra.mxu1 %v10415_v38  ;;  %v961_v38 = vld [vmem:[#allocation6 + $0x498] sm:$0xff] }
 0x33f   :  { %8031 = vmatpush1.bf16.msra.mxu0 %v10421_v7  ;;  %7540 = vmatprep.subr.bf16.mxu1 %v10432_v39  ;;  %v969_v7 = vld [vmem:[#allocation6 + $0x4d8] sm:$0xff]  ;;  %v964_v39 = vld [vmem:[#allocation6 + $0x4b0] sm:$0xff] }
 0x340   :  { %8032 = vmatprep.subr.bf16.mxu0 %v10438_v41  ;;  %v972_v41 = vld [vmem:[#allocation6 + $0x4f0] sm:$0xff]  ;;  %v10528_v51 = vcombine.high %v961_v38, %v969_v7  ;;  %v10527_v57 = vcombine.low %v961_v38, %v969_v7 }
 0x341   :  { %v10534_v20 = vcombine.high %v964_v39, %v972_v41  ;;  %v10533_v58 = vcombine.low %v964_v39, %v972_v41 }
 0x342   :  { %7541 = vmatpush1.bf16.msra.mxu1 %v10431_v53  ;;  %v977_v53 = vld [vmem:[#allocation6 + $0x518] sm:$0xff] }
 0x343   :  { %8033 = vmatpush1.bf16.msra.mxu0 %v10437_v47  ;;  %7542 = vmatprep.subr.bf16.mxu1 %v10448_v54  ;;  %v985_v47 = vld [vmem:[#allocation6 + $0x558] sm:$0xff]  ;;  %v980_v54 = vld [vmem:[#allocation6 + $0x530] sm:$0xff] }
 0x344   :  { %8034 = vmatprep.subr.bf16.mxu0 %v10454_v55  ;;  %v988_v55 = vld [vmem:[#allocation6 + $0x570] sm:$0xff]  ;;  %v10544_v61 = vcombine.high %v977_v53, %v985_v47  ;;  %v10543_v5 = vcombine.low %v977_v53, %v985_v47 }
 0x345   :  { %v10550_v14 = vcombine.high %v980_v54, %v988_v55  ;;  %v10549_v6 = vcombine.low %v980_v54, %v988_v55 }
 0x346   :  { %7543 = vmatpush1.bf16.msra.mxu1 %v10447_v62  ;;  %v993_v62 = vld [vmem:[#allocation6 + $0x598] sm:$0xff] }
 0x347   :  { %8035 = vmatpush1.bf16.msra.mxu0 %v10453_v0  ;;  %7544 = vmatprep.subr.bf16.mxu1 %v10464_v1  ;;  %v1001_v0 = vld [vmem:[#allocation6 + $0x5d8] sm:$0xff]  ;;  %v996_v1 = vld [vmem:[#allocation6 + $0x5b0] sm:$0xff] }
 0x348   :  { %8036 = vmatprep.subr.bf16.mxu0 %v10470_v4  ;;  %v1004_v4 = vld [vmem:[#allocation6 + $0x5f0] sm:$0xff]  ;;  %v10560_v8 = vcombine.high %v993_v62, %v1001_v0  ;;  %v10559_v44 = vcombine.low %v993_v62, %v1001_v0 }
 0x349   :  { %v10566_v9 = vcombine.high %v996_v1, %v1004_v4  ;;  %v10565_v17 = vcombine.low %v996_v1, %v1004_v4 }
 0x34a   :  { %7545 = vmatpush1.bf16.msra.mxu1 %v10463_v10  ;;  %v1009_v10 = vld [vmem:[#allocation6 + $0x618] sm:$0xff] }
 0x34b   :  { %8037 = vmatpush1.bf16.msra.mxu0 %v10469_v11  ;;  %7546 = vmatprep.subr.bf16.mxu1 %v10480_v12  ;;  %v1017_v11 = vld [vmem:[#allocation6 + $0x658] sm:$0xff]  ;;  %v1012_v12 = vld [vmem:[#allocation6 + $0x630] sm:$0xff] }
 0x34c   :  { %8038 = vmatprep.subr.bf16.mxu0 %v10486_v16  ;;  %v1020_v16 = vld [vmem:[#allocation6 + $0x670] sm:$0xff]  ;;  %v10576_v28 = vcombine.high %v1009_v10, %v1017_v11  ;;  %v10575_v24 = vcombine.low %v1009_v10, %v1017_v11 }
 0x34d   :  { %v10582_v49 = vcombine.high %v1012_v12, %v1020_v16  ;;  %v10581_v26 = vcombine.low %v1012_v12, %v1020_v16  ;;  %v1100_v10 = vld [vmem:[#allocation6 + $0x8f0] sm:$0xff]  ;;  %v1105_v16 = vld [vmem:[#allocation6 + $0x918] sm:$0xff] }
 0x34e   :  { %7547 = vmatpush1.bf16.msra.mxu1 %v10479_v29  ;;  %v1025_v29 = vld [vmem:[#allocation6 + $0x698] sm:$0xff] }
 0x34f   :  { %8039 = vmatpush1.bf16.msra.mxu0 %v10485_v19  ;;  %7548 = vmatprep.subr.bf16.mxu1 %v10496_v30  ;;  %v1033_v19 = vld [vmem:[#allocation6 + $0x6d8] sm:$0xff]  ;;  %v1028_v30 = vld [vmem:[#allocation6 + $0x6b0] sm:$0xff] }
 0x350   :  { %8040 = vmatprep.subr.bf16.mxu0 %v10502_v18  ;;  %v1036_v18 = vld [vmem:[#allocation6 + $0x6f0] sm:$0xff]  ;;  %v10592_v27 = vcombine.high %v1025_v29, %v1033_v19  ;;  %v10591_v38 = vcombine.low %v1025_v29, %v1033_v19 }
 0x351   :  { %v10598_v32 = vcombine.high %v1028_v30, %v1036_v18  ;;  %v10597_v7 = vcombine.low %v1028_v30, %v1036_v18 }
 0x352   :  { %7549 = vmatpush1.bf16.msra.mxu1 %v10495_v34  ;;  %v1041_v34 = vld [vmem:[#allocation6 + $0x718] sm:$0xff] }
 0x353   :  { %8041 = vmatpush1.bf16.msra.mxu0 %v10501_v52  ;;  %7550 = vmatprep.subr.bf16.mxu1 %v10512_v36  ;;  %v1049_v52 = vld [vmem:[#allocation6 + $0x758] sm:$0xff]  ;;  %v1044_v36 = vld [vmem:[#allocation6 + $0x730] sm:$0xff] }
 0x354   :  { %8042 = vmatprep.subr.bf16.mxu0 %v10518_v37  ;;  %v1052_v37 = vld [vmem:[#allocation6 + $0x770] sm:$0xff]  ;;  %v10608_v39 = vcombine.high %v1041_v34, %v1049_v52  ;;  %v10607_v53 = vcombine.low %v1041_v34, %v1049_v52 }
 0x355   :  { %v10614_v41 = vcombine.high %v1044_v36, %v1052_v37  ;;  %v10613_v47 = vcombine.low %v1044_v36, %v1052_v37 }
 0x356   :  { %7551 = vmatpush1.bf16.msra.mxu1 %v10511_v42  ;;  %v1057_v42 = vld [vmem:[#allocation6 + $0x798] sm:$0xff] }
 0x357   :  { %8043 = vmatpush1.bf16.msra.mxu0 %v10517_v45  ;;  %7552 = vmatprep.subr.bf16.mxu1 %v10528_v51  ;;  %v1065_v45 = vld [vmem:[#allocation6 + $0x7d8] sm:$0xff]  ;;  %v1060_v51 = vld [vmem:[#allocation6 + $0x7b0] sm:$0xff] }
 0x358   :  { %8044 = vmatprep.subr.bf16.mxu0 %v10534_v20  ;;  %v1068_v20 = vld [vmem:[#allocation6 + $0x7f0] sm:$0xff]  ;;  %v10624_v54 = vcombine.high %v1057_v42, %v1065_v45  ;;  %v10623_v62 = vcombine.low %v1057_v42, %v1065_v45 }
 0x359   :  { %v10630_v55 = vcombine.high %v1060_v51, %v1068_v20  ;;  %v10629_v0 = vcombine.low %v1060_v51, %v1068_v20 }
 0x35a   :  { %7553 = vmatpush1.bf16.msra.mxu1 %v10527_v57  ;;  %v1073_v57 = vld [vmem:[#allocation6 + $0x818] sm:$0xff] }
 0x35b   :  { %8045 = vmatpush1.bf16.msra.mxu0 %v10533_v58  ;;  %7554 = vmatprep.subr.bf16.mxu1 %v10544_v61  ;;  %v1081_v58 = vld [vmem:[#allocation6 + $0x858] sm:$0xff]  ;;  %v1076_v61 = vld [vmem:[#allocation6 + $0x830] sm:$0xff] }
 0x35c   :  { %8046 = vmatprep.subr.bf16.mxu0 %v10550_v14  ;;  %v1084_v14 = vld [vmem:[#allocation6 + $0x870] sm:$0xff]  ;;  %v10640_v1 = vcombine.high %v1073_v57, %v1081_v58 }
 0x35d   :  { %v10646_v4 = vcombine.high %v1076_v61, %v1084_v14  ;;  %v10645_v11 = vcombine.low %v1076_v61, %v1084_v14 }
 0x35e   :  { %7555 = vmatpush1.bf16.msra.mxu1 %v10543_v5  ;;  %v1089_v5 = vld [vmem:[#allocation6 + $0x898] sm:$0xff] }
 0x35f   :  { %8047 = vmatpush1.bf16.msra.mxu0 %v10549_v6  ;;  %7556 = vmatprep.subr.bf16.mxu1 %v10560_v8  ;;  %v1097_v6 = vld [vmem:[#allocation6 + $0x8d8] sm:$0xff]  ;;  %v10639_v8 = vcombine.low %v1073_v57, %v1081_v58 }
 0x360   :  { %8048 = vmatprep.subr.bf16.mxu0 %v10566_v9  ;;  %v1092_v9 = vld [vmem:[#allocation6 + $0x8b0] sm:$0xff]  ;;  %v10656_v12 = vcombine.high %v1089_v5, %v1097_v6  ;;  %v10655_v29 = vcombine.low %v1089_v5, %v1097_v6 }
 0x361   :  { %v10661_v19 = vcombine.low %v1092_v9, %v1100_v10 }
 0x362   :  { %7557 = vmatpush1.bf16.msra.mxu1 %v10559_v44  ;;  %v1113_v44 = vld [vmem:[#allocation6 + $0x958] sm:$0xff] }
 0x363   :  { %8049 = vmatpush1.bf16.msra.mxu0 %v10565_v17  ;;  %7558 = vmatprep.subr.bf16.mxu1 %v10576_v28  ;;  %v10662_v17 = vcombine.high %v1092_v9, %v1100_v10  ;;  %v1108_v28 = vld [vmem:[#allocation6 + $0x930] sm:$0xff]  ;;  %v10672_v30 = vcombine.high %v1105_v16, %v1113_v44  ;;  %v10671_v34 = vcombine.low %v1105_v16, %v1113_v44  ;;  %v1185_v10 = vld [vmem:[#allocation6 + $0xb98] sm:$0xff] }
 0x364   :  { %8050 = vmatprep.subr.bf16.mxu0 %v10582_v49  ;;  %v1116_v49 = vld [vmem:[#allocation6 + $0x970] sm:$0xff] }
 0x365   :  { %v10678_v18 = vcombine.high %v1108_v28, %v1116_v49  ;;  %v10677_v52 = vcombine.low %v1108_v28, %v1116_v49  ;;  %v1196_v16 = vld [vmem:[#allocation6 + $0xbf0] sm:$0xff] }
 0x366   :  { %7559 = vmatpush1.bf16.msra.mxu1 %v10575_v24  ;;  %v1121_v24 = vld [vmem:[#allocation6 + $0x998] sm:$0xff] }
 0x367   :  { %8051 = vmatpush1.bf16.msra.mxu0 %v10581_v26  ;;  %7560 = vmatprep.subr.bf16.mxu1 %v10592_v27  ;;  %v1129_v26 = vld [vmem:[#allocation6 + $0x9d8] sm:$0xff]  ;;  %v1124_v27 = vld [vmem:[#allocation6 + $0x9b0] sm:$0xff] }
 0x368   :  { %8052 = vmatprep.subr.bf16.mxu0 %v10598_v32  ;;  %v1132_v32 = vld [vmem:[#allocation6 + $0x9f0] sm:$0xff]  ;;  %v10688_v36 = vcombine.high %v1121_v24, %v1129_v26  ;;  %v10687_v42 = vcombine.low %v1121_v24, %v1129_v26 }
 0x369   :  { %v10694_v37 = vcombine.high %v1124_v27, %v1132_v32  ;;  %v10693_v45 = vcombine.low %v1124_v27, %v1132_v32 }
 0x36a   :  { %7561 = vmatpush1.bf16.msra.mxu1 %v10591_v38  ;;  %v1137_v38 = vld [vmem:[#allocation6 + $0xa18] sm:$0xff] }
 0x36b   :  { %8053 = vmatpush1.bf16.msra.mxu0 %v10597_v7  ;;  %7562 = vmatprep.subr.bf16.mxu1 %v10608_v39  ;;  %v1145_v7 = vld [vmem:[#allocation6 + $0xa58] sm:$0xff]  ;;  %v1140_v39 = vld [vmem:[#allocation6 + $0xa30] sm:$0xff] }
 0x36c   :  { %8054 = vmatprep.subr.bf16.mxu0 %v10614_v41  ;;  %v1148_v41 = vld [vmem:[#allocation6 + $0xa70] sm:$0xff]  ;;  %v10704_v51 = vcombine.high %v1137_v38, %v1145_v7  ;;  %v10703_v57 = vcombine.low %v1137_v38, %v1145_v7 }
 0x36d   :  { %v10710_v20 = vcombine.high %v1140_v39, %v1148_v41  ;;  %v10709_v58 = vcombine.low %v1140_v39, %v1148_v41 }
 0x36e   :  { %7563 = vmatpush1.bf16.msra.mxu1 %v10607_v53  ;;  %v1153_v53 = vld [vmem:[#allocation6 + $0xa98] sm:$0xff] }
 0x36f   :  { %8055 = vmatpush1.bf16.msra.mxu0 %v10613_v47  ;;  %7564 = vmatprep.subr.bf16.mxu1 %v10624_v54  ;;  %v1161_v47 = vld [vmem:[#allocation6 + $0xad8] sm:$0xff]  ;;  %v1156_v54 = vld [vmem:[#allocation6 + $0xab0] sm:$0xff] }
 0x370   :  { %8056 = vmatprep.subr.bf16.mxu0 %v10630_v55  ;;  %v1164_v55 = vld [vmem:[#allocation6 + $0xaf0] sm:$0xff]  ;;  %v10720_v61 = vcombine.high %v1153_v53, %v1161_v47  ;;  %v10719_v5 = vcombine.low %v1153_v53, %v1161_v47 }
 0x371   :  { %v10726_v14 = vcombine.high %v1156_v54, %v1164_v55  ;;  %v10725_v6 = vcombine.low %v1156_v54, %v1164_v55 }
 0x372   :  { %7565 = vmatpush1.bf16.msra.mxu1 %v10623_v62  ;;  %v1169_v62 = vld [vmem:[#allocation6 + $0xb18] sm:$0xff] }
 0x373   :  { %8057 = vmatpush1.bf16.msra.mxu0 %v10629_v0  ;;  %7575 = vmatprep.subr.bf16.mxu1 %v10640_v1  ;;  %v1177_v0 = vld [vmem:[#allocation6 + $0xb58] sm:$0xff]  ;;  %v1172_v1 = vld [vmem:[#allocation6 + $0xb30] sm:$0xff] }
 0x374   :  { %8067 = vmatprep.subr.bf16.mxu0 %v10646_v4  ;;  %v1180_v4 = vld [vmem:[#allocation6 + $0xb70] sm:$0xff]  ;;  %v10735_v44 = vcombine.low %v1169_v62, %v1177_v0 }
 0x375   :  { %7567 = vmatmul.mubr.bf16.vlgmr.msra.gmra.mrb[16].mxu1 %v12543_v3  ;;  %v10742_v9 = vcombine.high %v1172_v1, %v1180_v4 }
 0x376   :  { %8059 = vmatmul.mubr.bf16.vlgmr.msra.gmra.mrb[16].mxu0 %v12543_v3  ;;  %7576 = vmatpush1.bf16.msra.mxu1 %v10639_v8  ;;  %v10736_v8 = vcombine.high %v1169_v62, %v1177_v0 }
 0x377   :  { %7607 = vmatprep.mubr.bf16.mxu1 %v12557_v31  ;;  %8068 = vmatpush1.bf16.msra.mxu0 %v10645_v11  ;;  %v1193_v11 = vld [vmem:[#allocation6 + $0xbd8] sm:$0xff] }
 0x378   :  { %8099 = vmatprep.mubr.bf16.mxu0 %v12557_v31  ;;  %7577 = vmatprep.subr.bf16.mxu1 %v10656_v12  ;;  %v1188_v12 = vld [vmem:[#allocation6 + $0xbb0] sm:$0xff]  ;;  %v10752_v28 = vcombine.high %v1185_v10, %v1193_v11  ;;  %v10751_v24 = vcombine.low %v1185_v10, %v1193_v11 }
 0x379   :  { %8069 = vmatprep.subr.bf16.mxu0 %v10662_v17  ;;  %v10741_v17 = vcombine.low %v1172_v1, %v1180_v4  ;;  %v10758_v49 = vcombine.high %v1188_v12, %v1196_v16  ;;  %v10757_v26 = vcombine.low %v1188_v12, %v1196_v16 }
 0x37a   :  { %7578 = vmatpush1.bf16.msra.mxu1 %v10655_v29  ;;  %v1201_v29 = vld [vmem:[#allocation6 + $0xc18] sm:$0xff] }
 0x37b   :  { %8070 = vmatpush1.bf16.msra.mxu0 %v10661_v19  ;;  %7579 = vmatprep.subr.bf16.mxu1 %v10672_v30  ;;  %v1209_v19 = vld [vmem:[#allocation6 + $0xc58] sm:$0xff]  ;;  %v1204_v30 = vld [vmem:[#allocation6 + $0xc30] sm:$0xff] }
 0x37c   :  { %8071 = vmatprep.subr.bf16.mxu0 %v10678_v18  ;;  %v1212_v18 = vld [vmem:[#allocation6 + $0xc70] sm:$0xff]  ;;  %v10768_v27 = vcombine.high %v1201_v29, %v1209_v19  ;;  %v10767_v38 = vcombine.low %v1201_v29, %v1209_v19 }
 0x37d   :  { %v10774_v32 = vcombine.high %v1204_v30, %v1212_v18  ;;  %v10773_v7 = vcombine.low %v1204_v30, %v1212_v18 }
 0x37e   :  { %7580 = vmatpush1.bf16.msra.mxu1 %v10671_v34  ;;  %v1217_v34 = vld [vmem:[#allocation6 + $0xc98] sm:$0xff] }
 0x37f   :  { %8072 = vmatpush1.bf16.msra.mxu0 %v10677_v52  ;;  %7581 = vmatprep.subr.bf16.mxu1 %v10688_v36  ;;  %v1225_v52 = vld [vmem:[#allocation6 + $0xcd8] sm:$0xff]  ;;  %v1220_v36 = vld [vmem:[#allocation6 + $0xcb0] sm:$0xff] }
 0x380   :  { %8073 = vmatprep.subr.bf16.mxu0 %v10694_v37  ;;  %v1228_v37 = vld [vmem:[#allocation6 + $0xcf0] sm:$0xff]  ;;  %v10784_v39 = vcombine.high %v1217_v34, %v1225_v52  ;;  %v10783_v53 = vcombine.low %v1217_v34, %v1225_v52 }
 0x381   :  { %v10790_v41 = vcombine.high %v1220_v36, %v1228_v37  ;;  %v10789_v47 = vcombine.low %v1220_v36, %v1228_v37 }
 0x382   :  { %7582 = vmatpush1.bf16.msra.mxu1 %v10687_v42  ;;  %v1233_v42 = vld [vmem:[#allocation6 + $0xd18] sm:$0xff] }
 0x383   :  { %8074 = vmatpush1.bf16.msra.mxu0 %v10693_v45  ;;  %7583 = vmatprep.subr.bf16.mxu1 %v10704_v51  ;;  %v1241_v45 = vld [vmem:[#allocation6 + $0xd58] sm:$0xff]  ;;  %v1236_v51 = vld [vmem:[#allocation6 + $0xd30] sm:$0xff] }
 0x384   :  { %8075 = vmatprep.subr.bf16.mxu0 %v10710_v20  ;;  %v1244_v20 = vld [vmem:[#allocation6 + $0xd70] sm:$0xff]  ;;  %v10800_v54 = vcombine.high %v1233_v42, %v1241_v45  ;;  %v10799_v62 = vcombine.low %v1233_v42, %v1241_v45 }
 0x385   :  { %v10806_v55 = vcombine.high %v1236_v51, %v1244_v20  ;;  %v10805_v0 = vcombine.low %v1236_v51, %v1244_v20 }
 0x386   :  { %7584 = vmatpush1.bf16.msra.mxu1 %v10703_v57  ;;  %v1249_v57 = vld [vmem:[#allocation6 + $0xd98] sm:$0xff] }
 0x387   :  { %8076 = vmatpush1.bf16.msra.mxu0 %v10709_v58  ;;  %7585 = vmatprep.subr.bf16.mxu1 %v10720_v61  ;;  %v1257_v58 = vld [vmem:[#allocation6 + $0xdd8] sm:$0xff]  ;;  %v1252_v61 = vld [vmem:[#allocation6 + $0xdb0] sm:$0xff] }
 0x388   :  { %8077 = vmatprep.subr.bf16.mxu0 %v10726_v14  ;;  %v1260_v14 = vld [vmem:[#allocation6 + $0xdf0] sm:$0xff]  ;;  %v10816_v1 = vcombine.high %v1249_v57, %v1257_v58  ;;  %v10815_v10 = vcombine.low %v1249_v57, %v1257_v58 }
 0x389   :  { %v10822_v4 = vcombine.high %v1252_v61, %v1260_v14  ;;  %v10821_v11 = vcombine.low %v1252_v61, %v1260_v14 }
 0x38a   :  { %7586 = vmatpush1.bf16.msra.mxu1 %v10719_v5  ;;  %v1265_v5 = vld [vmem:[#allocation6 + $0xe18] sm:$0xff] }
 0x38b   :  { %8078 = vmatpush1.bf16.msra.mxu0 %v10725_v6  ;;  %7587 = vmatprep.subr.bf16.mxu1 %v10736_v8  ;;  %v1273_v6 = vld [vmem:[#allocation6 + $0xe58] sm:$0xff]  ;;  %v1268_v8 = vld [vmem:[#allocation6 + $0xe30] sm:$0xff] }
 0x38c   :  { %8079 = vmatprep.subr.bf16.mxu0 %v10742_v9  ;;  %v1276_v9 = vld [vmem:[#allocation6 + $0xe70] sm:$0xff]  ;;  %v10832_v12 = vcombine.high %v1265_v5, %v1273_v6  ;;  %v10831_v29 = vcombine.low %v1265_v5, %v1273_v6 }
 0x38d   :  { %v10838_v16 = vcombine.high %v1268_v8, %v1276_v9  ;;  %v10837_v19 = vcombine.low %v1268_v8, %v1276_v9  ;;  %v1356_v5 = vld [vmem:[#allocation6 + $0x10f0] sm:$0xff]  ;;  %v1361_v9 = vld [vmem:[#allocation6 + $0x1118] sm:$0xff] }
 0x38e   :  { %7588 = vmatpush1.bf16.msra.mxu1 %v10735_v44  ;;  %v1281_v44 = vld [vmem:[#allocation6 + $0xe98] sm:$0xff] }
 0x38f   :  { %8080 = vmatpush1.bf16.msra.mxu0 %v10741_v17  ;;  %7589 = vmatprep.subr.bf16.mxu1 %v10752_v28  ;;  %v1289_v17 = vld [vmem:[#allocation6 + $0xed8] sm:$0xff]  ;;  %v1284_v28 = vld [vmem:[#allocation6 + $0xeb0] sm:$0xff] }
 0x390   :  { %8081 = vmatprep.subr.bf16.mxu0 %v10758_v49  ;;  %v1292_v49 = vld [vmem:[#allocation6 + $0xef0] sm:$0xff]  ;;  %v10848_v30 = vcombine.high %v1281_v44, %v1289_v17  ;;  %v10847_v34 = vcombine.low %v1281_v44, %v1289_v17 }
 0x391   :  { %v10854_v18 = vcombine.high %v1284_v28, %v1292_v49  ;;  %v10853_v52 = vcombine.low %v1284_v28, %v1292_v49 }
 0x392   :  { %7590 = vmatpush1.bf16.msra.mxu1 %v10751_v24  ;;  %v1297_v24 = vld [vmem:[#allocation6 + $0xf18] sm:$0xff] }
 0x393   :  { %8082 = vmatpush1.bf16.msra.mxu0 %v10757_v26  ;;  %7591 = vmatprep.subr.bf16.mxu1 %v10768_v27  ;;  %v1305_v26 = vld [vmem:[#allocation6 + $0xf58] sm:$0xff]  ;;  %v1300_v27 = vld [vmem:[#allocation6 + $0xf30] sm:$0xff] }
 0x394   :  { %8083 = vmatprep.subr.bf16.mxu0 %v10774_v32  ;;  %v1308_v32 = vld [vmem:[#allocation6 + $0xf70] sm:$0xff]  ;;  %v10864_v36 = vcombine.high %v1297_v24, %v1305_v26  ;;  %v10863_v42 = vcombine.low %v1297_v24, %v1305_v26 }
 0x395   :  { %v10870_v37 = vcombine.high %v1300_v27, %v1308_v32  ;;  %v10869_v45 = vcombine.low %v1300_v27, %v1308_v32 }
 0x396   :  { %7592 = vmatpush1.bf16.msra.mxu1 %v10767_v38  ;;  %v1313_v38 = vld [vmem:[#allocation6 + $0xf98] sm:$0xff] }
 0x397   :  { %8084 = vmatpush1.bf16.msra.mxu0 %v10773_v7  ;;  %7593 = vmatprep.subr.bf16.mxu1 %v10784_v39  ;;  %v1321_v7 = vld [vmem:[#allocation6 + $0xfd8] sm:$0xff]  ;;  %v1316_v39 = vld [vmem:[#allocation6 + $0xfb0] sm:$0xff] }
 0x398   :  { %8085 = vmatprep.subr.bf16.mxu0 %v10790_v41  ;;  %v1324_v41 = vld [vmem:[#allocation6 + $0xff0] sm:$0xff]  ;;  %v10880_v51 = vcombine.high %v1313_v38, %v1321_v7  ;;  %v10879_v57 = vcombine.low %v1313_v38, %v1321_v7 }
 0x399   :  { %v10886_v20 = vcombine.high %v1316_v39, %v1324_v41  ;;  %v10885_v58 = vcombine.low %v1316_v39, %v1324_v41 }
 0x39a   :  { %7594 = vmatpush1.bf16.msra.mxu1 %v10783_v53  ;;  %v1329_v53 = vld [vmem:[#allocation6 + $0x1018] sm:$0xff] }
 0x39b   :  { %8086 = vmatpush1.bf16.msra.mxu0 %v10789_v47  ;;  %7595 = vmatprep.subr.bf16.mxu1 %v10800_v54  ;;  %v1337_v47 = vld [vmem:[#allocation6 + $0x1058] sm:$0xff]  ;;  %v1332_v54 = vld [vmem:[#allocation6 + $0x1030] sm:$0xff] }
 0x39c   :  { %8087 = vmatprep.subr.bf16.mxu0 %v10806_v55  ;;  %v1340_v55 = vld [vmem:[#allocation6 + $0x1070] sm:$0xff]  ;;  %v10896_v61 = vcombine.high %v1329_v53, %v1337_v47 }
 0x39d   :  { %v10902_v14 = vcombine.high %v1332_v54, %v1340_v55  ;;  %v10901_v6 = vcombine.low %v1332_v54, %v1340_v55 }
 0x39e   :  { %7596 = vmatpush1.bf16.msra.mxu1 %v10799_v62  ;;  %v1345_v62 = vld [vmem:[#allocation6 + $0x1098] sm:$0xff] }
 0x39f   :  { %8088 = vmatpush1.bf16.msra.mxu0 %v10805_v0  ;;  %7597 = vmatprep.subr.bf16.mxu1 %v10816_v1  ;;  %v1353_v0 = vld [vmem:[#allocation6 + $0x10d8] sm:$0xff]  ;;  %v10895_v1 = vcombine.low %v1329_v53, %v1337_v47 }
 0x3a0   :  { %8089 = vmatprep.subr.bf16.mxu0 %v10822_v4  ;;  %v1348_v4 = vld [vmem:[#allocation6 + $0x10b0] sm:$0xff]  ;;  %v10912_v8 = vcombine.high %v1345_v62, %v1353_v0  ;;  %v10911_v44 = vcombine.low %v1345_v62, %v1353_v0 }
 0x3a1   :  { %v10917_v17 = vcombine.low %v1348_v4, %v1356_v5 }
 0x3a2   :  { %7598 = vmatpush1.bf16.msra.mxu1 %v10815_v10  ;;  %v1369_v10 = vld [vmem:[#allocation6 + $0x1158] sm:$0xff] }
 0x3a3   :  { %8090 = vmatpush1.bf16.msra.mxu0 %v10821_v11  ;;  %7599 = vmatprep.subr.bf16.mxu1 %v10832_v12  ;;  %v10918_v11 = vcombine.high %v1348_v4, %v1356_v5  ;;  %v1364_v12 = vld [vmem:[#allocation6 + $0x1130] sm:$0xff]  ;;  %v10928_v28 = vcombine.high %v1361_v9, %v1369_v10  ;;  %v10927_v24 = vcombine.low %v1361_v9, %v1369_v10  ;;  %v1441_v5 = vld [vmem:[#allocation6 + $0x1398] sm:$0xff] }
 0x3a4   :  { %8091 = vmatprep.subr.bf16.mxu0 %v10838_v16  ;;  %v1372_v16 = vld [vmem:[#allocation6 + $0x1170] sm:$0xff] }
 0x3a5   :  { %v10934_v49 = vcombine.high %v1364_v12, %v1372_v16  ;;  %v10933_v26 = vcombine.low %v1364_v12, %v1372_v16  ;;  %v1452_v9 = vld [vmem:[#allocation6 + $0x13f0] sm:$0xff] }
 0x3a6   :  { %7600 = vmatpush1.bf16.msra.mxu1 %v10831_v29  ;;  %v1377_v29 = vld [vmem:[#allocation6 + $0x1198] sm:$0xff] }
 0x3a7   :  { %8092 = vmatpush1.bf16.msra.mxu0 %v10837_v19  ;;  %7601 = vmatprep.subr.bf16.mxu1 %v10848_v30  ;;  %v1385_v19 = vld [vmem:[#allocation6 + $0x11d8] sm:$0xff]  ;;  %v1380_v30 = vld [vmem:[#allocation6 + $0x11b0] sm:$0xff] }
 0x3a8   :  { %8093 = vmatprep.subr.bf16.mxu0 %v10854_v18  ;;  %v1388_v18 = vld [vmem:[#allocation6 + $0x11f0] sm:$0xff]  ;;  %v10944_v27 = vcombine.high %v1377_v29, %v1385_v19  ;;  %v10943_v38 = vcombine.low %v1377_v29, %v1385_v19 }
 0x3a9   :  { %v10950_v32 = vcombine.high %v1380_v30, %v1388_v18  ;;  %v10949_v7 = vcombine.low %v1380_v30, %v1388_v18 }
 0x3aa   :  { %7602 = vmatpush1.bf16.msra.mxu1 %v10847_v34  ;;  %v1393_v34 = vld [vmem:[#allocation6 + $0x1218] sm:$0xff] }
 0x3ab   :  { %8094 = vmatpush1.bf16.msra.mxu0 %v10853_v52  ;;  %7603 = vmatprep.subr.bf16.mxu1 %v10864_v36  ;;  %v1401_v52 = vld [vmem:[#allocation6 + $0x1258] sm:$0xff]  ;;  %v1396_v36 = vld [vmem:[#allocation6 + $0x1230] sm:$0xff] }
 0x3ac   :  { %8095 = vmatprep.subr.bf16.mxu0 %v10870_v37  ;;  %v1404_v37 = vld [vmem:[#allocation6 + $0x1270] sm:$0xff]  ;;  %v10960_v39 = vcombine.high %v1393_v34, %v1401_v52  ;;  %v10959_v53 = vcombine.low %v1393_v34, %v1401_v52 }
 0x3ad   :  { %v10966_v41 = vcombine.high %v1396_v36, %v1404_v37  ;;  %v10965_v47 = vcombine.low %v1396_v36, %v1404_v37 }
 0x3ae   :  { %7604 = vmatpush1.bf16.msra.mxu1 %v10863_v42  ;;  %v1409_v42 = vld [vmem:[#allocation6 + $0x1298] sm:$0xff] }
 0x3af   :  { %8096 = vmatpush1.bf16.msra.mxu0 %v10869_v45  ;;  %7605 = vmatprep.subr.bf16.mxu1 %v10880_v51  ;;  %v1417_v45 = vld [vmem:[#allocation6 + $0x12d8] sm:$0xff]  ;;  %v1412_v51 = vld [vmem:[#allocation6 + $0x12b0] sm:$0xff] }
 0x3b0   :  { %8097 = vmatprep.subr.bf16.mxu0 %v10886_v20  ;;  %v1420_v20 = vld [vmem:[#allocation6 + $0x12f0] sm:$0xff]  ;;  %v10976_v54 = vcombine.high %v1409_v42, %v1417_v45  ;;  %v10975_v62 = vcombine.low %v1409_v42, %v1417_v45 }
 0x3b1   :  { %v10982_v55 = vcombine.high %v1412_v51, %v1420_v20  ;;  %v10981_v0 = vcombine.low %v1412_v51, %v1420_v20 }
 0x3b2   :  { %7606 = vmatpush1.bf16.msra.mxu1 %v10879_v57  ;;  %v1425_v57 = vld [vmem:[#allocation6 + $0x1318] sm:$0xff] }
 0x3b3   :  { %8098 = vmatpush1.bf16.msra.mxu0 %v10885_v58  ;;  %7616 = vmatprep.subr.bf16.mxu1 %v10896_v61  ;;  %v1433_v58 = vld [vmem:[#allocation6 + $0x1358] sm:$0xff]  ;;  %v1428_v61 = vld [vmem:[#allocation6 + $0x1330] sm:$0xff] }
 0x3b4   :  { %8108 = vmatprep.subr.bf16.mxu0 %v10902_v14  ;;  %v1436_v14 = vld [vmem:[#allocation6 + $0x1370] sm:$0xff]  ;;  %v10991_v10 = vcombine.low %v1425_v57, %v1433_v58 }
 0x3b5   :  { %7608 = vmatmul.mubr.bf16.vlgmr.msra.gmra.mrb[16].mxu1 %v12581_v46  ;;  %v10998_v4 = vcombine.high %v1428_v61, %v1436_v14 }
 0x3b6   :  { %8100 = vmatmul.mubr.bf16.vlgmr.msra.gmra.mrb[16].mxu0 %v12581_v46  ;;  %7617 = vmatpush1.bf16.msra.mxu1 %v10895_v1  ;;  %v10992_v1 = vcombine.high %v1425_v57, %v1433_v58 }
 0x3b7   :  { %7648 = vmatprep.mubr.bf16.mxu1 %v12583_v60  ;;  %8109 = vmatpush1.bf16.msra.mxu0 %v10901_v6  ;;  %v1449_v6 = vld [vmem:[#allocation6 + $0x13d8] sm:$0xff] }
 0x3b8   :  { %8140 = vmatprep.mubr.bf16.mxu0 %v12583_v60  ;;  %7618 = vmatprep.subr.bf16.mxu1 %v10912_v8  ;;  %v1444_v8 = vld [vmem:[#allocation6 + $0x13b0] sm:$0xff]  ;;  %v11008_v12 = vcombine.high %v1441_v5, %v1449_v6  ;;  %v11007_v29 = vcombine.low %v1441_v5, %v1449_v6 }
 0x3b9   :  { %8110 = vmatprep.subr.bf16.mxu0 %v10918_v11  ;;  %v10997_v11 = vcombine.low %v1428_v61, %v1436_v14  ;;  %v11014_v16 = vcombine.high %v1444_v8, %v1452_v9  ;;  %v11013_v19 = vcombine.low %v1444_v8, %v1452_v9 }
 0x3ba   :  { %7619 = vmatpush1.bf16.msra.mxu1 %v10911_v44  ;;  %v1457_v44 = vld [vmem:[#allocation6 + $0x1418] sm:$0xff] }
 0x3bb   :  { %8111 = vmatpush1.bf16.msra.mxu0 %v10917_v17  ;;  %7620 = vmatprep.subr.bf16.mxu1 %v10928_v28  ;;  %v1465_v17 = vld [vmem:[#allocation6 + $0x1458] sm:$0xff]  ;;  %v1460_v28 = vld [vmem:[#allocation6 + $0x1430] sm:$0xff] }
 0x3bc   :  { %8112 = vmatprep.subr.bf16.mxu0 %v10934_v49  ;;  %v1468_v49 = vld [vmem:[#allocation6 + $0x1470] sm:$0xff]  ;;  %v11024_v30 = vcombine.high %v1457_v44, %v1465_v17  ;;  %v11023_v34 = vcombine.low %v1457_v44, %v1465_v17 }
 0x3bd   :  { %v11030_v18 = vcombine.high %v1460_v28, %v1468_v49  ;;  %v11029_v52 = vcombine.low %v1460_v28, %v1468_v49 }
 0x3be   :  { %7621 = vmatpush1.bf16.msra.mxu1 %v10927_v24  ;;  %v1473_v24 = vld [vmem:[#allocation6 + $0x1498] sm:$0xff] }
 0x3bf   :  { %8113 = vmatpush1.bf16.msra.mxu0 %v10933_v26  ;;  %7622 = vmatprep.subr.bf16.mxu1 %v10944_v27  ;;  %v1481_v26 = vld [vmem:[#allocation6 + $0x14d8] sm:$0xff]  ;;  %v1476_v27 = vld [vmem:[#allocation6 + $0x14b0] sm:$0xff] }
 0x3c0   :  { %8114 = vmatprep.subr.bf16.mxu0 %v10950_v32  ;;  %v1484_v32 = vld [vmem:[#allocation6 + $0x14f0] sm:$0xff]  ;;  %v11040_v36 = vcombine.high %v1473_v24, %v1481_v26  ;;  %v11039_v42 = vcombine.low %v1473_v24, %v1481_v26 }
 0x3c1   :  { %v11046_v37 = vcombine.high %v1476_v27, %v1484_v32  ;;  %v11045_v45 = vcombine.low %v1476_v27, %v1484_v32 }
 0x3c2   :  { %7623 = vmatpush1.bf16.msra.mxu1 %v10943_v38  ;;  %v1489_v38 = vld [vmem:[#allocation6 + $0x1518] sm:$0xff] }
 0x3c3   :  { %8115 = vmatpush1.bf16.msra.mxu0 %v10949_v7  ;;  %7624 = vmatprep.subr.bf16.mxu1 %v10960_v39  ;;  %v1497_v7 = vld [vmem:[#allocation6 + $0x1558] sm:$0xff]  ;;  %v1492_v39 = vld [vmem:[#allocation6 + $0x1530] sm:$0xff] }
 0x3c4   :  { %8116 = vmatprep.subr.bf16.mxu0 %v10966_v41  ;;  %v1500_v41 = vld [vmem:[#allocation6 + $0x1570] sm:$0xff]  ;;  %v11056_v51 = vcombine.high %v1489_v38, %v1497_v7  ;;  %v11055_v57 = vcombine.low %v1489_v38, %v1497_v7 }
 0x3c5   :  { %v11062_v20 = vcombine.high %v1492_v39, %v1500_v41  ;;  %v11061_v58 = vcombine.low %v1492_v39, %v1500_v41 }
 0x3c6   :  { %7625 = vmatpush1.bf16.msra.mxu1 %v10959_v53  ;;  %v1505_v53 = vld [vmem:[#allocation6 + $0x1598] sm:$0xff] }
 0x3c7   :  { %8117 = vmatpush1.bf16.msra.mxu0 %v10965_v47  ;;  %7626 = vmatprep.subr.bf16.mxu1 %v10976_v54  ;;  %v1513_v47 = vld [vmem:[#allocation6 + $0x15d8] sm:$0xff]  ;;  %v1508_v54 = vld [vmem:[#allocation6 + $0x15b0] sm:$0xff] }
 0x3c8   :  { %8118 = vmatprep.subr.bf16.mxu0 %v10982_v55  ;;  %v1516_v55 = vld [vmem:[#allocation6 + $0x15f0] sm:$0xff]  ;;  %v11072_v61 = vcombine.high %v1505_v53, %v1513_v47  ;;  %v11071_v5 = vcombine.low %v1505_v53, %v1513_v47 }
 0x3c9   :  { %v11078_v14 = vcombine.high %v1508_v54, %v1516_v55  ;;  %v11077_v6 = vcombine.low %v1508_v54, %v1516_v55 }
 0x3ca   :  { %7627 = vmatpush1.bf16.msra.mxu1 %v10975_v62  ;;  %v1521_v62 = vld [vmem:[#allocation6 + $0x1618] sm:$0xff] }
 0x3cb   :  { %8119 = vmatpush1.bf16.msra.mxu0 %v10981_v0  ;;  %7628 = vmatprep.subr.bf16.mxu1 %v10992_v1  ;;  %v1529_v0 = vld [vmem:[#allocation6 + $0x1658] sm:$0xff]  ;;  %v1524_v1 = vld [vmem:[#allocation6 + $0x1630] sm:$0xff] }
 0x3cc   :  { %8120 = vmatprep.subr.bf16.mxu0 %v10998_v4  ;;  %v1532_v4 = vld [vmem:[#allocation6 + $0x1670] sm:$0xff]  ;;  %v11088_v8 = vcombine.high %v1521_v62, %v1529_v0  ;;  %v11087_v44 = vcombine.low %v1521_v62, %v1529_v0 }
 0x3cd   :  { %v11094_v9 = vcombine.high %v1524_v1, %v1532_v4  ;;  %v11093_v17 = vcombine.low %v1524_v1, %v1532_v4  ;;  %v1612_v62 = vld [vmem:[#allocation6 + $0x18f0] sm:$0xff]  ;;  %v1617_v4 = vld [vmem:[#allocation6 + $0x1918] sm:$0xff] }
 0x3ce   :  { %7629 = vmatpush1.bf16.msra.mxu1 %v10991_v10  ;;  %v1537_v10 = vld [vmem:[#allocation6 + $0x1698] sm:$0xff] }
 0x3cf   :  { %8121 = vmatpush1.bf16.msra.mxu0 %v10997_v11  ;;  %7630 = vmatprep.subr.bf16.mxu1 %v11008_v12  ;;  %v1545_v11 = vld [vmem:[#allocation6 + $0x16d8] sm:$0xff]  ;;  %v1540_v12 = vld [vmem:[#allocation6 + $0x16b0] sm:$0xff] }
 0x3d0   :  { %8122 = vmatprep.subr.bf16.mxu0 %v11014_v16  ;;  %v1548_v16 = vld [vmem:[#allocation6 + $0x16f0] sm:$0xff]  ;;  %v11104_v28 = vcombine.high %v1537_v10, %v1545_v11  ;;  %v11103_v24 = vcombine.low %v1537_v10, %v1545_v11 }
 0x3d1   :  { %v11110_v49 = vcombine.high %v1540_v12, %v1548_v16  ;;  %v11109_v26 = vcombine.low %v1540_v12, %v1548_v16 }
 0x3d2   :  { %7631 = vmatpush1.bf16.msra.mxu1 %v11007_v29  ;;  %v1553_v29 = vld [vmem:[#allocation6 + $0x1718] sm:$0xff] }
 0x3d3   :  { %8123 = vmatpush1.bf16.msra.mxu0 %v11013_v19  ;;  %7632 = vmatprep.subr.bf16.mxu1 %v11024_v30  ;;  %v1561_v19 = vld [vmem:[#allocation6 + $0x1758] sm:$0xff]  ;;  %v1556_v30 = vld [vmem:[#allocation6 + $0x1730] sm:$0xff] }
 0x3d4   :  { %8124 = vmatprep.subr.bf16.mxu0 %v11030_v18  ;;  %v1564_v18 = vld [vmem:[#allocation6 + $0x1770] sm:$0xff]  ;;  %v11120_v27 = vcombine.high %v1553_v29, %v1561_v19  ;;  %v11119_v38 = vcombine.low %v1553_v29, %v1561_v19 }
 0x3d5   :  { %v11126_v32 = vcombine.high %v1556_v30, %v1564_v18  ;;  %v11125_v7 = vcombine.low %v1556_v30, %v1564_v18 }
 0x3d6   :  { %7633 = vmatpush1.bf16.msra.mxu1 %v11023_v34  ;;  %v1569_v34 = vld [vmem:[#allocation6 + $0x1798] sm:$0xff] }
 0x3d7   :  { %8125 = vmatpush1.bf16.msra.mxu0 %v11029_v52  ;;  %7634 = vmatprep.subr.bf16.mxu1 %v11040_v36  ;;  %v1577_v52 = vld [vmem:[#allocation6 + $0x17d8] sm:$0xff]  ;;  %v1572_v36 = vld [vmem:[#allocation6 + $0x17b0] sm:$0xff] }
 0x3d8   :  { %8126 = vmatprep.subr.bf16.mxu0 %v11046_v37  ;;  %v1580_v37 = vld [vmem:[#allocation6 + $0x17f0] sm:$0xff]  ;;  %v11136_v39 = vcombine.high %v1569_v34, %v1577_v52  ;;  %v11135_v53 = vcombine.low %v1569_v34, %v1577_v52 }
 0x3d9   :  { %v11142_v41 = vcombine.high %v1572_v36, %v1580_v37  ;;  %v11141_v47 = vcombine.low %v1572_v36, %v1580_v37 }
 0x3da   :  { %7635 = vmatpush1.bf16.msra.mxu1 %v11039_v42  ;;  %v1585_v42 = vld [vmem:[#allocation6 + $0x1818] sm:$0xff] }
 0x3db   :  { %8127 = vmatpush1.bf16.msra.mxu0 %v11045_v45  ;;  %7636 = vmatprep.subr.bf16.mxu1 %v11056_v51  ;;  %v1593_v45 = vld [vmem:[#allocation6 + $0x1858] sm:$0xff]  ;;  %v1588_v51 = vld [vmem:[#allocation6 + $0x1830] sm:$0xff] }
 0x3dc   :  { %8128 = vmatprep.subr.bf16.mxu0 %v11062_v20  ;;  %v1596_v20 = vld [vmem:[#allocation6 + $0x1870] sm:$0xff]  ;;  %v11152_v54 = vcombine.high %v1585_v42, %v1593_v45 }
 0x3dd   :  { %v11158_v55 = vcombine.high %v1588_v51, %v1596_v20  ;;  %v11157_v0 = vcombine.low %v1588_v51, %v1596_v20 }
 0x3de   :  { %7637 = vmatpush1.bf16.msra.mxu1 %v11055_v57  ;;  %v1601_v57 = vld [vmem:[#allocation6 + $0x1898] sm:$0xff] }
 0x3df   :  { %8129 = vmatpush1.bf16.msra.mxu0 %v11061_v58  ;;  %7638 = vmatprep.subr.bf16.mxu1 %v11072_v61  ;;  %v1609_v58 = vld [vmem:[#allocation6 + $0x18d8] sm:$0xff]  ;;  %v11151_v61 = vcombine.low %v1585_v42, %v1593_v45 }
 0x3e0   :  { %8130 = vmatprep.subr.bf16.mxu0 %v11078_v14  ;;  %v1604_v14 = vld [vmem:[#allocation6 + $0x18b0] sm:$0xff]  ;;  %v11168_v1 = vcombine.high %v1601_v57, %v1609_v58  ;;  %v11167_v10 = vcombine.low %v1601_v57, %v1609_v58 }
 0x3e1   :  { %v11173_v11 = vcombine.low %v1604_v14, %v1612_v62 }
 0x3e2   :  { %7639 = vmatpush1.bf16.msra.mxu1 %v11071_v5  ;;  %v1625_v5 = vld [vmem:[#allocation6 + $0x1958] sm:$0xff] }
 0x3e3   :  { %8131 = vmatpush1.bf16.msra.mxu0 %v11077_v6  ;;  %7640 = vmatprep.subr.bf16.mxu1 %v11088_v8  ;;  %v11174_v6 = vcombine.high %v1604_v14, %v1612_v62  ;;  %v1620_v8 = vld [vmem:[#allocation6 + $0x1930] sm:$0xff]  ;;  %v11184_v12 = vcombine.high %v1617_v4, %v1625_v5  ;;  %v11183_v29 = vcombine.low %v1617_v4, %v1625_v5 }
 0x3e4   :  { %8132 = vmatprep.subr.bf16.mxu0 %v11094_v9  ;;  %v1628_v9 = vld [vmem:[#allocation6 + $0x1970] sm:$0xff] }
 0x3e5   :  { %v11190_v16 = vcombine.high %v1620_v8, %v1628_v9  ;;  %v11189_v19 = vcombine.low %v1620_v8, %v1628_v9  ;;  %v1708_v8 = vld [vmem:[#allocation6 + $0x1bf0] sm:$0xff] }
 0x3e6   :  { %7641 = vmatpush1.bf16.msra.mxu1 %v11087_v44  ;;  %v1633_v44 = vld [vmem:[#allocation6 + $0x1998] sm:$0xff] }
 0x3e7   :  { %8133 = vmatpush1.bf16.msra.mxu0 %v11093_v17  ;;  %7642 = vmatprep.subr.bf16.mxu1 %v11104_v28  ;;  %v1641_v17 = vld [vmem:[#allocation6 + $0x19d8] sm:$0xff]  ;;  %v1636_v28 = vld [vmem:[#allocation6 + $0x19b0] sm:$0xff] }
 0x3e8   :  { %8134 = vmatprep.subr.bf16.mxu0 %v11110_v49  ;;  %v1644_v49 = vld [vmem:[#allocation6 + $0x19f0] sm:$0xff]  ;;  %v11200_v30 = vcombine.high %v1633_v44, %v1641_v17  ;;  %v11199_v34 = vcombine.low %v1633_v44, %v1641_v17 }
 0x3e9   :  { %v11206_v18 = vcombine.high %v1636_v28, %v1644_v49  ;;  %v11205_v52 = vcombine.low %v1636_v28, %v1644_v49 }
 0x3ea   :  { %7643 = vmatpush1.bf16.msra.mxu1 %v11103_v24  ;;  %v1649_v24 = vld [vmem:[#allocation6 + $0x1a18] sm:$0xff] }
 0x3eb   :  { %8135 = vmatpush1.bf16.msra.mxu0 %v11109_v26  ;;  %7644 = vmatprep.subr.bf16.mxu1 %v11120_v27  ;;  %v1657_v26 = vld [vmem:[#allocation6 + $0x1a58] sm:$0xff]  ;;  %v1652_v27 = vld [vmem:[#allocation6 + $0x1a30] sm:$0xff] }
 0x3ec   :  { %8136 = vmatprep.subr.bf16.mxu0 %v11126_v32  ;;  %v1660_v32 = vld [vmem:[#allocation6 + $0x1a70] sm:$0xff]  ;;  %v11216_v36 = vcombine.high %v1649_v24, %v1657_v26  ;;  %v11215_v42 = vcombine.low %v1649_v24, %v1657_v26 }
 0x3ed   :  { %v11222_v37 = vcombine.high %v1652_v27, %v1660_v32  ;;  %v11221_v45 = vcombine.low %v1652_v27, %v1660_v32 }
 0x3ee   :  { %7645 = vmatpush1.bf16.msra.mxu1 %v11119_v38  ;;  %v1665_v38 = vld [vmem:[#allocation6 + $0x1a98] sm:$0xff] }
 0x3ef   :  { %8137 = vmatpush1.bf16.msra.mxu0 %v11125_v7  ;;  %7646 = vmatprep.subr.bf16.mxu1 %v11136_v39  ;;  %v1673_v7 = vld [vmem:[#allocation6 + $0x1ad8] sm:$0xff]  ;;  %v1668_v39 = vld [vmem:[#allocation6 + $0x1ab0] sm:$0xff] }
 0x3f0   :  { %8138 = vmatprep.subr.bf16.mxu0 %v11142_v41  ;;  %v1676_v41 = vld [vmem:[#allocation6 + $0x1af0] sm:$0xff]  ;;  %v11232_v51 = vcombine.high %v1665_v38, %v1673_v7  ;;  %v11231_v57 = vcombine.low %v1665_v38, %v1673_v7 }
 0x3f1   :  { %v11238_v20 = vcombine.high %v1668_v39, %v1676_v41  ;;  %v11237_v58 = vcombine.low %v1668_v39, %v1676_v41 }
 0x3f2   :  { %7647 = vmatpush1.bf16.msra.mxu1 %v11135_v53  ;;  %v1681_v53 = vld [vmem:[#allocation6 + $0x1b18] sm:$0xff] }
 0x3f3   :  { %8139 = vmatpush1.bf16.msra.mxu0 %v11141_v47  ;;  %7657 = vmatprep.subr.bf16.mxu1 %v11152_v54  ;;  %v1689_v47 = vld [vmem:[#allocation6 + $0x1b58] sm:$0xff]  ;;  %v1684_v54 = vld [vmem:[#allocation6 + $0x1b30] sm:$0xff] }
 0x3f4   :  { %8149 = vmatprep.subr.bf16.mxu0 %v11158_v55  ;;  %v1692_v55 = vld [vmem:[#allocation6 + $0x1b70] sm:$0xff] }
 0x3f5   :  { %7649 = vmatmul.mubr.bf16.vlgmr.msra.gmra.mrb[16].mxu1 %v12601_v33  ;;  %v11254_v62 = vcombine.high %v1684_v54, %v1692_v55  ;;  %v11253_v44 = vcombine.low %v1684_v54, %v1692_v55 }
 0x3f6   :  { %8141 = vmatmul.mubr.bf16.vlgmr.msra.gmra.mrb[16].mxu0 %v12601_v33  ;;  %7658 = vmatpush1.bf16.msra.mxu1 %v11151_v61  ;;  %v11248_v61 = vcombine.high %v1681_v53, %v1689_v47 }
 0x3f7   :  { %7689 = vmatprep.mubr.bf16.mxu1 %v12603_v40  ;;  %8150 = vmatpush1.bf16.msra.mxu0 %v11157_v0  ;;  %v1697_v0 = vld [vmem:[#allocation6 + $0x1b98] sm:$0xff] }
 0x3f8   :  { %8181 = vmatprep.mubr.bf16.mxu0 %v12603_v40  ;;  %7659 = vmatprep.subr.bf16.mxu1 %v11168_v1  ;;  %v1705_v1 = vld [vmem:[#allocation6 + $0x1bd8] sm:$0xff] }
 0x3f9   :  { %8151 = vmatprep.subr.bf16.mxu0 %v11174_v6  ;;  %v1700_v6 = vld [vmem:[#allocation6 + $0x1bb0] sm:$0xff]  ;;  %v11264_v17 = vcombine.high %v1697_v0, %v1705_v1  ;;  %v11263_v24 = vcombine.low %v1697_v0, %v1705_v1 }
 0x3fa   :  { %7660 = vmatpush1.bf16.msra.mxu1 %v11167_v10  ;;  %v11270_v49 = vcombine.high %v1700_v6, %v1708_v8  ;;  %v11269_v26 = vcombine.low %v1700_v6, %v1708_v8 }
 0x3fb   :  { %8152 = vmatpush1.bf16.msra.mxu0 %v11173_v11  ;;  %7661 = vmatprep.subr.bf16.mxu1 %v11184_v12  ;;  %v11247_v11 = vcombine.low %v1681_v53, %v1689_v47 }
 0x3fc   :  { %8153 = vmatprep.subr.bf16.mxu0 %v11190_v16 }
 0x3fe   :  { %7662 = vmatpush1.bf16.msra.mxu1 %v11183_v29  ;;  %v1713_v29 = vld [vmem:[#allocation6 + $0x1c18] sm:$0xff] }
 0x3ff   :  { %8154 = vmatpush1.bf16.msra.mxu0 %v11189_v19  ;;  %7663 = vmatprep.subr.bf16.mxu1 %v11200_v30  ;;  %v1721_v19 = vld [vmem:[#allocation6 + $0x1c58] sm:$0xff]  ;;  %v1716_v30 = vld [vmem:[#allocation6 + $0x1c30] sm:$0xff] }
 0x400   :  { %8155 = vmatprep.subr.bf16.mxu0 %v11206_v18  ;;  %v1724_v18 = vld [vmem:[#allocation6 + $0x1c70] sm:$0xff]  ;;  %v11280_v27 = vcombine.high %v1713_v29, %v1721_v19  ;;  %v11279_v38 = vcombine.low %v1713_v29, %v1721_v19  ;;  %v1793_v29 = vld [vmem:[#allocation6 + $0x1e98] sm:$0xff] }
 0x401   :  { %v11286_v32 = vcombine.high %v1716_v30, %v1724_v18  ;;  %v11285_v7 = vcombine.low %v1716_v30, %v1724_v18  ;;  %v1801_v19 = vld [vmem:[#allocation6 + $0x1ed8] sm:$0xff]  ;;  %v1796_v30 = vld [vmem:[#allocation6 + $0x1eb0] sm:$0xff] }
 0x402   :  { %7664 = vmatpush1.bf16.msra.mxu1 %v11199_v34  ;;  %v1729_v34 = vld [vmem:[#allocation6 + $0x1c98] sm:$0xff]  ;;  %v1804_v18 = vld [vmem:[#allocation6 + $0x1ef0] sm:$0xff] }
 0x403   :  { %8156 = vmatpush1.bf16.msra.mxu0 %v11205_v52  ;;  %7665 = vmatprep.subr.bf16.mxu1 %v11216_v36  ;;  %v1737_v52 = vld [vmem:[#allocation6 + $0x1cd8] sm:$0xff]  ;;  %v1732_v36 = vld [vmem:[#allocation6 + $0x1cb0] sm:$0xff] }
 0x404   :  { %8157 = vmatprep.subr.bf16.mxu0 %v11222_v37  ;;  %v1740_v37 = vld [vmem:[#allocation6 + $0x1cf0] sm:$0xff]  ;;  %v11296_v39 = vcombine.high %v1729_v34, %v1737_v52  ;;  %v11295_v53 = vcombine.low %v1729_v34, %v1737_v52  ;;  %v1809_v34 = vld [vmem:[#allocation6 + $0x1f18] sm:$0xff] }
 0x405   :  { %v11302_v41 = vcombine.high %v1732_v36, %v1740_v37  ;;  %v11301_v47 = vcombine.low %v1732_v36, %v1740_v37  ;;  %v1817_v52 = vld [vmem:[#allocation6 + $0x1f58] sm:$0xff]  ;;  %v1812_v36 = vld [vmem:[#allocation6 + $0x1f30] sm:$0xff] }
 0x406   :  { %7666 = vmatpush1.bf16.msra.mxu1 %v11215_v42  ;;  %v1745_v42 = vld [vmem:[#allocation6 + $0x1d18] sm:$0xff]  ;;  %v1820_v37 = vld [vmem:[#allocation6 + $0x1f70] sm:$0xff] }
 0x407   :  { %8158 = vmatpush1.bf16.msra.mxu0 %v11221_v45  ;;  %7667 = vmatprep.subr.bf16.mxu1 %v11232_v51  ;;  %v1753_v45 = vld [vmem:[#allocation6 + $0x1d58] sm:$0xff]  ;;  %v1748_v51 = vld [vmem:[#allocation6 + $0x1d30] sm:$0xff] }
 0x408   :  { %v12656_v14 = vpop.f32.mrb[12].mxu1  ;;  %8159 = vmatprep.subr.bf16.mxu0 %v11238_v20  ;;  %v1756_v20 = vld [vmem:[#allocation6 + $0x1d70] sm:$0xff]  ;;  %v11312_v54 = vcombine.high %v1745_v42, %v1753_v45  ;;  %v11311_v0 = vcombine.low %v1745_v42, %v1753_v45  ;;  %v11382_v42 = vcombine.high %v1812_v36, %v1820_v37  ;;  %v1825_v45 = vld [vmem:[#allocation6 + $0x1f98] sm:$0xff] }
 0x409   :  { %v12658_v4 = vpop.f32.mrb[12].mxu0  ;;  %v12660_v5 = vpop.f32.mrb[13].mxu1  ;;  %v11318_v55 = vcombine.high %v1748_v51, %v1756_v20  ;;  %v11317_v1 = vcombine.low %v1748_v51, %v1756_v20  ;;  %v1833_v51 = vld [vmem:[#allocation6 + $0x1fd8] sm:$0xff]  ;;  %v1828_v20 = vld [vmem:[#allocation6 + $0x1fb0] sm:$0xff] }
 0x40a   :  { %v12662_v9 = vpop.f32.mrb[13].mxu0  ;;  %v7367_v10 = vpop.f32.mrb[14].mxu1  ;;  %7668 = vmatpush1.bf16.msra.mxu1 %v11231_v57  ;;  %v1761_v57 = vld [vmem:[#allocation6 + $0x1d98] sm:$0xff] }
 0x40b   :  { %v7859_v12 = vpop.f32.mrb[14].mxu0  ;;  %8160 = vmatpush1.bf16.msra.mxu0 %v11237_v58  ;;  %v7368_v16 = vpop.f32.mrb[15].mxu1  ;;  %7669 = vmatprep.subr.bf16.mxu1 %v11248_v61  ;;  %v1769_v58 = vld [vmem:[#allocation6 + $0x1dd8] sm:$0xff]  ;;  %v1764_v61 = vld [vmem:[#allocation6 + $0x1db0] sm:$0xff] }
 0x40c   :  { %v7860_v28 = vpop.f32.mrb[15].mxu0  ;;  %8161 = vmatprep.subr.bf16.mxu0 %v11254_v62  ;;  %v1772_v62 = vld [vmem:[#allocation6 + $0x1df0] sm:$0xff]  ;;  %v11328_v6 = vcombine.high %v1761_v57, %v1769_v58  ;;  %v1777_v10 = vld [vmem:[#allocation6 + $0x1e18] sm:$0xff] }
 0x40d   :  { %v11334_v8 = vcombine.high %v1764_v61, %v1772_v62  ;;  %v1780_v12 = vld [vmem:[#allocation6 + $0x1e30] sm:$0xff] }
 0x40e   :  { %7670 = vmatpush1.bf16.msra.mxu1 %v11247_v11  ;;  %v1785_v11 = vld [vmem:[#allocation6 + $0x1e58] sm:$0xff]  ;;  %v1788_v16 = vld [vmem:[#allocation6 + $0x1e70] sm:$0xff] }
 0x40f   :  { %8162 = vmatpush1.bf16.msra.mxu0 %v11253_v44  ;;  %7671 = vmatprep.subr.bf16.mxu1 %v11264_v17  ;;  %v11327_v44 = vcombine.low %v1761_v57, %v1769_v58  ;;  %v11333_v17 = vcombine.low %v1764_v61, %v1772_v62  ;;  %v11344_v28 = vcombine.high %v1777_v10, %v1785_v11  ;;  %v819_v61 = vld [vmem:[#allocation6 + $0x28] sm:$0xff] }
 0x410   :  { %8163 = vmatprep.subr.bf16.mxu0 %v11270_v49  ;;  %v11350_v49 = vcombine.high %v1780_v12, %v1788_v16  ;;  %v11392_v57 = vcombine.high %v1825_v45, %v1833_v51  ;;  %v827_v62 = vld [vmem:[#allocation6 + $0x68] sm:$0xff] }
 0x412   :  { %7672 = vmatpush1.bf16.msra.mxu1 %v11263_v24  ;;  %v11343_v24 = vcombine.low %v1777_v10, %v1785_v11  ;;  %v11821_v10 = vld [vmem:[#allocation9 + $0x4] ss:$8 sps:$4 sm:$0xff]   ;;  %v835_v11 = vld [vmem:[#allocation6 + $0xa8] sm:$0xff] }
 0x413   :  { %8164 = vmatpush1.bf16.msra.mxu0 %v11269_v26  ;;  %7673 = vmatprep.subr.bf16.mxu1 %v11280_v27  ;;  %v11349_v26 = vcombine.low %v1780_v12, %v1788_v16  ;;  %v11360_v27 = vcombine.high %v1793_v29, %v1801_v19  ;;  %v843_v12 = vld [vmem:[#allocation6 + $0xe8] sm:$0xff] }
 0x414   :  { %8165 = vmatprep.subr.bf16.mxu0 %v11286_v32  ;;  %v11366_v32 = vcombine.high %v1796_v30, %v1804_v18 }
 0x416   :  { %7674 = vmatpush1.bf16.msra.mxu1 %v11279_v38  ;;  %v11359_v38 = vcombine.low %v1793_v29, %v1801_v19  ;;  %v11824_v29 = vld [vmem:[#allocation9 + $0x14] ss:$8 sps:$4 sm:$0xff]  }
 0x417   :  { %8166 = vmatpush1.bf16.msra.mxu0 %v11285_v7  ;;  %7675 = vmatprep.subr.bf16.mxu1 %v11296_v39  ;;  %v12664_v7 = vld [vmem:[#allocation7] sm:$0xff]  ;;  %v11365_v39 = vcombine.low %v1796_v30, %v1804_v18  ;;  %v10403_v30 = vcombine.low %v835_v11, %v843_v12 }
 0x418   :  { %8167 = vmatprep.subr.bf16.mxu0 %v11302_v41  ;;  %v11376_v41 = vcombine.high %v1809_v34, %v1817_v52  ;;  %v11822_v18 = vld [vmem:[#allocation9 + $0x10] ss:$8 sps:$4 sm:$0xff]  }
 0x41a   :  { %7676 = vmatpush1.bf16.msra.mxu1 %v11295_v53  ;;  %v1836_v53 = vld [vmem:[#allocation6 + $0x1ff0] sm:$0xff] }
 0x41b   :  { %8168 = vmatpush1.bf16.msra.mxu0 %v11301_v47  ;;  %7677 = vmatprep.subr.bf16.mxu1 %v11312_v54  ;;  %v1849_v47 = vrot.slane %v12664_v7, %v12530_v50  ;;  %v11375_v54 = vcombine.low %v1809_v34, %v1817_v52  ;;  %v11398_v58 = vcombine.high %v1828_v20, %v1836_v53  ;;  %v11825_v52 = vld [vmem:[#allocation9 + $0x20] ss:$8 sps:$4 sm:$0xff]  }
 0x41c   :  { %8169 = vmatprep.subr.bf16.mxu0 %v11318_v55  ;;  %v11381_v55 = vcombine.low %v1812_v36, %v1820_v37  ;;  %v11830_v37 = vld [vmem:[#allocation9 + $0x34] ss:$8 sps:$4 sm:$0xff]  }
 0x41e   :  { %7678 = vmatpush1.bf16.msra.mxu1 %v11311_v0  ;;  %v11658_v0 = vadd.f32 %v12636_v22, %v1849_v47  ;;  %v859_v22 = vld [vmem:[#allocation6 + $0x168] sm:$0xff] }
 0x41f   :  { %8170 = vmatpush1.bf16.msra.mxu0 %v11317_v1  ;;  %7679 = vmatprep.subr.bf16.mxu1 %v11328_v6  ;;  %v11391_v1 = vcombine.low %v1825_v45, %v1833_v51  ;;  %v11397_v6 = vcombine.low %v1828_v20, %v1836_v53  ;;  %v11833_v51 = vld [vmem:[#allocation9 + $0x44] ss:$8 sps:$4 sm:$0xff]   ;;  %v899_v20 = vld [vmem:[#allocation6 + $0x2a8] sm:$0xff] }
 0x420   :  { %8171 = vmatprep.subr.bf16.mxu0 %v11334_v8  ;;  %v10388_v8 = vcombine.high %v819_v61, %v827_v62  ;;  %v8355_v16 = vmax.f32 %v11658_v0, 0.0  ;;  %v907_v53 = vld [vmem:[#allocation6 + $0x2e8] sm:$0xff] }
 0x421   :  { %v11834_v0 = vld [vmem:[#allocation9 + $0x50] ss:$8 sps:$4 sm:$0xff]  }
 0x422   :  { %7680 = vmatpush1.bf16.msra.mxu1 %v11327_v44  ;;  %v10387_v44 = vcombine.low %v819_v61, %v827_v62  ;;  %v8371_v19 = vpack.c.bf16 %v8355_v16, %v8355_v16  ;;  %v923_v61 = vld [vmem:[#allocation6 + $0x368] sm:$0xff]  ;;  %v10467_v62 = vcombine.low %v899_v20, %v907_v53 }
 0x423   :  { %8172 = vmatpush1.bf16.msra.mxu0 %v11333_v17  ;;  %7681 = vmatprep.subr.bf16.mxu1 %v11344_v28  ;;  %v11819_v17 = vld [vmem:[#allocation9] ss:$8 sps:$4 sm:$0xff]   ;;  %v10404_v28 = vcombine.high %v835_v11, %v843_v12 }
 0x424   :  { %8173 = vmatprep.subr.bf16.mxu0 %v11350_v49  ;;  %v851_v49 = vld [vmem:[#allocation6 + $0x128] sm:$0xff]  ;;  %v11837_v12 = vld [vmem:[#allocation9 + $0x60] ss:$8 sps:$4 sm:$0xff]  }
 0x425   :  { %v10419_v34 = vcombine.low %v851_v49, %v859_v22 }
 0x426   :  { %7682 = vmatpush1.bf16.msra.mxu1 %v11343_v24  ;;  %v10420_v24 = vcombine.high %v851_v49, %v859_v22  ;;  %v11840_v22 = vld [vmem:[#allocation9 + $0x70] ss:$8 sps:$4 sm:$0xff]  }
 0x427   :  { %8174 = vmatpush1.bf16.msra.mxu0 %v11349_v26  ;;  %7683 = vmatprep.subr.bf16.mxu1 %v11360_v27  ;;  %v11827_v26 = vld [vmem:[#allocation9 + $0x24] ss:$8 sps:$4 sm:$0xff]   ;;  %v867_v27 = vld [vmem:[#allocation6 + $0x1a8] sm:$0xff] }
 0x428   :  { %8175 = vmatprep.subr.bf16.mxu0 %v11366_v32  ;;  %v875_v32 = vld [vmem:[#allocation6 + $0x1e8] sm:$0xff] }
 0x429   :  { %v10436_v36 = vcombine.high %v867_v27, %v875_v32 }
 0x42a   :  { %7684 = vmatpush1.bf16.msra.mxu1 %v11359_v38  ;;  %v883_v38 = vld [vmem:[#allocation6 + $0x228] sm:$0xff] }
 0x42b   :  { %8176 = vmatpush1.bf16.msra.mxu0 %v11365_v39  ;;  %7685 = vmatprep.subr.bf16.mxu1 %v11376_v41  ;;  %v891_v39 = vld [vmem:[#allocation6 + $0x268] sm:$0xff]  ;;  %v10435_v41 = vcombine.low %v867_v27, %v875_v32 }
 0x42c   :  { %8177 = vmatprep.subr.bf16.mxu0 %v11382_v42  ;;  %v11828_v42 = vld [vmem:[#allocation9 + $0x30] ss:$8 sps:$4 sm:$0xff]   ;;  %v10452_v45 = vcombine.high %v883_v38, %v891_v39  ;;  %v10451_v47 = vcombine.low %v883_v38, %v891_v39  ;;  %v11848_v32 = vld [vmem:[#allocation9 + $0x94] ss:$8 sps:$4 sm:$0xff]   ;;  %v11851_v39 = vld [vmem:[#allocation9 + $0xa4] ss:$8 sps:$4 sm:$0xff]  }
 0x42e   :  { %7686 = vmatpush1.bf16.msra.mxu1 %v11375_v54  ;;  %v11831_v54 = vld [vmem:[#allocation9 + $0x40] ss:$8 sps:$4 sm:$0xff]  }
 0x42f   :  { %8178 = vmatpush1.bf16.msra.mxu0 %v11381_v55  ;;  %7687 = vmatprep.subr.bf16.mxu1 %v11392_v57  ;;  %v10468_v55 = vcombine.high %v899_v20, %v907_v53  ;;  %v11836_v57 = vld [vmem:[#allocation9 + $0x54] ss:$8 sps:$4 sm:$0xff]  }
 0x430   :  { %8179 = vmatprep.subr.bf16.mxu0 %v11398_v58  ;;  %v915_v58 = vld [vmem:[#allocation6 + $0x328] sm:$0xff] }
 0x431   :  { %v10483_v11 = vcombine.low %v915_v58, %v923_v61  ;;  %v11854_v53 = vld [vmem:[#allocation9 + $0xb4] ss:$8 sps:$4 sm:$0xff]  }
 0x432   :  { %7688 = vmatpush1.bf16.msra.mxu1 %v11391_v1  ;;  %v10484_v1 = vcombine.high %v915_v58, %v923_v61  ;;  %v11857_v61 = vld [vmem:[#allocation9 + $0xc4] ss:$8 sps:$4 sm:$0xff]  }
 0x433   :  { %8180 = vmatpush1.bf16.msra.mxu0 %v11397_v6  ;;  %7862 = vmatprep.subr.bf16.mxu1 %v10388_v8  ;;  %v11839_v6 = vld [vmem:[#allocation9 + $0x64] ss:$8 sps:$4 sm:$0xff]   ;;  %v931_v8 = vld [vmem:[#allocation6 + $0x3a8] sm:$0xff] }
 0x434   :  { %9934 = vmatprep.subr.bf16.mxu0 %v11821_v10  ;;  %v939_v10 = vld [vmem:[#allocation6 + $0x3e8] sm:$0xff] }
 0x435   :  { %7690 = vmatmul.mubr.bf16.vlgmr.msra.gmra.mrb[16].mxu1 %v12614_v23  ;;  %v10500_v16 = vcombine.high %v931_v8, %v939_v10  ;;  %v10499_v49 = vcombine.low %v931_v8, %v939_v10  ;;  %v11860_v10 = vld [vmem:[#allocation9 + $0xd4] ss:$8 sps:$4 sm:$0xff]  }
 0x436   :  { %8182 = vmatmul.mubr.bf16.vlgmr.msra.gmra.mrb[16].mxu0 %v12614_v23  ;;  %7863 = vmatpush1.bf16.msra.mxu1 %v10387_v44  ;;  %v11842_v44 = vld [vmem:[#allocation9 + $0x74] ss:$8 sps:$4 sm:$0xff]  }
 0x437   :  { %7894 = vmatprep.mubr.bf16.mxu1 %v12541_v2  ;;  %9935 = vmatpush1.bf16.msra.mxu0 %v11819_v17  ;;  %v947_v17 = vld [vmem:[#allocation6 + $0x428] sm:$0xff] }
 0x438   :  { %9966 = vmatprep.mubr.bf16.mxu0 %v8371_v19  ;;  %7864 = vmatprep.subr.bf16.mxu1 %v10404_v28  ;;  %v955_v28 = vld [vmem:[#allocation6 + $0x468] sm:$0xff]  ;;  %v11845_v19 = vld [vmem:[#allocation9 + $0x84] ss:$8 sps:$4 sm:$0xff]  }
 0x439   :  { %9936 = vmatprep.subr.bf16.mxu0 %v11824_v29  ;;  %v10516_v29 = vcombine.high %v947_v17, %v955_v28 }
 0x43a   :  { %7865 = vmatpush1.bf16.msra.mxu1 %v10403_v30  ;;  %v963_v30 = vld [vmem:[#allocation6 + $0x4a8] sm:$0xff] }
 0x43b   :  { %9937 = vmatpush1.bf16.msra.mxu0 %v11822_v18  ;;  %7866 = vmatprep.subr.bf16.mxu1 %v10420_v24  ;;  %v971_v18 = vld [vmem:[#allocation6 + $0x4e8] sm:$0xff]  ;;  %v10515_v24 = vcombine.low %v947_v17, %v955_v28  ;;  %v1845_v28 = vrot.slane %v12664_v7, %v12525_v48 }
 0x43c   :  { %9938 = vmatprep.subr.bf16.mxu0 %v11827_v26  ;;  %v11843_v26 = vld [vmem:[#allocation9 + $0x80] ss:$8 sps:$4 sm:$0xff]   ;;  %v10532_v27 = vcombine.high %v963_v30, %v971_v18 }
 0x43e   :  { %7867 = vmatpush1.bf16.msra.mxu1 %v10419_v34  ;;  %v979_v34 = vld [vmem:[#allocation6 + $0x528] sm:$0xff] }
 0x43f   :  { %9939 = vmatpush1.bf16.msra.mxu0 %v11825_v52  ;;  %7868 = vmatprep.subr.bf16.mxu1 %v10436_v36  ;;  %v987_v52 = vld [vmem:[#allocation6 + $0x568] sm:$0xff]  ;;  %v10531_v36 = vcombine.low %v963_v30, %v971_v18  ;;  %v11861_v18 = vld [vmem:[#allocation9 + $0xe0] ss:$8 sps:$4 sm:$0xff]  }
 0x440   :  { %9940 = vmatprep.subr.bf16.mxu0 %v11830_v37  ;;  %v11846_v37 = vld [vmem:[#allocation9 + $0x90] ss:$8 sps:$4 sm:$0xff]   ;;  %v10548_v38 = vcombine.high %v979_v34, %v987_v52 }
 0x442   :  { %7869 = vmatpush1.bf16.msra.mxu1 %v10435_v41  ;;  %v995_v41 = vld [vmem:[#allocation6 + $0x5a8] sm:$0xff] }
 0x443   :  { %9941 = vmatpush1.bf16.msra.mxu0 %v11828_v42  ;;  %7870 = vmatprep.subr.bf16.mxu1 %v10452_v45  ;;  %v1003_v42 = vld [vmem:[#allocation6 + $0x5e8] sm:$0xff]  ;;  %v10547_v45 = vcombine.low %v979_v34, %v987_v52 }
 0x444   :  { %9942 = vmatprep.subr.bf16.mxu0 %v11833_v51  ;;  %v11849_v51 = vld [vmem:[#allocation9 + $0xa0] ss:$8 sps:$4 sm:$0xff]   ;;  %v10564_v20 = vcombine.high %v995_v41, %v1003_v42  ;;  %v1083_v34 = vld [vmem:[#allocation6 + $0x868] sm:$0xff] }
 0x446   :  { %7871 = vmatpush1.bf16.msra.mxu1 %v10451_v47  ;;  %v1011_v47 = vld [vmem:[#allocation6 + $0x628] sm:$0xff] }
 0x447   :  { %9943 = vmatpush1.bf16.msra.mxu0 %v11831_v54  ;;  %7872 = vmatprep.subr.bf16.mxu1 %v10468_v55  ;;  %v1019_v54 = vld [vmem:[#allocation6 + $0x668] sm:$0xff]  ;;  %v10563_v55 = vcombine.low %v995_v41, %v1003_v42  ;;  %v11869_v41 = vld [vmem:[#allocation9 + $0x104] ss:$8 sps:$4 sm:$0xff]  }
 0x448   :  { %9944 = vmatprep.subr.bf16.mxu0 %v11836_v57  ;;  %v11852_v57 = vld [vmem:[#allocation9 + $0xb0] ss:$8 sps:$4 sm:$0xff]   ;;  %v10580_v58 = vcombine.high %v1011_v47, %v1019_v54 }
 0x449   :  { %v1091_v42 = vld [vmem:[#allocation6 + $0x8a8] sm:$0xff] }
 0x44a   :  { %7873 = vmatpush1.bf16.msra.mxu1 %v10467_v62  ;;  %v1027_v62 = vld [vmem:[#allocation6 + $0x6a8] sm:$0xff] }
 0x44b   :  { %9945 = vmatpush1.bf16.msra.mxu0 %v11834_v0  ;;  %7874 = vmatprep.subr.bf16.mxu1 %v10484_v1  ;;  %v1035_v0 = vld [vmem:[#allocation6 + $0x6e8] sm:$0xff]  ;;  %v10579_v1 = vcombine.low %v1011_v47, %v1019_v54 }
 0x44c   :  { %9946 = vmatprep.subr.bf16.mxu0 %v11839_v6  ;;  %v11855_v6 = vld [vmem:[#allocation9 + $0xc0] ss:$8 sps:$4 sm:$0xff]   ;;  %v10596_v8 = vcombine.high %v1027_v62, %v1035_v0  ;;  %v1107_v47 = vld [vmem:[#allocation6 + $0x928] sm:$0xff] }
 0x44d   :  { %v1115_v54 = vld [vmem:[#allocation6 + $0x968] sm:$0xff] }
 0x44e   :  { %7875 = vmatpush1.bf16.msra.mxu1 %v10483_v11  ;;  %v1043_v11 = vld [vmem:[#allocation6 + $0x728] sm:$0xff] }
 0x44f   :  { %9947 = vmatpush1.bf16.msra.mxu0 %v11837_v12  ;;  %7876 = vmatprep.subr.bf16.mxu1 %v10500_v16  ;;  %v1051_v12 = vld [vmem:[#allocation6 + $0x768] sm:$0xff]  ;;  %v10595_v16 = vcombine.low %v1027_v62, %v1035_v0  ;;  %v10676_v62 = vcombine.high %v1107_v47, %v1115_v54  ;;  %v11875_v0 = vld [vmem:[#allocation9 + $0x124] ss:$8 sps:$4 sm:$0xff]  }
 0x450   :  { %9948 = vmatprep.subr.bf16.mxu0 %v11842_v44  ;;  %v11858_v44 = vld [vmem:[#allocation9 + $0xd0] ss:$8 sps:$4 sm:$0xff]   ;;  %v10612_v17 = vcombine.high %v1043_v11, %v1051_v12  ;;  %v10611_v30 = vcombine.low %v1043_v11, %v1051_v12  ;;  %v11878_v12 = vld [vmem:[#allocation9 + $0x134] ss:$8 sps:$4 sm:$0xff]  }
 0x452   :  { %7877 = vmatpush1.bf16.msra.mxu1 %v10499_v49  ;;  %v11863_v49 = vld [vmem:[#allocation9 + $0xe4] ss:$8 sps:$4 sm:$0xff]  }
 0x453   :  { %9949 = vmatpush1.bf16.msra.mxu0 %v11840_v22  ;;  %7878 = vmatprep.subr.bf16.mxu1 %v10516_v29  ;;  %v1059_v22 = vld [vmem:[#allocation6 + $0x7a8] sm:$0xff] }
 0x454   :  { %9950 = vmatprep.subr.bf16.mxu0 %v11845_v19  ;;  %v1067_v29 = vld [vmem:[#allocation6 + $0x7e8] sm:$0xff]  ;;  %v1857_v19 = vrot.slane %v12664_v7, %v12537_v56 }
 0x456   :  { %7879 = vmatpush1.bf16.msra.mxu1 %v10515_v24  ;;  %v10628_v24 = vcombine.high %v1059_v22, %v1067_v29  ;;  %v11660_v52 = vadd.f32 %v12660_v5, %v1857_v19  ;;  %v1163_v19 = vld [vmem:[#allocation6 + $0xae8] sm:$0xff] }
 0x457   :  { %9951 = vmatpush1.bf16.msra.mxu0 %v11843_v26  ;;  %7880 = vmatprep.subr.bf16.mxu1 %v10532_v27  ;;  %v11657_v26 = vadd.f32 %v12632_v13, %v1845_v28  ;;  %v11866_v27 = vld [vmem:[#allocation9 + $0xf4] ss:$8 sps:$4 sm:$0xff]   ;;  %v11876_v28 = vld [vmem:[#allocation9 + $0x130] ss:$8 sps:$4 sm:$0xff]  }
 0x458   :  { %9952 = vmatprep.subr.bf16.mxu0 %v11848_v32  ;;  %v1075_v32 = vld [vmem:[#allocation6 + $0x828] sm:$0xff] }
 0x459   :  { %v10643_v13 = vcombine.low %v1075_v32, %v1083_v34 }
 0x45a   :  { %7881 = vmatpush1.bf16.msra.mxu1 %v10531_v36  ;;  %v10627_v36 = vcombine.low %v1059_v22, %v1067_v29  ;;  %v11881_v22 = vld [vmem:[#allocation9 + $0x144] ss:$8 sps:$4 sm:$0xff]   ;;  %v1155_v29 = vld [vmem:[#allocation6 + $0xaa8] sm:$0xff] }
 0x45b   :  { %9953 = vmatpush1.bf16.msra.mxu0 %v11846_v37  ;;  %7882 = vmatprep.subr.bf16.mxu1 %v10548_v38  ;;  %v11864_v37 = vld [vmem:[#allocation9 + $0xf0] ss:$8 sps:$4 sm:$0xff]   ;;  %v10644_v38 = vcombine.high %v1075_v32, %v1083_v34  ;;  %v10723_v34 = vcombine.low %v1155_v29, %v1163_v19 }
 0x45c   :  { %9954 = vmatprep.subr.bf16.mxu0 %v11851_v39  ;;  %v8354_v39 = vmax.f32 %v11657_v26, 0.0  ;;  %v11884_v26 = vld [vmem:[#allocation9 + $0x154] ss:$8 sps:$4 sm:$0xff]  }
 0x45d   :  { %v1179_v32 = vld [vmem:[#allocation6 + $0xb68] sm:$0xff] }
 0x45e   :  { %7883 = vmatpush1.bf16.msra.mxu1 %v10547_v45  ;;  %v1099_v45 = vld [vmem:[#allocation6 + $0x8e8] sm:$0xff] }
 0x45f   :  { %9955 = vmatpush1.bf16.msra.mxu0 %v11849_v51  ;;  %7884 = vmatprep.subr.bf16.mxu1 %v10564_v20  ;;  %v8357_v51 = vmax.f32 %v11660_v52, 0.0  ;;  %v11867_v20 = vld [vmem:[#allocation9 + $0x100] ss:$8 sps:$4 sm:$0xff]   ;;  %v10660_v5 = vcombine.high %v1091_v42, %v1099_v45  ;;  %v11882_v52 = vld [vmem:[#allocation9 + $0x150] ss:$8 sps:$4 sm:$0xff]  }
 0x460   :  { %9956 = vmatprep.subr.bf16.mxu0 %v11854_v53  ;;  %v8370_v53 = vpack.c.bf16 %v8354_v39, %v8354_v39  ;;  %v1195_v39 = vld [vmem:[#allocation6 + $0xbe8] sm:$0xff] }
 0x462   :  { %7885 = vmatpush1.bf16.msra.mxu1 %v10563_v55  ;;  %v11872_v55 = vld [vmem:[#allocation9 + $0x114] ss:$8 sps:$4 sm:$0xff]  }
 0x463   :  { %9957 = vmatpush1.bf16.msra.mxu0 %v11852_v57  ;;  %7886 = vmatprep.subr.bf16.mxu1 %v10580_v58  ;;  %v8373_v57 = vpack.c.bf16 %v8357_v51, %v8357_v51  ;;  %v10659_v58 = vcombine.low %v1091_v42, %v1099_v45  ;;  %v11885_v42 = vld [vmem:[#allocation9 + $0x160] ss:$8 sps:$4 sm:$0xff]   ;;  %v11890_v51 = vld [vmem:[#allocation9 + $0x174] ss:$8 sps:$4 sm:$0xff]  }
 0x464   :  { %9958 = vmatprep.subr.bf16.mxu0 %v11857_v61  ;;  %v11870_v61 = vld [vmem:[#allocation9 + $0x110] ss:$8 sps:$4 sm:$0xff]  }
 0x466   :  { %7887 = vmatpush1.bf16.msra.mxu1 %v10579_v1  ;;  %v1123_v1 = vld [vmem:[#allocation6 + $0x9a8] sm:$0xff] }
 0x467   :  { %9959 = vmatpush1.bf16.msra.mxu0 %v11855_v6  ;;  %7888 = vmatprep.subr.bf16.mxu1 %v10596_v8  ;;  %v1131_v6 = vld [vmem:[#allocation6 + $0x9e8] sm:$0xff]  ;;  %v10675_v8 = vcombine.low %v1107_v47, %v1115_v54  ;;  %v11893_v54 = vld [vmem:[#allocation9 + $0x184] ss:$8 sps:$4 sm:$0xff]  }
 0x468   :  { %9960 = vmatprep.subr.bf16.mxu0 %v11860_v10  ;;  %v11873_v10 = vld [vmem:[#allocation9 + $0x120] ss:$8 sps:$4 sm:$0xff]   ;;  %v10692_v11 = vcombine.high %v1123_v1, %v1131_v6 }
 0x46a   :  { %7889 = vmatpush1.bf16.msra.mxu1 %v10595_v16  ;;  %v1139_v16 = vld [vmem:[#allocation6 + $0xa28] sm:$0xff] }
 0x46b   :  { %9961 = vmatpush1.bf16.msra.mxu0 %v11858_v44  ;;  %7890 = vmatprep.subr.bf16.mxu1 %v10612_v17  ;;  %v1147_v44 = vld [vmem:[#allocation6 + $0xa68] sm:$0xff]  ;;  %v10691_v17 = vcombine.low %v1123_v1, %v1131_v6 }
 0x46c   :  { %9962 = vmatprep.subr.bf16.mxu0 %v11863_v49  ;;  %v10708_v49 = vcombine.high %v1139_v16, %v1147_v44  ;;  %v1235_v1 = vld [vmem:[#allocation6 + $0xd28] sm:$0xff] }
 0x46d   :  { %v1243_v6 = vld [vmem:[#allocation6 + $0xd68] sm:$0xff] }
 0x46e   :  { %7891 = vmatpush1.bf16.msra.mxu1 %v10611_v30  ;;  %v10707_v30 = vcombine.low %v1139_v16, %v1147_v44  ;;  %v1251_v16 = vld [vmem:[#allocation6 + $0xda8] sm:$0xff] }
 0x46f   :  { %9963 = vmatpush1.bf16.msra.mxu0 %v11861_v18  ;;  %7892 = vmatprep.subr.bf16.mxu1 %v10628_v24  ;;  %v11879_v18 = vld [vmem:[#allocation9 + $0x140] ss:$8 sps:$4 sm:$0xff]   ;;  %v10724_v24 = vcombine.high %v1155_v29, %v1163_v19  ;;  %v1259_v44 = vld [vmem:[#allocation6 + $0xde8] sm:$0xff] }
 0x470   :  { %9964 = vmatprep.subr.bf16.mxu0 %v11866_v27  ;;  %v1171_v27 = vld [vmem:[#allocation6 + $0xb28] sm:$0xff] }
 0x471   :  { %v1267_v29 = vld [vmem:[#allocation6 + $0xe28] sm:$0xff] }
 0x472   :  { %7893 = vmatpush1.bf16.msra.mxu1 %v10627_v36  ;;  %v10740_v36 = vcombine.high %v1171_v27, %v1179_v32  ;;  %v1275_v19 = vld [vmem:[#allocation6 + $0xe68] sm:$0xff] }
 0x473   :  { %9965 = vmatpush1.bf16.msra.mxu0 %v11864_v37  ;;  %7903 = vmatprep.subr.bf16.mxu1 %v10644_v38  ;;  %v11887_v37 = vld [vmem:[#allocation9 + $0x164] ss:$8 sps:$4 sm:$0xff]   ;;  %v1187_v38 = vld [vmem:[#allocation6 + $0xba8] sm:$0xff] }
 0x474   :  { %9975 = vmatprep.subr.bf16.mxu0 %v11869_v41  ;;  %v10739_v41 = vcombine.low %v1171_v27, %v1179_v32  ;;  %v10756_v45 = vcombine.high %v1187_v38, %v1195_v39  ;;  %v1283_v27 = vld [vmem:[#allocation6 + $0xea8] sm:$0xff] }
 0x475   :  { %7895 = vmatmul.mubr.bf16.vlgmr.msra.gmra.mrb[20].mxu1 %v12543_v3  ;;  %v1291_v32 = vld [vmem:[#allocation6 + $0xee8] sm:$0xff] }
 0x476   :  { %9967 = vmatmul.mubr.bf16.vlgmr.msra.gmra.mrb[20].mxu0 %v8370_v53  ;;  %7904 = vmatpush1.bf16.msra.mxu1 %v10643_v13  ;;  %v1203_v13 = vld [vmem:[#allocation6 + $0xc28] sm:$0xff]  ;;  %v10755_v53 = vcombine.low %v1187_v38, %v1195_v39 }
 0x477   :  { %7935 = vmatprep.mubr.bf16.mxu1 %v12557_v31  ;;  %9976 = vmatpush1.bf16.msra.mxu0 %v11867_v20  ;;  %v1211_v20 = vld [vmem:[#allocation6 + $0xc68] sm:$0xff] }
 0x478   :  { %10007 = vmatprep.mubr.bf16.mxu0 %v8373_v57  ;;  %7905 = vmatprep.subr.bf16.mxu1 %v10660_v5  ;;  %v11888_v5 = vld [vmem:[#allocation9 + $0x170] ss:$8 sps:$4 sm:$0xff]   ;;  %v10772_v47 = vcombine.high %v1203_v13, %v1211_v20 }
 0x479   :  { %9977 = vmatprep.subr.bf16.mxu0 %v11872_v55  ;;  %v1219_v55 = vld [vmem:[#allocation6 + $0xca8] sm:$0xff] }
 0x47a   :  { %7906 = vmatpush1.bf16.msra.mxu1 %v10659_v58  ;;  %v1227_v57 = vld [vmem:[#allocation6 + $0xce8] sm:$0xff]  ;;  %v10771_v58 = vcombine.low %v1203_v13, %v1211_v20  ;;  %v11911_v13 = vld [vmem:[#allocation9 + $0x1e4] ss:$8 sps:$4 sm:$0xff]  }
 0x47b   :  { %9978 = vmatpush1.bf16.msra.mxu0 %v11870_v61  ;;  %7907 = vmatprep.subr.bf16.mxu1 %v10676_v62  ;;  %v11891_v61 = vld [vmem:[#allocation9 + $0x180] ss:$8 sps:$4 sm:$0xff]   ;;  %v10788_v62 = vcombine.high %v1219_v55, %v1227_v57  ;;  %v1299_v38 = vld [vmem:[#allocation6 + $0xf28] sm:$0xff] }
 0x47c   :  { %9979 = vmatprep.subr.bf16.mxu0 %v11875_v0  ;;  %v11896_v0 = vld [vmem:[#allocation9 + $0x194] ss:$8 sps:$4 sm:$0xff]  }
 0x47d   :  { %v1307_v39 = vld [vmem:[#allocation6 + $0xf68] sm:$0xff] }
 0x47e   :  { %7908 = vmatpush1.bf16.msra.mxu1 %v10675_v8  ;;  %v10787_v8 = vcombine.low %v1219_v55, %v1227_v57  ;;  %v1315_v20 = vld [vmem:[#allocation6 + $0xfa8] sm:$0xff] }
 0x47f   :  { %9980 = vmatpush1.bf16.msra.mxu0 %v11873_v10  ;;  %7909 = vmatprep.subr.bf16.mxu1 %v10692_v11  ;;  %v11894_v10 = vld [vmem:[#allocation9 + $0x190] ss:$8 sps:$4 sm:$0xff]   ;;  %v10804_v11 = vcombine.high %v1235_v1, %v1243_v6 }
 0x480   :  { %9981 = vmatprep.subr.bf16.mxu0 %v11878_v12  ;;  %v11899_v12 = vld [vmem:[#allocation9 + $0x1a4] ss:$8 sps:$4 sm:$0xff]  }
 0x482   :  { %7910 = vmatpush1.bf16.msra.mxu1 %v10691_v17  ;;  %v10803_v17 = vcombine.low %v1235_v1, %v1243_v6  ;;  %v11912_v6 = vld [vmem:[#allocation9 + $0x1f0] ss:$8 sps:$4 sm:$0xff]  }
 0x483   :  { %9982 = vmatpush1.bf16.msra.mxu0 %v11876_v28  ;;  %7911 = vmatprep.subr.bf16.mxu1 %v10708_v49  ;;  %v11897_v28 = vld [vmem:[#allocation9 + $0x1a0] ss:$8 sps:$4 sm:$0xff]   ;;  %v10820_v49 = vcombine.high %v1251_v16, %v1259_v44 }
 0x484   :  { %9983 = vmatprep.subr.bf16.mxu0 %v11881_v22  ;;  %v11902_v22 = vld [vmem:[#allocation9 + $0x1b4] ss:$8 sps:$4 sm:$0xff]  }
 0x486   :  { %7912 = vmatpush1.bf16.msra.mxu1 %v10707_v30  ;;  %v10819_v30 = vcombine.low %v1251_v16, %v1259_v44  ;;  %v11915_v44 = vld [vmem:[#allocation9 + $0x200] ss:$8 sps:$4 sm:$0xff]  }
 0x487   :  { %9984 = vmatpush1.bf16.msra.mxu0 %v11879_v18  ;;  %7913 = vmatprep.subr.bf16.mxu1 %v10724_v24  ;;  %v11900_v18 = vld [vmem:[#allocation9 + $0x1b0] ss:$8 sps:$4 sm:$0xff]   ;;  %v10836_v24 = vcombine.high %v1267_v29, %v1275_v19 }
 0x488   :  { %9985 = vmatprep.subr.bf16.mxu0 %v11884_v26  ;;  %v11905_v26 = vld [vmem:[#allocation9 + $0x1c4] ss:$8 sps:$4 sm:$0xff]  }
 0x48a   :  { %7914 = vmatpush1.bf16.msra.mxu1 %v10723_v34  ;;  %v10835_v34 = vcombine.low %v1267_v29, %v1275_v19 }
 0x48b   :  { %9986 = vmatpush1.bf16.msra.mxu0 %v11882_v52  ;;  %7915 = vmatprep.subr.bf16.mxu1 %v10740_v36  ;;  %v11903_v52 = vld [vmem:[#allocation9 + $0x1c0] ss:$8 sps:$4 sm:$0xff]   ;;  %v10852_v36 = vcombine.high %v1283_v27, %v1291_v32 }
 0x48c   :  { %9987 = vmatprep.subr.bf16.mxu0 %v11887_v37  ;;  %v11908_v37 = vld [vmem:[#allocation9 + $0x1d4] ss:$8 sps:$4 sm:$0xff]  }
 0x48e   :  { %7916 = vmatpush1.bf16.msra.mxu1 %v10739_v41  ;;  %v10851_v41 = vcombine.low %v1283_v27, %v1291_v32  ;;  %v1387_v27 = vld [vmem:[#allocation6 + $0x11e8] sm:$0xff] }
 0x48f   :  { %9988 = vmatpush1.bf16.msra.mxu0 %v11885_v42  ;;  %7917 = vmatprep.subr.bf16.mxu1 %v10756_v45  ;;  %v11906_v42 = vld [vmem:[#allocation9 + $0x1d0] ss:$8 sps:$4 sm:$0xff]   ;;  %v10868_v45 = vcombine.high %v1299_v38, %v1307_v39 }
 0x490   :  { %9989 = vmatprep.subr.bf16.mxu0 %v11890_v51  ;;  %v1853_v51 = vrot.slane %v12664_v7, %v12570_v63 }
 0x492   :  { %7918 = vmatpush1.bf16.msra.mxu1 %v10755_v53  ;;  %v1323_v53 = vld [vmem:[#allocation6 + $0xfe8] sm:$0xff]  ;;  %v11659_v57 = vadd.f32 %v12656_v14, %v1853_v51 }
 0x493   :  { %9990 = vmatpush1.bf16.msra.mxu0 %v11888_v5  ;;  %7919 = vmatprep.subr.bf16.mxu1 %v10772_v47  ;;  %v1865_v5 = vrot.slane %v12664_v7, %v12573_v21  ;;  %v10867_v47 = vcombine.low %v1299_v38, %v1307_v39  ;;  %v10884_v55 = vcombine.high %v1315_v20, %v1323_v53  ;;  %v1403_v38 = vld [vmem:[#allocation6 + $0x1268] sm:$0xff] }
 0x494   :  { %9991 = vmatprep.subr.bf16.mxu0 %v11893_v54  ;;  %v11909_v54 = vld [vmem:[#allocation9 + $0x1e0] ss:$8 sps:$4 sm:$0xff]   ;;  %v10883_v1 = vcombine.low %v1315_v20, %v1323_v53  ;;  %v1411_v51 = vld [vmem:[#allocation6 + $0x12a8] sm:$0xff] }
 0x495   :  { %v11927_v53 = vld [vmem:[#allocation9 + $0x240] ss:$8 sps:$4 sm:$0xff]  }
 0x496   :  { %7920 = vmatpush1.bf16.msra.mxu1 %v10771_v58  ;;  %v11914_v58 = vld [vmem:[#allocation9 + $0x1f4] ss:$8 sps:$4 sm:$0xff]  }
 0x497   :  { %9992 = vmatpush1.bf16.msra.mxu0 %v11891_v61  ;;  %7921 = vmatprep.subr.bf16.mxu1 %v10788_v62  ;;  %v1331_v61 = vld [vmem:[#allocation6 + $0x1028] sm:$0xff] }
 0x498   :  { %9993 = vmatprep.subr.bf16.mxu0 %v11896_v0  ;;  %v1339_v62 = vld [vmem:[#allocation6 + $0x1068] sm:$0xff]  ;;  %v11662_v0 = vadd.f32 %v12638_v25, %v1865_v5 }
 0x499   :  { %v10900_v7 = vcombine.high %v1331_v61, %v1339_v62  ;;  %v10899_v14 = vcombine.low %v1331_v61, %v1339_v62  ;;  %v11935_v62 = vld [vmem:[#allocation9 + $0x264] ss:$8 sps:$4 sm:$0xff]  }
 0x49a   :  { %7922 = vmatpush1.bf16.msra.mxu1 %v10787_v8  ;;  %v8356_v8 = vmax.f32 %v11659_v57, 0.0  ;;  %v8359_v16 = vmax.f32 %v11662_v0, 0.0  ;;  %v1443_v0 = vld [vmem:[#allocation6 + $0x13a8] sm:$0xff] }
 0x49b   :  { %9994 = vmatpush1.bf16.msra.mxu0 %v11894_v10  ;;  %7923 = vmatprep.subr.bf16.mxu1 %v10804_v11  ;;  %v11917_v10 = vld [vmem:[#allocation9 + $0x204] ss:$8 sps:$4 sm:$0xff]   ;;  %v1347_v11 = vld [vmem:[#allocation6 + $0x10a8] sm:$0xff] }
 0x49c   :  { %9995 = vmatprep.subr.bf16.mxu0 %v11899_v12  ;;  %v1355_v12 = vld [vmem:[#allocation6 + $0x10e8] sm:$0xff]  ;;  %v8375_v29 = vpack.c.bf16 %v8359_v16, %v8359_v16 }
 0x49d   :  { %v10916_v25 = vcombine.high %v1347_v11, %v1355_v12  ;;  %v10915_v19 = vcombine.low %v1347_v11, %v1355_v12  ;;  %v1459_v11 = vld [vmem:[#allocation6 + $0x1428] sm:$0xff] }
 0x49e   :  { %7924 = vmatpush1.bf16.msra.mxu1 %v10803_v17  ;;  %v8372_v17 = vpack.c.bf16 %v8356_v8, %v8356_v8  ;;  %v1467_v12 = vld [vmem:[#allocation6 + $0x1468] sm:$0xff] }
 0x49f   :  { %9996 = vmatpush1.bf16.msra.mxu0 %v11897_v28  ;;  %7925 = vmatprep.subr.bf16.mxu1 %v10820_v49  ;;  %v1363_v28 = vld [vmem:[#allocation6 + $0x1128] sm:$0xff] }
 0x4a0   :  { %9997 = vmatprep.subr.bf16.mxu0 %v11902_v22  ;;  %v1371_v49 = vld [vmem:[#allocation6 + $0x1168] sm:$0xff] }
 0x4a1   :  { %v11920_v22 = vld [vmem:[#allocation9 + $0x214] ss:$8 sps:$4 sm:$0xff]   ;;  %v10931_v32 = vcombine.low %v1363_v28, %v1371_v49 }
 0x4a2   :  { %7926 = vmatpush1.bf16.msra.mxu1 %v10819_v30  ;;  %v11918_v30 = vld [vmem:[#allocation9 + $0x210] ss:$8 sps:$4 sm:$0xff]  }
 0x4a3   :  { %9998 = vmatpush1.bf16.msra.mxu0 %v11900_v18  ;;  %7927 = vmatprep.subr.bf16.mxu1 %v10836_v24  ;;  %v10932_v18 = vcombine.high %v1363_v28, %v1371_v49  ;;  %v11923_v24 = vld [vmem:[#allocation9 + $0x224] ss:$8 sps:$4 sm:$0xff]   ;;  %v1483_v28 = vld [vmem:[#allocation6 + $0x14e8] sm:$0xff]  ;;  %v11027_v49 = vcombine.low %v1459_v11, %v1467_v12 }
 0x4a4   :  { %9999 = vmatprep.subr.bf16.mxu0 %v11905_v26  ;;  %v1379_v26 = vld [vmem:[#allocation6 + $0x11a8] sm:$0xff] }
 0x4a5   :  { %v10947_v39 = vcombine.low %v1379_v26, %v1387_v27 }
 0x4a6   :  { %7928 = vmatpush1.bf16.msra.mxu1 %v10835_v34  ;;  %v11921_v34 = vld [vmem:[#allocation9 + $0x220] ss:$8 sps:$4 sm:$0xff]  }
 0x4a7   :  { %10000 = vmatpush1.bf16.msra.mxu0 %v11903_v52  ;;  %7929 = vmatprep.subr.bf16.mxu1 %v10852_v36  ;;  %v10948_v52 = vcombine.high %v1379_v26, %v1387_v27  ;;  %v11926_v36 = vld [vmem:[#allocation9 + $0x234] ss:$8 sps:$4 sm:$0xff]   ;;  %v11942_v26 = vld [vmem:[#allocation9 + $0x290] ss:$8 sps:$4 sm:$0xff]  }
 0x4a8   :  { %10001 = vmatprep.subr.bf16.mxu0 %v11908_v37  ;;  %v1395_v37 = vld [vmem:[#allocation6 + $0x1228] sm:$0xff] }
 0x4a9   :  { %v10963_v20 = vcombine.low %v1395_v37, %v1403_v38 }
 0x4aa   :  { %7930 = vmatpush1.bf16.msra.mxu1 %v10851_v41  ;;  %v11924_v41 = vld [vmem:[#allocation9 + $0x230] ss:$8 sps:$4 sm:$0xff]  }
 0x4ab   :  { %10002 = vmatpush1.bf16.msra.mxu0 %v11906_v42  ;;  %7931 = vmatprep.subr.bf16.mxu1 %v10868_v45  ;;  %v10964_v42 = vcombine.high %v1395_v37, %v1403_v38  ;;  %v11929_v45 = vld [vmem:[#allocation9 + $0x244] ss:$8 sps:$4 sm:$0xff]   ;;  %v11945_v37 = vld [vmem:[#allocation9 + $0x2a0] ss:$8 sps:$4 sm:$0xff]  }
 0x4ac   :  { %10003 = vmatprep.subr.bf16.mxu0 %v11911_v13  ;;  %v1419_v13 = vld [vmem:[#allocation6 + $0x12e8] sm:$0xff] }
 0x4ad   :  { %v10980_v5 = vcombine.high %v1411_v51, %v1419_v13  ;;  %v10979_v57 = vcombine.low %v1411_v51, %v1419_v13  ;;  %v11948_v51 = vld [vmem:[#allocation9 + $0x2b0] ss:$8 sps:$4 sm:$0xff]  }
 0x4ae   :  { %7932 = vmatpush1.bf16.msra.mxu1 %v10867_v47  ;;  %v11932_v47 = vld [vmem:[#allocation9 + $0x254] ss:$8 sps:$4 sm:$0xff]  }
 0x4af   :  { %10004 = vmatpush1.bf16.msra.mxu0 %v11909_v54  ;;  %7933 = vmatprep.subr.bf16.mxu1 %v10884_v55  ;;  %v1427_v54 = vld [vmem:[#allocation6 + $0x1328] sm:$0xff] }
 0x4b0   :  { %10005 = vmatprep.subr.bf16.mxu0 %v11914_v58  ;;  %v1435_v55 = vld [vmem:[#allocation6 + $0x1368] sm:$0xff] }
 0x4b1   :  { %v11930_v58 = vld [vmem:[#allocation9 + $0x250] ss:$8 sps:$4 sm:$0xff]   ;;  %v10996_v61 = vcombine.high %v1427_v54, %v1435_v55 }
 0x4b2   :  { %7934 = vmatpush1.bf16.msra.mxu1 %v10883_v1  ;;  %v1451_v1 = vld [vmem:[#allocation6 + $0x13e8] sm:$0xff] }
 0x4b3   :  { %10006 = vmatpush1.bf16.msra.mxu0 %v11912_v6  ;;  %7944 = vmatprep.subr.bf16.mxu1 %v10900_v7  ;;  %v10995_v6 = vcombine.low %v1427_v54, %v1435_v55  ;;  %v11933_v7 = vld [vmem:[#allocation9 + $0x260] ss:$8 sps:$4 sm:$0xff]   ;;  %v11012_v8 = vcombine.high %v1443_v0, %v1451_v1  ;;  %v11011_v16 = vcombine.low %v1443_v0, %v1451_v1  ;;  %v11954_v0 = vld [vmem:[#allocation9 + $0x2d0] ss:$8 sps:$4 sm:$0xff]  }
 0x4b4   :  { %10016 = vmatprep.subr.bf16.mxu0 %v11917_v10  ;;  %v11938_v10 = vld [vmem:[#allocation9 + $0x274] ss:$8 sps:$4 sm:$0xff]   ;;  %v11951_v54 = vld [vmem:[#allocation9 + $0x2c0] ss:$8 sps:$4 sm:$0xff]  }
 0x4b5   :  { %7936 = vmatmul.mubr.bf16.vlgmr.msra.gmra.mrb[20].mxu1 %v12581_v46 }
 0x4b6   :  { %10008 = vmatmul.mubr.bf16.vlgmr.msra.gmra.mrb[20].mxu0 %v8372_v17  ;;  %7945 = vmatpush1.bf16.msra.mxu1 %v10899_v14  ;;  %v11936_v14 = vld [vmem:[#allocation9 + $0x270] ss:$8 sps:$4 sm:$0xff]   ;;  %v11941_v17 = vld [vmem:[#allocation9 + $0x284] ss:$8 sps:$4 sm:$0xff]  }
 0x4b7   :  { %7976 = vmatprep.mubr.bf16.mxu1 %v12583_v60  ;;  %10017 = vmatpush1.bf16.msra.mxu0 %v11915_v44  ;;  %v11028_v44 = vcombine.high %v1459_v11, %v1467_v12  ;;  %v1579_v11 = vld [vmem:[#allocation6 + $0x17e8] sm:$0xff] }
 0x4b8   :  { %10048 = vmatprep.mubr.bf16.mxu0 %v8375_v29  ;;  %7946 = vmatprep.subr.bf16.mxu1 %v10916_v25  ;;  %v1475_v25 = vld [vmem:[#allocation6 + $0x14a8] sm:$0xff] }
 0x4b9   :  { %10018 = vmatprep.subr.bf16.mxu0 %v11920_v22  ;;  %v11939_v22 = vld [vmem:[#allocation9 + $0x280] ss:$8 sps:$4 sm:$0xff]   ;;  %v11044_v29 = vcombine.high %v1475_v25, %v1483_v28 }
 0x4ba   :  { %7947 = vmatpush1.bf16.msra.mxu1 %v10915_v19  ;;  %v11944_v19 = vld [vmem:[#allocation9 + $0x294] ss:$8 sps:$4 sm:$0xff]  }
 0x4bb   :  { %10019 = vmatpush1.bf16.msra.mxu0 %v11918_v30  ;;  %7948 = vmatprep.subr.bf16.mxu1 %v10932_v18  ;;  %v1491_v30 = vld [vmem:[#allocation6 + $0x1528] sm:$0xff] }
 0x4bc   :  { %10020 = vmatprep.subr.bf16.mxu0 %v11923_v24  ;;  %v1499_v18 = vld [vmem:[#allocation6 + $0x1568] sm:$0xff]  ;;  %v11043_v24 = vcombine.low %v1475_v25, %v1483_v28 }
 0x4bd   :  { %v11060_v27 = vcombine.high %v1491_v30, %v1499_v18  ;;  %v1587_v25 = vld [vmem:[#allocation6 + $0x1828] sm:$0xff] }
 0x4be   :  { %7949 = vmatpush1.bf16.msra.mxu1 %v10931_v32  ;;  %v11947_v32 = vld [vmem:[#allocation9 + $0x2a4] ss:$8 sps:$4 sm:$0xff]   ;;  %v1595_v28 = vld [vmem:[#allocation6 + $0x1868] sm:$0xff] }
 0x4bf   :  { %10021 = vmatpush1.bf16.msra.mxu0 %v11921_v34  ;;  %7950 = vmatprep.subr.bf16.mxu1 %v10948_v52  ;;  %v1507_v34 = vld [vmem:[#allocation6 + $0x15a8] sm:$0xff] }
 0x4c0   :  { %10022 = vmatprep.subr.bf16.mxu0 %v11926_v36  ;;  %v1515_v52 = vld [vmem:[#allocation6 + $0x15e8] sm:$0xff]  ;;  %v11059_v36 = vcombine.low %v1491_v30, %v1499_v18  ;;  %v11965_v30 = vld [vmem:[#allocation9 + $0x304] ss:$8 sps:$4 sm:$0xff]  }
 0x4c1   :  { %v11076_v38 = vcombine.high %v1507_v34, %v1515_v52  ;;  %v1603_v18 = vld [vmem:[#allocation6 + $0x18a8] sm:$0xff] }
 0x4c2   :  { %7951 = vmatpush1.bf16.msra.mxu1 %v10947_v39  ;;  %v11950_v39 = vld [vmem:[#allocation9 + $0x2b4] ss:$8 sps:$4 sm:$0xff]  }
 0x4c3   :  { %10023 = vmatpush1.bf16.msra.mxu0 %v11924_v41  ;;  %7952 = vmatprep.subr.bf16.mxu1 %v10964_v42  ;;  %v1523_v41 = vld [vmem:[#allocation6 + $0x1628] sm:$0xff] }
 0x4c4   :  { %10024 = vmatprep.subr.bf16.mxu0 %v11929_v45  ;;  %v1531_v42 = vld [vmem:[#allocation6 + $0x1668] sm:$0xff]  ;;  %v11075_v45 = vcombine.low %v1507_v34, %v1515_v52 }
 0x4c5   :  { %v11092_v13 = vcombine.high %v1523_v41, %v1531_v42  ;;  %v11968_v34 = vld [vmem:[#allocation9 + $0x314] ss:$8 sps:$4 sm:$0xff]  }
 0x4c6   :  { %7953 = vmatpush1.bf16.msra.mxu1 %v10963_v20  ;;  %v11953_v20 = vld [vmem:[#allocation9 + $0x2c4] ss:$8 sps:$4 sm:$0xff]   ;;  %v1619_v52 = vld [vmem:[#allocation6 + $0x1928] sm:$0xff] }
 0x4c7   :  { %10025 = vmatpush1.bf16.msra.mxu0 %v11927_v53  ;;  %7954 = vmatprep.subr.bf16.mxu1 %v10980_v5  ;;  %v1539_v53 = vld [vmem:[#allocation6 + $0x16a8] sm:$0xff] }
 0x4c8   :  { %10026 = vmatprep.subr.bf16.mxu0 %v11932_v47  ;;  %v1547_v5 = vld [vmem:[#allocation6 + $0x16e8] sm:$0xff]  ;;  %v11091_v47 = vcombine.low %v1523_v41, %v1531_v42  ;;  %v11971_v41 = vld [vmem:[#allocation9 + $0x324] ss:$8 sps:$4 sm:$0xff]  }
 0x4c9   :  { %v11108_v55 = vcombine.high %v1539_v53, %v1547_v5  ;;  %v1635_v42 = vld [vmem:[#allocation6 + $0x19a8] sm:$0xff] }
 0x4ca   :  { %7955 = vmatpush1.bf16.msra.mxu1 %v10979_v57  ;;  %v11956_v57 = vld [vmem:[#allocation9 + $0x2d4] ss:$8 sps:$4 sm:$0xff]  }
 0x4cb   :  { %10027 = vmatpush1.bf16.msra.mxu0 %v11930_v58  ;;  %7956 = vmatprep.subr.bf16.mxu1 %v10996_v61  ;;  %v1555_v58 = vld [vmem:[#allocation6 + $0x1728] sm:$0xff] }
 0x4cc   :  { %10028 = vmatprep.subr.bf16.mxu0 %v11935_v62  ;;  %v1563_v61 = vld [vmem:[#allocation6 + $0x1768] sm:$0xff]  ;;  %v11107_v62 = vcombine.low %v1539_v53, %v1547_v5 }
 0x4cd   :  { %v11124_v1 = vcombine.high %v1555_v58, %v1563_v61  ;;  %v11123_v12 = vcombine.low %v1555_v58, %v1563_v61  ;;  %v11974_v53 = vld [vmem:[#allocation9 + $0x334] ss:$8 sps:$4 sm:$0xff]   ;;  %v11977_v58 = vld [vmem:[#allocation9 + $0x344] ss:$8 sps:$4 sm:$0xff]  }
 0x4ce   :  { %7957 = vmatpush1.bf16.msra.mxu1 %v10995_v6  ;;  %v12688_v6 = vld [vmem:[#allocation7] sm:$0xff]  ;;  %v1651_v5 = vld [vmem:[#allocation6 + $0x1a28] sm:$0xff] }
 0x4cf   :  { %10029 = vmatpush1.bf16.msra.mxu0 %v11933_v7  ;;  %7958 = vmatprep.subr.bf16.mxu1 %v11012_v8  ;;  %v1861_v7 = vrot.slane %v12688_v6, %v12590_v43  ;;  %v11959_v8 = vld [vmem:[#allocation9 + $0x2e4] ss:$8 sps:$4 sm:$0xff]   ;;  %v1667_v61 = vld [vmem:[#allocation6 + $0x1aa8] sm:$0xff] }
 0x4d0   :  { %10030 = vmatprep.subr.bf16.mxu0 %v11938_v10  ;;  %v1571_v10 = vld [vmem:[#allocation6 + $0x17a8] sm:$0xff] }
 0x4d2   :  { %7959 = vmatpush1.bf16.msra.mxu1 %v11011_v16  ;;  %v11957_v16 = vld [vmem:[#allocation9 + $0x2e0] ss:$8 sps:$4 sm:$0xff]  }
 0x4d3   :  { %10031 = vmatpush1.bf16.msra.mxu0 %v11936_v14  ;;  %7960 = vmatprep.subr.bf16.mxu1 %v11028_v44  ;;  %v11140_v14 = vcombine.high %v1571_v10, %v1579_v11  ;;  %v11661_v44 = vadd.f32 %v12634_v15, %v1861_v7  ;;  %v11963_v15 = vld [vmem:[#allocation9 + $0x300] ss:$8 sps:$4 sm:$0xff]  }
 0x4d4   :  { %10032 = vmatprep.subr.bf16.mxu0 %v11941_v17  ;;  %v11962_v17 = vld [vmem:[#allocation9 + $0x2f4] ss:$8 sps:$4 sm:$0xff]  }
 0x4d6   :  { %7961 = vmatpush1.bf16.msra.mxu1 %v11027_v49  ;;  %v11139_v49 = vcombine.low %v1571_v10, %v1579_v11  ;;  %v1683_v10 = vld [vmem:[#allocation6 + $0x1b28] sm:$0xff] }
 0x4d7   :  { %10033 = vmatpush1.bf16.msra.mxu0 %v11939_v22  ;;  %7962 = vmatprep.subr.bf16.mxu1 %v11044_v29  ;;  %v11960_v22 = vld [vmem:[#allocation9 + $0x2f0] ss:$8 sps:$4 sm:$0xff]   ;;  %v11156_v29 = vcombine.high %v1587_v25, %v1595_v28 }
 0x4d8   :  { %10034 = vmatprep.subr.bf16.mxu0 %v11944_v19  ;;  %v8358_v19 = vmax.f32 %v11661_v44, 0.0  ;;  %v1691_v11 = vld [vmem:[#allocation6 + $0x1b68] sm:$0xff] }
 0x4d9   :  { %v11252_v44 = vcombine.high %v1683_v10, %v1691_v11 }
 0x4da   :  { %7963 = vmatpush1.bf16.msra.mxu1 %v11043_v24  ;;  %v1611_v24 = vld [vmem:[#allocation6 + $0x18e8] sm:$0xff] }
 0x4db   :  { %10035 = vmatpush1.bf16.msra.mxu0 %v11942_v26  ;;  %7964 = vmatprep.subr.bf16.mxu1 %v11060_v27  ;;  %v11155_v26 = vcombine.low %v1587_v25, %v1595_v28  ;;  %v8374_v27 = vpack.c.bf16 %v8358_v19, %v8358_v19  ;;  %v11983_v25 = vld [vmem:[#allocation9 + $0x364] ss:$8 sps:$4 sm:$0xff]   ;;  %v1699_v28 = vld [vmem:[#allocation6 + $0x1ba8] sm:$0xff] }
 0x4dc   :  { %10036 = vmatprep.subr.bf16.mxu0 %v11947_v32  ;;  %v11172_v32 = vcombine.high %v1603_v18, %v1611_v24 }
 0x4de   :  { %7965 = vmatpush1.bf16.msra.mxu1 %v11059_v36  ;;  %v1627_v36 = vld [vmem:[#allocation6 + $0x1968] sm:$0xff] }
 0x4df   :  { %10037 = vmatpush1.bf16.msra.mxu0 %v11945_v37  ;;  %7966 = vmatprep.subr.bf16.mxu1 %v11076_v38  ;;  %v11171_v37 = vcombine.low %v1603_v18, %v1611_v24  ;;  %v11966_v38 = vld [vmem:[#allocation9 + $0x310] ss:$8 sps:$4 sm:$0xff]   ;;  %v11251_v24 = vcombine.low %v1683_v10, %v1691_v11  ;;  %v11993_v10 = vld [vmem:[#allocation9 + $0x3a0] ss:$8 sps:$4 sm:$0xff]  }
 0x4e0   :  { %10038 = vmatprep.subr.bf16.mxu0 %v11950_v39  ;;  %v11188_v39 = vcombine.high %v1619_v52, %v1627_v36 }
 0x4e2   :  { %7967 = vmatpush1.bf16.msra.mxu1 %v11075_v45  ;;  %v1643_v45 = vld [vmem:[#allocation6 + $0x19e8] sm:$0xff] }
 0x4e3   :  { %10039 = vmatpush1.bf16.msra.mxu0 %v11948_v51  ;;  %7968 = vmatprep.subr.bf16.mxu1 %v11092_v13  ;;  %v11187_v51 = vcombine.low %v1619_v52, %v1627_v36  ;;  %v11969_v13 = vld [vmem:[#allocation9 + $0x320] ss:$8 sps:$4 sm:$0xff]   ;;  %v11986_v36 = vld [vmem:[#allocation9 + $0x374] ss:$8 sps:$4 sm:$0xff]  }
 0x4e4   :  { %10040 = vmatprep.subr.bf16.mxu0 %v11953_v20  ;;  %v11204_v20 = vcombine.high %v1635_v42, %v1643_v45 }
 0x4e6   :  { %7969 = vmatpush1.bf16.msra.mxu1 %v11091_v47  ;;  %v1659_v47 = vld [vmem:[#allocation6 + $0x1a68] sm:$0xff] }
 0x4e7   :  { %10041 = vmatpush1.bf16.msra.mxu0 %v11951_v54  ;;  %7970 = vmatprep.subr.bf16.mxu1 %v11108_v55  ;;  %v11203_v54 = vcombine.low %v1635_v42, %v1643_v45  ;;  %v11972_v55 = vld [vmem:[#allocation9 + $0x330] ss:$8 sps:$4 sm:$0xff]  }
 0x4e8   :  { %10042 = vmatprep.subr.bf16.mxu0 %v11956_v57  ;;  %v11220_v57 = vcombine.high %v1651_v5, %v1659_v47  ;;  %v11984_v42 = vld [vmem:[#allocation9 + $0x370] ss:$8 sps:$4 sm:$0xff]  }
 0x4ea   :  { %7971 = vmatpush1.bf16.msra.mxu1 %v11107_v62  ;;  %v1675_v62 = vld [vmem:[#allocation6 + $0x1ae8] sm:$0xff] }
 0x4eb   :  { %10043 = vmatpush1.bf16.msra.mxu0 %v11954_v0  ;;  %7972 = vmatprep.subr.bf16.mxu1 %v11124_v1  ;;  %v11219_v0 = vcombine.low %v1651_v5, %v1659_v47  ;;  %v11975_v1 = vld [vmem:[#allocation9 + $0x340] ss:$8 sps:$4 sm:$0xff]   ;;  %v11236_v7 = vcombine.high %v1667_v61, %v1675_v62 }
 0x4ec   :  { %10044 = vmatprep.subr.bf16.mxu0 %v11959_v8  ;;  %v11980_v8 = vld [vmem:[#allocation9 + $0x354] ss:$8 sps:$4 sm:$0xff]   ;;  %v11987_v5 = vld [vmem:[#allocation9 + $0x380] ss:$8 sps:$4 sm:$0xff]  }
 0x4ee   :  { %7973 = vmatpush1.bf16.msra.mxu1 %v11123_v12  ;;  %v1873_v12 = vrot.slane %v12688_v6, %v12593_v59 }
 0x4ef   :  { %10045 = vmatpush1.bf16.msra.mxu0 %v11957_v16  ;;  %7974 = vmatprep.subr.bf16.mxu1 %v11140_v14  ;;  %v11235_v16 = vcombine.low %v1667_v61, %v1675_v62  ;;  %v11978_v14 = vld [vmem:[#allocation9 + $0x350] ss:$8 sps:$4 sm:$0xff]  }
 0x4f0   :  { %10046 = vmatprep.subr.bf16.mxu0 %v11962_v17  ;;  %v11990_v61 = vld [vmem:[#allocation9 + $0x390] ss:$8 sps:$4 sm:$0xff]  }
 0x4f2   :  { %7975 = vmatpush1.bf16.msra.mxu1 %v11139_v49  ;;  %v1707_v49 = vld [vmem:[#allocation6 + $0x1be8] sm:$0xff] }
 0x4f3   :  { %10047 = vmatpush1.bf16.msra.mxu0 %v11960_v22  ;;  %7985 = vmatprep.subr.bf16.mxu1 %v11156_v29 }
 0x4f4   :  { %10057 = vmatprep.subr.bf16.mxu0 %v11965_v30 }
 0x4f5   :  { %7977 = vmatmul.mubr.bf16.vlgmr.msra.gmra.mrb[20].mxu1 %v12601_v33 }
 0x4f6   :  { %10049 = vmatmul.mubr.bf16.vlgmr.msra.gmra.mrb[20].mxu0 %v8374_v27  ;;  %7986 = vmatpush1.bf16.msra.mxu1 %v11155_v26  ;;  %v11981_v27 = vld [vmem:[#allocation9 + $0x360] ss:$8 sps:$4 sm:$0xff]  }
 0x4f7   :  { %8017 = vmatprep.mubr.bf16.mxu1 %v12603_v40  ;;  %10058 = vmatpush1.bf16.msra.mxu0 %v11963_v15 }
 0x4f8   :  { %7987 = vmatprep.subr.bf16.mxu1 %v11172_v32  ;;  %10059 = vmatprep.subr.bf16.mxu0 %v11968_v34  ;;  %v11268_v32 = vcombine.high %v1699_v28, %v1707_v49 }
 0x4fa   :  { %7988 = vmatpush1.bf16.msra.mxu1 %v11171_v37  ;;  %v1715_v37 = vld [vmem:[#allocation6 + $0x1c28] sm:$0xff] }
 0x4fb   :  { %10060 = vmatpush1.bf16.msra.mxu0 %v11966_v38  ;;  %7989 = vmatprep.subr.bf16.mxu1 %v11188_v39  ;;  %v1723_v38 = vld [vmem:[#allocation6 + $0x1c68] sm:$0xff] }
 0x4fc   :  { %10061 = vmatprep.subr.bf16.mxu0 %v11971_v41  ;;  %v11267_v41 = vcombine.low %v1699_v28, %v1707_v49  ;;  %v11284_v45 = vcombine.high %v1715_v37, %v1723_v38  ;;  %v12001_v49 = vld [vmem:[#allocation9 + $0x3c4] ss:$8 sps:$4 sm:$0xff]  }
 0x4fe   :  { %7990 = vmatpush1.bf16.msra.mxu1 %v11187_v51  ;;  %v11989_v51 = vld [vmem:[#allocation9 + $0x384] ss:$8 sps:$4 sm:$0xff]  }
 0x4ff   :  { %10062 = vmatpush1.bf16.msra.mxu0 %v11969_v13  ;;  %7991 = vmatprep.subr.bf16.mxu1 %v11204_v20  ;;  %v1731_v13 = vld [vmem:[#allocation6 + $0x1ca8] sm:$0xff] }
 0x500   :  { %10063 = vmatprep.subr.bf16.mxu0 %v11974_v53  ;;  %v1739_v20 = vld [vmem:[#allocation6 + $0x1ce8] sm:$0xff]  ;;  %v11283_v53 = vcombine.low %v1715_v37, %v1723_v38  ;;  %v1869_v38 = vrot.slane %v12688_v6, %v12610_v35 }
 0x501   :  { %v11300_v47 = vcombine.high %v1731_v13, %v1739_v20 }
 0x502   :  { %7992 = vmatpush1.bf16.msra.mxu1 %v11203_v54  ;;  %v11992_v54 = vld [vmem:[#allocation9 + $0x394] ss:$8 sps:$4 sm:$0xff]  }
 0x503   :  { %10064 = vmatpush1.bf16.msra.mxu0 %v11972_v55  ;;  %7993 = vmatprep.subr.bf16.mxu1 %v11220_v57  ;;  %v1747_v55 = vld [vmem:[#allocation6 + $0x1d28] sm:$0xff] }
 0x504   :  { %10065 = vmatprep.subr.bf16.mxu0 %v11977_v58  ;;  %v1755_v57 = vld [vmem:[#allocation6 + $0x1d68] sm:$0xff]  ;;  %v11299_v58 = vcombine.low %v1731_v13, %v1739_v20  ;;  %v12005_v13 = vld [vmem:[#allocation9 + $0x3e0] ss:$8 sps:$4 sm:$0xff]  }
 0x505   :  { %v11316_v62 = vcombine.high %v1747_v55, %v1755_v57 }
 0x506   :  { %7994 = vmatpush1.bf16.msra.mxu1 %v11219_v0  ;;  %v11995_v0 = vld [vmem:[#allocation9 + $0x3a4] ss:$8 sps:$4 sm:$0xff]  }
 0x507   :  { %10066 = vmatpush1.bf16.msra.mxu0 %v11975_v1  ;;  %7995 = vmatprep.subr.bf16.mxu1 %v11236_v7  ;;  %v1763_v1 = vld [vmem:[#allocation6 + $0x1da8] sm:$0xff] }
 0x508   :  { %v12697_v17 = vpop.f32.mrb[16].mxu1  ;;  %10067 = vmatprep.subr.bf16.mxu0 %v11980_v8  ;;  %v1771_v7 = vld [vmem:[#allocation6 + $0x1de8] sm:$0xff]  ;;  %v11315_v8 = vcombine.low %v1747_v55, %v1755_v57 }
 0x509   :  { %v12699_v22 = vpop.f32.mrb[16].mxu0  ;;  %v7693_v29 = vpop.f32.mrb[17].mxu1  ;;  %v11332_v11 = vcombine.high %v1763_v1, %v1771_v7  ;;  %v12008_v57 = vld [vmem:[#allocation9 + $0x3f0] ss:$8 sps:$4 sm:$0xff]  }
 0x50a   :  { %v11664_v19 = vadd.f32 %v7693_v29, %v1873_v12  ;;  %v12701_v30 = vpop.f32.mrb[17].mxu0  ;;  %v7695_v18 = vpop.f32.mrb[18].mxu1  ;;  %7996 = vmatpush1.bf16.msra.mxu1 %v11235_v16  ;;  %v11998_v12 = vld [vmem:[#allocation9 + $0x3b4] ss:$8 sps:$4 sm:$0xff]  }
 0x50b   :  { %v8187_v26 = vpop.f32.mrb[18].mxu0  ;;  %10068 = vmatpush1.bf16.msra.mxu0 %v11978_v14  ;;  %v7696_v15 = vpop.f32.mrb[19].mxu1  ;;  %7997 = vmatprep.subr.bf16.mxu1 %v11252_v44  ;;  %v1779_v16 = vld [vmem:[#allocation6 + $0x1e28] sm:$0xff]  ;;  %v11331_v44 = vcombine.low %v1763_v1, %v1771_v7  ;;  %v845_v1 = vld [vmem:[#allocation6 + $0xf8] sm:$0xff] }
 0x50c   :  { %v8361_v34 = vmax.f32 %v11664_v19, 0.0  ;;  %v8188_v52 = vpop.f32.mrb[19].mxu0  ;;  %10069 = vmatprep.subr.bf16.mxu0 %v11983_v25  ;;  %v1787_v14 = vld [vmem:[#allocation6 + $0x1e68] sm:$0xff] }
 0x50d   :  { %v11996_v25 = vld [vmem:[#allocation9 + $0x3b0] ss:$8 sps:$4 sm:$0xff]   ;;  %v11348_v28 = vcombine.high %v1779_v16, %v1787_v14  ;;  %v11347_v18 = vcombine.low %v1779_v16, %v1787_v14  ;;  %v12004_v15 = vld [vmem:[#allocation9 + $0x3d4] ss:$8 sps:$4 sm:$0xff]  }
 0x50e   :  { %v8377_v39 = vpack.c.bf16 %v8361_v34, %v8361_v34  ;;  %7998 = vmatpush1.bf16.msra.mxu1 %v11251_v24  ;;  %v1795_v29 = vld [vmem:[#allocation6 + $0x1ea8] sm:$0xff]  ;;  %v11999_v24 = vld [vmem:[#allocation9 + $0x3c0] ss:$8 sps:$4 sm:$0xff]  }
 0x50f   :  { %10070 = vmatpush1.bf16.msra.mxu0 %v11981_v27  ;;  %7999 = vmatprep.subr.bf16.mxu1 %v11268_v32  ;;  %v1803_v19 = vld [vmem:[#allocation6 + $0x1ee8] sm:$0xff] }
 0x510   :  { %10089 = vmatprep.mubr.bf16.mxu0 %v8377_v39  ;;  %10071 = vmatprep.subr.bf16.mxu0 %v11986_v36  ;;  %v11364_v26 = vcombine.high %v1795_v29, %v1803_v19  ;;  %v1811_v27 = vld [vmem:[#allocation6 + $0x1f28] sm:$0xff]  ;;  %v11363_v34 = vcombine.low %v1795_v29, %v1803_v19  ;;  %v12007_v39 = vld [vmem:[#allocation9 + $0x3e4] ss:$8 sps:$4 sm:$0xff]  }
 0x511   :  { %v1819_v32 = vld [vmem:[#allocation6 + $0x1f68] sm:$0xff]  ;;  %v869_v29 = vld [vmem:[#allocation6 + $0x1b8] sm:$0xff] }
 0x512   :  { %8000 = vmatpush1.bf16.msra.mxu1 %v11267_v41  ;;  %v12703_v52 = vld [vmem:[#allocation7 + $0x8] sm:$0xff]  ;;  %v11380_v37 = vcombine.high %v1811_v27, %v1819_v32  ;;  %v877_v19 = vld [vmem:[#allocation6 + $0x1f8] sm:$0xff] }
 0x513   :  { %10072 = vmatpush1.bf16.msra.mxu0 %v11984_v42  ;;  %8001 = vmatprep.subr.bf16.mxu1 %v11284_v45  ;;  %v12002_v36 = vld [vmem:[#allocation9 + $0x3d0] ss:$8 sps:$4 sm:$0xff]   ;;  %v1881_v45 = vrot.slane %v12703_v52, %v12530_v50  ;;  %v12016_v16 = vld [vmem:[#allocation9 + $0x414] ss:$8 sps:$4 sm:$0xff]  }
 0x514   :  { %10073 = vmatprep.subr.bf16.mxu0 %v11989_v51  ;;  %v1827_v41 = vld [vmem:[#allocation6 + $0x1fa8] sm:$0xff]  ;;  %v11379_v51 = vcombine.low %v1811_v27, %v1819_v32  ;;  %v885_v27 = vld [vmem:[#allocation6 + $0x238] sm:$0xff] }
 0x515   :  { %v1835_v42 = vld [vmem:[#allocation6 + $0x1fe8] sm:$0xff]  ;;  %v11666_v6 = vadd.f32 %v12662_v9, %v1881_v45  ;;  %v893_v32 = vld [vmem:[#allocation6 + $0x278] sm:$0xff] }
 0x516   :  { %8002 = vmatpush1.bf16.msra.mxu1 %v11283_v53  ;;  %v11396_v20 = vcombine.high %v1827_v41, %v1835_v42  ;;  %v11663_v53 = vadd.f32 %v12697_v17, %v1869_v38  ;;  %v11395_v55 = vcombine.low %v1827_v41, %v1835_v42  ;;  %v901_v38 = vld [vmem:[#allocation6 + $0x2b8] sm:$0xff]  ;;  %v10455_v41 = vcombine.low %v885_v27, %v893_v32 }
 0x517   :  { %10074 = vmatpush1.bf16.msra.mxu0 %v11987_v5  ;;  %8003 = vmatprep.subr.bf16.mxu1 %v11300_v47  ;;  %v12010_v5 = vld [vmem:[#allocation9 + $0x3f4] ss:$8 sps:$4 sm:$0xff]   ;;  %v821_v47 = vld [vmem:[#allocation6 + $0x38] sm:$0xff]  ;;  %v8363_v7 = vmax.f32 %v11666_v6, 0.0 }
 0x518   :  { %10075 = vmatprep.subr.bf16.mxu0 %v11992_v54  ;;  %v829_v54 = vld [vmem:[#allocation6 + $0x78] sm:$0xff] }
 0x519   :  { %v10391_v17 = vcombine.low %v821_v47, %v829_v54  ;;  %v8379_v14 = vpack.c.bf16 %v8363_v7, %v8363_v7  ;;  %v12023_v42 = vld [vmem:[#allocation9 + $0x440] ss:$8 sps:$4 sm:$0xff]  }
 0x51a   :  { %8004 = vmatpush1.bf16.msra.mxu1 %v11299_v58  ;;  %v10392_v58 = vcombine.high %v821_v47, %v829_v54  ;;  %v12031_v54 = vld [vmem:[#allocation9 + $0x464] ss:$8 sps:$4 sm:$0xff]  }
 0x51b   :  { %10076 = vmatpush1.bf16.msra.mxu0 %v11990_v61  ;;  %8005 = vmatprep.subr.bf16.mxu1 %v11316_v62  ;;  %v8360_v61 = vmax.f32 %v11663_v53, 0.0  ;;  %v12013_v62 = vld [vmem:[#allocation9 + $0x404] ss:$8 sps:$4 sm:$0xff]  }
 0x51c   :  { %10077 = vmatprep.subr.bf16.mxu0 %v11995_v0  ;;  %v837_v0 = vld [vmem:[#allocation6 + $0xb8] sm:$0xff] }
 0x51d   :  { %v10408_v9 = vcombine.high %v837_v0, %v845_v1  ;;  %v933_v6 = vld [vmem:[#allocation6 + $0x3b8] sm:$0xff] }
 0x51e   :  { %8006 = vmatpush1.bf16.msra.mxu1 %v11315_v8  ;;  %v12011_v8 = vld [vmem:[#allocation9 + $0x400] ss:$8 sps:$4 sm:$0xff]  }
 0x51f   :  { %10078 = vmatpush1.bf16.msra.mxu0 %v11993_v10  ;;  %8007 = vmatprep.subr.bf16.mxu1 %v11332_v11  ;;  %v8376_v10 = vpack.c.bf16 %v8360_v61, %v8360_v61  ;;  %v853_v11 = vld [vmem:[#allocation6 + $0x138] sm:$0xff] }
 0x520   :  { %10079 = vmatprep.subr.bf16.mxu0 %v11998_v12  ;;  %v861_v12 = vld [vmem:[#allocation6 + $0x178] sm:$0xff] }
 0x522   :  { %8008 = vmatpush1.bf16.msra.mxu1 %v11331_v44  ;;  %v10407_v44 = vcombine.low %v837_v0, %v845_v1  ;;  %v949_v0 = vld [vmem:[#allocation6 + $0x438] sm:$0xff] }
 0x523   :  { %10080 = vmatpush1.bf16.msra.mxu0 %v11996_v25  ;;  %8009 = vmatprep.subr.bf16.mxu1 %v11348_v28  ;;  %v12014_v25 = vld [vmem:[#allocation9 + $0x410] ss:$8 sps:$4 sm:$0xff]   ;;  %v10424_v28 = vcombine.high %v853_v11, %v861_v12  ;;  %v957_v1 = vld [vmem:[#allocation6 + $0x478] sm:$0xff] }
 0x524   :  { %10081 = vmatprep.subr.bf16.mxu0 %v12001_v49  ;;  %v12019_v49 = vld [vmem:[#allocation9 + $0x424] ss:$8 sps:$4 sm:$0xff]  }
 0x526   :  { %8010 = vmatpush1.bf16.msra.mxu1 %v11347_v18  ;;  %v10423_v18 = vcombine.low %v853_v11, %v861_v12  ;;  %v973_v11 = vld [vmem:[#allocation6 + $0x4f8] sm:$0xff]  ;;  %v10519_v12 = vcombine.low %v949_v0, %v957_v1 }
 0x527   :  { %10082 = vmatpush1.bf16.msra.mxu0 %v11999_v24  ;;  %8011 = vmatprep.subr.bf16.mxu1 %v11364_v26  ;;  %v12017_v24 = vld [vmem:[#allocation9 + $0x420] ss:$8 sps:$4 sm:$0xff]   ;;  %v10440_v26 = vcombine.high %v869_v29, %v877_v19 }
 0x528   :  { %10083 = vmatprep.subr.bf16.mxu0 %v12004_v15  ;;  %v12022_v15 = vld [vmem:[#allocation9 + $0x434] ss:$8 sps:$4 sm:$0xff]  }
 0x52a   :  { %8012 = vmatpush1.bf16.msra.mxu1 %v11363_v34  ;;  %v12020_v34 = vld [vmem:[#allocation9 + $0x430] ss:$8 sps:$4 sm:$0xff]  }
 0x52b   :  { %10084 = vmatpush1.bf16.msra.mxu0 %v12002_v36  ;;  %8013 = vmatprep.subr.bf16.mxu1 %v11380_v37  ;;  %v10456_v36 = vcombine.high %v885_v27, %v893_v32  ;;  %v12025_v37 = vld [vmem:[#allocation9 + $0x444] ss:$8 sps:$4 sm:$0xff]   ;;  %v12041_v27 = vld [vmem:[#allocation9 + $0x4a0] ss:$8 sps:$4 sm:$0xff]  }
 0x52c   :  { %10085 = vmatprep.subr.bf16.mxu0 %v12007_v39  ;;  %v909_v39 = vld [vmem:[#allocation6 + $0x2f8] sm:$0xff] }
 0x52d   :  { %v10472_v45 = vcombine.high %v901_v38, %v909_v39  ;;  %v10471_v53 = vcombine.low %v901_v38, %v909_v39  ;;  %v12044_v38 = vld [vmem:[#allocation9 + $0x4b0] ss:$8 sps:$4 sm:$0xff]  }
 0x52e   :  { %8014 = vmatpush1.bf16.msra.mxu1 %v11379_v51  ;;  %v12028_v51 = vld [vmem:[#allocation9 + $0x454] ss:$8 sps:$4 sm:$0xff]  }
 0x52f   :  { %10086 = vmatpush1.bf16.msra.mxu0 %v12005_v13  ;;  %8015 = vmatprep.subr.bf16.mxu1 %v11396_v20  ;;  %v917_v13 = vld [vmem:[#allocation6 + $0x338] sm:$0xff] }
 0x530   :  { %10087 = vmatprep.subr.bf16.mxu0 %v12010_v5  ;;  %v925_v20 = vld [vmem:[#allocation6 + $0x378] sm:$0xff]  ;;  %v12026_v5 = vld [vmem:[#allocation9 + $0x450] ss:$8 sps:$4 sm:$0xff]  }
 0x531   :  { %v10488_v47 = vcombine.high %v917_v13, %v925_v20 }
 0x532   :  { %8016 = vmatpush1.bf16.msra.mxu1 %v11395_v55  ;;  %v941_v55 = vld [vmem:[#allocation6 + $0x3f8] sm:$0xff] }
 0x533   :  { %10088 = vmatpush1.bf16.msra.mxu0 %v12008_v57  ;;  %8190 = vmatprep.subr.bf16.mxu1 %v10392_v58  ;;  %v10487_v57 = vcombine.low %v917_v13, %v925_v20  ;;  %v12029_v58 = vld [vmem:[#allocation9 + $0x460] ss:$8 sps:$4 sm:$0xff]   ;;  %v10504_v61 = vcombine.high %v933_v6, %v941_v55  ;;  %v10503_v7 = vcombine.low %v933_v6, %v941_v55  ;;  %v12050_v6 = vld [vmem:[#allocation9 + $0x4d0] ss:$8 sps:$4 sm:$0xff]  }
 0x534   :  { %10098 = vmatprep.subr.bf16.mxu0 %v12013_v62  ;;  %v12034_v62 = vld [vmem:[#allocation9 + $0x474] ss:$8 sps:$4 sm:$0xff]   ;;  %v12047_v13 = vld [vmem:[#allocation9 + $0x4c0] ss:$8 sps:$4 sm:$0xff]  }
 0x535   :  { %8018 = vmatmul.mubr.bf16.vlgmr.msra.gmra.mrb[20].mxu1 %v12614_v23 }
 0x536   :  { %10090 = vmatmul.mubr.bf16.vlgmr.msra.gmra.mrb[20].mxu0 %v8376_v10  ;;  %8191 = vmatpush1.bf16.msra.mxu1 %v10391_v17  ;;  %v12032_v17 = vld [vmem:[#allocation9 + $0x470] ss:$8 sps:$4 sm:$0xff]   ;;  %v12037_v10 = vld [vmem:[#allocation9 + $0x484] ss:$8 sps:$4 sm:$0xff]  }
 0x537   :  { %8222 = vmatprep.mubr.bf16.mxu1 %v12541_v2  ;;  %10099 = vmatpush1.bf16.msra.mxu0 %v12011_v8  ;;  %v10439_v2 = vcombine.low %v869_v29, %v877_v19  ;;  %v10520_v8 = vcombine.high %v949_v0, %v957_v1  ;;  %v12038_v29 = vld [vmem:[#allocation9 + $0x490] ss:$8 sps:$4 sm:$0xff]   ;;  %v12053_v1 = vld [vmem:[#allocation9 + $0x4e0] ss:$8 sps:$4 sm:$0xff]  }
 0x538   :  { %10130 = vmatprep.mubr.bf16.mxu0 %v8379_v14  ;;  %8192 = vmatprep.subr.bf16.mxu1 %v10408_v9  ;;  %v965_v9 = vld [vmem:[#allocation6 + $0x4b8] sm:$0xff] }
 0x539   :  { %10100 = vmatprep.subr.bf16.mxu0 %v12016_v16  ;;  %v12035_v16 = vld [vmem:[#allocation9 + $0x480] ss:$8 sps:$4 sm:$0xff]   ;;  %v10536_v14 = vcombine.high %v965_v9, %v973_v11 }
 0x53a   :  { %8193 = vmatpush1.bf16.msra.mxu1 %v10407_v44  ;;  %v12040_v44 = vld [vmem:[#allocation9 + $0x494] ss:$8 sps:$4 sm:$0xff]  }
 0x53b   :  { %10101 = vmatpush1.bf16.msra.mxu0 %v12014_v25  ;;  %8194 = vmatprep.subr.bf16.mxu1 %v10424_v28  ;;  %v981_v25 = vld [vmem:[#allocation6 + $0x538] sm:$0xff] }
 0x53c   :  { %10102 = vmatprep.subr.bf16.mxu0 %v12019_v49  ;;  %v989_v28 = vld [vmem:[#allocation6 + $0x578] sm:$0xff]  ;;  %v10535_v49 = vcombine.low %v965_v9, %v973_v11 }
 0x53d   :  { %v10552_v19 = vcombine.high %v981_v25, %v989_v28  ;;  %v1085_v9 = vld [vmem:[#allocation6 + $0x878] sm:$0xff] }
 0x53e   :  { %8195 = vmatpush1.bf16.msra.mxu1 %v10423_v18  ;;  %v12043_v18 = vld [vmem:[#allocation9 + $0x4a4] ss:$8 sps:$4 sm:$0xff]  }
 0x53f   :  { %10103 = vmatpush1.bf16.msra.mxu0 %v12017_v24  ;;  %8196 = vmatprep.subr.bf16.mxu1 %v10440_v26  ;;  %v997_v24 = vld [vmem:[#allocation6 + $0x5b8] sm:$0xff] }
 0x540   :  { %10104 = vmatprep.subr.bf16.mxu0 %v12022_v15  ;;  %v1005_v26 = vld [vmem:[#allocation6 + $0x5f8] sm:$0xff]  ;;  %v10551_v15 = vcombine.low %v981_v25, %v989_v28 }
 0x541   :  { %v10568_v32 = vcombine.high %v997_v24, %v1005_v26  ;;  %v1101_v25 = vld [vmem:[#allocation6 + $0x8f8] sm:$0xff] }
 0x542   :  { %8197 = vmatpush1.bf16.msra.mxu1 %v10439_v2  ;;  %v12046_v2 = vld [vmem:[#allocation9 + $0x4b4] ss:$8 sps:$4 sm:$0xff]   ;;  %v12061_v28 = vld [vmem:[#allocation9 + $0x504] ss:$8 sps:$4 sm:$0xff]  }
 0x543   :  { %10105 = vmatpush1.bf16.msra.mxu0 %v12020_v34  ;;  %8198 = vmatprep.subr.bf16.mxu1 %v10456_v36  ;;  %v1013_v34 = vld [vmem:[#allocation6 + $0x638] sm:$0xff] }
 0x544   :  { %10106 = vmatprep.subr.bf16.mxu0 %v12025_v37  ;;  %v1021_v36 = vld [vmem:[#allocation6 + $0x678] sm:$0xff]  ;;  %v10567_v37 = vcombine.low %v997_v24, %v1005_v26  ;;  %v12064_v26 = vld [vmem:[#allocation9 + $0x514] ss:$8 sps:$4 sm:$0xff]  }
 0x545   :  { %v10584_v39 = vcombine.high %v1013_v34, %v1021_v36  ;;  %v12059_v24 = vld [vmem:[#allocation9 + $0x500] ss:$8 sps:$4 sm:$0xff]  }
 0x546   :  { %8199 = vmatpush1.bf16.msra.mxu1 %v10455_v41  ;;  %v12049_v41 = vld [vmem:[#allocation9 + $0x4c4] ss:$8 sps:$4 sm:$0xff]  }
 0x547   :  { %10107 = vmatpush1.bf16.msra.mxu0 %v12023_v42  ;;  %8200 = vmatprep.subr.bf16.mxu1 %v10472_v45  ;;  %v1029_v42 = vld [vmem:[#allocation6 + $0x6b8] sm:$0xff] }
 0x548   :  { %10108 = vmatprep.subr.bf16.mxu0 %v12028_v51  ;;  %v1037_v45 = vld [vmem:[#allocation6 + $0x6f8] sm:$0xff]  ;;  %v10583_v51 = vcombine.low %v1013_v34, %v1021_v36  ;;  %v12062_v34 = vld [vmem:[#allocation9 + $0x510] ss:$8 sps:$4 sm:$0xff]  }
 0x549   :  { %v10600_v20 = vcombine.high %v1029_v42, %v1037_v45  ;;  %v12067_v36 = vld [vmem:[#allocation9 + $0x524] ss:$8 sps:$4 sm:$0xff]  }
 0x54a   :  { %8201 = vmatpush1.bf16.msra.mxu1 %v10471_v53  ;;  %v12052_v53 = vld [vmem:[#allocation9 + $0x4d4] ss:$8 sps:$4 sm:$0xff]  }
 0x54b   :  { %10109 = vmatpush1.bf16.msra.mxu0 %v12026_v5  ;;  %8202 = vmatprep.subr.bf16.mxu1 %v10488_v47  ;;  %v1045_v5 = vld [vmem:[#allocation6 + $0x738] sm:$0xff] }
 0x54c   :  { %10110 = vmatprep.subr.bf16.mxu0 %v12031_v54  ;;  %v1053_v47 = vld [vmem:[#allocation6 + $0x778] sm:$0xff]  ;;  %v10599_v54 = vcombine.low %v1029_v42, %v1037_v45  ;;  %v12070_v42 = vld [vmem:[#allocation9 + $0x534] ss:$8 sps:$4 sm:$0xff]  }
 0x54d   :  { %v10616_v55 = vcombine.high %v1045_v5, %v1053_v47  ;;  %v10615_v0 = vcombine.low %v1045_v5, %v1053_v47 }
 0x54e   :  { %8203 = vmatpush1.bf16.msra.mxu1 %v10487_v57  ;;  %v1877_v57 = vrot.slane %v12703_v52, %v12525_v48 }
 0x54f   :  { %10111 = vmatpush1.bf16.msra.mxu0 %v12029_v58  ;;  %8204 = vmatprep.subr.bf16.mxu1 %v10504_v61  ;;  %v12055_v58 = vld [vmem:[#allocation9 + $0x4e4] ss:$8 sps:$4 sm:$0xff]  }
 0x550   :  { %10112 = vmatprep.subr.bf16.mxu0 %v12034_v62  ;;  %v1061_v61 = vld [vmem:[#allocation6 + $0x7b8] sm:$0xff] }
 0x551   :  { %v1069_v62 = vld [vmem:[#allocation6 + $0x7f8] sm:$0xff] }
 0x552   :  { %8205 = vmatpush1.bf16.msra.mxu1 %v10503_v7  ;;  %v10632_v7 = vcombine.high %v1061_v61, %v1069_v62  ;;  %v10631_v11 = vcombine.low %v1061_v61, %v1069_v62  ;;  %v1189_v62 = vld [vmem:[#allocation6 + $0xbb8] sm:$0xff] }
 0x553   :  { %10113 = vmatpush1.bf16.msra.mxu0 %v12032_v17  ;;  %8206 = vmatprep.subr.bf16.mxu1 %v10520_v8  ;;  %v11665_v17 = vadd.f32 %v12658_v4, %v1877_v57  ;;  %v12058_v8 = vld [vmem:[#allocation9 + $0x4f4] ss:$8 sps:$4 sm:$0xff]  }
 0x554   :  { %10114 = vmatprep.subr.bf16.mxu0 %v12037_v10  ;;  %v1077_v10 = vld [vmem:[#allocation6 + $0x838] sm:$0xff]  ;;  %v12076_v57 = vld [vmem:[#allocation9 + $0x554] ss:$8 sps:$4 sm:$0xff]  }
 0x556   :  { %8207 = vmatpush1.bf16.msra.mxu1 %v10519_v12  ;;  %v12056_v12 = vld [vmem:[#allocation9 + $0x4f0] ss:$8 sps:$4 sm:$0xff]  }
 0x557   :  { %10115 = vmatpush1.bf16.msra.mxu0 %v12035_v16  ;;  %8208 = vmatprep.subr.bf16.mxu1 %v10536_v14  ;;  %v10648_v16 = vcombine.high %v1077_v10, %v1085_v9  ;;  %v8362_v14 = vmax.f32 %v11665_v17, 0.0 }
 0x558   :  { %10116 = vmatprep.subr.bf16.mxu0 %v12040_v44  ;;  %v1093_v44 = vld [vmem:[#allocation6 + $0x8b8] sm:$0xff] }
 0x559   :  { %v10664_v4 = vcombine.high %v1093_v44, %v1101_v25 }
 0x55a   :  { %8209 = vmatpush1.bf16.msra.mxu1 %v10535_v49  ;;  %v10647_v49 = vcombine.low %v1077_v10, %v1085_v9  ;;  %v1205_v10 = vld [vmem:[#allocation6 + $0xc38] sm:$0xff] }
 0x55b   :  { %10117 = vmatpush1.bf16.msra.mxu0 %v12038_v29  ;;  %8210 = vmatprep.subr.bf16.mxu1 %v10552_v19  ;;  %v8378_v29 = vpack.c.bf16 %v8362_v14, %v8362_v14  ;;  %v1109_v19 = vld [vmem:[#allocation6 + $0x938] sm:$0xff] }
 0x55c   :  { %10118 = vmatprep.subr.bf16.mxu0 %v12043_v18  ;;  %v1117_v18 = vld [vmem:[#allocation6 + $0x978] sm:$0xff] }
 0x55d   :  { %v1213_v9 = vld [vmem:[#allocation6 + $0xc78] sm:$0xff] }
 0x55e   :  { %8211 = vmatpush1.bf16.msra.mxu1 %v10551_v15  ;;  %v10663_v15 = vcombine.low %v1093_v44, %v1101_v25  ;;  %v10776_v14 = vcombine.high %v1205_v10, %v1213_v9  ;;  %v1221_v44 = vld [vmem:[#allocation6 + $0xcb8] sm:$0xff] }
 0x55f   :  { %10119 = vmatpush1.bf16.msra.mxu0 %v12041_v27  ;;  %8212 = vmatprep.subr.bf16.mxu1 %v10568_v32  ;;  %v10680_v27 = vcombine.high %v1109_v19, %v1117_v18  ;;  %v1125_v32 = vld [vmem:[#allocation6 + $0x9b8] sm:$0xff] }
 0x560   :  { %10120 = vmatprep.subr.bf16.mxu0 %v12046_v2  ;;  %v1133_v2 = vld [vmem:[#allocation6 + $0x9f8] sm:$0xff] }
 0x561   :  { %v1229_v25 = vld [vmem:[#allocation6 + $0xcf8] sm:$0xff] }
 0x562   :  { %8213 = vmatpush1.bf16.msra.mxu1 %v10567_v37  ;;  %v10679_v37 = vcombine.low %v1109_v19, %v1117_v18  ;;  %v1237_v19 = vld [vmem:[#allocation6 + $0xd38] sm:$0xff] }
 0x563   :  { %10121 = vmatpush1.bf16.msra.mxu0 %v12044_v38  ;;  %8214 = vmatprep.subr.bf16.mxu1 %v10584_v39  ;;  %v10696_v38 = vcombine.high %v1125_v32, %v1133_v2  ;;  %v1141_v39 = vld [vmem:[#allocation6 + $0xa38] sm:$0xff] }
 0x564   :  { %10122 = vmatprep.subr.bf16.mxu0 %v12049_v41  ;;  %v12065_v41 = vld [vmem:[#allocation9 + $0x520] ss:$8 sps:$4 sm:$0xff]  }
 0x565   :  { %v1245_v18 = vld [vmem:[#allocation6 + $0xd78] sm:$0xff] }
 0x566   :  { %8215 = vmatpush1.bf16.msra.mxu1 %v10583_v51  ;;  %v1157_v51 = vld [vmem:[#allocation6 + $0xab8] sm:$0xff] }
 0x567   :  { %10123 = vmatpush1.bf16.msra.mxu0 %v12047_v13  ;;  %8216 = vmatprep.subr.bf16.mxu1 %v10600_v20  ;;  %v1165_v13 = vld [vmem:[#allocation6 + $0xaf8] sm:$0xff]  ;;  %v12068_v20 = vld [vmem:[#allocation9 + $0x530] ss:$8 sps:$4 sm:$0xff]  }
 0x568   :  { %10124 = vmatprep.subr.bf16.mxu0 %v12052_v53  ;;  %v12073_v53 = vld [vmem:[#allocation9 + $0x544] ss:$8 sps:$4 sm:$0xff]   ;;  %v10728_v47 = vcombine.high %v1157_v51, %v1165_v13 }
 0x56a   :  { %8217 = vmatpush1.bf16.msra.mxu1 %v10599_v54  ;;  %v1173_v54 = vld [vmem:[#allocation6 + $0xb38] sm:$0xff] }
 0x56b   :  { %10125 = vmatpush1.bf16.msra.mxu0 %v12050_v6  ;;  %8218 = vmatprep.subr.bf16.mxu1 %v10616_v55  ;;  %v1181_v6 = vld [vmem:[#allocation6 + $0xb78] sm:$0xff] }
 0x56c   :  { %10126 = vmatprep.subr.bf16.mxu0 %v12055_v58  ;;  %v12071_v55 = vld [vmem:[#allocation9 + $0x540] ss:$8 sps:$4 sm:$0xff]   ;;  %v10727_v58 = vcombine.low %v1157_v51, %v1165_v13  ;;  %v10744_v61 = vcombine.high %v1173_v54, %v1181_v6  ;;  %v10743_v17 = vcombine.low %v1173_v54, %v1181_v6 }
 0x56d   :  { %v1285_v51 = vld [vmem:[#allocation6 + $0xeb8] sm:$0xff] }
 0x56e   :  { %8219 = vmatpush1.bf16.msra.mxu1 %v10615_v0  ;;  %v1197_v0 = vld [vmem:[#allocation6 + $0xbf8] sm:$0xff] }
 0x56f   :  { %10127 = vmatpush1.bf16.msra.mxu0 %v12053_v1  ;;  %8220 = vmatprep.subr.bf16.mxu1 %v10632_v7  ;;  %v12074_v1 = vld [vmem:[#allocation9 + $0x550] ss:$8 sps:$4 sm:$0xff]   ;;  %v12079_v7 = vld [vmem:[#allocation9 + $0x564] ss:$8 sps:$4 sm:$0xff]  }
 0x570   :  { %10128 = vmatprep.subr.bf16.mxu0 %v12058_v8  ;;  %v10760_v8 = vcombine.high %v1189_v62, %v1197_v0  ;;  %v1293_v13 = vld [vmem:[#allocation6 + $0xef8] sm:$0xff] }
 0x571   :  { %v1301_v54 = vld [vmem:[#allocation6 + $0xf38] sm:$0xff] }
 0x572   :  { %8221 = vmatpush1.bf16.msra.mxu1 %v10631_v11  ;;  %v12077_v11 = vld [vmem:[#allocation9 + $0x560] ss:$8 sps:$4 sm:$0xff]  }
 0x573   :  { %10129 = vmatpush1.bf16.msra.mxu0 %v12056_v12  ;;  %8231 = vmatprep.subr.bf16.mxu1 %v10648_v16  ;;  %v12082_v12 = vld [vmem:[#allocation9 + $0x574] ss:$8 sps:$4 sm:$0xff]   ;;  %v10759_v16 = vcombine.low %v1189_v62, %v1197_v0  ;;  %v1309_v6 = vld [vmem:[#allocation6 + $0xf78] sm:$0xff] }
 0x574   :  { %10139 = vmatprep.subr.bf16.mxu0 %v12061_v28  ;;  %v12080_v28 = vld [vmem:[#allocation9 + $0x570] ss:$8 sps:$4 sm:$0xff]   ;;  %v1317_v62 = vld [vmem:[#allocation6 + $0xfb8] sm:$0xff] }
 0x575   :  { %8223 = vmatmul.mubr.bf16.vlgmr.msra.gmra.mrb[24].mxu1 %v12543_v3  ;;  %v1149_v3 = vld [vmem:[#allocation6 + $0xa78] sm:$0xff] }
 0x576   :  { %10131 = vmatmul.mubr.bf16.vlgmr.msra.gmra.mrb[20].mxu0 %v8378_v29  ;;  %8232 = vmatpush1.bf16.msra.mxu1 %v10647_v49  ;;  %v10712_v45 = vcombine.high %v1141_v39, %v1149_v3  ;;  %v10711_v5 = vcombine.low %v1141_v39, %v1149_v3  ;;  %v12085_v49 = vld [vmem:[#allocation9 + $0x584] ss:$8 sps:$4 sm:$0xff]   ;;  %v10792_v29 = vcombine.high %v1221_v44, %v1229_v25 }
 0x577   :  { %8263 = vmatprep.mubr.bf16.mxu1 %v12557_v31  ;;  %8233 = vmatprep.subr.bf16.mxu1 %v10664_v4  ;;  %v10695_v31 = vcombine.low %v1125_v32, %v1133_v2  ;;  %v10775_v4 = vcombine.low %v1205_v10, %v1213_v9  ;;  %v1253_v32 = vld [vmem:[#allocation6 + $0xdb8] sm:$0xff] }
 0x578   :  { %10140 = vmatpush1.bf16.msra.mxu0 %v12059_v24  ;;  %v12083_v24 = vld [vmem:[#allocation9 + $0x580] ss:$8 sps:$4 sm:$0xff]  }
 0x579   :  { %10141 = vmatprep.subr.bf16.mxu0 %v12064_v26  ;;  %v12088_v26 = vld [vmem:[#allocation9 + $0x594] ss:$8 sps:$4 sm:$0xff]   ;;  %v1261_v2 = vld [vmem:[#allocation6 + $0xdf8] sm:$0xff] }
 0x57a   :  { %8234 = vmatpush1.bf16.msra.mxu1 %v10663_v15  ;;  %v10791_v15 = vcombine.low %v1221_v44, %v1229_v25  ;;  %v1269_v39 = vld [vmem:[#allocation6 + $0xe38] sm:$0xff] }
 0x57b   :  { %8235 = vmatprep.subr.bf16.mxu1 %v10680_v27  ;;  %v10808_v27 = vcombine.high %v1237_v19, %v1245_v18  ;;  %v1277_v3 = vld [vmem:[#allocation6 + $0xe78] sm:$0xff] }
 0x57c   :  { %10142 = vmatpush1.bf16.msra.mxu0 %v12062_v34  ;;  %v12086_v34 = vld [vmem:[#allocation9 + $0x590] ss:$8 sps:$4 sm:$0xff]   ;;  %v1325_v0 = vld [vmem:[#allocation6 + $0xff8] sm:$0xff] }
 0x57d   :  { %10143 = vmatprep.subr.bf16.mxu0 %v12067_v36  ;;  %v12091_v36 = vld [vmem:[#allocation9 + $0x5a4] ss:$8 sps:$4 sm:$0xff]  }
 0x57e   :  { %8236 = vmatpush1.bf16.msra.mxu1 %v10679_v37  ;;  %v10807_v37 = vcombine.low %v1237_v19, %v1245_v18  ;;  %v1333_v10 = vld [vmem:[#allocation6 + $0x1038] sm:$0xff] }
 0x57f   :  { %8237 = vmatprep.subr.bf16.mxu1 %v10696_v38  ;;  %v10824_v38 = vcombine.high %v1253_v32, %v1261_v2  ;;  %v1341_v9 = vld [vmem:[#allocation6 + $0x1078] sm:$0xff] }
 0x580   :  { %10144 = vmatpush1.bf16.msra.mxu0 %v12065_v41  ;;  %v12089_v41 = vld [vmem:[#allocation9 + $0x5a0] ss:$8 sps:$4 sm:$0xff]  }
 0x581   :  { %10145 = vmatprep.subr.bf16.mxu0 %v12070_v42  ;;  %v12094_v42 = vld [vmem:[#allocation9 + $0x5b4] ss:$8 sps:$4 sm:$0xff]   ;;  %v1349_v44 = vld [vmem:[#allocation6 + $0x10b8] sm:$0xff] }
 0x582   :  { %8238 = vmatpush1.bf16.msra.mxu1 %v10695_v31  ;;  %v10823_v31 = vcombine.low %v1253_v32, %v1261_v2  ;;  %v1357_v25 = vld [vmem:[#allocation6 + $0x10f8] sm:$0xff] }
 0x583   :  { %8239 = vmatprep.subr.bf16.mxu1 %v10712_v45  ;;  %v10840_v45 = vcombine.high %v1269_v39, %v1277_v3  ;;  %v1365_v19 = vld [vmem:[#allocation6 + $0x1138] sm:$0xff] }
 0x584   :  { %10146 = vmatpush1.bf16.msra.mxu0 %v12068_v20  ;;  %v12092_v20 = vld [vmem:[#allocation9 + $0x5b0] ss:$8 sps:$4 sm:$0xff]   ;;  %v1373_v18 = vld [vmem:[#allocation6 + $0x1178] sm:$0xff] }
 0x585   :  { %10147 = vmatprep.subr.bf16.mxu0 %v12073_v53  ;;  %v12097_v53 = vld [vmem:[#allocation9 + $0x5c4] ss:$8 sps:$4 sm:$0xff]   ;;  %v10935_v32 = vcombine.low %v1365_v19, %v1373_v18 }
 0x586   :  { %8240 = vmatpush1.bf16.msra.mxu1 %v10711_v5  ;;  %v10839_v5 = vcombine.low %v1269_v39, %v1277_v3  ;;  %v1421_v39 = vld [vmem:[#allocation6 + $0x12f8] sm:$0xff] }
 0x587   :  { %8241 = vmatprep.subr.bf16.mxu1 %v10728_v47  ;;  %v10856_v47 = vcombine.high %v1285_v51, %v1293_v13 }
 0x588   :  { %10148 = vmatpush1.bf16.msra.mxu0 %v12071_v55  ;;  %v12095_v55 = vld [vmem:[#allocation9 + $0x5c0] ss:$8 sps:$4 sm:$0xff]  }
 0x589   :  { %10149 = vmatprep.subr.bf16.mxu0 %v12076_v57  ;;  %v12100_v57 = vld [vmem:[#allocation9 + $0x5d4] ss:$8 sps:$4 sm:$0xff]  }
 0x58a   :  { %8242 = vmatpush1.bf16.msra.mxu1 %v10727_v58  ;;  %v10855_v58 = vcombine.low %v1285_v51, %v1293_v13  ;;  %v1445_v51 = vld [vmem:[#allocation6 + $0x13b8] sm:$0xff] }
 0x58b   :  { %8243 = vmatprep.subr.bf16.mxu1 %v10744_v61  ;;  %v10872_v61 = vcombine.high %v1301_v54, %v1309_v6  ;;  %v1453_v13 = vld [vmem:[#allocation6 + $0x13f8] sm:$0xff] }
 0x58c   :  { %10150 = vmatpush1.bf16.msra.mxu0 %v12074_v1  ;;  %v12098_v1 = vld [vmem:[#allocation9 + $0x5d0] ss:$8 sps:$4 sm:$0xff]  }
 0x58d   :  { %10151 = vmatprep.subr.bf16.mxu0 %v12079_v7  ;;  %v12103_v7 = vld [vmem:[#allocation9 + $0x5e4] ss:$8 sps:$4 sm:$0xff]  }
 0x58e   :  { %8244 = vmatpush1.bf16.msra.mxu1 %v10743_v17  ;;  %v10871_v17 = vcombine.low %v1301_v54, %v1309_v6  ;;  %v11015_v54 = vcombine.low %v1445_v51, %v1453_v13 }
 0x58f   :  { %8245 = vmatprep.subr.bf16.mxu1 %v10760_v8  ;;  %v10888_v8 = vcombine.high %v1317_v62, %v1325_v0 }
 0x590   :  { %10152 = vmatpush1.bf16.msra.mxu0 %v12077_v11  ;;  %v12101_v11 = vld [vmem:[#allocation9 + $0x5e0] ss:$8 sps:$4 sm:$0xff]  }
 0x591   :  { %10153 = vmatprep.subr.bf16.mxu0 %v12082_v12  ;;  %v12106_v12 = vld [vmem:[#allocation9 + $0x5f4] ss:$8 sps:$4 sm:$0xff]  }
 0x592   :  { %8246 = vmatpush1.bf16.msra.mxu1 %v10759_v16  ;;  %v10887_v16 = vcombine.low %v1317_v62, %v1325_v0  ;;  %v1493_v62 = vld [vmem:[#allocation6 + $0x1538] sm:$0xff] }
 0x593   :  { %8247 = vmatprep.subr.bf16.mxu1 %v10776_v14  ;;  %v10904_v14 = vcombine.high %v1333_v10, %v1341_v9  ;;  %v1501_v0 = vld [vmem:[#allocation6 + $0x1578] sm:$0xff] }
 0x594   :  { %10154 = vmatpush1.bf16.msra.mxu0 %v12080_v28  ;;  %v12104_v28 = vld [vmem:[#allocation9 + $0x5f0] ss:$8 sps:$4 sm:$0xff]  }
 0x595   :  { %10155 = vmatprep.subr.bf16.mxu0 %v12085_v49  ;;  %v12109_v49 = vld [vmem:[#allocation9 + $0x604] ss:$8 sps:$4 sm:$0xff]  }
 0x596   :  { %8248 = vmatpush1.bf16.msra.mxu1 %v10775_v4  ;;  %v10903_v4 = vcombine.low %v1333_v10, %v1341_v9  ;;  %v11063_v10 = vcombine.low %v1493_v62, %v1501_v0 }
 0x597   :  { %8249 = vmatprep.subr.bf16.mxu1 %v10792_v29  ;;  %v10920_v29 = vcombine.high %v1349_v44, %v1357_v25 }
 0x598   :  { %10156 = vmatpush1.bf16.msra.mxu0 %v12083_v24  ;;  %v10919_v24 = vcombine.low %v1349_v44, %v1357_v25  ;;  %v1541_v44 = vld [vmem:[#allocation6 + $0x16b8] sm:$0xff] }
 0x599   :  { %10157 = vmatprep.subr.bf16.mxu0 %v12088_v26  ;;  %v10936_v26 = vcombine.high %v1365_v19, %v1373_v18  ;;  %v1549_v25 = vld [vmem:[#allocation6 + $0x16f8] sm:$0xff] }
 0x59a   :  { %8250 = vmatpush1.bf16.msra.mxu1 %v10791_v15  ;;  %v1381_v15 = vld [vmem:[#allocation6 + $0x11b8] sm:$0xff]  ;;  %v11111_v19 = vcombine.low %v1541_v44, %v1549_v25 }
 0x59b   :  { %8251 = vmatprep.subr.bf16.mxu1 %v10808_v27  ;;  %v1389_v27 = vld [vmem:[#allocation6 + $0x11f8] sm:$0xff] }
 0x59c   :  { %10158 = vmatpush1.bf16.msra.mxu0 %v12086_v34  ;;  %v10952_v2 = vcombine.high %v1381_v15, %v1389_v27  ;;  %v1397_v34 = vld [vmem:[#allocation6 + $0x1238] sm:$0xff] }
 0x59d   :  { %10159 = vmatprep.subr.bf16.mxu0 %v12091_v36  ;;  %v1405_v36 = vld [vmem:[#allocation6 + $0x1278] sm:$0xff] }
 0x59e   :  { %8252 = vmatpush1.bf16.msra.mxu1 %v10807_v37  ;;  %v10951_v37 = vcombine.low %v1381_v15, %v1389_v27  ;;  %v10967_v3 = vcombine.low %v1397_v34, %v1405_v36 }
 0x59f   :  { %8253 = vmatprep.subr.bf16.mxu1 %v10824_v38  ;;  %v10968_v38 = vcombine.high %v1397_v34, %v1405_v36 }
 0x5a0   :  { %10160 = vmatpush1.bf16.msra.mxu0 %v12089_v41  ;;  %v1429_v41 = vld [vmem:[#allocation6 + $0x1338] sm:$0xff] }
 0x5a1   :  { %10161 = vmatprep.subr.bf16.mxu0 %v12094_v42  ;;  %v1437_v42 = vld [vmem:[#allocation6 + $0x1378] sm:$0xff] }
 0x5a2   :  { %8254 = vmatpush1.bf16.msra.mxu1 %v10823_v31 }
 0x5a3   :  { %8255 = vmatprep.subr.bf16.mxu1 %v10840_v45  ;;  %v11000_v45 = vcombine.high %v1429_v41, %v1437_v42 }
 0x5a4   :  { %10162 = vmatpush1.bf16.msra.mxu0 %v12092_v20  ;;  %v10999_v20 = vcombine.low %v1429_v41, %v1437_v42 }
 0x5a5   :  { %10163 = vmatprep.subr.bf16.mxu0 %v12097_v53  ;;  %v11016_v53 = vcombine.high %v1445_v51, %v1453_v13 }
 0x5a6   :  { %8256 = vmatpush1.bf16.msra.mxu1 %v10839_v5  ;;  %v1461_v5 = vld [vmem:[#allocation6 + $0x1438] sm:$0xff] }
 0x5a7   :  { %8257 = vmatprep.subr.bf16.mxu1 %v10856_v47  ;;  %v1469_v47 = vld [vmem:[#allocation6 + $0x1478] sm:$0xff] }
 0x5a8   :  { %10164 = vmatpush1.bf16.msra.mxu0 %v12095_v55  ;;  %v11032_v6 = vcombine.high %v1461_v5, %v1469_v47  ;;  %v1477_v55 = vld [vmem:[#allocation6 + $0x14b8] sm:$0xff] }
 0x5a9   :  { %10165 = vmatprep.subr.bf16.mxu0 %v12100_v57  ;;  %v1485_v57 = vld [vmem:[#allocation6 + $0x14f8] sm:$0xff] }
 0x5aa   :  { %8258 = vmatpush1.bf16.msra.mxu1 %v10855_v58  ;;  %v11031_v58 = vcombine.low %v1461_v5, %v1469_v47 }
 0x5ab   :  { %8259 = vmatprep.subr.bf16.mxu1 %v10872_v61  ;;  %v11048_v61 = vcombine.high %v1477_v55, %v1485_v57 }
 0x5ac   :  { %10166 = vmatpush1.bf16.msra.mxu0 %v12098_v1  ;;  %v11047_v1 = vcombine.low %v1477_v55, %v1485_v57  ;;  %v1685_v55 = vld [vmem:[#allocation6 + $0x1b38] sm:$0xff] }
 0x5ad   :  { %10167 = vmatprep.subr.bf16.mxu0 %v12103_v7  ;;  %v11064_v7 = vcombine.high %v1493_v62, %v1501_v0  ;;  %v1693_v57 = vld [vmem:[#allocation6 + $0x1b78] sm:$0xff]  ;;  %v1889_v62 = vrot.slane %v12703_v52, %v12537_v56 }
 0x5ae   :  { %8260 = vmatpush1.bf16.msra.mxu1 %v10871_v17  ;;  %v1509_v17 = vld [vmem:[#allocation6 + $0x15b8] sm:$0xff] }
 0x5af   :  { %8261 = vmatprep.subr.bf16.mxu1 %v10888_v8  ;;  %v1517_v8 = vld [vmem:[#allocation6 + $0x15f8] sm:$0xff] }
 0x5b0   :  { %10168 = vmatpush1.bf16.msra.mxu0 %v12101_v11  ;;  %v11080_v9 = vcombine.high %v1509_v17, %v1517_v8  ;;  %v1525_v11 = vld [vmem:[#allocation6 + $0x1638] sm:$0xff] }
 0x5b1   :  { %10169 = vmatprep.subr.bf16.mxu0 %v12106_v12  ;;  %v1533_v12 = vld [vmem:[#allocation6 + $0x1678] sm:$0xff] }
 0x5b2   :  { %8262 = vmatpush1.bf16.msra.mxu1 %v10887_v16  ;;  %v11079_v16 = vcombine.low %v1509_v17, %v1517_v8  ;;  %v1701_v17 = vld [vmem:[#allocation6 + $0x1bb8] sm:$0xff] }
 0x5b3   :  { %8272 = vmatprep.subr.bf16.mxu1 %v10904_v14  ;;  %v11096_v14 = vcombine.high %v1525_v11, %v1533_v12  ;;  %v1709_v8 = vld [vmem:[#allocation6 + $0x1bf8] sm:$0xff] }
 0x5b4   :  { %10170 = vmatpush1.bf16.msra.mxu0 %v12104_v28  ;;  %v11095_v28 = vcombine.low %v1525_v11, %v1533_v12 }
 0x5b5   :  { %8264 = vmatmul.mubr.bf16.vlgmr.msra.gmra.mrb[24].mxu1 %v12581_v46  ;;  %10180 = vmatprep.subr.bf16.mxu0 %v12109_v49  ;;  %v1413_v46 = vld [vmem:[#allocation6 + $0x12b8] sm:$0xff]  ;;  %v11112_v49 = vcombine.high %v1541_v44, %v1549_v25  ;;  %v11272_v44 = vcombine.high %v1701_v17, %v1709_v8 }
 0x5b6   :  { %8273 = vmatpush1.bf16.msra.mxu1 %v10903_v4  ;;  %8304 = vmatprep.mubr.bf16.mxu1 %v12583_v60  ;;  %v10984_v60 = vcombine.high %v1413_v46, %v1421_v39  ;;  %v10983_v31 = vcombine.low %v1413_v46, %v1421_v39  ;;  %v1557_v4 = vld [vmem:[#allocation6 + $0x1738] sm:$0xff] }
 0x5b7   :  { %8274 = vmatprep.subr.bf16.mxu1 %v10920_v29  ;;  %v1565_v29 = vld [vmem:[#allocation6 + $0x1778] sm:$0xff] }
 0x5b8   :  { %v11128_v18 = vcombine.high %v1557_v4, %v1565_v29  ;;  %v11127_v15 = vcombine.low %v1557_v4, %v1565_v29  ;;  %v12107_v4 = vld [vmem:[#allocation9 + $0x600] ss:$8 sps:$4 sm:$0xff]   ;;  %v11271_v29 = vcombine.low %v1701_v17, %v1709_v8 }
 0x5b9   :  { %v1829_v8 = vld [vmem:[#allocation6 + $0x1fb8] sm:$0xff] }
 0x5ba   :  { %8275 = vmatpush1.bf16.msra.mxu1 %v10919_v24  ;;  %v1573_v24 = vld [vmem:[#allocation6 + $0x17b8] sm:$0xff] }
 0x5bb   :  { %8276 = vmatprep.subr.bf16.mxu1 %v10936_v26  ;;  %v1581_v26 = vld [vmem:[#allocation6 + $0x17f8] sm:$0xff] }
 0x5bc   :  { %v11144_v27 = vcombine.high %v1573_v24, %v1581_v26  ;;  %v11143_v34 = vcombine.low %v1573_v24, %v1581_v26  ;;  %v1733_v24 = vld [vmem:[#allocation6 + $0x1cb8] sm:$0xff] }
 0x5bd   :  { %v1741_v26 = vld [vmem:[#allocation6 + $0x1cf8] sm:$0xff] }
 0x5be   :  { %8277 = vmatpush1.bf16.msra.mxu1 %v10935_v32  ;;  %v1589_v32 = vld [vmem:[#allocation6 + $0x1838] sm:$0xff] }
 0x5bf   :  { %8278 = vmatprep.subr.bf16.mxu1 %v10952_v2  ;;  %v1597_v2 = vld [vmem:[#allocation6 + $0x1878] sm:$0xff] }
 0x5c0   :  { %v11160_v36 = vcombine.high %v1589_v32, %v1597_v2  ;;  %v11159_v46 = vcombine.low %v1589_v32, %v1597_v2  ;;  %v12115_v2 = vld [vmem:[#allocation9 + $0x624] ss:$8 sps:$4 sm:$0xff]  }
 0x5c2   :  { %8279 = vmatpush1.bf16.msra.mxu1 %v10951_v37  ;;  %v1605_v37 = vld [vmem:[#allocation6 + $0x18b8] sm:$0xff] }
 0x5c3   :  { %8280 = vmatprep.subr.bf16.mxu1 %v10968_v38  ;;  %v1613_v38 = vld [vmem:[#allocation6 + $0x18f8] sm:$0xff] }
 0x5c4   :  { %v11176_v39 = vcombine.high %v1605_v37, %v1613_v38  ;;  %v11175_v41 = vcombine.low %v1605_v37, %v1613_v38  ;;  %v1757_v37 = vld [vmem:[#allocation6 + $0x1d78] sm:$0xff] }
 0x5c5   :  { %v12113_v38 = vld [vmem:[#allocation9 + $0x620] ss:$8 sps:$4 sm:$0xff]  }
 0x5c6   :  { %8281 = vmatpush1.bf16.msra.mxu1 %v10967_v3  ;;  %v1621_v3 = vld [vmem:[#allocation6 + $0x1938] sm:$0xff] }
 0x5c7   :  { %8282 = vmatprep.subr.bf16.mxu1 %v10984_v60  ;;  %v1629_v60 = vld [vmem:[#allocation6 + $0x1978] sm:$0xff] }
 0x5c8   :  { %v11192_v42 = vcombine.high %v1621_v3, %v1629_v60  ;;  %v11191_v51 = vcombine.low %v1621_v3, %v1629_v60  ;;  %v1765_v60 = vld [vmem:[#allocation6 + $0x1db8] sm:$0xff] }
 0x5ca   :  { %8283 = vmatpush1.bf16.msra.mxu1 %v10983_v31  ;;  %v1637_v31 = vld [vmem:[#allocation6 + $0x19b8] sm:$0xff] }
 0x5cb   :  { %8284 = vmatprep.subr.bf16.mxu1 %v11000_v45  ;;  %v1645_v45 = vld [vmem:[#allocation6 + $0x19f8] sm:$0xff] }
 0x5cc   :  { %v11208_v13 = vcombine.high %v1637_v31, %v1645_v45  ;;  %v11207_v5 = vcombine.low %v1637_v31, %v1645_v45  ;;  %v12121_v45 = vld [vmem:[#allocation9 + $0x644] ss:$8 sps:$4 sm:$0xff]  }
 0x5ce   :  { %8285 = vmatpush1.bf16.msra.mxu1 %v10999_v20  ;;  %v1653_v20 = vld [vmem:[#allocation6 + $0x1a38] sm:$0xff] }
 0x5cf   :  { %8286 = vmatprep.subr.bf16.mxu1 %v11016_v53  ;;  %v1661_v53 = vld [vmem:[#allocation6 + $0x1a78] sm:$0xff] }
 0x5d0   :  { %v11224_v47 = vcombine.high %v1653_v20, %v1661_v53 }
 0x5d2   :  { %8287 = vmatpush1.bf16.msra.mxu1 %v11015_v54  ;;  %v1669_v54 = vld [vmem:[#allocation6 + $0x1ab8] sm:$0xff] }
 0x5d3   :  { %8288 = vmatprep.subr.bf16.mxu1 %v11032_v6  ;;  %v11223_v6 = vcombine.low %v1653_v20, %v1661_v53  ;;  %v1789_v20 = vld [vmem:[#allocation6 + $0x1e78] sm:$0xff] }
 0x5d4   :  { %v12119_v53 = vld [vmem:[#allocation9 + $0x640] ss:$8 sps:$4 sm:$0xff]  }
 0x5d6   :  { %8289 = vmatpush1.bf16.msra.mxu1 %v11031_v58  ;;  %v1897_v58 = vrot.slane %v12703_v52, %v12573_v21  ;;  %v11255_v21 = vcombine.low %v1685_v55, %v1693_v57 }
 0x5d7   :  { %8290 = vmatprep.subr.bf16.mxu1 %v11048_v61  ;;  %v1885_v61 = vrot.slane %v12703_v52, %v12570_v63  ;;  %v1717_v52 = vld [vmem:[#allocation6 + $0x1c38] sm:$0xff] }
 0x5da   :  { %8291 = vmatpush1.bf16.msra.mxu1 %v11047_v1  ;;  %v11256_v1 = vcombine.high %v1685_v55, %v1693_v57  ;;  %v12127_v57 = vld [vmem:[#allocation9 + $0x664] ss:$8 sps:$4 sm:$0xff]  }
 0x5db   :  { %8292 = vmatprep.subr.bf16.mxu1 %v11064_v7 }
 0x5de   :  { %8293 = vmatpush1.bf16.msra.mxu1 %v11063_v10  ;;  %v11670_v10 = vadd.f32 %v12701_v30, %v1897_v58  ;;  %v12112_v30 = vld [vmem:[#allocation9 + $0x614] ss:$8 sps:$4 sm:$0xff]  }
 0x5df   :  { %8294 = vmatprep.subr.bf16.mxu1 %v11080_v9 }
 0x5e0   :  { %v8367_v56 = vmax.f32 %v11670_v10, 0.0  ;;  %v1837_v10 = vld [vmem:[#allocation6 + $0x1ff8] sm:$0xff] }
 0x5e2   :  { %8295 = vmatpush1.bf16.msra.mxu1 %v11079_v16 }
 0x5e3   :  { %8296 = vmatprep.subr.bf16.mxu1 %v11096_v14 }
 0x5e6   :  { %8297 = vmatpush1.bf16.msra.mxu1 %v11095_v28  ;;  %v1725_v28 = vld [vmem:[#allocation6 + $0x1c78] sm:$0xff] }
 0x5e7   :  { %8298 = vmatprep.subr.bf16.mxu1 %v11112_v49  ;;  %v11287_v32 = vcombine.low %v1717_v52, %v1725_v28 }
 0x5ea   :  { %8299 = vmatpush1.bf16.msra.mxu1 %v11111_v19 }
 0x5eb   :  { %8300 = vmatprep.subr.bf16.mxu1 %v11128_v18  ;;  %v11288_v18 = vcombine.high %v1717_v52, %v1725_v28  ;;  %v12142_v52 = vld [vmem:[#allocation9 + $0x6b4] ss:$8 sps:$4 sm:$0xff]   ;;  %v12140_v28 = vld [vmem:[#allocation9 + $0x6b0] ss:$8 sps:$4 sm:$0xff]  }
 0x5ee   :  { %8301 = vmatpush1.bf16.msra.mxu1 %v11127_v15  ;;  %v8383_v15 = vpack.c.bf16 %v8367_v56, %v8367_v56  ;;  %v12137_v56 = vld [vmem:[#allocation9 + $0x6a0] ss:$8 sps:$4 sm:$0xff]  }
 0x5ef   :  { %8302 = vmatprep.subr.bf16.mxu1 %v11144_v27  ;;  %v12110_v27 = vld [vmem:[#allocation9 + $0x610] ss:$8 sps:$4 sm:$0xff]  }
 0x5f2   :  { %8303 = vmatpush1.bf16.msra.mxu1 %v11143_v34  ;;  %v11304_v34 = vcombine.high %v1733_v24, %v1741_v26 }
 0x5f3   :  { %8313 = vmatprep.subr.bf16.mxu1 %v11160_v36  ;;  %v1749_v36 = vld [vmem:[#allocation6 + $0x1d38] sm:$0xff] }
 0x5f4   :  { %v11320_v3 = vcombine.high %v1749_v36, %v1757_v37  ;;  %v11319_v31 = vcombine.low %v1749_v36, %v1757_v37  ;;  %v12160_v37 = vld [vmem:[#allocation9 + $0x714] ss:$8 sps:$4 sm:$0xff]  }
 0x5f5   :  { %8305 = vmatmul.mubr.bf16.vlgmr.msra.gmra.mrb[24].mxu1 %v12601_v33  ;;  %v1677_v33 = vld [vmem:[#allocation6 + $0x1af8] sm:$0xff] }
 0x5f6   :  { %8314 = vmatpush1.bf16.msra.mxu1 %v11159_v46  ;;  %8345 = vmatprep.mubr.bf16.mxu1 %v12603_v40  ;;  %v11240_v40 = vcombine.high %v1669_v54, %v1677_v33  ;;  %v11239_v0 = vcombine.low %v1669_v54, %v1677_v33  ;;  %v11303_v46 = vcombine.low %v1733_v24, %v1741_v26  ;;  %v1797_v33 = vld [vmem:[#allocation6 + $0x1eb8] sm:$0xff] }
 0x5f7   :  { %8315 = vmatprep.subr.bf16.mxu1 %v11176_v39  ;;  %v12118_v39 = vld [vmem:[#allocation9 + $0x634] ss:$8 sps:$4 sm:$0xff]   ;;  %v12149_v24 = vld [vmem:[#allocation9 + $0x6e0] ss:$8 sps:$4 sm:$0xff]  }
 0x5fa   :  { %8316 = vmatpush1.bf16.msra.mxu1 %v11175_v41  ;;  %v1773_v41 = vld [vmem:[#allocation6 + $0x1df8] sm:$0xff] }
 0x5fb   :  { %8317 = vmatprep.subr.bf16.mxu1 %v11192_v42  ;;  %v12116_v42 = vld [vmem:[#allocation9 + $0x630] ss:$8 sps:$4 sm:$0xff]  }
 0x5fe   :  { %8318 = vmatpush1.bf16.msra.mxu1 %v11191_v51  ;;  %v11336_v51 = vcombine.high %v1765_v60, %v1773_v41 }
 0x5ff   :  { %8319 = vmatprep.subr.bf16.mxu1 %v11208_v13  ;;  %v1781_v13 = vld [vmem:[#allocation6 + $0x1e38] sm:$0xff] }
 0x600   :  { %v11352_v54 = vcombine.high %v1781_v13, %v1789_v20  ;;  %v11351_v55 = vcombine.low %v1781_v13, %v1789_v20  ;;  %v12176_v13 = vld [vmem:[#allocation9 + $0x770] ss:$8 sps:$4 sm:$0xff]   ;;  %v12181_v20 = vld [vmem:[#allocation9 + $0x784] ss:$8 sps:$4 sm:$0xff]  }
 0x602   :  { %8320 = vmatpush1.bf16.msra.mxu1 %v11207_v5  ;;  %v11335_v5 = vcombine.low %v1765_v60, %v1773_v41  ;;  %v12167_v60 = vld [vmem:[#allocation9 + $0x740] ss:$8 sps:$4 sm:$0xff]   ;;  %v12172_v41 = vld [vmem:[#allocation9 + $0x754] ss:$8 sps:$4 sm:$0xff]  }
 0x603   :  { %8321 = vmatprep.subr.bf16.mxu1 %v11224_v47  ;;  %v12124_v47 = vld [vmem:[#allocation9 + $0x654] ss:$8 sps:$4 sm:$0xff]  }
 0x606   :  { %8322 = vmatpush1.bf16.msra.mxu1 %v11223_v6  ;;  %v1805_v6 = vld [vmem:[#allocation6 + $0x1ef8] sm:$0xff] }
 0x607   :  { %8323 = vmatprep.subr.bf16.mxu1 %v11240_v40  ;;  %v12122_v40 = vld [vmem:[#allocation9 + $0x650] ss:$8 sps:$4 sm:$0xff]   ;;  %v11368_v58 = vcombine.high %v1797_v33, %v1805_v6 }
 0x608   :  { %v8019_v7 = vpop.f32.mrb[20].mxu1 }
 0x609   :  { %v11667_v9 = vadd.f32 %v8019_v7, %v1885_v61  ;;  %v8021_v11 = vpop.f32.mrb[21].mxu1  ;;  %v1813_v61 = vld [vmem:[#allocation6 + $0x1f38] sm:$0xff]  ;;  %v12130_v7 = vld [vmem:[#allocation9 + $0x674] ss:$8 sps:$4 sm:$0xff]  }
 0x60a   :  { %v11668_v12 = vadd.f32 %v8021_v11, %v1889_v62  ;;  %v8023_v16 = vpop.f32.mrb[22].mxu1  ;;  %8324 = vmatpush1.bf16.msra.mxu1 %v11239_v0  ;;  %v1821_v62 = vld [vmem:[#allocation6 + $0x1f78] sm:$0xff] }
 0x60b   :  { %v8364_v14 = vmax.f32 %v11667_v9, 0.0  ;;  %v8024_v63 = vpop.f32.mrb[23].mxu1  ;;  %8325 = vmatprep.subr.bf16.mxu1 %v11256_v1  ;;  %v12125_v0 = vld [vmem:[#allocation9 + $0x660] ss:$8 sps:$4 sm:$0xff]   ;;  %v11367_v1 = vcombine.low %v1797_v33, %v1805_v6  ;;  %v11384_v17 = vcombine.high %v1813_v61, %v1821_v62  ;;  %v12128_v9 = vld [vmem:[#allocation9 + $0x670] ss:$8 sps:$4 sm:$0xff]   ;;  %v11383_v11 = vcombine.low %v1813_v61, %v1821_v62 }
 0x60c   :  { %v8365_v25 = vmax.f32 %v11668_v12, 0.0  ;;  %v12133_v12 = vld [vmem:[#allocation9 + $0x684] ss:$8 sps:$4 sm:$0xff]   ;;  %v11400_v16 = vcombine.high %v1829_v8, %v1837_v10  ;;  %v12136_v63 = vld [vmem:[#allocation9 + $0x694] ss:$8 sps:$4 sm:$0xff]  }
 0x60d   :  { %v8380_v19 = vpack.c.bf16 %v8364_v14, %v8364_v14  ;;  %v11399_v14 = vcombine.low %v1829_v8, %v1837_v10  ;;  %v12185_v33 = vld [vmem:[#allocation9 + $0x7a0] ss:$8 sps:$4 sm:$0xff]   ;;  %v12190_v6 = vld [vmem:[#allocation9 + $0x7b4] ss:$8 sps:$4 sm:$0xff]   ;;  %v12194_v61 = vld [vmem:[#allocation9 + $0x7d0] ss:$8 sps:$4 sm:$0xff]  }
 0x60e   :  { %v8381_v49 = vpack.c.bf16 %v8365_v25, %v8365_v25  ;;  %8326 = vmatpush1.bf16.msra.mxu1 %v11255_v21  ;;  %v12131_v21 = vld [vmem:[#allocation9 + $0x680] ss:$8 sps:$4 sm:$0xff]   ;;  %v12139_v25 = vld [vmem:[#allocation9 + $0x6a4] ss:$8 sps:$4 sm:$0xff]  }
 0x60f   :  { %8327 = vmatprep.subr.bf16.mxu1 %v11272_v44  ;;  %v12134_v44 = vld [vmem:[#allocation9 + $0x690] ss:$8 sps:$4 sm:$0xff]   ;;  %v12199_v62 = vld [vmem:[#allocation9 + $0x7e4] ss:$8 sps:$4 sm:$0xff]  }
 0x610   :  { %10171 = vmatprep.mubr.bf16.mxu0 %v8381_v49  ;;  %v12145_v49 = vld [vmem:[#allocation9 + $0x6c4] ss:$8 sps:$4 sm:$0xff]  }
 0x611   :  { %10172 = vmatmul.mubr.bf16.vlgmr.msra.gmra.mrb[20].mxu0 %v8380_v19  ;;  %v12146_v19 = vld [vmem:[#allocation9 + $0x6d0] ss:$8 sps:$4 sm:$0xff]  }
 0x612   :  { %10181 = vmatpush1.bf16.msra.mxu0 %v12107_v4  ;;  %8328 = vmatpush1.bf16.msra.mxu1 %v11271_v29  ;;  %v12143_v4 = vld [vmem:[#allocation9 + $0x6c0] ss:$8 sps:$4 sm:$0xff]   ;;  %v12148_v29 = vld [vmem:[#allocation9 + $0x6d4] ss:$8 sps:$4 sm:$0xff]  }
 0x613   :  { %10212 = vmatprep.mubr.bf16.mxu0 %v8383_v15  ;;  %10182 = vmatprep.subr.bf16.mxu0 %v12112_v30  ;;  %v12730_v30 = vld [vmem:[#allocation7 + $0x8] sm:$0xff] }
 0x614   :  { %8329 = vmatprep.subr.bf16.mxu1 %v11288_v18  ;;  %v1893_v18 = vrot.slane %v12730_v30, %v12590_v43  ;;  %v12154_v15 = vld [vmem:[#allocation9 + $0x6f4] ss:$8 sps:$4 sm:$0xff]   ;;  %v12158_v43 = vld [vmem:[#allocation9 + $0x710] ss:$8 sps:$4 sm:$0xff]   ;;  %v1905_v8 = vrot.slane %v12730_v30, %v12593_v59 }
 0x616   :  { %10183 = vmatpush1.bf16.msra.mxu0 %v12110_v27  ;;  %8330 = vmatpush1.bf16.msra.mxu1 %v11287_v32  ;;  %v11669_v26 = vadd.f32 %v12699_v22, %v1893_v18  ;;  %v12152_v27 = vld [vmem:[#allocation9 + $0x6f0] ss:$8 sps:$4 sm:$0xff]   ;;  %v12166_v22 = vld [vmem:[#allocation9 + $0x734] ss:$8 sps:$4 sm:$0xff]  }
 0x617   :  { %10184 = vmatprep.subr.bf16.mxu0 %v12115_v2  ;;  %8331 = vmatprep.subr.bf16.mxu1 %v11304_v34  ;;  %v12157_v2 = vld [vmem:[#allocation9 + $0x704] ss:$8 sps:$4 sm:$0xff]   ;;  %v12155_v34 = vld [vmem:[#allocation9 + $0x700] ss:$8 sps:$4 sm:$0xff]  }
 0x618   :  { %v8366_v32 = vmax.f32 %v11669_v26, 0.0 }
 0x61a   :  { %10185 = vmatpush1.bf16.msra.mxu0 %v12113_v38  ;;  %8332 = vmatpush1.bf16.msra.mxu1 %v11303_v46  ;;  %v8382_v36 = vpack.c.bf16 %v8366_v32, %v8366_v32  ;;  %v12163_v38 = vld [vmem:[#allocation9 + $0x724] ss:$8 sps:$4 sm:$0xff]   ;;  %v12161_v46 = vld [vmem:[#allocation9 + $0x720] ss:$8 sps:$4 sm:$0xff]  }
 0x61b   :  { %10186 = vmatprep.subr.bf16.mxu0 %v12118_v39  ;;  %8333 = vmatprep.subr.bf16.mxu1 %v11320_v3  ;;  %v12164_v39 = vld [vmem:[#allocation9 + $0x730] ss:$8 sps:$4 sm:$0xff]   ;;  %v12169_v3 = vld [vmem:[#allocation9 + $0x744] ss:$8 sps:$4 sm:$0xff]  }
 0x61e   :  { %10187 = vmatpush1.bf16.msra.mxu0 %v12116_v42  ;;  %8334 = vmatpush1.bf16.msra.mxu1 %v11319_v31  ;;  %v12170_v42 = vld [vmem:[#allocation9 + $0x750] ss:$8 sps:$4 sm:$0xff]   ;;  %v12175_v31 = vld [vmem:[#allocation9 + $0x764] ss:$8 sps:$4 sm:$0xff]  }
 0x61f   :  { %10188 = vmatprep.subr.bf16.mxu0 %v12121_v45  ;;  %8335 = vmatprep.subr.bf16.mxu1 %v11336_v51  ;;  %v12173_v45 = vld [vmem:[#allocation9 + $0x760] ss:$8 sps:$4 sm:$0xff]   ;;  %v12178_v51 = vld [vmem:[#allocation9 + $0x774] ss:$8 sps:$4 sm:$0xff]  }
 0x622   :  { %10189 = vmatpush1.bf16.msra.mxu0 %v12119_v53  ;;  %8336 = vmatpush1.bf16.msra.mxu1 %v11335_v5  ;;  %v12179_v53 = vld [vmem:[#allocation9 + $0x780] ss:$8 sps:$4 sm:$0xff]   ;;  %v12184_v5 = vld [vmem:[#allocation9 + $0x794] ss:$8 sps:$4 sm:$0xff]  }
 0x623   :  { %10190 = vmatprep.subr.bf16.mxu0 %v12124_v47  ;;  %8337 = vmatprep.subr.bf16.mxu1 %v11352_v54  ;;  %v12182_v47 = vld [vmem:[#allocation9 + $0x790] ss:$8 sps:$4 sm:$0xff]   ;;  %v12187_v54 = vld [vmem:[#allocation9 + $0x7a4] ss:$8 sps:$4 sm:$0xff]  }
 0x626   :  { %10191 = vmatpush1.bf16.msra.mxu0 %v12122_v40  ;;  %8338 = vmatpush1.bf16.msra.mxu1 %v11351_v55  ;;  %v12188_v40 = vld [vmem:[#allocation9 + $0x7b0] ss:$8 sps:$4 sm:$0xff]   ;;  %v12193_v55 = vld [vmem:[#allocation9 + $0x7c4] ss:$8 sps:$4 sm:$0xff]  }
 0x627   :  { %10192 = vmatprep.subr.bf16.mxu0 %v12127_v57  ;;  %8339 = vmatprep.subr.bf16.mxu1 %v11368_v58  ;;  %v12191_v57 = vld [vmem:[#allocation9 + $0x7c0] ss:$8 sps:$4 sm:$0xff]   ;;  %v12196_v58 = vld [vmem:[#allocation9 + $0x7d4] ss:$8 sps:$4 sm:$0xff]  }
 0x62a   :  { %10193 = vmatpush1.bf16.msra.mxu0 %v12125_v0  ;;  %8340 = vmatpush1.bf16.msra.mxu1 %v11367_v1  ;;  %v12197_v0 = vld [vmem:[#allocation9 + $0x7e0] ss:$8 sps:$4 sm:$0xff]   ;;  %v12202_v1 = vld [vmem:[#allocation9 + $0x7f4] ss:$8 sps:$4 sm:$0xff]  }
 0x62b   :  { %10194 = vmatprep.subr.bf16.mxu0 %v12130_v7  ;;  %8341 = vmatprep.subr.bf16.mxu1 %v11384_v17  ;;  %v12200_v7 = vld [vmem:[#allocation9 + $0x7f0] ss:$8 sps:$4 sm:$0xff]   ;;  %v1901_v17 = vrot.slane %v12730_v30, %v12610_v35 }
 0x62e   :  { %10195 = vmatpush1.bf16.msra.mxu0 %v12128_v9  ;;  %8342 = vmatpush1.bf16.msra.mxu1 %v11383_v11 }
 0x62f   :  { %10196 = vmatprep.subr.bf16.mxu0 %v12133_v12  ;;  %8343 = vmatprep.subr.bf16.mxu1 %v11400_v16 }
 0x632   :  { %10197 = vmatpush1.bf16.msra.mxu0 %v12131_v21  ;;  %8344 = vmatpush1.bf16.msra.mxu1 %v11399_v14 }
 0x633   :  { %10198 = vmatprep.subr.bf16.mxu0 %v12136_v63 }
 0x635   :  { %8346 = vmatmul.mubr.bf16.vlgmr.msra.gmra.mrb[24].mxu1 %v12614_v23  ;;  %v12151_v23 = vld [vmem:[#allocation9 + $0x6e4] ss:$8 sps:$4 sm:$0xff]  }
 0x636   :  { %10199 = vmatpush1.bf16.msra.mxu0 %v12134_v44 }
 0x637   :  { %10200 = vmatprep.subr.bf16.mxu0 %v12139_v25 }
 0x63a   :  { %10201 = vmatpush1.bf16.msra.mxu0 %v12137_v56  ;;  %v8642_v56 = vld [vmem:[#allocation10] sm:$0x3] }
 0x63b   :  { %10202 = vmatprep.subr.bf16.mxu0 %v12142_v52  ;;  %v8647_v52 = vrot.slane %v8642_v56, %v12525_v48  ;;  %v8651_v35 = vrot.slane %v8642_v56, %v12530_v50 }
 0x63e   :  { %10203 = vmatpush1.bf16.msra.mxu0 %v12140_v28 }
 0x63f   :  { %10204 = vmatprep.subr.bf16.mxu0 %v12145_v49 }
 0x642   :  { %10205 = vmatpush1.bf16.msra.mxu0 %v12143_v4 }
 0x643   :  { %10206 = vmatprep.subr.bf16.mxu0 %v12148_v29 }
 0x646   :  { %10207 = vmatpush1.bf16.msra.mxu0 %v12146_v19 }
 0x647   :  { %10208 = vmatprep.subr.bf16.mxu0 %v12151_v23 }
 0x64a   :  { %10209 = vmatpush1.bf16.msra.mxu0 %v12149_v24 }
 0x64b   :  { %10210 = vmatprep.subr.bf16.mxu0 %v12154_v15 }
 0x64e   :  { %10211 = vmatpush1.bf16.msra.mxu0 %v12152_v27 }
 0x64f   :  { %10221 = vmatprep.subr.bf16.mxu0 %v12157_v2 }
 0x651   :  { %10213 = vmatmul.mubr.bf16.vlgmr.msra.gmra.mrb[20].mxu0 %v8382_v36 }
 0x652   :  { %10222 = vmatpush1.bf16.msra.mxu0 %v12155_v34 }
 0x653   :  { %10223 = vmatprep.subr.bf16.mxu0 %v12160_v37 }
 0x656   :  { %10224 = vmatpush1.bf16.msra.mxu0 %v12158_v43 }
 0x657   :  { %10225 = vmatprep.subr.bf16.mxu0 %v12163_v38 }
 0x65a   :  { %10226 = vmatpush1.bf16.msra.mxu0 %v12161_v46 }
 0x65b   :  { %10227 = vmatprep.subr.bf16.mxu0 %v12166_v22 }
 0x65e   :  { %10228 = vmatpush1.bf16.msra.mxu0 %v12164_v39 }
 0x65f   :  { %10229 = vmatprep.subr.bf16.mxu0 %v12169_v3 }
 0x662   :  { %10230 = vmatpush1.bf16.msra.mxu0 %v12167_v60 }
 0x663   :  { %10231 = vmatprep.subr.bf16.mxu0 %v12172_v41 }
 0x666   :  { %10232 = vmatpush1.bf16.msra.mxu0 %v12170_v42 }
 0x667   :  { %10233 = vmatprep.subr.bf16.mxu0 %v12175_v31 }
 0x66a   :  { %10234 = vmatpush1.bf16.msra.mxu0 %v12173_v45 }
 0x66b   :  { %10235 = vmatprep.subr.bf16.mxu0 %v12178_v51 }
 0x66e   :  { %10236 = vmatpush1.bf16.msra.mxu0 %v12176_v13 }
 0x66f   :  { %10237 = vmatprep.subr.bf16.mxu0 %v12181_v20 }
 0x672   :  { %10238 = vmatpush1.bf16.msra.mxu0 %v12179_v53 }
 0x673   :  { %10239 = vmatprep.subr.bf16.mxu0 %v12184_v5 }
 0x676   :  { %10240 = vmatpush1.bf16.msra.mxu0 %v12182_v47 }
 0x677   :  { %10241 = vmatprep.subr.bf16.mxu0 %v12187_v54 }
 0x67a   :  { %10242 = vmatpush1.bf16.msra.mxu0 %v12185_v33 }
 0x67b   :  { %10243 = vmatprep.subr.bf16.mxu0 %v12190_v6 }
 0x67e   :  { %10244 = vmatpush1.bf16.msra.mxu0 %v12188_v40 }
 0x67f   :  { %10245 = vmatprep.subr.bf16.mxu0 %v12193_v55 }
 0x682   :  { %10246 = vmatpush1.bf16.msra.mxu0 %v12191_v57 }
 0x683   :  { %10247 = vmatprep.subr.bf16.mxu0 %v12196_v58 }
 0x686   :  { %10248 = vmatpush1.bf16.msra.mxu0 %v12194_v61 }
 0x687   :  { %10249 = vmatprep.subr.bf16.mxu0 %v12199_v62 }
 0x68a   :  { %10250 = vmatpush1.bf16.msra.mxu0 %v12197_v0 }
 0x68b   :  { %10251 = vmatprep.subr.bf16.mxu0 %v12202_v1 }
 0x68e   :  { %10252 = vmatpush1.bf16.msra.mxu0 %v12200_v7 }
 0x708   :  { %v8347_v10 = vpop.f32.mrb[24].mxu1 }
 0x709   :  { %v11671_v9 = vadd.f32 %v8347_v10, %v1901_v17  ;;  %v8349_v11 = vpop.f32.mrb[25].mxu1 }
 0x70a   :  { %v11672_v12 = vadd.f32 %v8349_v11, %v1905_v8  ;;  %v8351_v16 = vpop.f32.mrb[26].mxu1 }
 0x70b   :  { %v8368_v21 = vmax.f32 %v11671_v9, 0.0  ;;  %v8352_v14 = vpop.f32.mrb[27].mxu1 }
 0x70c   :  { %v8369_v63 = vmax.f32 %v11672_v12, 0.0 }
 0x70d   :  { %v8384_v25 = vpack.c.bf16 %v8368_v21, %v8368_v21 }
 0x70e   :  { %v8385_v44 = vpack.c.bf16 %v8369_v63, %v8369_v63 }
 0x710   :  { %10253 = vmatprep.mubr.bf16.mxu0 %v8385_v44 }
 0x711   :  { %10254 = vmatmul.mubr.bf16.vlgmr.msra.gmra.mrb[20].mxu0 %v8384_v25 }
 0x7e4   :  { %v10255_v28 = vpop.f32.mrb[20].mxu0 }
 0x7e5   :  { %v11673_v49 = vadd.f32 %v10255_v28, %v8647_v52  ;;  %v10257_v59 = vpop.f32.mrb[21].mxu0 }
 0x7e6   :  { %v11674_v4 = vadd.f32 %v10257_v59, %v8651_v35  ;;  %v10259_v29 = vpop.f32.mrb[22].mxu0 }
 0x7e7   :  { %v10260_v19 = vpop.f32.mrb[23].mxu0 }
 0x7e8   :  { %v10262_v30 = vmax.f32 %v11673_v49, %v11674_v4 }
 0x7ea   :  { %10263 = vmax.xlane.f32.xlu0 %v10262_v30 }
 0x877   :  { %v10264_v18 = vpop.xlane.xlu0 %10263 }
 0x878   :  { %v10265_v23 = vsub.f32 %v11673_v49, %v10264_v18  ;;  %v10266_v24 = vsub.f32 %v11674_v4, %v10264_v18 }
 0x87a   :  { %v10267_v26 = vmul.f32 1.442695, %v10265_v23  ;;  %v10269_v15 = vmul.f32 1.442695, %v10266_v24 }
 0x87c   :  { %12203 = vpow2.f32 %v10267_v26 }
 0x87d   :  { %12205 = vpow2.f32 %v10269_v15 }
 0x886   :  { %v12204_v27 = vpop.eup %12203 }
 0x887   :  { %v12206_v32 = vpop.eup %12205 }
 0x888   :  { %v10271_v48 = vadd.f32 %v12206_v32, %v12204_v27 }
 0x88a   :  { %10272 = vadd.xlane.f32.xlu0 %v10271_v48 }
 0x917   :  { %v10273_v50 = vpop.xlane.xlu0 %10272 }
 0x918   :  { %12207 = vlog2.f32 %v10273_v50 }
 0x922   :  { %v12208_v2 = vpop.eup %12207 }
 0x923   :  { %v10275_v34 = vmul.f32 0.6931472, %v12208_v2 }
 0x925   :  { %v10276_v36 = vadd.f32 %v10275_v34, %v10264_v18 }
 0x927   :  { %v10277_v37 = vsub.f32 %v11673_v49, %v10276_v36  ;;  %v10278_v43 = vsub.f32 %v11674_v4, %v10276_v36 }
 0x929   :  { %10279 = vst [vmem:[%s12754_s7] sm:$0xff] %v10277_v37  ;;  %10280 = vst [vmem:[%s12754_s7 + $0x8] sm:$0xff] %v10278_v43 }
 0x92a   :  { %10285 = vsyncpa [#allocation3], 1 }
 0x92b   :  { %10286 = vsyncpa [#allocation5], 1 }
 0x92c   :  { %10287 = vsyncpa [#allocation8], 1 }
 0x92d   :  { %10288 = vsyncpa [#allocation11], 1 }

</bundles_post_ra>
